<compile_context>
chip_gen: v6e
topology: v6e:2x2x1
jax: 0.10.0
libtpu: 0.0.40
codegen_flags: <defaults>
</compile_context>

<pallas_src>
import functools

import jax
import jax.numpy as jnp
from jax.experimental import pallas as pl
from jax.experimental.pallas import tpu as pltpu

TM = 8  # f32 sublane minimum row tile for the (tiny) batch dimension.


def _linear_kernel(x_ref, w_ref, b_ref, o_ref, acc_ref, *, apply_relu):
    """One (i, j, k) grid step of y = relu?(x @ W + b) with f32 accumulation."""
    k = pl.program_id(2)

    @pl.when(k == 0)
    def _():
        acc_ref[...] = jnp.zeros_like(acc_ref)

    acc_ref[...] += jnp.dot(
        x_ref[...].astype(w_ref.dtype),  # bf16 on the big layers, f32 otherwise
        w_ref[...],
        preferred_element_type=jnp.float32,
    )

    @pl.when(k == pl.num_programs(2) - 1)
    def _():
        out = acc_ref[...] + b_ref[...]
        if apply_relu:
            out = jnp.maximum(out, 0.0)
        o_ref[...] = out.astype(o_ref.dtype)


def _round_up(x, m):
    return (x + m - 1) // m * m


def pallas_linear(x, w, b, *, tn, tk, apply_relu):
    """y = relu?(x @ w + b); x:(Mp,K) f32, w:(K,Np) (pre-padded), b:(1,Np) f32."""
    Mp, K = x.shape
    Kw, Np = w.shape
    assert K == Kw and b.shape == (1, Np)
    assert Mp % TM == 0 and K % tk == 0 and Np % tn == 0

    grid = (Mp // TM, Np // tn, K // tk)

    return pl.pallas_call(
        functools.partial(_linear_kernel, apply_relu=apply_relu),
        out_shape=jax.ShapeDtypeStruct((Mp, Np), jnp.float32),
        grid_spec=pltpu.PrefetchScalarGridSpec(
            num_scalar_prefetch=0,
            grid=grid,
            in_specs=[
                # x chunk is tiny (<= 8x3200 f32 = 100 KB) vs the weight tile,
                # so the standard per-(i,k) block costs <3% extra DMA traffic.
                pl.BlockSpec((TM, tk), lambda i, j, k: (i, k)),   # activations
                pl.BlockSpec((tk, tn), lambda i, j, k: (k, j)),   # weights (dominant)
                pl.BlockSpec((1, tn), lambda i, j, k: (0, j)),    # bias
            ],
            out_specs=pl.BlockSpec((TM, tn), lambda i, j, k: (i, j)),
            scratch_shapes=[pltpu.VMEM((TM, tn), jnp.float32)],
        ),
        compiler_params=pltpu.CompilerParams(
            dimension_semantics=("parallel", "parallel", "arbitrary"),
            vmem_limit_bytes=48 * 1024 * 1024,
        ),
    )(x, w, b)


# Per-layer tiling / dtype config.
#   L1: 784 -> 12800 : full-K tile (784), 4 N-blocks of 3200 (~5.0 MiB bf16 each)
#   L2: 12800 -> 1280: 4 K-blocks of 3200, 2 N-blocks of 640 (~4.1 MiB bf16 each)
#   L3: 1280 -> 128  : single full-block step (0.65 MB f32)
#   L4: 128 -> 10    : single full-block step (N padded to 128 once at init)
_LAYER_CFG = (
    dict(tn=3200, tk=784,  relu=True,  wdtype=jnp.bfloat16),
    dict(tn=640,  tk=3200, relu=True,  wdtype=jnp.bfloat16),
    dict(tn=128,  tk=1280, relu=True,  wdtype=jnp.float32),
    dict(tn=128,  tk=128,  relu=False, wdtype=jnp.float32),
)


def init_params(key):
    """Deterministic init mirroring nn.Linear shapes (stored transposed: (in, out))."""
    sizes = [(28 * 28, 12800), (12800, 1280), (1280, 128), (128, 10)]
    params = []
    for fan_in, fan_out in sizes:
        kw, kb, key = jax.random.split(key, 3)
        bound = 1.0 / jnp.sqrt(fan_in)
        w = jax.random.uniform(kw, (fan_in, fan_out), jnp.float32, -bound, bound)
        b = jax.random.uniform(kb, (fan_out,), jnp.float32, -bound, bound)
        params.append((w, b))
    return params


def pack_params(params):
    """Pad (N -> multiple of 128), reshape bias and cast weight dtype ONCE."""
    packed = []
    for (w, b), cfg in zip(params, _LAYER_CFG):
        K, N = w.shape
        Np = _round_up(N, 128)
        if Np != N:
            w = jnp.zeros((K, Np), w.dtype).at[:, :N].set(w)
            b = jnp.zeros((Np,), b.dtype).at[:N].set(b)
        packed.append((w.astype(cfg["wdtype"]),
                       b.reshape(1, Np).astype(jnp.float32)))
    return packed


@jax.jit
def simple_nn_forward(x, packed_params):
    # PyTorch: x = x.view(-1, 28*28)
    B = x.shape[0]
    x = x.reshape(B, 28 * 28).astype(jnp.float32)
    Mp = _round_up(B, TM)
    if Mp != B:
        x = jnp.pad(x, ((0, Mp - B), (0, 0)))
    for (w, b), cfg in zip(packed_params, _LAYER_CFG):
        x = pallas_linear(x, w, b, tn=cfg["tn"], tk=cfg["tk"],
                          apply_relu=cfg["relu"])
    return x[:B, :10]


if __name__ == "__main__":
    key = jax.random.PRNGKey(0)
    kx, kp = jax.random.split(key)

    # Small MNIST-like batch: (B, 1, 28, 28), NCHW like the PyTorch module.
    x = jax.random.normal(kx, (2, 1, 28, 28), jnp.float32)
    params = init_params(kp)
    packed = pack_params(params)

    out = simple_nn_forward(x, packed)
    out = jax.block_until_ready(out)
    assert out.shape == (2, 10), out.shape

    # Plain-JAX reference performing the identical computation (same packed
    # weights, bf16 streaming on the big layers, f32 accumulation).
    ref = x.reshape(-1, 28 * 28).astype(jnp.float32)
    for (w, b), cfg in zip(packed, _LAYER_CFG):
        ref = jnp.dot(ref.astype(w.dtype), w,
                      preferred_element_type=jnp.float32) + b
        if cfg["relu"]:
            ref = jnp.maximum(ref, 0.0)
    ref = ref[:, :10]
    assert jnp.allclose(out, ref, atol=2e-3, rtol=2e-3), \
        float(jnp.max(jnp.abs(out - ref)))

    print("KERNEL_OK")
</pallas_src>

<mosaic_0001>
module attributes {stable_mosaic.version = 11 : i64} {
  func.func @_linear_kernel(%arg0: i32, %arg1: i32, %arg2: i32, %arg3: memref<8x784xf32, #tpu.memory_space<vmem>>, %arg4: memref<784x3200xbf16, #tpu.memory_space<vmem>>, %arg5: memref<1x3200xf32, #tpu.memory_space<vmem>>, %arg6: memref<8x3200xf32, #tpu.memory_space<vmem>>, %arg7: memref<8x3200xf32, #tpu.memory_space<vmem>>) attributes {dimension_semantics = [#tpu.dimension_semantics<parallel>, #tpu.dimension_semantics<parallel>, #tpu.dimension_semantics<arbitrary>], iteration_bounds = array<i64: 1, 4, 1>, scalar_prefetch = 0 : i64, scratch_operands = 1 : i64, tpu.core_type = #tpu.core_type<tc>, window_params = [{transform_indices = @transform_0, window_bounds = array<i64: 8, 784>}, {transform_indices = @transform_1, window_bounds = array<i64: 784, 3200>}, {transform_indices = @transform_2, window_bounds = array<i64: 1, 3200>}, {transform_indices = @transform_3, window_bounds = array<i64: 8, 3200>}]} {
    %c0_i32 = arith.constant 0 : i32
    %0 = arith.cmpi eq, %arg2, %c0_i32 : i32
    %1 = arith.extui %0 : i1 to i32
    %c0_i32_0 = arith.constant 0 : i32
    %2 = arith.cmpi ne, %1, %c0_i32_0 : i32
    scf.if %2 {
      %cst_10 = arith.constant 0.000000e+00 : f32
      %13 = vector.broadcast %cst_10 : f32 to vector<8x3200xf32>
      %c0_11 = arith.constant 0 : index
      %c0_12 = arith.constant 0 : index
      %14 = vector.load %arg7[%c0_11, %c0_12] : memref<8x3200xf32, #tpu.memory_space<vmem>>, vector<8x3200xf32>
      tpu.vector_store %arg7[%c0_11, %c0_12], %13 {strides = array<i32>} : memref<8x3200xf32, #tpu.memory_space<vmem>>, vector<8x3200xf32>,
    } else {
    }
    %c0 = arith.constant 0 : index
    %c0_1 = arith.constant 0 : index
    %3 = vector.load %arg7[%c0, %c0_1] : memref<8x3200xf32, #tpu.memory_space<vmem>>, vector<8x3200xf32>
    %c0_2 = arith.constant 0 : index
    %c0_3 = arith.constant 0 : index
    %4 = vector.load %arg3[%c0_2, %c0_3] : memref<8x784xf32, #tpu.memory_space<vmem>>, vector<8x784xf32>
    %5 = arith.truncf %4 : vector<8x784xf32> to vector<8x784xbf16>
    %c0_4 = arith.constant 0 : index
    %c0_5 = arith.constant 0 : index
    %6 = vector.load %arg4[%c0_4, %c0_5] : memref<784x3200xbf16, #tpu.memory_space<vmem>>, vector<784x3200xbf16>
    %cst = arith.constant dense<0.000000e+00> : vector<8x3200xf32>
    %7 = tpu.matmul %5, %6, %cst {dimension_numbers = #tpu.dot_dimension_numbers<[1], [0], [0], [1], [0, 0, 1, 1], [], []>} : vector<8x784xbf16>, vector<784x3200xbf16>, vector<8x3200xf32> -> vector<8x3200xf32>
    %8 = arith.addf %3, %7 : vector<8x3200xf32>
    %c0_6 = arith.constant 0 : index
    %c0_7 = arith.constant 0 : index
    %9 = vector.load %arg7[%c0_6, %c0_7] : memref<8x3200xf32, #tpu.memory_space<vmem>>, vector<8x3200xf32>
    tpu.vector_store %arg7[%c0_6, %c0_7], %8 {strides = array<i32>} : memref<8x3200xf32, #tpu.memory_space<vmem>>, vector<8x3200xf32>,
    %c0_i32_8 = arith.constant 0 : i32
    %10 = arith.cmpi eq, %arg2, %c0_i32_8 : i32
    %11 = arith.extui %10 : i1 to i32
    %c0_i32_9 = arith.constant 0 : i32
    %12 = arith.cmpi ne, %11, %c0_i32_9 : i32
    scf.if %12 {
      %c0_10 = arith.constant 0 : index
      %c0_11 = arith.constant 0 : index
      %13 = vector.load %arg7[%c0_10, %c0_11] : memref<8x3200xf32, #tpu.memory_space<vmem>>, vector<8x3200xf32>
      %c0_12 = arith.constant 0 : index
      %c0_13 = arith.constant 0 : index
      %14 = vector.load %arg5[%c0_12, %c0_13] : memref<1x3200xf32, #tpu.memory_space<vmem>>, vector<1x3200xf32>
      %15 = vector.broadcast %14 : vector<1x3200xf32> to vector<8x3200xf32>
      %16 = arith.addf %13, %15 : vector<8x3200xf32>
      %cst_14 = arith.constant 0.000000e+00 : f32
      %17 = vector.broadcast %cst_14 : f32 to vector<8x3200xf32>
      %18 = arith.maximumf %16, %17 : vector<8x3200xf32>
      %c0_15 = arith.constant 0 : index
      %c0_16 = arith.constant 0 : index
      %19 = vector.load %arg6[%c0_15, %c0_16] : memref<8x3200xf32, #tpu.memory_space<vmem>>, vector<8x3200xf32>
      tpu.vector_store %arg6[%c0_15, %c0_16], %18 {strides = array<i32>} : memref<8x3200xf32, #tpu.memory_space<vmem>>, vector<8x3200xf32>,
    } else {
    }
    return
  }
  func.func @transform_0(%arg0: i32, %arg1: i32, %arg2: i32) -> (i32, i32) {
    %c0_i32 = arith.constant 0 : i32
    return %arg0, %arg2 : i32, i32
  }
  func.func @transform_1(%arg0: i32, %arg1: i32, %arg2: i32) -> (i32, i32) {
    %c0_i32 = arith.constant 0 : i32
    return %arg2, %arg1 : i32, i32
  }
  func.func @transform_2(%arg0: i32, %arg1: i32, %arg2: i32) -> (i32, i32) {
    %c0_i32 = arith.constant 0 : i32
    %c0_i32_0 = arith.constant 0 : i32
    return %c0_i32, %arg1 : i32, i32
  }
  func.func @transform_3(%arg0: i32, %arg1: i32, %arg2: i32) -> (i32, i32) {
    %c0_i32 = arith.constant 0 : i32
    return %arg0, %arg1 : i32, i32
  }
}

module attributes {stable_mosaic.version = 11 : i64} {
  func.func @_linear_kernel(%arg0: i32, %arg1: i32, %arg2: i32, %arg3: memref<8x3200xf32, #tpu.memory_space<vmem>>, %arg4: memref<3200x640xbf16, #tpu.memory_space<vmem>>, %arg5: memref<1x640xf32, #tpu.memory_space<vmem>>, %arg6: memref<8x640xf32, #tpu.memory_space<vmem>>, %arg7: memref<8x640xf32, #tpu.memory_space<vmem>>) attributes {dimension_semantics = [#tpu.dimension_semantics<parallel>, #tpu.dimension_semantics<parallel>, #tpu.dimension_semantics<arbitrary>], iteration_bounds = array<i64: 1, 2, 4>, scalar_prefetch = 0 : i64, scratch_operands = 1 : i64, tpu.core_type = #tpu.core_type<tc>, window_params = [{transform_indices = @transform_0, window_bounds = array<i64: 8, 3200>}, {transform_indices = @transform_1, window_bounds = array<i64: 3200, 640>}, {transform_indices = @transform_2, window_bounds = array<i64: 1, 640>}, {transform_indices = @transform_3, window_bounds = array<i64: 8, 640>}]} {
    %c0_i32 = arith.constant 0 : i32
    %0 = arith.cmpi eq, %arg2, %c0_i32 : i32
    %1 = arith.extui %0 : i1 to i32
    %c0_i32_0 = arith.constant 0 : i32
    %2 = arith.cmpi ne, %1, %c0_i32_0 : i32
    scf.if %2 {
      %cst_9 = arith.constant 0.000000e+00 : f32
      %13 = vector.broadcast %cst_9 : f32 to vector<8x640xf32>
      %c0_10 = arith.constant 0 : index
      %c0_11 = arith.constant 0 : index
      %14 = vector.load %arg7[%c0_10, %c0_11] : memref<8x640xf32, #tpu.memory_space<vmem>>, vector<8x640xf32>
      tpu.vector_store %arg7[%c0_10, %c0_11], %13 {strides = array<i32>} : memref<8x640xf32, #tpu.memory_space<vmem>>, vector<8x640xf32>,
    } else {
    }
    %c0 = arith.constant 0 : index
    %c0_1 = arith.constant 0 : index
    %3 = vector.load %arg7[%c0, %c0_1] : memref<8x640xf32, #tpu.memory_space<vmem>>, vector<8x640xf32>
    %c0_2 = arith.constant 0 : index
    %c0_3 = arith.constant 0 : index
    %4 = vector.load %arg3[%c0_2, %c0_3] : memref<8x3200xf32, #tpu.memory_space<vmem>>, vector<8x3200xf32>
    %5 = arith.truncf %4 : vector<8x3200xf32> to vector<8x3200xbf16>
    %c0_4 = arith.constant 0 : index
    %c0_5 = arith.constant 0 : index
    %6 = vector.load %arg4[%c0_4, %c0_5] : memref<3200x640xbf16, #tpu.memory_space<vmem>>, vector<3200x640xbf16>
    %cst = arith.constant dense<0.000000e+00> : vector<8x640xf32>
    %7 = tpu.matmul %5, %6, %cst {dimension_numbers = #tpu.dot_dimension_numbers<[1], [0], [0], [1], [0, 0, 1, 1], [], []>} : vector<8x3200xbf16>, vector<3200x640xbf16>, vector<8x640xf32> -> vector<8x640xf32>
    %8 = arith.addf %3, %7 : vector<8x640xf32>
    %c0_6 = arith.constant 0 : index
    %c0_7 = arith.constant 0 : index
    %9 = vector.load %arg7[%c0_6, %c0_7] : memref<8x640xf32, #tpu.memory_space<vmem>>, vector<8x640xf32>
    tpu.vector_store %arg7[%c0_6, %c0_7], %8 {strides = array<i32>} : memref<8x640xf32, #tpu.memory_space<vmem>>, vector<8x640xf32>,
    %c3_i32 = arith.constant 3 : i32
    %10 = arith.cmpi eq, %arg2, %c3_i32 : i32
    %11 = arith.extui %10 : i1 to i32
    %c0_i32_8 = arith.constant 0 : i32
    %12 = arith.cmpi ne, %11, %c0_i32_8 : i32
    scf.if %12 {
      %c0_9 = arith.constant 0 : index
      %c0_10 = arith.constant 0 : index
      %13 = vector.load %arg7[%c0_9, %c0_10] : memref<8x640xf32, #tpu.memory_space<vmem>>, vector<8x640xf32>
      %c0_11 = arith.constant 0 : index
      %c0_12 = arith.constant 0 : index
      %14 = vector.load %arg5[%c0_11, %c0_12] : memref<1x640xf32, #tpu.memory_space<vmem>>, vector<1x640xf32>
      %15 = vector.broadcast %14 : vector<1x640xf32> to vector<8x640xf32>
      %16 = arith.addf %13, %15 : vector<8x640xf32>
      %cst_13 = arith.constant 0.000000e+00 : f32
      %17 = vector.broadcast %cst_13 : f32 to vector<8x640xf32>
      %18 = arith.maximumf %16, %17 : vector<8x640xf32>
      %c0_14 = arith.constant 0 : index
      %c0_15 = arith.constant 0 : index
      %19 = vector.load %arg6[%c0_14, %c0_15] : memref<8x640xf32, #tpu.memory_space<vmem>>, vector<8x640xf32>
      tpu.vector_store %arg6[%c0_14, %c0_15], %18 {strides = array<i32>} : memref<8x640xf32, #tpu.memory_space<vmem>>, vector<8x640xf32>,
    } else {
    }
    return
  }
  func.func @transform_0(%arg0: i32, %arg1: i32, %arg2: i32) -> (i32, i32) {
    %c0_i32 = arith.constant 0 : i32
    return %arg0, %arg2 : i32, i32
  }
  func.func @transform_1(%arg0: i32, %arg1: i32, %arg2: i32) -> (i32, i32) {
    %c0_i32 = arith.constant 0 : i32
    return %arg2, %arg1 : i32, i32
  }
  func.func @transform_2(%arg0: i32, %arg1: i32, %arg2: i32) -> (i32, i32) {
    %c0_i32 = arith.constant 0 : i32
    %c0_i32_0 = arith.constant 0 : i32
    return %c0_i32, %arg1 : i32, i32
  }
  func.func @transform_3(%arg0: i32, %arg1: i32, %arg2: i32) -> (i32, i32) {
    %c0_i32 = arith.constant 0 : i32
    return %arg0, %arg1 : i32, i32
  }
}

module attributes {stable_mosaic.version = 11 : i64} {
  func.func @_linear_kernel(%arg0: i32, %arg1: i32, %arg2: i32, %arg3: memref<8x1280xf32, #tpu.memory_space<vmem>>, %arg4: memref<1280x128xf32, #tpu.memory_space<vmem>>, %arg5: memref<1x128xf32, #tpu.memory_space<vmem>>, %arg6: memref<8x128xf32, #tpu.memory_space<vmem>>, %arg7: memref<8x128xf32, #tpu.memory_space<vmem>>) attributes {dimension_semantics = [#tpu.dimension_semantics<parallel>, #tpu.dimension_semantics<parallel>, #tpu.dimension_semantics<arbitrary>], iteration_bounds = array<i64: 1, 1, 1>, scalar_prefetch = 0 : i64, scratch_operands = 1 : i64, tpu.core_type = #tpu.core_type<tc>, window_params = [{transform_indices = @transform_0, window_bounds = array<i64: 8, 1280>}, {transform_indices = @transform_1, window_bounds = array<i64: 1280, 128>}, {transform_indices = @transform_2, window_bounds = array<i64: 1, 128>}, {transform_indices = @transform_3, window_bounds = array<i64: 8, 128>}]} {
    %c0_i32 = arith.constant 0 : i32
    %0 = arith.cmpi eq, %arg2, %c0_i32 : i32
    %1 = arith.extui %0 : i1 to i32
    %c0_i32_0 = arith.constant 0 : i32
    %2 = arith.cmpi ne, %1, %c0_i32_0 : i32
    scf.if %2 {
      %cst_10 = arith.constant 0.000000e+00 : f32
      %12 = vector.broadcast %cst_10 : f32 to vector<8x128xf32>
      %c0_11 = arith.constant 0 : index
      %c0_12 = arith.constant 0 : index
      %13 = vector.load %arg7[%c0_11, %c0_12] : memref<8x128xf32, #tpu.memory_space<vmem>>, vector<8x128xf32>
      tpu.vector_store %arg7[%c0_11, %c0_12], %12 {strides = array<i32>} : memref<8x128xf32, #tpu.memory_space<vmem>>, vector<8x128xf32>,
    } else {
    }
    %c0 = arith.constant 0 : index
    %c0_1 = arith.constant 0 : index
    %3 = vector.load %arg7[%c0, %c0_1] : memref<8x128xf32, #tpu.memory_space<vmem>>, vector<8x128xf32>
    %c0_2 = arith.constant 0 : index
    %c0_3 = arith.constant 0 : index
    %4 = vector.load %arg3[%c0_2, %c0_3] : memref<8x1280xf32, #tpu.memory_space<vmem>>, vector<8x1280xf32>
    %c0_4 = arith.constant 0 : index
    %c0_5 = arith.constant 0 : index
    %5 = vector.load %arg4[%c0_4, %c0_5] : memref<1280x128xf32, #tpu.memory_space<vmem>>, vector<1280x128xf32>
    %cst = arith.constant dense<0.000000e+00> : vector<8x128xf32>
    %6 = tpu.matmul %4, %5, %cst {dimension_numbers = #tpu.dot_dimension_numbers<[1], [0], [0], [1], [0, 0, 1, 1], [], []>} : vector<8x1280xf32>, vector<1280x128xf32>, vector<8x128xf32> -> vector<8x128xf32>
    %7 = arith.addf %3, %6 : vector<8x128xf32>
    %c0_6 = arith.constant 0 : index
    %c0_7 = arith.constant 0 : index
    %8 = vector.load %arg7[%c0_6, %c0_7] : memref<8x128xf32, #tpu.memory_space<vmem>>, vector<8x128xf32>
    tpu.vector_store %arg7[%c0_6, %c0_7], %7 {strides = array<i32>} : memref<8x128xf32, #tpu.memory_space<vmem>>, vector<8x128xf32>,
    %c0_i32_8 = arith.constant 0 : i32
    %9 = arith.cmpi eq, %arg2, %c0_i32_8 : i32
    %10 = arith.extui %9 : i1 to i32
    %c0_i32_9 = arith.constant 0 : i32
    %11 = arith.cmpi ne, %10, %c0_i32_9 : i32
    scf.if %11 {
      %c0_10 = arith.constant 0 : index
      %c0_11 = arith.constant 0 : index
      %12 = vector.load %arg7[%c0_10, %c0_11] : memref<8x128xf32, #tpu.memory_space<vmem>>, vector<8x128xf32>
      %c0_12 = arith.constant 0 : index
      %c0_13 = arith.constant 0 : index
      %13 = vector.load %arg5[%c0_12, %c0_13] : memref<1x128xf32, #tpu.memory_space<vmem>>, vector<1x128xf32>
      %14 = vector.broadcast %13 : vector<1x128xf32> to vector<8x128xf32>
      %15 = arith.addf %12, %14 : vector<8x128xf32>
      %cst_14 = arith.constant 0.000000e+00 : f32
      %16 = vector.broadcast %cst_14 : f32 to vector<8x128xf32>
      %17 = arith.maximumf %15, %16 : vector<8x128xf32>
      %c0_15 = arith.constant 0 : index
      %c0_16 = arith.constant 0 : index
      %18 = vector.load %arg6[%c0_15, %c0_16] : memref<8x128xf32, #tpu.memory_space<vmem>>, vector<8x128xf32>
      tpu.vector_store %arg6[%c0_15, %c0_16], %17 {strides = array<i32>} : memref<8x128xf32, #tpu.memory_space<vmem>>, vector<8x128xf32>,
    } else {
    }
    return
  }
  func.func @transform_0(%arg0: i32, %arg1: i32, %arg2: i32) -> (i32, i32) {
    %c0_i32 = arith.constant 0 : i32
    return %arg0, %arg2 : i32, i32
  }
  func.func @transform_1(%arg0: i32, %arg1: i32, %arg2: i32) -> (i32, i32) {
    %c0_i32 = arith.constant 0 : i32
    return %arg2, %arg1 : i32, i32
  }
  func.func @transform_2(%arg0: i32, %arg1: i32, %arg2: i32) -> (i32, i32) {
    %c0_i32 = arith.constant 0 : i32
    %c0_i32_0 = arith.constant 0 : i32
    return %c0_i32, %arg1 : i32, i32
  }
  func.func @transform_3(%arg0: i32, %arg1: i32, %arg2: i32) -> (i32, i32) {
    %c0_i32 = arith.constant 0 : i32
    return %arg0, %arg1 : i32, i32
  }
}

module attributes {stable_mosaic.version = 11 : i64} {
  func.func @_linear_kernel(%arg0: i32, %arg1: i32, %arg2: i32, %arg3: memref<8x128xf32, #tpu.memory_space<vmem>>, %arg4: memref<128x128xf32, #tpu.memory_space<vmem>>, %arg5: memref<1x128xf32, #tpu.memory_space<vmem>>, %arg6: memref<8x128xf32, #tpu.memory_space<vmem>>, %arg7: memref<8x128xf32, #tpu.memory_space<vmem>>) attributes {dimension_semantics = [#tpu.dimension_semantics<parallel>, #tpu.dimension_semantics<parallel>, #tpu.dimension_semantics<arbitrary>], iteration_bounds = array<i64: 1, 1, 1>, scalar_prefetch = 0 : i64, scratch_operands = 1 : i64, tpu.core_type = #tpu.core_type<tc>, window_params = [{transform_indices = @transform_0, window_bounds = array<i64: 8, 128>}, {transform_indices = @transform_1, window_bounds = array<i64: 128, 128>}, {transform_indices = @transform_2, window_bounds = array<i64: 1, 128>}, {transform_indices = @transform_3, window_bounds = array<i64: 8, 128>}]} {
    %c0_i32 = arith.constant 0 : i32
    %0 = arith.cmpi eq, %arg2, %c0_i32 : i32
    %1 = arith.extui %0 : i1 to i32
    %c0_i32_0 = arith.constant 0 : i32
    %2 = arith.cmpi ne, %1, %c0_i32_0 : i32
    scf.if %2 {
      %cst_10 = arith.constant 0.000000e+00 : f32
      %12 = vector.broadcast %cst_10 : f32 to vector<8x128xf32>
      %c0_11 = arith.constant 0 : index
      %c0_12 = arith.constant 0 : index
      %13 = vector.load %arg7[%c0_11, %c0_12] : memref<8x128xf32, #tpu.memory_space<vmem>>, vector<8x128xf32>
      tpu.vector_store %arg7[%c0_11, %c0_12], %12 {strides = array<i32>} : memref<8x128xf32, #tpu.memory_space<vmem>>, vector<8x128xf32>,
    } else {
    }
    %c0 = arith.constant 0 : index
    %c0_1 = arith.constant 0 : index
    %3 = vector.load %arg7[%c0, %c0_1] : memref<8x128xf32, #tpu.memory_space<vmem>>, vector<8x128xf32>
    %c0_2 = arith.constant 0 : index
    %c0_3 = arith.constant 0 : index
    %4 = vector.load %arg3[%c0_2, %c0_3] : memref<8x128xf32, #tpu.memory_space<vmem>>, vector<8x128xf32>
    %c0_4 = arith.constant 0 : index
    %c0_5 = arith.constant 0 : index
    %5 = vector.load %arg4[%c0_4, %c0_5] : memref<128x128xf32, #tpu.memory_space<vmem>>, vector<128x128xf32>
    %cst = arith.constant dense<0.000000e+00> : vector<8x128xf32>
    %6 = tpu.matmul %4, %5, %cst {dimension_numbers = #tpu.dot_dimension_numbers<[1], [0], [0], [1], [0, 0, 1, 1], [], []>} : vector<8x128xf32>, vector<128x128xf32>, vector<8x128xf32> -> vector<8x128xf32>
    %7 = arith.addf %3, %6 : vector<8x128xf32>
    %c0_6 = arith.constant 0 : index
    %c0_7 = arith.constant 0 : index
    %8 = vector.load %arg7[%c0_6, %c0_7] : memref<8x128xf32, #tpu.memory_space<vmem>>, vector<8x128xf32>
    tpu.vector_store %arg7[%c0_6, %c0_7], %7 {strides = array<i32>} : memref<8x128xf32, #tpu.memory_space<vmem>>, vector<8x128xf32>,
    %c0_i32_8 = arith.constant 0 : i32
    %9 = arith.cmpi eq, %arg2, %c0_i32_8 : i32
    %10 = arith.extui %9 : i1 to i32
    %c0_i32_9 = arith.constant 0 : i32
    %11 = arith.cmpi ne, %10, %c0_i32_9 : i32
    scf.if %11 {
      %c0_10 = arith.constant 0 : index
      %c0_11 = arith.constant 0 : index
      %12 = vector.load %arg7[%c0_10, %c0_11] : memref<8x128xf32, #tpu.memory_space<vmem>>, vector<8x128xf32>
      %c0_12 = arith.constant 0 : index
      %c0_13 = arith.constant 0 : index
      %13 = vector.load %arg5[%c0_12, %c0_13] : memref<1x128xf32, #tpu.memory_space<vmem>>, vector<1x128xf32>
      %14 = vector.broadcast %13 : vector<1x128xf32> to vector<8x128xf32>
      %15 = arith.addf %12, %14 : vector<8x128xf32>
      %c0_14 = arith.constant 0 : index
      %c0_15 = arith.constant 0 : index
      %16 = vector.load %arg6[%c0_14, %c0_15] : memref<8x128xf32, #tpu.memory_space<vmem>>, vector<8x128xf32>
      tpu.vector_store %arg6[%c0_14, %c0_15], %15 {strides = array<i32>} : memref<8x128xf32, #tpu.memory_space<vmem>>, vector<8x128xf32>,
    } else {
    }
    return
  }
  func.func @transform_0(%arg0: i32, %arg1: i32, %arg2: i32) -> (i32, i32) {
    %c0_i32 = arith.constant 0 : i32
    return %arg0, %arg2 : i32, i32
  }
  func.func @transform_1(%arg0: i32, %arg1: i32, %arg2: i32) -> (i32, i32) {
    %c0_i32 = arith.constant 0 : i32
    return %arg2, %arg1 : i32, i32
  }
  func.func @transform_2(%arg0: i32, %arg1: i32, %arg2: i32) -> (i32, i32) {
    %c0_i32 = arith.constant 0 : i32
    %c0_i32_0 = arith.constant 0 : i32
    return %c0_i32, %arg1 : i32, i32
  }
  func.func @transform_3(%arg0: i32, %arg1: i32, %arg2: i32) -> (i32, i32) {
    %c0_i32 = arith.constant 0 : i32
    return %arg0, %arg1 : i32, i32
  }
}

</mosaic_0001>

<bundles_post_ra>
// kernel: simple_nn_forward.7
= control target key start
LH: loop header
LB: loop body
LE: loop exit
PB: predicated region body
PF: predicated region fallthrough
CT: control target
= control target key end

     0   :  { %v181_v0 = vmov 0.0   ;;  %vm182_vm0 = vmmov 0   ;;  %s260_s1 = inlined_call_operand.vmem [shape: f32[128,128], index: 1, kind: input, shape index: {}]   ;;  %s261_s0 = inlined_call_operand.vmem [shape: f32[8,128], index: 0, kind: input, shape index: {}]   ;;  %s262_s2 = inlined_call_operand.vmem [shape: f32[1,128], index: 2, kind: input, shape index: {}]   ;;  %s263_s3 = inlined_call_operand.vmem [shape: f32[8,128], index: 3, kind: output, shape index: {}]  }
   0x1   :  { %144 = vmatprep.subr.mxu0 %v181_v0  ;;  %v36_v1 = vld [vmem:[%s260_s1 + $0x78] sm:$0xff]  ;;  %v35_v2 = vld [vmem:[%s260_s1 + $0x70] sm:$0xff]  ;;  %176 = vmatprep.mubr.msk.f32.mxu0 %vm182_vm0, %v181_v0  ;;  %v34_v3 = vld [vmem:[%s260_s1 + $0x68] sm:$0xff] }
   0x2   :  { %145 = vmatpush3.msra.mxu0 %v36_v1  ;;  %v33_v4 = vld [vmem:[%s260_s1 + $0x60] sm:$0xff]  ;;  %v32_v5 = vld [vmem:[%s260_s1 + $0x58] sm:$0xff]  ;;  %v31_v6 = vld [vmem:[%s260_s1 + $0x50] sm:$0xff] }
   0x3   :  { %146 = vmatprep.subr.mxu0 %v181_v0  ;;  %v30_v7 = vld [vmem:[%s260_s1 + $0x48] sm:$0xff]  ;;  %v29_v8 = vld [vmem:[%s260_s1 + $0x40] sm:$0xff]  ;;  %v28_v9 = vld [vmem:[%s260_s1 + $0x38] sm:$0xff] }
   0x4   :  { %147 = vmatpush3.msra.mxu0 %v35_v2  ;;  %v27_v10 = vld [vmem:[%s260_s1 + $0x30] sm:$0xff]  ;;  %v26_v11 = vld [vmem:[%s260_s1 + $0x28] sm:$0xff]  ;;  %v25_v12 = vld [vmem:[%s260_s1 + $0x20] sm:$0xff] }
   0x5   :  { %148 = vmatprep.subr.mxu0 %v181_v0  ;;  %v24_v13 = vld [vmem:[%s260_s1 + $0x18] sm:$0xff]  ;;  %v23_v14 = vld [vmem:[%s260_s1 + $0x10] sm:$0xff]  ;;  %v22_v15 = vld [vmem:[%s260_s1 + $0x8] sm:$0xff] }
   0x6   :  { %149 = vmatpush3.msra.mxu0 %v34_v3  ;;  %v21_v16 = vld [vmem:[%s260_s1] sm:$0xff] }
   0x7   :  { %150 = vmatprep.subr.mxu0 %v181_v0  ;;  %v20_v17 = vld [vmem:[%s261_s0] sm:$0xff] }
   0x8   :  { %151 = vmatpush3.msra.mxu0 %v33_v4  ;;  %v126_v18 = vld [vmem:[%s262_s2] ss:$0 sm:$0xff] }
   0x9   :  { %152 = vmatprep.subr.mxu0 %v181_v0 }
   0xa   :  { %153 = vmatpush3.msra.mxu0 %v32_v5 }
   0xb   :  { %154 = vmatprep.subr.mxu0 %v181_v0 }
   0xc   :  { %155 = vmatpush3.msra.mxu0 %v31_v6 }
   0xd   :  { %156 = vmatprep.subr.mxu0 %v181_v0 }
   0xe   :  { %157 = vmatpush3.msra.mxu0 %v30_v7 }
   0xf   :  { %158 = vmatprep.subr.mxu0 %v181_v0 }
  0x10   :  { %159 = vmatpush3.msra.mxu0 %v29_v8 }
  0x11   :  { %160 = vmatprep.subr.mxu0 %v181_v0 }
  0x12   :  { %161 = vmatpush3.msra.mxu0 %v28_v9 }
  0x13   :  { %162 = vmatprep.subr.mxu0 %v181_v0 }
  0x14   :  { %163 = vmatpush3.msra.mxu0 %v27_v10 }
  0x15   :  { %164 = vmatprep.subr.mxu0 %v181_v0 }
  0x16   :  { %165 = vmatpush3.msra.mxu0 %v26_v11 }
  0x17   :  { %166 = vmatprep.subr.mxu0 %v181_v0 }
  0x18   :  { %167 = vmatpush3.msra.mxu0 %v25_v12 }
  0x19   :  { %168 = vmatprep.subr.mxu0 %v181_v0 }
  0x1a   :  { %169 = vmatpush3.msra.mxu0 %v24_v13 }
  0x1b   :  { %170 = vmatprep.subr.mxu0 %v181_v0 }
  0x1c   :  { %171 = vmatpush3.msra.mxu0 %v23_v14 }
  0x1d   :  { %172 = vmatprep.subr.mxu0 %v181_v0 }
  0x1e   :  { %173 = vmatpush3.msra.mxu0 %v22_v15 }
  0x1f   :  { %174 = vmatprep.subr.mxu0 %v181_v0 }
  0x20   :  { %175 = vmatpush3.msra.mxu0 %v21_v16 }
  0x21   :  { %177 = vmatmul.mubr.f32.vlgmr.msra.gmra.mxu0 %v20_v17 }
  0xe1   :  { %v103_v19 = vpop.f32.mrf.mxu0 }
  0xe2   :  { %v120_v20 = vadd.f32 %v126_v18, %v103_v19 }
  0xe3   :  { %v178_v21 = vpop.f32.mrf.mxu0 }
  0xe4   :  { %121 = vst [vmem:[%s263_s3] sm:$0xff] %v120_v20 }

// kernel: simple_nn_forward.6
= control target key start
LH: loop header
LB: loop body
LE: loop exit
PB: predicated region body
PF: predicated region fallthrough
CT: control target
= control target key end

     0   :  { %s1272_s1 = inlined_call_operand.vmem [shape: f32[1280,128], index: 1, kind: input, shape index: {}]   ;;  %s1273_s0 = inlined_call_operand.vmem [shape: f32[8,1280], index: 0, kind: input, shape index: {}]   ;;  %s1274_s2 = inlined_call_operand.vmem [shape: f32[1,128], index: 2, kind: input, shape index: {}]   ;;  %s1275_s3 = inlined_call_operand.vmem [shape: f32[8,128], index: 3, kind: output, shape index: {}]  }
   0x1   :  { %v61_v0 = vld [vmem:[%s1272_s1 + $0xf8] sm:$0xff]  ;;  %v60_v4 = vld [vmem:[%s1272_s1 + $0xf0] sm:$0xff]  ;;  %v59_v8 = vld [vmem:[%s1272_s1 + $0xe8] sm:$0xff] }
   0x2   :  { %v93_v1 = vld [vmem:[%s1272_s1 + $0x1f8] sm:$0xff]  ;;  %561 = vmatprep.subr.mxu0 %v61_v0  ;;  %v92_v5 = vld [vmem:[%s1272_s1 + $0x1f0] sm:$0xff]  ;;  %v91_v9 = vld [vmem:[%s1272_s1 + $0x1e8] sm:$0xff] }
   0x3   :  { %v45_v2 = vld [vmem:[%s1272_s1 + $0x78] sm:$0xff]  ;;  %596 = vmatprep.subr.mxu1 %v93_v1  ;;  %v44_v6 = vld [vmem:[%s1272_s1 + $0x70] sm:$0xff]  ;;  %v43_v10 = vld [vmem:[%s1272_s1 + $0x68] sm:$0xff] }
   0x4   :  { %v77_v3 = vld [vmem:[%s1272_s1 + $0x178] sm:$0xff]  ;;  %562 = vmatpush3.msra.mxu0 %v45_v2  ;;  %v76_v7 = vld [vmem:[%s1272_s1 + $0x170] sm:$0xff]  ;;  %v75_v11 = vld [vmem:[%s1272_s1 + $0x168] sm:$0xff] }
   0x5   :  { %597 = vmatpush3.msra.mxu1 %v77_v3  ;;  %563 = vmatprep.subr.mxu0 %v60_v4  ;;  %v58_v12 = vld [vmem:[%s1272_s1 + $0xe0] sm:$0xff]  ;;  %v57_v16 = vld [vmem:[%s1272_s1 + $0xd8] sm:$0xff]  ;;  %v56_v20 = vld [vmem:[%s1272_s1 + $0xd0] sm:$0xff] }
   0x6   :  { %598 = vmatprep.subr.mxu1 %v92_v5  ;;  %564 = vmatpush3.msra.mxu0 %v44_v6  ;;  %v90_v13 = vld [vmem:[%s1272_s1 + $0x1e0] sm:$0xff]  ;;  %v89_v17 = vld [vmem:[%s1272_s1 + $0x1d8] sm:$0xff]  ;;  %v88_v21 = vld [vmem:[%s1272_s1 + $0x1d0] sm:$0xff] }
   0x7   :  { %599 = vmatpush3.msra.mxu1 %v76_v7  ;;  %565 = vmatprep.subr.mxu0 %v59_v8  ;;  %v42_v14 = vld [vmem:[%s1272_s1 + $0x60] sm:$0xff]  ;;  %v41_v18 = vld [vmem:[%s1272_s1 + $0x58] sm:$0xff]  ;;  %v40_v22 = vld [vmem:[%s1272_s1 + $0x50] sm:$0xff] }
   0x8   :  { %600 = vmatprep.subr.mxu1 %v91_v9  ;;  %v74_v15 = vld [vmem:[%s1272_s1 + $0x160] sm:$0xff]  ;;  %566 = vmatpush3.msra.mxu0 %v43_v10  ;;  %v73_v19 = vld [vmem:[%s1272_s1 + $0x158] sm:$0xff]  ;;  %v72_v23 = vld [vmem:[%s1272_s1 + $0x150] sm:$0xff] }
   0x9   :  { %601 = vmatpush3.msra.mxu1 %v75_v11  ;;  %567 = vmatprep.subr.mxu0 %v58_v12  ;;  %v55_v24 = vld [vmem:[%s1272_s1 + $0xc8] sm:$0xff]  ;;  %v54_v28 = vld [vmem:[%s1272_s1 + $0xc0] sm:$0xff]  ;;  %v53_v32 = vld [vmem:[%s1272_s1 + $0xb8] sm:$0xff] }
   0xa   :  { %602 = vmatprep.subr.mxu1 %v90_v13  ;;  %568 = vmatpush3.msra.mxu0 %v42_v14  ;;  %v87_v25 = vld [vmem:[%s1272_s1 + $0x1c8] sm:$0xff]  ;;  %v86_v29 = vld [vmem:[%s1272_s1 + $0x1c0] sm:$0xff]  ;;  %v85_v33 = vld [vmem:[%s1272_s1 + $0x1b8] sm:$0xff] }
   0xb   :  { %603 = vmatpush3.msra.mxu1 %v74_v15  ;;  %569 = vmatprep.subr.mxu0 %v57_v16  ;;  %v39_v26 = vld [vmem:[%s1272_s1 + $0x48] sm:$0xff]  ;;  %v38_v30 = vld [vmem:[%s1272_s1 + $0x40] sm:$0xff]  ;;  %v37_v34 = vld [vmem:[%s1272_s1 + $0x38] sm:$0xff] }
   0xc   :  { %604 = vmatprep.subr.mxu1 %v89_v17  ;;  %570 = vmatpush3.msra.mxu0 %v41_v18  ;;  %v71_v27 = vld [vmem:[%s1272_s1 + $0x148] sm:$0xff]  ;;  %v70_v31 = vld [vmem:[%s1272_s1 + $0x140] sm:$0xff]  ;;  %v69_v35 = vld [vmem:[%s1272_s1 + $0x138] sm:$0xff] }
   0xd   :  { %605 = vmatpush3.msra.mxu1 %v73_v19  ;;  %571 = vmatprep.subr.mxu0 %v56_v20  ;;  %v52_v36 = vld [vmem:[%s1272_s1 + $0xb0] sm:$0xff]  ;;  %v51_v40 = vld [vmem:[%s1272_s1 + $0xa8] sm:$0xff]  ;;  %v50_v44 = vld [vmem:[%s1272_s1 + $0xa0] sm:$0xff] }
   0xe   :  { %606 = vmatprep.subr.mxu1 %v88_v21  ;;  %572 = vmatpush3.msra.mxu0 %v40_v22  ;;  %v84_v37 = vld [vmem:[%s1272_s1 + $0x1b0] sm:$0xff]  ;;  %v83_v41 = vld [vmem:[%s1272_s1 + $0x1a8] sm:$0xff]  ;;  %v82_v45 = vld [vmem:[%s1272_s1 + $0x1a0] sm:$0xff] }
   0xf   :  { %607 = vmatpush3.msra.mxu1 %v72_v23  ;;  %573 = vmatprep.subr.mxu0 %v55_v24  ;;  %v36_v38 = vld [vmem:[%s1272_s1 + $0x30] sm:$0xff]  ;;  %v35_v42 = vld [vmem:[%s1272_s1 + $0x28] sm:$0xff]  ;;  %v34_v46 = vld [vmem:[%s1272_s1 + $0x20] sm:$0xff] }
  0x10   :  { %608 = vmatprep.subr.mxu1 %v87_v25  ;;  %574 = vmatpush3.msra.mxu0 %v39_v26  ;;  %v68_v39 = vld [vmem:[%s1272_s1 + $0x130] sm:$0xff]  ;;  %v67_v43 = vld [vmem:[%s1272_s1 + $0x128] sm:$0xff]  ;;  %v66_v47 = vld [vmem:[%s1272_s1 + $0x120] sm:$0xff] }
  0x11   :  { %609 = vmatpush3.msra.mxu1 %v71_v27  ;;  %575 = vmatprep.subr.mxu0 %v54_v28  ;;  %v49_v48 = vld [vmem:[%s1272_s1 + $0x98] sm:$0xff]  ;;  %v48_v52 = vld [vmem:[%s1272_s1 + $0x90] sm:$0xff]  ;;  %v47_v56 = vld [vmem:[%s1272_s1 + $0x88] sm:$0xff] }
  0x12   :  { %610 = vmatprep.subr.mxu1 %v86_v29  ;;  %576 = vmatpush3.msra.mxu0 %v38_v30  ;;  %v81_v49 = vld [vmem:[%s1272_s1 + $0x198] sm:$0xff]  ;;  %v80_v53 = vld [vmem:[%s1272_s1 + $0x190] sm:$0xff]  ;;  %v79_v57 = vld [vmem:[%s1272_s1 + $0x188] sm:$0xff] }
  0x13   :  { %611 = vmatpush3.msra.mxu1 %v70_v31  ;;  %577 = vmatprep.subr.mxu0 %v53_v32  ;;  %v33_v50 = vld [vmem:[%s1272_s1 + $0x18] sm:$0xff]  ;;  %v32_v54 = vld [vmem:[%s1272_s1 + $0x10] sm:$0xff]  ;;  %v31_v58 = vld [vmem:[%s1272_s1 + $0x8] sm:$0xff] }
  0x14   :  { %612 = vmatprep.subr.mxu1 %v85_v33  ;;  %578 = vmatpush3.msra.mxu0 %v37_v34  ;;  %v65_v51 = vld [vmem:[%s1272_s1 + $0x118] sm:$0xff]  ;;  %v64_v55 = vld [vmem:[%s1272_s1 + $0x110] sm:$0xff]  ;;  %v63_v59 = vld [vmem:[%s1272_s1 + $0x108] sm:$0xff] }
  0x15   :  { %613 = vmatpush3.msra.mxu1 %v69_v35  ;;  %579 = vmatprep.subr.mxu0 %v52_v36  ;;  %v46_v60 = vld [vmem:[%s1272_s1 + $0x80] sm:$0xff]  ;;  %v21_v63 = vld [vmem:[%s1273_s0 + $0x8] sm:$0xff]  ;;  %v23_v1 = vld [vmem:[%s1273_s0 + $0x18] sm:$0xff] }
  0x16   :  { %614 = vmatprep.subr.mxu1 %v84_v37  ;;  %580 = vmatpush3.msra.mxu0 %v36_v38  ;;  %v78_v61 = vld [vmem:[%s1272_s1 + $0x180] sm:$0xff]  ;;  %v22_v3 = vld [vmem:[%s1273_s0 + $0x10] sm:$0xff]  ;;  %v125_v4 = vld [vmem:[%s1272_s1 + $0x2f8] sm:$0xff] }
  0x17   :  { %615 = vmatpush3.msra.mxu1 %v68_v39  ;;  %581 = vmatprep.subr.mxu0 %v51_v40  ;;  %v30_v62 = vld [vmem:[%s1272_s1] sm:$0xff]  ;;  %v157_v5 = vld [vmem:[%s1272_s1 + $0x3f8] sm:$0xff]  ;;  %v124_v8 = vld [vmem:[%s1272_s1 + $0x2f0] sm:$0xff] }
  0x18   :  { %616 = vmatprep.subr.mxu1 %v83_v41  ;;  %582 = vmatpush3.msra.mxu0 %v35_v42  ;;  %v62_v0 = vld [vmem:[%s1272_s1 + $0x100] sm:$0xff]  ;;  %v109_v6 = vld [vmem:[%s1272_s1 + $0x278] sm:$0xff]  ;;  %v156_v9 = vld [vmem:[%s1272_s1 + $0x3f0] sm:$0xff] }
  0x19   :  { %617 = vmatpush3.msra.mxu1 %v67_v43  ;;  %583 = vmatprep.subr.mxu0 %v50_v44  ;;  %v20_v2 = vld [vmem:[%s1273_s0] sm:$0xff]  ;;  %v141_v7 = vld [vmem:[%s1272_s1 + $0x378] sm:$0xff]  ;;  %v108_v10 = vld [vmem:[%s1272_s1 + $0x270] sm:$0xff] }
  0x1a   :  { %618 = vmatprep.subr.mxu1 %v82_v45  ;;  %584 = vmatpush3.msra.mxu0 %v34_v46  ;;  %v140_v11 = vld [vmem:[%s1272_s1 + $0x370] sm:$0xff]  ;;  %v123_v12 = vld [vmem:[%s1272_s1 + $0x2e8] sm:$0xff]  ;;  %v122_v16 = vld [vmem:[%s1272_s1 + $0x2e0] sm:$0xff] }
  0x1b   :  { %619 = vmatpush3.msra.mxu1 %v66_v47  ;;  %585 = vmatprep.subr.mxu0 %v49_v48  ;;  %v155_v13 = vld [vmem:[%s1272_s1 + $0x3e8] sm:$0xff]  ;;  %v154_v17 = vld [vmem:[%s1272_s1 + $0x3e0] sm:$0xff]  ;;  %v121_v20 = vld [vmem:[%s1272_s1 + $0x2d8] sm:$0xff] }
  0x1c   :  { %620 = vmatprep.subr.mxu1 %v81_v49  ;;  %586 = vmatpush3.msra.mxu0 %v33_v50  ;;  %v107_v14 = vld [vmem:[%s1272_s1 + $0x268] sm:$0xff]  ;;  %v106_v18 = vld [vmem:[%s1272_s1 + $0x260] sm:$0xff]  ;;  %v153_v21 = vld [vmem:[%s1272_s1 + $0x3d8] sm:$0xff] }
  0x1d   :  { %621 = vmatpush3.msra.mxu1 %v65_v51  ;;  %587 = vmatprep.subr.mxu0 %v48_v52  ;;  %v139_v15 = vld [vmem:[%s1272_s1 + $0x368] sm:$0xff]  ;;  %v138_v19 = vld [vmem:[%s1272_s1 + $0x360] sm:$0xff]  ;;  %v105_v22 = vld [vmem:[%s1272_s1 + $0x258] sm:$0xff] }
  0x1e   :  { %622 = vmatprep.subr.mxu1 %v80_v53  ;;  %588 = vmatpush3.msra.mxu0 %v32_v54  ;;  %v137_v23 = vld [vmem:[%s1272_s1 + $0x358] sm:$0xff]  ;;  %v120_v24 = vld [vmem:[%s1272_s1 + $0x2d0] sm:$0xff]  ;;  %v119_v28 = vld [vmem:[%s1272_s1 + $0x2c8] sm:$0xff] }
  0x1f   :  { %623 = vmatpush3.msra.mxu1 %v64_v55  ;;  %589 = vmatprep.subr.mxu0 %v47_v56  ;;  %v152_v25 = vld [vmem:[%s1272_s1 + $0x3d0] sm:$0xff]  ;;  %v151_v29 = vld [vmem:[%s1272_s1 + $0x3c8] sm:$0xff]  ;;  %v118_v32 = vld [vmem:[%s1272_s1 + $0x2c0] sm:$0xff] }
  0x20   :  { %624 = vmatprep.subr.mxu1 %v79_v57  ;;  %590 = vmatpush3.msra.mxu0 %v31_v58  ;;  %v104_v26 = vld [vmem:[%s1272_s1 + $0x250] sm:$0xff]  ;;  %v103_v30 = vld [vmem:[%s1272_s1 + $0x248] sm:$0xff]  ;;  %v150_v33 = vld [vmem:[%s1272_s1 + $0x3c0] sm:$0xff] }
  0x21   :  { %625 = vmatpush3.msra.mxu1 %v63_v59  ;;  %591 = vmatprep.subr.mxu0 %v46_v60  ;;  %v136_v27 = vld [vmem:[%s1272_s1 + $0x350] sm:$0xff]  ;;  %v135_v31 = vld [vmem:[%s1272_s1 + $0x348] sm:$0xff]  ;;  %v102_v34 = vld [vmem:[%s1272_s1 + $0x240] sm:$0xff] }
  0x22   :  { %626 = vmatprep.subr.mxu1 %v78_v61  ;;  %592 = vmatpush3.msra.mxu0 %v30_v62  ;;  %v134_v35 = vld [vmem:[%s1272_s1 + $0x340] sm:$0xff]  ;;  %v117_v36 = vld [vmem:[%s1272_s1 + $0x2b8] sm:$0xff]  ;;  %v116_v40 = vld [vmem:[%s1272_s1 + $0x2b0] sm:$0xff] }
  0x23   :  { %254 = vmatprep.mubr.f32.mxu0 %v21_v63  ;;  %627 = vmatpush3.msra.mxu1 %v62_v0  ;;  %v149_v37 = vld [vmem:[%s1272_s1 + $0x3b8] sm:$0xff]  ;;  %v148_v41 = vld [vmem:[%s1272_s1 + $0x3b0] sm:$0xff]  ;;  %v115_v44 = vld [vmem:[%s1272_s1 + $0x2a8] sm:$0xff] }
  0x24   :  { %324 = vmatprep.mubr.f32.mxu1 %v23_v1  ;;  %255 = vmatmul.mubr.f32.vlgmr.msra.gmra.mxu0 %v20_v2  ;;  %v101_v38 = vld [vmem:[%s1272_s1 + $0x238] sm:$0xff]  ;;  %v100_v42 = vld [vmem:[%s1272_s1 + $0x230] sm:$0xff]  ;;  %v147_v45 = vld [vmem:[%s1272_s1 + $0x3a8] sm:$0xff] }
  0x25   :  { %325 = vmatmul.mubr.f32.vlgmr.msra.gmra.mxu1 %v22_v3  ;;  %631 = vmatprep.subr.mxu0 %v125_v4  ;;  %v133_v39 = vld [vmem:[%s1272_s1 + $0x338] sm:$0xff]  ;;  %v132_v43 = vld [vmem:[%s1272_s1 + $0x330] sm:$0xff]  ;;  %v99_v46 = vld [vmem:[%s1272_s1 + $0x228] sm:$0xff] }
  0x26   :  { %666 = vmatprep.subr.mxu1 %v157_v5  ;;  %632 = vmatpush3.msra.mxu0 %v109_v6  ;;  %v131_v47 = vld [vmem:[%s1272_s1 + $0x328] sm:$0xff]  ;;  %v114_v48 = vld [vmem:[%s1272_s1 + $0x2a0] sm:$0xff]  ;;  %v113_v52 = vld [vmem:[%s1272_s1 + $0x298] sm:$0xff] }
  0x27   :  { %667 = vmatpush3.msra.mxu1 %v141_v7  ;;  %633 = vmatprep.subr.mxu0 %v124_v8  ;;  %v146_v49 = vld [vmem:[%s1272_s1 + $0x3a0] sm:$0xff]  ;;  %v145_v53 = vld [vmem:[%s1272_s1 + $0x398] sm:$0xff]  ;;  %v112_v56 = vld [vmem:[%s1272_s1 + $0x290] sm:$0xff] }
  0x28   :  { %668 = vmatprep.subr.mxu1 %v156_v9  ;;  %634 = vmatpush3.msra.mxu0 %v108_v10  ;;  %v98_v50 = vld [vmem:[%s1272_s1 + $0x220] sm:$0xff]  ;;  %v97_v54 = vld [vmem:[%s1272_s1 + $0x218] sm:$0xff]  ;;  %v144_v57 = vld [vmem:[%s1272_s1 + $0x390] sm:$0xff] }
  0x29   :  { %669 = vmatpush3.msra.mxu1 %v140_v11  ;;  %635 = vmatprep.subr.mxu0 %v123_v12  ;;  %v130_v51 = vld [vmem:[%s1272_s1 + $0x320] sm:$0xff]  ;;  %v129_v55 = vld [vmem:[%s1272_s1 + $0x318] sm:$0xff]  ;;  %v96_v58 = vld [vmem:[%s1272_s1 + $0x210] sm:$0xff] }
  0x2a   :  { %670 = vmatprep.subr.mxu1 %v155_v13  ;;  %636 = vmatpush3.msra.mxu0 %v107_v14  ;;  %v128_v59 = vld [vmem:[%s1272_s1 + $0x310] sm:$0xff]  ;;  %v111_v60 = vld [vmem:[%s1272_s1 + $0x288] sm:$0xff]  ;;  %v110_v0 = vld [vmem:[%s1272_s1 + $0x280] sm:$0xff] }
  0x2b   :  { %671 = vmatpush3.msra.mxu1 %v139_v15  ;;  %637 = vmatprep.subr.mxu0 %v122_v16  ;;  %v143_v61 = vld [vmem:[%s1272_s1 + $0x388] sm:$0xff]  ;;  %v94_v2 = vld [vmem:[%s1272_s1 + $0x200] sm:$0xff]  ;;  %v189_v5 = vld [vmem:[%s1272_s1 + $0x4f8] sm:$0xff] }
  0x2c   :  { %672 = vmatprep.subr.mxu1 %v154_v17  ;;  %638 = vmatpush3.msra.mxu0 %v106_v18  ;;  %v95_v62 = vld [vmem:[%s1272_s1 + $0x208] sm:$0xff]  ;;  %v142_v3 = vld [vmem:[%s1272_s1 + $0x380] sm:$0xff]  ;;  %v27_v7 = vld [vmem:[%s1273_s0 + $0x38] sm:$0xff] }
  0x2d   :  { %673 = vmatpush3.msra.mxu1 %v138_v19  ;;  %639 = vmatprep.subr.mxu0 %v121_v20  ;;  %v25_v63 = vld [vmem:[%s1273_s0 + $0x28] sm:$0xff]  ;;  %v24_v4 = vld [vmem:[%s1273_s0 + $0x20] sm:$0xff]  ;;  %v173_v8 = vld [vmem:[%s1272_s1 + $0x478] sm:$0xff] }
  0x2e   :  { %674 = vmatprep.subr.mxu1 %v153_v21  ;;  %640 = vmatpush3.msra.mxu0 %v105_v22  ;;  %v127_v1 = vld [vmem:[%s1272_s1 + $0x308] sm:$0xff]  ;;  %v126_v6 = vld [vmem:[%s1272_s1 + $0x300] sm:$0xff]  ;;  %v26_v9 = vld [vmem:[%s1273_s0 + $0x30] sm:$0xff] }
  0x2f   :  { %675 = vmatpush3.msra.mxu1 %v137_v23  ;;  %641 = vmatprep.subr.mxu0 %v120_v24  ;;  %v188_v10 = vld [vmem:[%s1272_s1 + $0x4f0] sm:$0xff]  ;;  %v29_v11 = vld [vmem:[%s1273_s0 + $0x48] sm:$0xff]  ;;  %v186_v15 = vld [vmem:[%s1272_s1 + $0x4e0] sm:$0xff] }
  0x30   :  { %676 = vmatprep.subr.mxu1 %v152_v25  ;;  %642 = vmatpush3.msra.mxu0 %v104_v26  ;;  %v172_v12 = vld [vmem:[%s1272_s1 + $0x470] sm:$0xff]  ;;  %v187_v13 = vld [vmem:[%s1272_s1 + $0x4e8] sm:$0xff]  ;;  %v170_v16 = vld [vmem:[%s1272_s1 + $0x460] sm:$0xff] }
  0x31   :  { %677 = vmatpush3.msra.mxu1 %v136_v27  ;;  %643 = vmatprep.subr.mxu0 %v119_v28  ;;  %v171_v14 = vld [vmem:[%s1272_s1 + $0x468] sm:$0xff]  ;;  %v185_v17 = vld [vmem:[%s1272_s1 + $0x4d8] sm:$0xff]  ;;  %v184_v19 = vld [vmem:[%s1272_s1 + $0x4d0] sm:$0xff] }
  0x32   :  { %678 = vmatprep.subr.mxu1 %v151_v29  ;;  %644 = vmatpush3.msra.mxu0 %v103_v30  ;;  %v169_v18 = vld [vmem:[%s1272_s1 + $0x458] sm:$0xff]  ;;  %v168_v20 = vld [vmem:[%s1272_s1 + $0x450] sm:$0xff]  ;;  %v183_v21 = vld [vmem:[%s1272_s1 + $0x4c8] sm:$0xff] }
  0x33   :  { %679 = vmatpush3.msra.mxu1 %v135_v31  ;;  %645 = vmatprep.subr.mxu0 %v118_v32  ;;  %v167_v22 = vld [vmem:[%s1272_s1 + $0x448] sm:$0xff]  ;;  %v182_v23 = vld [vmem:[%s1272_s1 + $0x4c0] sm:$0xff]  ;;  %v181_v25 = vld [vmem:[%s1272_s1 + $0x4b8] sm:$0xff] }
  0x34   :  { %680 = vmatprep.subr.mxu1 %v150_v33  ;;  %646 = vmatpush3.msra.mxu0 %v102_v34  ;;  %v166_v24 = vld [vmem:[%s1272_s1 + $0x440] sm:$0xff]  ;;  %v165_v26 = vld [vmem:[%s1272_s1 + $0x438] sm:$0xff]  ;;  %v180_v27 = vld [vmem:[%s1272_s1 + $0x4b0] sm:$0xff] }
  0x35   :  { %681 = vmatpush3.msra.mxu1 %v134_v35  ;;  %647 = vmatprep.subr.mxu0 %v117_v36  ;;  %v164_v28 = vld [vmem:[%s1272_s1 + $0x430] sm:$0xff]  ;;  %v179_v29 = vld [vmem:[%s1272_s1 + $0x4a8] sm:$0xff]  ;;  %v178_v31 = vld [vmem:[%s1272_s1 + $0x4a0] sm:$0xff] }
  0x36   :  { %682 = vmatprep.subr.mxu1 %v149_v37  ;;  %648 = vmatpush3.msra.mxu0 %v101_v38  ;;  %v163_v30 = vld [vmem:[%s1272_s1 + $0x428] sm:$0xff]  ;;  %v162_v32 = vld [vmem:[%s1272_s1 + $0x420] sm:$0xff]  ;;  %v177_v33 = vld [vmem:[%s1272_s1 + $0x498] sm:$0xff] }
  0x37   :  { %683 = vmatpush3.msra.mxu1 %v133_v39  ;;  %649 = vmatprep.subr.mxu0 %v116_v40  ;;  %v161_v34 = vld [vmem:[%s1272_s1 + $0x418] sm:$0xff]  ;;  %v176_v35 = vld [vmem:[%s1272_s1 + $0x490] sm:$0xff]  ;;  %v175_v37 = vld [vmem:[%s1272_s1 + $0x488] sm:$0xff] }
  0x38   :  { %684 = vmatprep.subr.mxu1 %v148_v41  ;;  %650 = vmatpush3.msra.mxu0 %v100_v42  ;;  %v160_v36 = vld [vmem:[%s1272_s1 + $0x410] sm:$0xff]  ;;  %v159_v38 = vld [vmem:[%s1272_s1 + $0x408] sm:$0xff]  ;;  %v174_v39 = vld [vmem:[%s1272_s1 + $0x480] sm:$0xff] }
  0x39   :  { %685 = vmatpush3.msra.mxu1 %v132_v43  ;;  %651 = vmatprep.subr.mxu0 %v115_v44  ;;  %v158_v40 = vld [vmem:[%s1272_s1 + $0x400] sm:$0xff] }
  0x3a   :  { %686 = vmatprep.subr.mxu1 %v147_v45  ;;  %652 = vmatpush3.msra.mxu0 %v99_v46  ;;  %v28_v41 = vld [vmem:[%s1273_s0 + $0x40] sm:$0xff] }
  0x3b   :  { %687 = vmatpush3.msra.mxu1 %v131_v47  ;;  %653 = vmatprep.subr.mxu0 %v114_v48 }
  0x3c   :  { %688 = vmatprep.subr.mxu1 %v146_v49  ;;  %654 = vmatpush3.msra.mxu0 %v98_v50 }
  0x3d   :  { %689 = vmatpush3.msra.mxu1 %v130_v51  ;;  %655 = vmatprep.subr.mxu0 %v113_v52 }
  0x3e   :  { %690 = vmatprep.subr.mxu1 %v145_v53  ;;  %656 = vmatpush3.msra.mxu0 %v97_v54 }
  0x3f   :  { %691 = vmatpush3.msra.mxu1 %v129_v55  ;;  %657 = vmatprep.subr.mxu0 %v112_v56 }
  0x40   :  { %692 = vmatprep.subr.mxu1 %v144_v57  ;;  %658 = vmatpush3.msra.mxu0 %v96_v58 }
  0x41   :  { %693 = vmatpush3.msra.mxu1 %v128_v59  ;;  %659 = vmatprep.subr.mxu0 %v111_v60  ;;  %v560_v60 = vld [vmem:[%s1274_s2] ss:$0 sm:$0xff] }
  0x42   :  { %694 = vmatprep.subr.mxu1 %v143_v61  ;;  %660 = vmatpush3.msra.mxu0 %v95_v62 }
  0x43   :  { %394 = vmatprep.mubr.f32.mxu0 %v25_v63  ;;  %661 = vmatprep.subr.mxu0 %v110_v0 }
  0x44   :  { %695 = vmatpush3.msra.mxu1 %v127_v1  ;;  %662 = vmatpush3.msra.mxu0 %v94_v2 }
  0x45   :  { %696 = vmatprep.subr.mxu1 %v142_v3  ;;  %395 = vmatmul.mubr.f32.vlgmr.msra.gmra.mxu0 %v24_v4 }
  0x46   :  { %701 = vmatprep.subr.mxu0 %v189_v5  ;;  %697 = vmatpush3.msra.mxu1 %v126_v6 }
  0x47   :  { %464 = vmatprep.mubr.f32.mxu1 %v27_v7  ;;  %702 = vmatpush3.msra.mxu0 %v173_v8 }
  0x48   :  { %465 = vmatmul.mubr.f32.vlgmr.msra.gmra.mxu1 %v26_v9  ;;  %703 = vmatprep.subr.mxu0 %v188_v10 }
  0x49   :  { %534 = vmatprep.mubr.f32.mxu0 %v29_v11  ;;  %704 = vmatpush3.msra.mxu0 %v172_v12 }
  0x4a   :  { %705 = vmatprep.subr.mxu0 %v187_v13 }
  0x4b   :  { %706 = vmatpush3.msra.mxu0 %v171_v14 }
  0x4c   :  { %707 = vmatprep.subr.mxu0 %v186_v15 }
  0x4d   :  { %708 = vmatpush3.msra.mxu0 %v170_v16 }
  0x4e   :  { %709 = vmatprep.subr.mxu0 %v185_v17 }
  0x4f   :  { %710 = vmatpush3.msra.mxu0 %v169_v18 }
  0x50   :  { %711 = vmatprep.subr.mxu0 %v184_v19 }
  0x51   :  { %712 = vmatpush3.msra.mxu0 %v168_v20 }
  0x52   :  { %713 = vmatprep.subr.mxu0 %v183_v21 }
  0x53   :  { %714 = vmatpush3.msra.mxu0 %v167_v22 }
  0x54   :  { %715 = vmatprep.subr.mxu0 %v182_v23 }
  0x55   :  { %716 = vmatpush3.msra.mxu0 %v166_v24 }
  0x56   :  { %717 = vmatprep.subr.mxu0 %v181_v25 }
  0x57   :  { %718 = vmatpush3.msra.mxu0 %v165_v26 }
  0x58   :  { %719 = vmatprep.subr.mxu0 %v180_v27 }
  0x59   :  { %720 = vmatpush3.msra.mxu0 %v164_v28 }
  0x5a   :  { %721 = vmatprep.subr.mxu0 %v179_v29 }
  0x5b   :  { %722 = vmatpush3.msra.mxu0 %v163_v30 }
  0x5c   :  { %723 = vmatprep.subr.mxu0 %v178_v31 }
  0x5d   :  { %724 = vmatpush3.msra.mxu0 %v162_v32 }
  0x5e   :  { %725 = vmatprep.subr.mxu0 %v177_v33 }
  0x5f   :  { %726 = vmatpush3.msra.mxu0 %v161_v34 }
  0x60   :  { %727 = vmatprep.subr.mxu0 %v176_v35 }
  0x61   :  { %728 = vmatpush3.msra.mxu0 %v160_v36 }
  0x62   :  { %729 = vmatprep.subr.mxu0 %v175_v37 }
  0x63   :  { %730 = vmatpush3.msra.mxu0 %v159_v38 }
  0x64   :  { %731 = vmatprep.subr.mxu0 %v174_v39 }
  0x65   :  { %732 = vmatpush3.msra.mxu0 %v158_v40 }
  0x66   :  { %535 = vmatmul.mubr.f32.vlgmr.msra.gmra.mxu0 %v28_v41 }
  0xe4   :  { %v593_v42 = vpop.f32.mrf.mxu0 }
  0xe5   :  { %v628_v43 = vpop.f32.mrf.mxu1 }
  0xe6   :  { %v594_v44 = vpop.f32.mrf.mxu0 }
  0xe7   :  { %v629_v46 = vpop.f32.mrf.mxu1  ;;  %v595_v49 = vadd.f32 %v594_v44, %v593_v42 }
  0xe8   :  { %v630_v50 = vadd.f32 %v629_v46, %v628_v43 }
  0xea   :  { %v327_v53 = vadd.f32 %v630_v50, %v595_v49 }
 0x105   :  { %v663_v45 = vpop.f32.mrf.mxu0 }
 0x107   :  { %v664_v47 = vpop.f32.mrf.mxu0 }
 0x108   :  { %v698_v48 = vpop.f32.mrf.mxu1  ;;  %v665_v51 = vadd.f32 %v664_v47, %v663_v45 }
 0x10a   :  { %v699_v52 = vpop.f32.mrf.mxu1  ;;  %v397_v54 = vadd.f32 %v665_v51, %v327_v53 }
 0x10b   :  { %v700_v55 = vadd.f32 %v699_v52, %v698_v48 }
 0x10d   :  { %v467_v58 = vadd.f32 %v700_v55, %v397_v54 }
 0x126   :  { %v733_v56 = vpop.f32.mrf.mxu0 }
 0x128   :  { %v734_v57 = vpop.f32.mrf.mxu0 }
 0x129   :  { %v735_v59 = vadd.f32 %v734_v57, %v733_v56 }
 0x12b   :  { %v537_v61 = vadd.f32 %v735_v59, %v467_v58 }
 0x12d   :  { %v553_v62 = vadd.f32 %v560_v60, %v537_v61 }
 0x12f   :  { %v554_v63 = vmax.f32 %v553_v62, 0.0 }
 0x131   :  { %555 = vst [vmem:[%s1275_s3] sm:$0xff] %v554_v63 }

// kernel: simple_nn_forward.5
= control target key start
LH: loop header
LB: loop body
LE: loop exit
PB: predicated region body
PF: predicated region fallthrough
CT: control target
= control target key end

     0   :  { %s13036_s0 = inlined_call_operand.vmem [shape: f32[8,12800], index: 0, kind: input, shape index: {}]   ;;  %s13037_s1 = inlined_call_operand.hbm [shape: bf16[12800,1280], index: 1, kind: input, shape index: {}]   ;;  %s13038_s2 = inlined_call_operand.hbm [shape: f32[1,1280], index: 2, kind: input, shape index: {}]   ;;  %s13039_s3 = inlined_call_operand.vmem [shape: f32[8,1280], index: 3, kind: output, shape index: {}]  }
   0x1   :  { %13042 = sst [smem:[#allocation10_spill]] %s13037_s1 }
   0x2   :  { %13043 = sst [smem:[#allocation11_spill]] %s13039_s3 }
   0x3   :  { %8 = vsyncpa [#allocation4], 0 }
   0x4   :  { %10 = vsyncpa [#allocation4 + $0x1], 0 }
   0x5   :  { %11 = vsyncpa [#allocation6], 0 }
   0x6   :  { %13 = vsyncpa [#allocation6 + $0x1], 0  ;;  %s11558_s12 = smov 0   ;;  %s11560_s13 = smov 0  }
   0x7   :  { %s11562_s14 = smov 0   ;;  %s11564_s15 = smov 0  }
   0x8   :  { %s11566_s16 = smov 0   ;;  %s11568_s17 = smov 0  }
   0x9   :  { %s11570_s18 = smov 0   ;;  %s11572_s19 = smov 0  }
   0xa   :  { %s11574_s20 = smov 0   ;;  %s11576_s21 = smov 0  }
   0xb   :  { %s11578_s22 = smov 0  }
   0xc LB: > { %s13040_s23 = sadd.s32 1, %s11519_s20  ;;  %p82_p1 = scmp.ne.s32.totalorder %s11507_s17, %s11503_s16  ;;  %s11527_s22 = sphi %s11578_s22, %s19_s22   ;;  %s11523_s21 = sphi %s11576_s21, %s13065_s21   ;;  %s11519_s20 = sphi %s11574_s20, %s13064_s20   ;;  %s11515_s19 = sphi %s11572_s19, %s13063_s19   ;;  %s11511_s18 = sphi %s11570_s18, %s13062_s18   ;;  %s11507_s17 = sphi %s11568_s17, %s13061_s17   ;;  %s11503_s16 = sphi %s11566_s16, %s13060_s16   ;;  %s11499_s15 = sphi %s11564_s15, %s13059_s15   ;;  %s11495_s14 = sphi %s11562_s14, %s13058_s14   ;;  %s11491_s13 = sphi %s11560_s13, %s13057_s13   ;;  %s11487_s12 = sphi %s11558_s12, %s13056_s12  }
   0xd   : > { %p11617_p0 = scmp.ge.s32.totalorder %s13040_s23, 4  ;;  %p83_p2 = scmp.eq.s32.totalorder %s11527_s22, 0 }
   0xe   : > { %p9880_p3 = scmp.lt.s32.totalorder %s11527_s22, 8  ;;  %s179_s26 = sand.u32 1, %s11507_s17  }
   0xf   : > { %p84_p4 = por %p83_p2, %p82_p1  ;;  %s9864_s27 = smul.u32 8000, %s179_s26 }
  0x10   : > { %s185_s29 = smul.u32 5, %s11523_s21  ;;  %s13046_s1 = sld [smem:[#allocation10_spill]] }
  0x11   : > { %p11630_p5 = pnand %p9880_p3, %p84_p4  ;;  %s9881_s30 = smul.u32 4000, %s11519_s20 }
  0x12   : > { %s183_s4 = scalar_lea.vmem [#allocation3], %s9864_s27  ;;  %p8563_p6 = scmp.ge.s32.totalorder %s11527_s22, 1 }
  0x13   : > { %s193_s5 = sshll.u32 %s183_s4, 4  ;;  %s190_s6 = sadd.s32 %s9881_s30, %s185_s29  ;;  %s194_s5 = int_to_ptr.vmem [resolvable:$true] %s193_s5 }
  0x14   : > { %s8561_s7 = sshll.u32 %s190_s6, 6  ;;  %s180_s11 = scalar_lea.sflag [#allocation4], %s179_s26 }
  0x15   : > { %p11379_p7 = pneg %p11630_p5  ;;  %s11390_s24 = scalar_lea.vmem %s194_s5, 128000 }
  0x16   : > { %s192_s10 = scalar_lea.hbm %s13046_s1, %s8561_s7  ;;  %p11391_p8 = scmp.ne.s32.totalorder %s194_s5, %s11390_s24 }
  0x17   : > { %s11529_s23 = smov [#allocation3]  }
  0x18   : > { %p11393_p9 = pnand %p11391_p8, %p11379_p7  ;;  %s11395_s3 = sshll.u32 %s11529_s23, 4  ;;  %s11396_s3 = int_to_ptr.vmem [resolvable:$false] %s11395_s3 }
  0x19   : > { %s11397_s27 = scalar_lea.vmem %s11396_s3, 256000  ;;  %p11398_p11 = scmp.lt.s32.totalorder %s194_s5, %s11396_s3 }
  0x1a   : > { %p11394_p10 = pneg %p11393_p9  ;;  %p11399_p12 = scmp.lt.s32.totalorder %s11397_s27, %s11390_s24 }
  0x1c   : > { %p11400_p13 = por %p11399_p12, %p11398_p11 }
  0x1e   : > { %p11401_p1 = pnand %p11400_p13, %p11394_p10 }
  0x20   : > { %11404 = shalt.err (!%p11401_p1)
}
  0x21   : > { %s11530_s29 = smov 640   ;;  %s11531_s3 = smov 320  }
  0x22   : > { %s11532_s23 = smov 20   ;;  %p220_p4 = scmp.lt.s32.totalorder %s11527_s22, 9 }
  0x23   : > { %9876 = dma.hbm_to_vmem [thread:$0]  (!%p11630_p5), %s192_s10, 128000, %s194_s5, %s180_s11, %s11530_s29, %s11531_s3, %s11532_s23  }
  0x24   : > { %p11647_p7 = pnand %p8563_p6, %p220_p4  ;;  %s8557_s26 = sadd.s32 4294967295, %s11527_s22  }
  0x25   : > { %s34_s30 = sadd.s32 1, %s11523_s21  ;;  %s13048_s4 = sadd.s32 1, %s11519_s20 }
  0x26   : > { %s13067_s4 = smov (%p11617_p0, %s13048_s4), 0  ;;  %s13069_s30 = smov (!%p11617_p0, %s34_s30), %s11523_s21 }
  0x27   : > { %s70_s28 = ssub.s32 %s11519_s20, %s13067_s4  ;;  %p88_p5 = scmp.ne.s32.totalorder %s11503_s16, %s11499_s15 }
  0x28   : > { %p36_p8 = scmp.ge.s32.totalorder %s13069_s30, 2  ;;  %p89_p6 = scmp.eq.s32.totalorder %s8557_s26, 0 }
  0x29   : > { %s101_s5 = sadd.s32 1, %s11495_s14  ;;  %p108_p9 = scmp.ne.s32.totalorder %s11495_s14, %s11491_s13 }
  0x2a   : > { %s13071_s30 = smov (%p36_p8, %s13069_s30), 0  ;;  %p11671_p10 = por %p89_p6, %p88_p5 }
  0x2b   : > { %13049 = sst [smem:[#allocation9_spill]] %s13071_s30  ;;  %p110_p0 = por %p108_p9, %p83_p2 }
  0x2c   : > { %s71_s25 = ssub.s32 %s11523_s21, %s13071_s30  ;;  %p114_p11 = scmp.ne.s32.totalorder %s11491_s13, %s11487_s12 }
  0x2d   : > { %s72_s7 = sor.u32 %s71_s25, %s70_s28  ;;  %p99_p12 = scmp.eq.s32.totalorder %s71_s25, 0 }
  0x2e   : > { %p73_p13 = scmp.eq.s32.totalorder %s72_s7, 0  ;;  %p11681_p1 = por %p114_p11, %p89_p6 }
  0x2f   : > { %s11686_s8 = scalar_select %p99_p12, %s11495_s14, %s101_s5  }
  0x30   : > { %s13052_s9 = sadd.s32 1, %s11507_s17  ;;  %s203_s11 = sand.u32 1, %s11495_s14  }
  0x31   : > { %s11691_s10 = scalar_select %p73_p13, %s11507_s17, %s13052_s9  }
  0x32   : > { %s9570_s27 = smul.u32 80, %s11523_s21  ;;  %p11697_p4 = pnand %p9880_p3, %p110_p0 }
  0x33   : > { %s9866_s29 = smul.u32 5, %s203_s11  ;;  %s204_s5 = scalar_lea.sflag [#allocation6], %s203_s11 }
  0x34   : > { %s213_s26 = scalar_lea.hbm %s13038_s2, %s9570_s27  ;;  %p11407_p2 = pneg %p11697_p4 }
  0x35   : > { %s207_s28 = scalar_lea.vmem [#allocation5], %s9866_s29  ;;  %s11533_s9 = smov [#allocation5]  }
  0x36   : > { %s215_s25 = sshll.u32 %s207_s28, 4  ;;  %s11423_s1 = sshll.u32 %s11533_s9, 4  ;;  %s216_s25 = int_to_ptr.vmem [resolvable:$true] %s215_s25  ;;  %s11424_s1 = int_to_ptr.vmem [resolvable:$false] %s11423_s1 }
  0x37   : > { %s11418_s7 = scalar_lea.vmem %s216_s25, 80  ;;  %s11425_s30 = scalar_lea.vmem %s11424_s1, 160 }
  0x38   : > { %p11419_p5 = scmp.ne.s32.totalorder %s216_s25, %s11418_s7  ;;  %p11426_p3 = scmp.lt.s32.totalorder %s216_s25, %s11424_s1 }
  0x39   : > { %p11427_p9 = scmp.lt.s32.totalorder %s11425_s30, %s11418_s7 }
  0x3a   : > { %p11421_p8 = pnand %p11419_p5, %p11407_p2 }
  0x3b   : > { %p11428_p0 = por %p11427_p9, %p11426_p3 }
  0x3c   : > { %p11422_p6 = pneg %p11421_p8 }
  0x3e   : > { %p11429_p11 = pnand %p11428_p0, %p11422_p6 }
  0x40   : > { %11432 = shalt.err (!%p11429_p11)
}
  0x41   : > { %9879 = dma.hbm_to_vmem [thread:$0]  (!%p11697_p4), %s213_s26, 80, %s216_s25, %s204_s5  }
  0x42   : > { %224 = sbr.rel (%p11647_p7) target bundleno = 1328 (0x530), region = 32  ;;  %s226_s11 = sand.u32 (!%p11647_p7), 1, %s11503_s16  }
  0x43   : > { %s9867_s27 = smul.u32 (!%p11647_p7), 8000, %s226_s11  ;;  %s227_s29 = scalar_lea.sflag (!%p11647_p7), [#allocation4], %s226_s11 }
  0x45   : > { %s11711_s12 = scalar_lea.vmem (!%p11647_p7), [#allocation3], %s9867_s27 }
  0x47   : > { %11478 = dma.done.wait (%p11671_p10), %s227_s29, 128000  }
  0x48   : > { %11480 = vsyncadd (%p11671_p10), %s227_s29, 4294839296  ;;  %s235_s1 = sand.u32 1, %s11491_s13  }
  0x49   : > { %s11718_s30 = smul.u32 5, %s235_s1  ;;  %s236_s24 = scalar_lea.sflag [#allocation6], %s235_s1 }
  0x4b   : > { %s239_s3 = scalar_lea.vmem [#allocation5], %s11718_s30 }
  0x4c   : > { %11482 = dma.done.wait (%p11681_p1), %s236_s24, 80  }
  0x4d   : > { %11484 = vsyncadd (%p11681_p1), %s236_s24, 4294967216  ;;  %s280_s23 = smul.u32 25, %s11511_s18  ;;  %s13054_s27 = sld [smem:[#allocation11_spill]] }
  0x4e   : > { %s293_s26 = smul.u32 5, %s11515_s19  ;;  %p8566_p10 = scmp.ne.s32.totalorder %s11511_s18, 0 }
  0x4f   : > { %p283_p7 = scmp.lt.s32.totalorder %s280_s23, 99 }
  0x50   : > { %p296_p12 = scmp.lt.s32.totalorder %s293_s26, 9  ;;  %307 = sbr.rel (%p8566_p10) target bundleno = 89 (0x59), region = 44 }
  0x51   : > { %s13073_s23 = smov (!%p283_p7, %s280_s23), 99 }
  0x52   : > { %s13075_s26 = smov (!%p296_p12, %s293_s26), 9  ;;  %s8564_s6 = sshll.u32 %s13073_s23, 3 }
  0x53   : > { %s11730_s5 = scalar_lea.vmem %s13036_s0, %s8564_s6  ;;  %s8565_s7 = sshll.u32 %s13075_s26, 3 }
  0x54   : > { %s11735_s15 = scalar_lea.vmem %s13054_s27, %s8565_s7 }
  0x55   : > { %v11534_v0 = vmov 0.0  }
  0x56   : > { %308 = vst [vmem:[#allocation2 + $0x8] sm:$0xff] %v11534_v0  ;;  %309 = vst [vmem:[#allocation2] sm:$0xff] %v11534_v0 }
  0x57   : > { %310 = vst [vmem:[#allocation2 + $0x20] sm:$0xff] %v11534_v0  ;;  %311 = vst [vmem:[#allocation2 + $0x10] sm:$0xff] %v11534_v0 }
  0x58   : > { %312 = vst [vmem:[#allocation2 + $0x18] sm:$0xff] %v11534_v0 }
  0x59 PF: > { %v9977_v1 = vld [vmem:[%s11711_s12 + $0x11c] ss:$20 sps:$4 sm:$0xff]   ;;  %v9981_v3 = vld [vmem:[%s11711_s12 + $0x118] ss:$20 sps:$4 sm:$0xff]   ;;  %v9983_v5 = vld [vmem:[%s11711_s12 + $0xf4] ss:$20 sps:$4 sm:$0xff]  }
  0x5a   : > { %v9979_v2 = vld [vmem:[%s11711_s12 + $0x39c] ss:$20 sps:$4 sm:$0xff]   ;;  %6768 = vmatprep.subr.bf16.mxu0 %v9977_v1  ;;  %v9982_v4 = vld [vmem:[%s11711_s12 + $0x398] ss:$20 sps:$4 sm:$0xff]   ;;  %v9985_v6 = vld [vmem:[%s11711_s12 + $0x374] ss:$20 sps:$4 sm:$0xff]  }
  0x5b   : > { %6809 = vmatprep.subr.bf16.mxu1 %v9979_v2  ;;  %6769 = vmatpush1.bf16.msra.mxu0 %v9981_v3  ;;  %v9987_v7 = vld [vmem:[%s11711_s12 + $0xf0] ss:$20 sps:$4 sm:$0xff]   ;;  %v9989_v9 = vld [vmem:[%s11711_s12 + $0xcc] ss:$20 sps:$4 sm:$0xff]   ;;  %v9993_v11 = vld [vmem:[%s11711_s12 + $0xc8] ss:$20 sps:$4 sm:$0xff]  }
  0x5c   : > { %6810 = vmatpush1.bf16.msra.mxu1 %v9982_v4  ;;  %6770 = vmatprep.subr.bf16.mxu0 %v9983_v5  ;;  %v9988_v8 = vld [vmem:[%s11711_s12 + $0x370] ss:$20 sps:$4 sm:$0xff]   ;;  %v9991_v10 = vld [vmem:[%s11711_s12 + $0x34c] ss:$20 sps:$4 sm:$0xff]   ;;  %v9994_v12 = vld [vmem:[%s11711_s12 + $0x348] ss:$20 sps:$4 sm:$0xff]  }
  0x5d   : > { %6811 = vmatprep.subr.bf16.mxu1 %v9985_v6  ;;  %v9995_v13 = vld [vmem:[%s11711_s12 + $0xa4] ss:$20 sps:$4 sm:$0xff]   ;;  %v9999_v15 = vld [vmem:[%s11711_s12 + $0xa0] ss:$20 sps:$4 sm:$0xff]   ;;  %v10001_v17 = vld [vmem:[%s11711_s12 + $0x7c] ss:$20 sps:$4 sm:$0xff]  }
  0x5e   : > { %v9997_v14 = vld [vmem:[%s11711_s12 + $0x324] ss:$20 sps:$4 sm:$0xff]   ;;  %v10000_v16 = vld [vmem:[%s11711_s12 + $0x320] ss:$20 sps:$4 sm:$0xff]   ;;  %v10003_v18 = vld [vmem:[%s11711_s12 + $0x2fc] ss:$20 sps:$4 sm:$0xff]  }
  0x5f   : > { %6771 = vmatpush1.bf16.msra.mxu0 %v9987_v7  ;;  %v10005_v19 = vld [vmem:[%s11711_s12 + $0x78] ss:$20 sps:$4 sm:$0xff]   ;;  %v10007_v21 = vld [vmem:[%s11711_s12 + $0x54] ss:$20 sps:$4 sm:$0xff]   ;;  %v10011_v23 = vld [vmem:[%s11711_s12 + $0x50] ss:$20 sps:$4 sm:$0xff]  }
  0x60   : > { %6812 = vmatpush1.bf16.msra.mxu1 %v9988_v8  ;;  %6772 = vmatprep.subr.bf16.mxu0 %v9989_v9  ;;  %v10006_v20 = vld [vmem:[%s11711_s12 + $0x2f8] ss:$20 sps:$4 sm:$0xff]   ;;  %v10009_v22 = vld [vmem:[%s11711_s12 + $0x2d4] ss:$20 sps:$4 sm:$0xff]   ;;  %v10012_v24 = vld [vmem:[%s11711_s12 + $0x2d0] ss:$20 sps:$4 sm:$0xff]  }
  0x61   : > { %6813 = vmatprep.subr.bf16.mxu1 %v9991_v10  ;;  %v10013_v25 = vld [vmem:[%s11711_s12 + $0x2c] ss:$20 sps:$4 sm:$0xff]   ;;  %v10017_v27 = vld [vmem:[%s11711_s12 + $0x28] ss:$20 sps:$4 sm:$0xff]   ;;  %v10019_v29 = vld [vmem:[%s11711_s12 + $0x4] ss:$20 sps:$4 sm:$0xff]  }
  0x62   : > { %v10015_v26 = vld [vmem:[%s11711_s12 + $0x2ac] ss:$20 sps:$4 sm:$0xff]   ;;  %v10018_v28 = vld [vmem:[%s11711_s12 + $0x2a8] ss:$20 sps:$4 sm:$0xff]   ;;  %v10021_v30 = vld [vmem:[%s11711_s12 + $0x284] ss:$20 sps:$4 sm:$0xff]  }
  0x63   : > { %6773 = vmatpush1.bf16.msra.mxu0 %v9993_v11  ;;  %v10023_v31 = vld [vmem:[%s11711_s12] ss:$20 sps:$4 sm:$0xff]   ;;  %v10025_v33 = vld [vmem:[%s11711_s12 + $0x25c] ss:$20 sps:$4 sm:$0xff]   ;;  %v10029_v35 = vld [vmem:[%s11711_s12 + $0x258] ss:$20 sps:$4 sm:$0xff]  }
  0x64   : > { %6814 = vmatpush1.bf16.msra.mxu1 %v9994_v12  ;;  %6774 = vmatprep.subr.bf16.mxu0 %v9995_v13  ;;  %v10024_v32 = vld [vmem:[%s11711_s12 + $0x280] ss:$20 sps:$4 sm:$0xff]   ;;  %v10027_v34 = vld [vmem:[%s11711_s12 + $0x4dc] ss:$20 sps:$4 sm:$0xff]   ;;  %v10030_v36 = vld [vmem:[%s11711_s12 + $0x4d8] ss:$20 sps:$4 sm:$0xff]  }
  0x65   : > { %6815 = vmatprep.subr.bf16.mxu1 %v9997_v14  ;;  %v10031_v37 = vld [vmem:[%s11711_s12 + $0x234] ss:$20 sps:$4 sm:$0xff]   ;;  %v10035_v39 = vld [vmem:[%s11711_s12 + $0x230] ss:$20 sps:$4 sm:$0xff]   ;;  %v10037_v41 = vld [vmem:[%s11711_s12 + $0x20c] ss:$20 sps:$4 sm:$0xff]  }
  0x66   : > { %v10033_v38 = vld [vmem:[%s11711_s12 + $0x4b4] ss:$20 sps:$4 sm:$0xff]   ;;  %v10036_v40 = vld [vmem:[%s11711_s12 + $0x4b0] ss:$20 sps:$4 sm:$0xff]   ;;  %v10039_v42 = vld [vmem:[%s11711_s12 + $0x48c] ss:$20 sps:$4 sm:$0xff]  }
  0x67   : > { %6775 = vmatpush1.bf16.msra.mxu0 %v9999_v15  ;;  %v10041_v43 = vld [vmem:[%s11711_s12 + $0x208] ss:$20 sps:$4 sm:$0xff]   ;;  %v10043_v45 = vld [vmem:[%s11711_s12 + $0x1e4] ss:$20 sps:$4 sm:$0xff]   ;;  %v10047_v48 = vld [vmem:[%s11711_s12 + $0x1e0] ss:$20 sps:$4 sm:$0xff]  }
  0x68   : > { %6816 = vmatpush1.bf16.msra.mxu1 %v10000_v16  ;;  %6776 = vmatprep.subr.bf16.mxu0 %v10001_v17  ;;  %v10042_v44 = vld [vmem:[%s11711_s12 + $0x488] ss:$20 sps:$4 sm:$0xff]   ;;  %v10045_v46 = vld [vmem:[%s11711_s12 + $0x464] ss:$20 sps:$4 sm:$0xff]   ;;  %v10048_v49 = vld [vmem:[%s11711_s12 + $0x460] ss:$20 sps:$4 sm:$0xff]  }
  0x69   : > { %6817 = vmatprep.subr.bf16.mxu1 %v10003_v18  ;;  %v319_v47 = vld [vmem:[%s11730_s5 + $0x8] sm:$0xff]  ;;  %v321_v51 = vld [vmem:[%s11730_s5 + $0x18] sm:$0xff]  ;;  %v10053_v55 = vld [vmem:[%s11711_s12 + $0x1b8] ss:$20 sps:$4 sm:$0xff]   ;;  %vm11537_vm0 = vmmov 0   ;;  %p9567_p13 = scmp.ne.s32.totalorder %s11511_s18, 3 }
  0x6a   : > { %v11787_v50 = vpack.c.bf16 %v319_v47, %v319_v47  ;;  %v10049_v52 = vld [vmem:[%s11711_s12 + $0x1bc] ss:$20 sps:$4 sm:$0xff]   ;;  %v11791_v53 = vpack.c.bf16 %v321_v51, %v321_v51  ;;  %v10054_v56 = vld [vmem:[%s11711_s12 + $0x438] ss:$20 sps:$4 sm:$0xff]   ;;  %v10055_v57 = vld [vmem:[%s11711_s12 + $0x194] ss:$20 sps:$4 sm:$0xff]  }
  0x6b   : > { %6777 = vmatpush1.bf16.msra.mxu0 %v10005_v19  ;;  %v10051_v54 = vld [vmem:[%s11711_s12 + $0x43c] ss:$20 sps:$4 sm:$0xff]   ;;  %v10057_v58 = vld [vmem:[%s11711_s12 + $0x414] ss:$20 sps:$4 sm:$0xff]   ;;  %v10061_v61 = vld [vmem:[%s11711_s12 + $0x16c] ss:$20 sps:$4 sm:$0xff]  }
  0x6c   : > { %6818 = vmatpush1.bf16.msra.mxu1 %v10006_v20  ;;  %6778 = vmatprep.subr.bf16.mxu0 %v10007_v21  ;;  %v10059_v59 = vld [vmem:[%s11711_s12 + $0x190] ss:$20 sps:$4 sm:$0xff]   ;;  %v10063_v62 = vld [vmem:[%s11711_s12 + $0x3ec] ss:$20 sps:$4 sm:$0xff]   ;;  %v10065_v63 = vld [vmem:[%s11711_s12 + $0x168] ss:$20 sps:$4 sm:$0xff]  }
  0x6d   : > { %6819 = vmatprep.subr.bf16.mxu1 %v10009_v22  ;;  %6800 = vmatprep.mubr.bf16.mxu0 %v11787_v50  ;;  %v10060_v60 = vld [vmem:[%s11711_s12 + $0x410] ss:$20 sps:$4 sm:$0xff]   ;;  %v10066_v0 = vld [vmem:[%s11711_s12 + $0x3e8] ss:$20 sps:$4 sm:$0xff]   ;;  %v10071_v3 = vld [vmem:[%s11711_s12 + $0x140] ss:$20 sps:$4 sm:$0xff]  }
  0x6e   : > { %6841 = vmatprep.mubr.bf16.mxu1 %v11791_v53  ;;  %v10067_v1 = vld [vmem:[%s11711_s12 + $0x144] ss:$20 sps:$4 sm:$0xff]   ;;  %v10072_v4 = vld [vmem:[%s11711_s12 + $0x3c0] ss:$20 sps:$4 sm:$0xff]   ;;  %v320_v6 = vld [vmem:[%s11730_s5 + $0x10] sm:$0xff] }
  0x6f   : > { %6779 = vmatpush1.bf16.msra.mxu0 %v10011_v23  ;;  %v10069_v2 = vld [vmem:[%s11711_s12 + $0x3c4] ss:$20 sps:$4 sm:$0xff]   ;;  %v10075_v7 = vld [vmem:[%s11711_s12 + $0x61c] ss:$20 sps:$4 sm:$0xff]   ;;  %v11816_v10 = vpack.c.bf16 %v320_v6, %v320_v6  ;;  %v10081_v13 = vld [vmem:[%s11711_s12 + $0x5f4] ss:$20 sps:$4 sm:$0xff]  }
  0x70   : > { %6820 = vmatpush1.bf16.msra.mxu1 %v10012_v24  ;;  %6780 = vmatprep.subr.bf16.mxu0 %v10013_v25  ;;  %v318_v5 = vld [vmem:[%s11730_s5] sm:$0xff]  ;;  %v10084_v14 = vld [vmem:[%s11711_s12 + $0x874] ss:$20 sps:$4 sm:$0xff]   ;;  %v10079_v15 = vld [vmem:[%s11711_s12 + $0x5f0] ss:$20 sps:$4 sm:$0xff]  }
  0x71   : > { %6821 = vmatprep.subr.bf16.mxu1 %v10015_v26  ;;  %v10078_v8 = vld [vmem:[%s11711_s12 + $0x89c] ss:$20 sps:$4 sm:$0xff]   ;;  %v11814_v9 = vpack.c.bf16 %v318_v5, %v318_v5  ;;  %v10073_v11 = vld [vmem:[%s11711_s12 + $0x618] ss:$20 sps:$4 sm:$0xff]   ;;  %v10091_v23 = vld [vmem:[%s11711_s12 + $0x5a0] ss:$20 sps:$4 sm:$0xff]  }
  0x72   : > { %v10076_v12 = vld [vmem:[%s11711_s12 + $0x898] ss:$20 sps:$4 sm:$0xff]   ;;  %v10082_v16 = vld [vmem:[%s11711_s12 + $0x870] ss:$20 sps:$4 sm:$0xff]   ;;  %v10085_v19 = vld [vmem:[%s11711_s12 + $0x5c8] ss:$20 sps:$4 sm:$0xff]  }
  0x73   : > { %6781 = vmatpush1.bf16.msra.mxu0 %v10017_v27  ;;  %v10087_v17 = vld [vmem:[%s11711_s12 + $0x5cc] ss:$20 sps:$4 sm:$0xff]   ;;  %v10088_v20 = vld [vmem:[%s11711_s12 + $0x848] ss:$20 sps:$4 sm:$0xff]   ;;  %v10093_v21 = vld [vmem:[%s11711_s12 + $0x5a4] ss:$20 sps:$4 sm:$0xff]  }
  0x74   : > { %6822 = vmatpush1.bf16.msra.mxu1 %v10018_v28  ;;  %6782 = vmatprep.subr.bf16.mxu0 %v10019_v29  ;;  %v10090_v18 = vld [vmem:[%s11711_s12 + $0x84c] ss:$20 sps:$4 sm:$0xff]   ;;  %v10096_v22 = vld [vmem:[%s11711_s12 + $0x824] ss:$20 sps:$4 sm:$0xff]   ;;  %v10099_v25 = vld [vmem:[%s11711_s12 + $0x57c] ss:$20 sps:$4 sm:$0xff]  }
  0x75   : > { %6823 = vmatprep.subr.bf16.mxu1 %v10021_v30  ;;  %v10094_v24 = vld [vmem:[%s11711_s12 + $0x820] ss:$20 sps:$4 sm:$0xff]   ;;  %v10102_v26 = vld [vmem:[%s11711_s12 + $0x7fc] ss:$20 sps:$4 sm:$0xff]   ;;  %v10097_v27 = vld [vmem:[%s11711_s12 + $0x578] ss:$20 sps:$4 sm:$0xff]  }
  0x76   : > { %v10100_v28 = vld [vmem:[%s11711_s12 + $0x7f8] ss:$20 sps:$4 sm:$0xff]   ;;  %v10105_v29 = vld [vmem:[%s11711_s12 + $0x554] ss:$20 sps:$4 sm:$0xff]   ;;  %v10151_v5 = vld [vmem:[%s11711_s12 + $0x690] ss:$20 sps:$4 sm:$0xff]  }
  0x77   : > { %6783 = vmatpush1.bf16.msra.mxu0 %v10023_v31  ;;  %v10108_v30 = vld [vmem:[%s11711_s12 + $0x7d4] ss:$20 sps:$4 sm:$0xff]   ;;  %v10103_v31 = vld [vmem:[%s11711_s12 + $0x550] ss:$20 sps:$4 sm:$0xff]   ;;  %v10121_v47 = vld [vmem:[%s11711_s12 + $0x758] ss:$20 sps:$4 sm:$0xff]  }
  0x78   : > { %6824 = vmatpush1.bf16.msra.mxu1 %v10024_v32  ;;  %6784 = vmatprep.subr.bf16.mxu0 %v10025_v33  ;;  %v10106_v32 = vld [vmem:[%s11711_s12 + $0x7d0] ss:$20 sps:$4 sm:$0xff]   ;;  %v10111_v33 = vld [vmem:[%s11711_s12 + $0x52c] ss:$20 sps:$4 sm:$0xff]   ;;  %v10132_v51 = vld [vmem:[%s11711_s12 + $0x9b4] ss:$20 sps:$4 sm:$0xff]  }
  0x79   : > { %6825 = vmatprep.subr.bf16.mxu1 %v10027_v34  ;;  %v10114_v34 = vld [vmem:[%s11711_s12 + $0x7ac] ss:$20 sps:$4 sm:$0xff]   ;;  %v10154_v6 = vld [vmem:[%s11711_s12 + $0x910] ss:$20 sps:$4 sm:$0xff]  }
  0x7b   : > { %6785 = vmatpush2.bf16.msra.mxu0 %v10029_v35  ;;  %v323_v35 = vld [vmem:[%s11730_s5 + $0x28] sm:$0xff] }
  0x7c   : > { %6826 = vmatpush2.bf16.msra.mxu1 %v10030_v36  ;;  %6786 = vmatprep.subr.bf16.mxu0 %v10031_v37  ;;  %v10109_v36 = vld [vmem:[%s11711_s12 + $0x528] ss:$20 sps:$4 sm:$0xff]   ;;  %v11846_v37 = vpack.c.bf16 %v323_v35, %v323_v35 }
  0x7d   : > { %6827 = vmatprep.subr.bf16.mxu1 %v10033_v38  ;;  %v325_v38 = vld [vmem:[%s11730_s5 + $0x38] sm:$0xff]  ;;  %v10181_v35 = vld [vmem:[%s11711_s12 + $0xac8] ss:$20 sps:$4 sm:$0xff]  }
  0x7f   : > { %6787 = vmatpush2.bf16.msra.mxu0 %v10035_v39  ;;  %v10112_v39 = vld [vmem:[%s11711_s12 + $0x7a8] ss:$20 sps:$4 sm:$0xff]  }
  0x80   : > { %6828 = vmatpush2.bf16.msra.mxu1 %v10036_v40  ;;  %6788 = vmatprep.subr.bf16.mxu0 %v10037_v41  ;;  %v10117_v40 = vld [vmem:[%s11711_s12 + $0x504] ss:$20 sps:$4 sm:$0xff]   ;;  %v11851_v41 = vpack.c.bf16 %v325_v38, %v325_v38 }
  0x81   : > { %6829 = vmatprep.subr.bf16.mxu1 %v10039_v42  ;;  %v10120_v42 = vld [vmem:[%s11711_s12 + $0x784] ss:$20 sps:$4 sm:$0xff]  }
  0x82   : > { %v10189_v38 = vld [vmem:[%s11711_s12 + $0xaa4] ss:$20 sps:$4 sm:$0xff]  }
  0x83   : > { %6789 = vmatpush2.bf16.msra.mxu0 %v10041_v43  ;;  %v10115_v43 = vld [vmem:[%s11711_s12 + $0x500] ss:$20 sps:$4 sm:$0xff]  }
  0x84   : > { %6830 = vmatpush2.bf16.msra.mxu1 %v10042_v44  ;;  %6790 = vmatprep.subr.bf16.mxu0 %v10043_v45  ;;  %v10118_v44 = vld [vmem:[%s11711_s12 + $0x780] ss:$20 sps:$4 sm:$0xff]   ;;  %v10123_v45 = vld [vmem:[%s11711_s12 + $0x75c] ss:$20 sps:$4 sm:$0xff]  }
  0x85   : > { %6831 = vmatprep.subr.bf16.mxu1 %v10045_v46  ;;  %v10126_v46 = vld [vmem:[%s11711_s12 + $0x9dc] ss:$20 sps:$4 sm:$0xff]  }
  0x87   : > { %6791 = vmatpush2.bf16.msra.mxu0 %v10047_v48  ;;  %v10124_v48 = vld [vmem:[%s11711_s12 + $0x9d8] ss:$20 sps:$4 sm:$0xff]  }
  0x88   : > { %6832 = vmatpush2.bf16.msra.mxu1 %v10048_v49  ;;  %6792 = vmatprep.subr.bf16.mxu0 %v10049_v52  ;;  %v10129_v49 = vld [vmem:[%s11711_s12 + $0x734] ss:$20 sps:$4 sm:$0xff]   ;;  %v10127_v52 = vld [vmem:[%s11711_s12 + $0x730] ss:$20 sps:$4 sm:$0xff]  }
  0x89   : > { %6833 = vmatprep.subr.bf16.mxu1 %v10051_v54  ;;  %v10130_v54 = vld [vmem:[%s11711_s12 + $0x9b0] ss:$20 sps:$4 sm:$0xff]  }
  0x8b   : > { %6793 = vmatpush2.bf16.msra.mxu0 %v10053_v55  ;;  %v10135_v55 = vld [vmem:[%s11711_s12 + $0x70c] ss:$20 sps:$4 sm:$0xff]  }
  0x8c   : > { %6834 = vmatpush2.bf16.msra.mxu1 %v10054_v56  ;;  %6794 = vmatprep.subr.bf16.mxu0 %v10055_v57  ;;  %v10138_v56 = vld [vmem:[%s11711_s12 + $0x98c] ss:$20 sps:$4 sm:$0xff]   ;;  %v10133_v57 = vld [vmem:[%s11711_s12 + $0x708] ss:$20 sps:$4 sm:$0xff]  }
  0x8d   : > { %6835 = vmatprep.subr.bf16.mxu1 %v10057_v58  ;;  %v10136_v58 = vld [vmem:[%s11711_s12 + $0x988] ss:$20 sps:$4 sm:$0xff]  }
  0x8f   : > { %6795 = vmatpush2.bf16.msra.mxu0 %v10059_v59  ;;  %v10141_v59 = vld [vmem:[%s11711_s12 + $0x6e4] ss:$20 sps:$4 sm:$0xff]  }
  0x90   : > { %6836 = vmatpush2.bf16.msra.mxu1 %v10060_v60  ;;  %6796 = vmatprep.subr.bf16.mxu0 %v10061_v61  ;;  %v10144_v60 = vld [vmem:[%s11711_s12 + $0x964] ss:$20 sps:$4 sm:$0xff]   ;;  %v10139_v61 = vld [vmem:[%s11711_s12 + $0x6e0] ss:$20 sps:$4 sm:$0xff]  }
  0x91   : > { %6837 = vmatprep.subr.bf16.mxu1 %v10063_v62  ;;  %v10142_v62 = vld [vmem:[%s11711_s12 + $0x960] ss:$20 sps:$4 sm:$0xff]  }
  0x93   : > { %6797 = vmatpush2.bf16.msra.mxu0 %v10065_v63  ;;  %v10147_v63 = vld [vmem:[%s11711_s12 + $0x6bc] ss:$20 sps:$4 sm:$0xff]  }
  0x94   : > { %6838 = vmatpush2.bf16.msra.mxu1 %v10066_v0  ;;  %6798 = vmatprep.subr.bf16.mxu0 %v10067_v1  ;;  %v10150_v0 = vld [vmem:[%s11711_s12 + $0x93c] ss:$20 sps:$4 sm:$0xff]   ;;  %v10145_v1 = vld [vmem:[%s11711_s12 + $0x6b8] ss:$20 sps:$4 sm:$0xff]  }
  0x95   : > { %6839 = vmatprep.subr.bf16.mxu1 %v10069_v2  ;;  %v10148_v2 = vld [vmem:[%s11711_s12 + $0x938] ss:$20 sps:$4 sm:$0xff]  }
  0x97   : > { %6799 = vmatpush2.bf16.msra.mxu0 %v10071_v3  ;;  %v10153_v3 = vld [vmem:[%s11711_s12 + $0x694] ss:$20 sps:$4 sm:$0xff]  }
  0x98   : > { %6840 = vmatpush2.bf16.msra.mxu1 %v10072_v4  ;;  %6850 = vmatprep.subr.bf16.mxu0 %v10075_v7  ;;  %v10156_v4 = vld [vmem:[%s11711_s12 + $0x914] ss:$20 sps:$4 sm:$0xff]   ;;  %v10159_v7 = vld [vmem:[%s11711_s12 + $0x66c] ss:$20 sps:$4 sm:$0xff]  }
  0x99   : > { %6891 = vmatprep.subr.bf16.mxu1 %v10078_v8  ;;  %v10162_v8 = vld [vmem:[%s11711_s12 + $0x8ec] ss:$20 sps:$4 sm:$0xff]  }
  0x9a   : > { %6801 = vmatmul.mubr.bf16.vlgmr.msra.gmra.mxu0 %v11814_v9 }
  0x9b   : > { %6842 = vmatmul.mubr.bf16.vlgmr.msra.gmra.mxu1 %v11816_v10  ;;  %6851 = vmatpush1.bf16.msra.mxu0 %v10073_v11  ;;  %v10157_v11 = vld [vmem:[%s11711_s12 + $0x668] ss:$20 sps:$4 sm:$0xff]  }
  0x9c   : > { %6892 = vmatpush1.bf16.msra.mxu1 %v10076_v12  ;;  %6852 = vmatprep.subr.bf16.mxu0 %v10081_v13  ;;  %v10160_v12 = vld [vmem:[%s11711_s12 + $0x8e8] ss:$20 sps:$4 sm:$0xff]   ;;  %v10165_v13 = vld [vmem:[%s11711_s12 + $0x644] ss:$20 sps:$4 sm:$0xff]  }
  0x9d   : > { %6893 = vmatprep.subr.bf16.mxu1 %v10084_v14  ;;  %6882 = vmatprep.mubr.bf16.mxu0 %v11846_v37  ;;  %v10168_v14 = vld [vmem:[%s11711_s12 + $0x8c4] ss:$20 sps:$4 sm:$0xff]  }
  0x9e   : > { %6923 = vmatprep.mubr.bf16.mxu1 %v11851_v41 }
  0x9f   : > { %6853 = vmatpush1.bf16.msra.mxu0 %v10079_v15  ;;  %v10163_v15 = vld [vmem:[%s11711_s12 + $0x640] ss:$20 sps:$4 sm:$0xff]  }
  0xa0   : > { %6894 = vmatpush1.bf16.msra.mxu1 %v10082_v16  ;;  %6854 = vmatprep.subr.bf16.mxu0 %v10087_v17  ;;  %v10166_v16 = vld [vmem:[%s11711_s12 + $0x8c0] ss:$20 sps:$4 sm:$0xff]   ;;  %v322_v17 = vld [vmem:[%s11730_s5 + $0x20] sm:$0xff] }
  0xa1   : > { %6895 = vmatprep.subr.bf16.mxu1 %v10090_v18  ;;  %v10171_v18 = vld [vmem:[%s11711_s12 + $0xb1c] ss:$20 sps:$4 sm:$0xff]  }
  0xa3   : > { %6855 = vmatpush1.bf16.msra.mxu0 %v10085_v19  ;;  %v324_v19 = vld [vmem:[%s11730_s5 + $0x30] sm:$0xff] }
  0xa4   : > { %6896 = vmatpush1.bf16.msra.mxu1 %v10088_v20  ;;  %6856 = vmatprep.subr.bf16.mxu0 %v10093_v21  ;;  %v10174_v20 = vld [vmem:[%s11711_s12 + $0xd9c] ss:$20 sps:$4 sm:$0xff]   ;;  %v11894_v21 = vpack.c.bf16 %v322_v17, %v322_v17  ;;  %v10241_v17 = vld [vmem:[%s11711_s12 + $0xbb8] ss:$20 sps:$4 sm:$0xff]  }
  0xa5   : > { %6897 = vmatprep.subr.bf16.mxu1 %v10096_v22  ;;  %v10169_v22 = vld [vmem:[%s11711_s12 + $0xb18] ss:$20 sps:$4 sm:$0xff]  }
  0xa7   : > { %6857 = vmatpush1.bf16.msra.mxu0 %v10091_v23  ;;  %v10172_v23 = vld [vmem:[%s11711_s12 + $0xd98] ss:$20 sps:$4 sm:$0xff]  }
  0xa8   : > { %6898 = vmatpush1.bf16.msra.mxu1 %v10094_v24  ;;  %6858 = vmatprep.subr.bf16.mxu0 %v10099_v25  ;;  %v11898_v24 = vpack.c.bf16 %v324_v19, %v324_v19  ;;  %v10177_v25 = vld [vmem:[%s11711_s12 + $0xaf4] ss:$20 sps:$4 sm:$0xff]  }
  0xa9   : > { %6899 = vmatprep.subr.bf16.mxu1 %v10102_v26  ;;  %v10180_v26 = vld [vmem:[%s11711_s12 + $0xd74] ss:$20 sps:$4 sm:$0xff]  }
  0xaa   : > { %v10249_v19 = vld [vmem:[%s11711_s12 + $0xb94] ss:$20 sps:$4 sm:$0xff]  }
  0xab   : > { %6859 = vmatpush1.bf16.msra.mxu0 %v10097_v27  ;;  %v327_v27 = vld [vmem:[%s11730_s5 + $0x48] sm:$0xff] }
  0xac   : > { %6900 = vmatpush1.bf16.msra.mxu1 %v10100_v28  ;;  %6860 = vmatprep.subr.bf16.mxu0 %v10105_v29  ;;  %v10175_v28 = vld [vmem:[%s11711_s12 + $0xaf0] ss:$20 sps:$4 sm:$0xff]   ;;  %v11906_v29 = vpack.c.bf16 %v327_v27, %v327_v27  ;;  %v10253_v27 = vld [vmem:[%s11711_s12 + $0xb68] ss:$20 sps:$4 sm:$0xff]  }
  0xad   : > { %6901 = vmatprep.subr.bf16.mxu1 %v10108_v30  ;;  %v329_v30 = vld [vmem:[%s11730_s5 + $0x58] sm:$0xff] }
  0xaf   : > { %6861 = vmatpush1.bf16.msra.mxu0 %v10103_v31  ;;  %v10178_v31 = vld [vmem:[%s11711_s12 + $0xd70] ss:$20 sps:$4 sm:$0xff]  }
  0xb0   : > { %6902 = vmatpush1.bf16.msra.mxu1 %v10106_v32  ;;  %6862 = vmatprep.subr.bf16.mxu0 %v10111_v33  ;;  %v10183_v32 = vld [vmem:[%s11711_s12 + $0xacc] ss:$20 sps:$4 sm:$0xff]   ;;  %v11911_v33 = vpack.c.bf16 %v329_v30, %v329_v30  ;;  %v10261_v30 = vld [vmem:[%s11711_s12 + $0xb44] ss:$20 sps:$4 sm:$0xff]  }
  0xb1   : > { %6903 = vmatprep.subr.bf16.mxu1 %v10114_v34  ;;  %v10186_v34 = vld [vmem:[%s11711_s12 + $0xd4c] ss:$20 sps:$4 sm:$0xff]  }
  0xb3   : > { %6863 = vmatpush1.bf16.msra.mxu0 %v10109_v36  ;;  %v10184_v36 = vld [vmem:[%s11711_s12 + $0xd48] ss:$20 sps:$4 sm:$0xff]  }
  0xb4   : > { %6904 = vmatpush1.bf16.msra.mxu1 %v10112_v39  ;;  %6864 = vmatprep.subr.bf16.mxu0 %v10117_v40  ;;  %v10192_v39 = vld [vmem:[%s11711_s12 + $0xd24] ss:$20 sps:$4 sm:$0xff]   ;;  %v10187_v40 = vld [vmem:[%s11711_s12 + $0xaa0] ss:$20 sps:$4 sm:$0xff]  }
  0xb5   : > { %6905 = vmatprep.subr.bf16.mxu1 %v10120_v42  ;;  %v10190_v42 = vld [vmem:[%s11711_s12 + $0xd20] ss:$20 sps:$4 sm:$0xff]  }
  0xb7   : > { %6865 = vmatpush1.bf16.msra.mxu0 %v10115_v43  ;;  %v10195_v43 = vld [vmem:[%s11711_s12 + $0xa7c] ss:$20 sps:$4 sm:$0xff]  }
  0xb8   : > { %6906 = vmatpush1.bf16.msra.mxu1 %v10118_v44  ;;  %6866 = vmatprep.subr.bf16.mxu0 %v10123_v45  ;;  %v10198_v44 = vld [vmem:[%s11711_s12 + $0xcfc] ss:$20 sps:$4 sm:$0xff]   ;;  %v10193_v45 = vld [vmem:[%s11711_s12 + $0xa78] ss:$20 sps:$4 sm:$0xff]  }
  0xb9   : > { %6907 = vmatprep.subr.bf16.mxu1 %v10126_v46  ;;  %v10196_v46 = vld [vmem:[%s11711_s12 + $0xcf8] ss:$20 sps:$4 sm:$0xff]  }
  0xbb   : > { %6867 = vmatpush2.bf16.msra.mxu0 %v10121_v47  ;;  %v10201_v47 = vld [vmem:[%s11711_s12 + $0xa54] ss:$20 sps:$4 sm:$0xff]  }
  0xbc   : > { %6908 = vmatpush2.bf16.msra.mxu1 %v10124_v48  ;;  %6868 = vmatprep.subr.bf16.mxu0 %v10129_v49  ;;  %v10204_v48 = vld [vmem:[%s11711_s12 + $0xcd4] ss:$20 sps:$4 sm:$0xff]   ;;  %v10199_v49 = vld [vmem:[%s11711_s12 + $0xa50] ss:$20 sps:$4 sm:$0xff]  }
  0xbd   : > { %6909 = vmatprep.subr.bf16.mxu1 %v10132_v51  ;;  %v10202_v51 = vld [vmem:[%s11711_s12 + $0xcd0] ss:$20 sps:$4 sm:$0xff]  }
  0xbf   : > { %6869 = vmatpush2.bf16.msra.mxu0 %v10127_v52  ;;  %v10207_v52 = vld [vmem:[%s11711_s12 + $0xa2c] ss:$20 sps:$4 sm:$0xff]  }
  0xc0   : > { %6910 = vmatpush2.bf16.msra.mxu1 %v10130_v54  ;;  %6870 = vmatprep.subr.bf16.mxu0 %v10135_v55  ;;  %v10210_v54 = vld [vmem:[%s11711_s12 + $0xcac] ss:$20 sps:$4 sm:$0xff]   ;;  %v10205_v55 = vld [vmem:[%s11711_s12 + $0xa28] ss:$20 sps:$4 sm:$0xff]  }
  0xc1   : > { %6911 = vmatprep.subr.bf16.mxu1 %v10138_v56  ;;  %v10208_v56 = vld [vmem:[%s11711_s12 + $0xca8] ss:$20 sps:$4 sm:$0xff]  }
  0xc3   : > { %6871 = vmatpush2.bf16.msra.mxu0 %v10133_v57  ;;  %v10213_v57 = vld [vmem:[%s11711_s12 + $0xa04] ss:$20 sps:$4 sm:$0xff]  }
  0xc4   : > { %6912 = vmatpush2.bf16.msra.mxu1 %v10136_v58  ;;  %6872 = vmatprep.subr.bf16.mxu0 %v10141_v59  ;;  %v10216_v58 = vld [vmem:[%s11711_s12 + $0xc84] ss:$20 sps:$4 sm:$0xff]   ;;  %v10211_v59 = vld [vmem:[%s11711_s12 + $0xa00] ss:$20 sps:$4 sm:$0xff]  }
  0xc5   : > { %6913 = vmatprep.subr.bf16.mxu1 %v10144_v60  ;;  %v10214_v60 = vld [vmem:[%s11711_s12 + $0xc80] ss:$20 sps:$4 sm:$0xff]  }
  0xc7   : > { %6873 = vmatpush2.bf16.msra.mxu0 %v10139_v61  ;;  %v10219_v61 = vld [vmem:[%s11711_s12 + $0xc5c] ss:$20 sps:$4 sm:$0xff]  }
  0xc8   : > { %6914 = vmatpush2.bf16.msra.mxu1 %v10142_v62  ;;  %6874 = vmatprep.subr.bf16.mxu0 %v10147_v63  ;;  %v10222_v62 = vld [vmem:[%s11711_s12 + $0xedc] ss:$20 sps:$4 sm:$0xff]   ;;  %v10217_v63 = vld [vmem:[%s11711_s12 + $0xc58] ss:$20 sps:$4 sm:$0xff]  }
  0xc9   : > { %6915 = vmatprep.subr.bf16.mxu1 %v10150_v0  ;;  %v10220_v0 = vld [vmem:[%s11711_s12 + $0xed8] ss:$20 sps:$4 sm:$0xff]  }
  0xcb   : > { %6875 = vmatpush2.bf16.msra.mxu0 %v10145_v1  ;;  %v10225_v1 = vld [vmem:[%s11711_s12 + $0xc34] ss:$20 sps:$4 sm:$0xff]  }
  0xcc   : > { %6916 = vmatpush2.bf16.msra.mxu1 %v10148_v2  ;;  %6876 = vmatprep.subr.bf16.mxu0 %v10153_v3  ;;  %v10228_v2 = vld [vmem:[%s11711_s12 + $0xeb4] ss:$20 sps:$4 sm:$0xff]   ;;  %v10223_v3 = vld [vmem:[%s11711_s12 + $0xc30] ss:$20 sps:$4 sm:$0xff]  }
  0xcd   : > { %6917 = vmatprep.subr.bf16.mxu1 %v10156_v4  ;;  %v10226_v4 = vld [vmem:[%s11711_s12 + $0xeb0] ss:$20 sps:$4 sm:$0xff]  }
  0xcf   : > { %6877 = vmatpush2.bf16.msra.mxu0 %v10151_v5  ;;  %v10231_v5 = vld [vmem:[%s11711_s12 + $0xc0c] ss:$20 sps:$4 sm:$0xff]  }
  0xd0   : > { %6918 = vmatpush2.bf16.msra.mxu1 %v10154_v6  ;;  %6878 = vmatprep.subr.bf16.mxu0 %v10159_v7  ;;  %v10234_v6 = vld [vmem:[%s11711_s12 + $0xe8c] ss:$20 sps:$4 sm:$0xff]   ;;  %v10229_v7 = vld [vmem:[%s11711_s12 + $0xc08] ss:$20 sps:$4 sm:$0xff]  }
  0xd1   : > { %6919 = vmatprep.subr.bf16.mxu1 %v10162_v8  ;;  %v10232_v8 = vld [vmem:[%s11711_s12 + $0xe88] ss:$20 sps:$4 sm:$0xff]  }
  0xd3   : > { %6879 = vmatpush2.bf16.msra.mxu0 %v10157_v11  ;;  %v10237_v11 = vld [vmem:[%s11711_s12 + $0xbe4] ss:$20 sps:$4 sm:$0xff]  }
  0xd4   : > { %6920 = vmatpush2.bf16.msra.mxu1 %v10160_v12  ;;  %6880 = vmatprep.subr.bf16.mxu0 %v10165_v13  ;;  %v10240_v12 = vld [vmem:[%s11711_s12 + $0xe64] ss:$20 sps:$4 sm:$0xff]   ;;  %v10235_v13 = vld [vmem:[%s11711_s12 + $0xbe0] ss:$20 sps:$4 sm:$0xff]  }
  0xd5   : > { %6921 = vmatprep.subr.bf16.mxu1 %v10168_v14  ;;  %v10238_v14 = vld [vmem:[%s11711_s12 + $0xe60] ss:$20 sps:$4 sm:$0xff]  }
  0xd7   : > { %6881 = vmatpush2.bf16.msra.mxu0 %v10163_v15  ;;  %v10243_v15 = vld [vmem:[%s11711_s12 + $0xbbc] ss:$20 sps:$4 sm:$0xff]  }
  0xd8   : > { %6922 = vmatpush2.bf16.msra.mxu1 %v10166_v16  ;;  %6932 = vmatprep.subr.bf16.mxu0 %v10171_v18  ;;  %v10246_v16 = vld [vmem:[%s11711_s12 + $0xe3c] ss:$20 sps:$4 sm:$0xff]   ;;  %v10244_v18 = vld [vmem:[%s11711_s12 + $0xe38] ss:$20 sps:$4 sm:$0xff]  }
  0xd9   : > { %6973 = vmatprep.subr.bf16.mxu1 %v10174_v20  ;;  %v10252_v20 = vld [vmem:[%s11711_s12 + $0xe14] ss:$20 sps:$4 sm:$0xff]  }
  0xda   : > { %6883 = vmatmul.mubr.bf16.vlgmr.msra.gmra.mxu0 %v11894_v21 }
  0xdb   : > { %6924 = vmatmul.mubr.bf16.vlgmr.msra.gmra.mxu1 %v11898_v24  ;;  %6933 = vmatpush1.bf16.msra.mxu0 %v10169_v22  ;;  %v10247_v22 = vld [vmem:[%s11711_s12 + $0xb90] ss:$20 sps:$4 sm:$0xff]  }
  0xdc   : > { %6974 = vmatpush1.bf16.msra.mxu1 %v10172_v23  ;;  %6934 = vmatprep.subr.bf16.mxu0 %v10177_v25  ;;  %v10250_v23 = vld [vmem:[%s11711_s12 + $0xe10] ss:$20 sps:$4 sm:$0xff]   ;;  %v10255_v25 = vld [vmem:[%s11711_s12 + $0xb6c] ss:$20 sps:$4 sm:$0xff]  }
  0xdd   : > { %6975 = vmatprep.subr.bf16.mxu1 %v10180_v26  ;;  %6964 = vmatprep.mubr.bf16.mxu0 %v11906_v29  ;;  %v10258_v26 = vld [vmem:[%s11711_s12 + $0xdec] ss:$20 sps:$4 sm:$0xff]  }
  0xde   : > { %7005 = vmatprep.mubr.bf16.mxu1 %v11911_v33 }
  0xdf   : > { %6935 = vmatpush1.bf16.msra.mxu0 %v10175_v28  ;;  %v10256_v28 = vld [vmem:[%s11711_s12 + $0xde8] ss:$20 sps:$4 sm:$0xff]  }
  0xe0   : > { %6976 = vmatpush1.bf16.msra.mxu1 %v10178_v31  ;;  %6936 = vmatprep.subr.bf16.mxu0 %v10183_v32  ;;  %v10264_v31 = vld [vmem:[%s11711_s12 + $0xdc4] ss:$20 sps:$4 sm:$0xff]   ;;  %v10259_v32 = vld [vmem:[%s11711_s12 + $0xb40] ss:$20 sps:$4 sm:$0xff]  }
  0xe1   : > { %6977 = vmatprep.subr.bf16.mxu1 %v10186_v34  ;;  %v10262_v34 = vld [vmem:[%s11711_s12 + $0xdc0] ss:$20 sps:$4 sm:$0xff]  }
  0xe3   : > { %6937 = vmatpush1.bf16.msra.mxu0 %v10181_v35  ;;  %v326_v35 = vld [vmem:[%s11730_s5 + $0x40] sm:$0xff] }
  0xe4   : > { %6978 = vmatpush1.bf16.msra.mxu1 %v10184_v36  ;;  %6938 = vmatprep.subr.bf16.mxu0 %v10189_v38  ;;  %v10267_v36 = vld [vmem:[%s11711_s12 + $0x101c] ss:$20 sps:$4 sm:$0xff]   ;;  %v328_v38 = vld [vmem:[%s11730_s5 + $0x50] sm:$0xff] }
  0xe5   : > { %6979 = vmatprep.subr.bf16.mxu1 %v10192_v39  ;;  %v10270_v39 = vld [vmem:[%s11711_s12 + $0x129c] ss:$20 sps:$4 sm:$0xff]  }
  0xe7   : > { %6939 = vmatpush1.bf16.msra.mxu0 %v10187_v40  ;;  %v10265_v40 = vld [vmem:[%s11711_s12 + $0x1018] ss:$20 sps:$4 sm:$0xff]  }
  0xe8   : > { %6980 = vmatpush1.bf16.msra.mxu1 %v10190_v42  ;;  %6940 = vmatprep.subr.bf16.mxu0 %v10195_v43  ;;  %v10268_v42 = vld [vmem:[%s11711_s12 + $0x1298] ss:$20 sps:$4 sm:$0xff]   ;;  %v11976_v43 = vpack.c.bf16 %v326_v35, %v326_v35  ;;  %v10331_v35 = vld [vmem:[%s11711_s12 + $0x10e0] ss:$20 sps:$4 sm:$0xff]  }
  0xe9   : > { %6981 = vmatprep.subr.bf16.mxu1 %v10198_v44  ;;  %v11978_v44 = vpack.c.bf16 %v328_v38, %v328_v38  ;;  %v10339_v38 = vld [vmem:[%s11711_s12 + $0x10bc] ss:$20 sps:$4 sm:$0xff]  }
  0xeb   : > { %6941 = vmatpush1.bf16.msra.mxu0 %v10193_v45  ;;  %v331_v45 = vld [vmem:[%s11730_s5 + $0x68] sm:$0xff] }
  0xec   : > { %6982 = vmatpush1.bf16.msra.mxu1 %v10196_v46  ;;  %6942 = vmatprep.subr.bf16.mxu0 %v10201_v47  ;;  %v333_v46 = vld [vmem:[%s11730_s5 + $0x78] sm:$0xff] }
  0xed   : > { %6983 = vmatprep.subr.bf16.mxu1 %v10204_v48  ;;  %v10273_v47 = vld [vmem:[%s11711_s12 + $0xff4] ss:$20 sps:$4 sm:$0xff]  }
  0xee   : > { %v10276_v48 = vld [vmem:[%s11711_s12 + $0x1274] ss:$20 sps:$4 sm:$0xff]  }
  0xef   : > { %6943 = vmatpush1.bf16.msra.mxu0 %v10199_v49  ;;  %v11984_v49 = vpack.c.bf16 %v331_v45, %v331_v45  ;;  %v10345_v45 = vld [vmem:[%s11711_s12 + $0x1094] ss:$20 sps:$4 sm:$0xff]  }
  0xf0   : > { %6984 = vmatpush1.bf16.msra.mxu1 %v10202_v51  ;;  %6944 = vmatprep.subr.bf16.mxu0 %v10207_v52  ;;  %v11986_v51 = vpack.c.bf16 %v333_v46, %v333_v46  ;;  %v10271_v52 = vld [vmem:[%s11711_s12 + $0xff0] ss:$20 sps:$4 sm:$0xff]   ;;  %v10348_v46 = vld [vmem:[%s11711_s12 + $0x1314] ss:$20 sps:$4 sm:$0xff]  }
  0xf1   : > { %6985 = vmatprep.subr.bf16.mxu1 %v10210_v54  ;;  %v10274_v54 = vld [vmem:[%s11711_s12 + $0x1270] ss:$20 sps:$4 sm:$0xff]  }
  0xf3   : > { %6945 = vmatpush1.bf16.msra.mxu0 %v10205_v55  ;;  %v10279_v55 = vld [vmem:[%s11711_s12 + $0xfcc] ss:$20 sps:$4 sm:$0xff]  }
  0xf4   : > { %6986 = vmatpush1.bf16.msra.mxu1 %v10208_v56  ;;  %6946 = vmatprep.subr.bf16.mxu0 %v10213_v57  ;;  %v10282_v56 = vld [vmem:[%s11711_s12 + $0x124c] ss:$20 sps:$4 sm:$0xff]   ;;  %v10277_v57 = vld [vmem:[%s11711_s12 + $0xfc8] ss:$20 sps:$4 sm:$0xff]  }
  0xf5   : > { %6987 = vmatprep.subr.bf16.mxu1 %v10216_v58  ;;  %v10280_v58 = vld [vmem:[%s11711_s12 + $0x1248] ss:$20 sps:$4 sm:$0xff]  }
  0xf7   : > { %6947 = vmatpush1.bf16.msra.mxu0 %v10211_v59  ;;  %v10285_v59 = vld [vmem:[%s11711_s12 + $0xfa4] ss:$20 sps:$4 sm:$0xff]  }
  0xf8   : > { %6988 = vmatpush1.bf16.msra.mxu1 %v10214_v60  ;;  %6948 = vmatprep.subr.bf16.mxu0 %v10219_v61  ;;  %v10288_v60 = vld [vmem:[%s11711_s12 + $0x1224] ss:$20 sps:$4 sm:$0xff]   ;;  %v10283_v61 = vld [vmem:[%s11711_s12 + $0xfa0] ss:$20 sps:$4 sm:$0xff]  }
  0xf9   : > { %6989 = vmatprep.subr.bf16.mxu1 %v10222_v62  ;;  %v10286_v62 = vld [vmem:[%s11711_s12 + $0x1220] ss:$20 sps:$4 sm:$0xff]  }
  0xfb   : > { %6949 = vmatpush2.bf16.msra.mxu0 %v10217_v63  ;;  %v10291_v63 = vld [vmem:[%s11711_s12 + $0xf7c] ss:$20 sps:$4 sm:$0xff]  }
  0xfc   : > { %6990 = vmatpush2.bf16.msra.mxu1 %v10220_v0  ;;  %6950 = vmatprep.subr.bf16.mxu0 %v10225_v1  ;;  %v10294_v0 = vld [vmem:[%s11711_s12 + $0x11fc] ss:$20 sps:$4 sm:$0xff]   ;;  %v10289_v1 = vld [vmem:[%s11711_s12 + $0xf78] ss:$20 sps:$4 sm:$0xff]  }
  0xfd   : > { %6991 = vmatprep.subr.bf16.mxu1 %v10228_v2  ;;  %v10292_v2 = vld [vmem:[%s11711_s12 + $0x11f8] ss:$20 sps:$4 sm:$0xff]  }
  0xff   : > { %6951 = vmatpush2.bf16.msra.mxu0 %v10223_v3  ;;  %v10297_v3 = vld [vmem:[%s11711_s12 + $0xf54] ss:$20 sps:$4 sm:$0xff]  }
 0x100   : > { %6992 = vmatpush2.bf16.msra.mxu1 %v10226_v4  ;;  %6952 = vmatprep.subr.bf16.mxu0 %v10231_v5  ;;  %v10300_v4 = vld [vmem:[%s11711_s12 + $0x11d4] ss:$20 sps:$4 sm:$0xff]   ;;  %v10295_v5 = vld [vmem:[%s11711_s12 + $0xf50] ss:$20 sps:$4 sm:$0xff]  }
 0x101   : > { %6993 = vmatprep.subr.bf16.mxu1 %v10234_v6  ;;  %v10298_v6 = vld [vmem:[%s11711_s12 + $0x11d0] ss:$20 sps:$4 sm:$0xff]  }
 0x103   : > { %6953 = vmatpush2.bf16.msra.mxu0 %v10229_v7  ;;  %v10303_v7 = vld [vmem:[%s11711_s12 + $0xf2c] ss:$20 sps:$4 sm:$0xff]  }
 0x104   : > { %6994 = vmatpush2.bf16.msra.mxu1 %v10232_v8  ;;  %6954 = vmatprep.subr.bf16.mxu0 %v10237_v11  ;;  %v10306_v8 = vld [vmem:[%s11711_s12 + $0x11ac] ss:$20 sps:$4 sm:$0xff]   ;;  %v10301_v11 = vld [vmem:[%s11711_s12 + $0xf28] ss:$20 sps:$4 sm:$0xff]  }
 0x105   : > { %6995 = vmatprep.subr.bf16.mxu1 %v10240_v12  ;;  %v10304_v12 = vld [vmem:[%s11711_s12 + $0x11a8] ss:$20 sps:$4 sm:$0xff]  }
 0x107   : > { %6955 = vmatpush2.bf16.msra.mxu0 %v10235_v13  ;;  %v10309_v13 = vld [vmem:[%s11711_s12 + $0xf04] ss:$20 sps:$4 sm:$0xff]  }
 0x108   : > { %6996 = vmatpush2.bf16.msra.mxu1 %v10238_v14  ;;  %6956 = vmatprep.subr.bf16.mxu0 %v10243_v15  ;;  %v10312_v14 = vld [vmem:[%s11711_s12 + $0x1184] ss:$20 sps:$4 sm:$0xff]   ;;  %v10307_v15 = vld [vmem:[%s11711_s12 + $0xf00] ss:$20 sps:$4 sm:$0xff]  }
 0x109   : > { %6997 = vmatprep.subr.bf16.mxu1 %v10246_v16  ;;  %v10310_v16 = vld [vmem:[%s11711_s12 + $0x1180] ss:$20 sps:$4 sm:$0xff]  }
 0x10b   : > { %6957 = vmatpush2.bf16.msra.mxu0 %v10241_v17  ;;  %v10315_v17 = vld [vmem:[%s11711_s12 + $0x115c] ss:$20 sps:$4 sm:$0xff]  }
 0x10c   : > { %6998 = vmatpush2.bf16.msra.mxu1 %v10244_v18  ;;  %6958 = vmatprep.subr.bf16.mxu0 %v10249_v19  ;;  %v10318_v18 = vld [vmem:[%s11711_s12 + $0x13dc] ss:$20 sps:$4 sm:$0xff]   ;;  %v10313_v19 = vld [vmem:[%s11711_s12 + $0x1158] ss:$20 sps:$4 sm:$0xff]  }
 0x10d   : > { %6999 = vmatprep.subr.bf16.mxu1 %v10252_v20  ;;  %v10316_v20 = vld [vmem:[%s11711_s12 + $0x13d8] ss:$20 sps:$4 sm:$0xff]  }
 0x10f   : > { %6959 = vmatpush2.bf16.msra.mxu0 %v10247_v22  ;;  %v10321_v22 = vld [vmem:[%s11711_s12 + $0x1134] ss:$20 sps:$4 sm:$0xff]  }
 0x110   : > { %7000 = vmatpush2.bf16.msra.mxu1 %v10250_v23  ;;  %6960 = vmatprep.subr.bf16.mxu0 %v10255_v25  ;;  %v10324_v23 = vld [vmem:[%s11711_s12 + $0x13b4] ss:$20 sps:$4 sm:$0xff]   ;;  %v10319_v25 = vld [vmem:[%s11711_s12 + $0x1130] ss:$20 sps:$4 sm:$0xff]  }
 0x111   : > { %7001 = vmatprep.subr.bf16.mxu1 %v10258_v26  ;;  %v10322_v26 = vld [vmem:[%s11711_s12 + $0x13b0] ss:$20 sps:$4 sm:$0xff]  }
 0x113   : > { %6961 = vmatpush2.bf16.msra.mxu0 %v10253_v27  ;;  %v10327_v27 = vld [vmem:[%s11711_s12 + $0x110c] ss:$20 sps:$4 sm:$0xff]  }
 0x114   : > { %7002 = vmatpush2.bf16.msra.mxu1 %v10256_v28  ;;  %6962 = vmatprep.subr.bf16.mxu0 %v10261_v30  ;;  %v10330_v28 = vld [vmem:[%s11711_s12 + $0x138c] ss:$20 sps:$4 sm:$0xff]   ;;  %v10325_v30 = vld [vmem:[%s11711_s12 + $0x1108] ss:$20 sps:$4 sm:$0xff]  }
 0x115   : > { %7003 = vmatprep.subr.bf16.mxu1 %v10264_v31  ;;  %v10328_v31 = vld [vmem:[%s11711_s12 + $0x1388] ss:$20 sps:$4 sm:$0xff]  }
 0x117   : > { %6963 = vmatpush2.bf16.msra.mxu0 %v10259_v32  ;;  %v10333_v32 = vld [vmem:[%s11711_s12 + $0x10e4] ss:$20 sps:$4 sm:$0xff]  }
 0x118   : > { %7004 = vmatpush2.bf16.msra.mxu1 %v10262_v34  ;;  %7014 = vmatprep.subr.bf16.mxu0 %v10267_v36  ;;  %v10336_v34 = vld [vmem:[%s11711_s12 + $0x1364] ss:$20 sps:$4 sm:$0xff]   ;;  %v10334_v36 = vld [vmem:[%s11711_s12 + $0x1360] ss:$20 sps:$4 sm:$0xff]  }
 0x119   : > { %7055 = vmatprep.subr.bf16.mxu1 %v10270_v39  ;;  %v10342_v39 = vld [vmem:[%s11711_s12 + $0x133c] ss:$20 sps:$4 sm:$0xff]  }
 0x11a   : > { %6965 = vmatmul.mubr.bf16.vlgmr.msra.gmra.mxu0 %v11976_v43 }
 0x11b   : > { %7006 = vmatmul.mubr.bf16.vlgmr.msra.gmra.mxu1 %v11978_v44  ;;  %7015 = vmatpush1.bf16.msra.mxu0 %v10265_v40  ;;  %v10337_v40 = vld [vmem:[%s11711_s12 + $0x10b8] ss:$20 sps:$4 sm:$0xff]  }
 0x11c   : > { %7056 = vmatpush1.bf16.msra.mxu1 %v10268_v42  ;;  %7016 = vmatprep.subr.bf16.mxu0 %v10273_v47  ;;  %v10340_v42 = vld [vmem:[%s11711_s12 + $0x1338] ss:$20 sps:$4 sm:$0xff]   ;;  %v10343_v47 = vld [vmem:[%s11711_s12 + $0x1090] ss:$20 sps:$4 sm:$0xff]  }
 0x11d   : > { %7057 = vmatprep.subr.bf16.mxu1 %v10276_v48  ;;  %7046 = vmatprep.mubr.bf16.mxu0 %v11984_v49  ;;  %v10346_v48 = vld [vmem:[%s11711_s12 + $0x1310] ss:$20 sps:$4 sm:$0xff]  }
 0x11e   : > { %7087 = vmatprep.mubr.bf16.mxu1 %v11986_v51 }
 0x11f   : > { %7017 = vmatpush1.bf16.msra.mxu0 %v10271_v52  ;;  %v10351_v52 = vld [vmem:[%s11711_s12 + $0x106c] ss:$20 sps:$4 sm:$0xff]  }
 0x120   : > { %7058 = vmatpush1.bf16.msra.mxu1 %v10274_v54  ;;  %7018 = vmatprep.subr.bf16.mxu0 %v10279_v55  ;;  %v10354_v54 = vld [vmem:[%s11711_s12 + $0x12ec] ss:$20 sps:$4 sm:$0xff]   ;;  %v10349_v55 = vld [vmem:[%s11711_s12 + $0x1068] ss:$20 sps:$4 sm:$0xff]  }
 0x121   : > { %7059 = vmatprep.subr.bf16.mxu1 %v10282_v56  ;;  %v10352_v56 = vld [vmem:[%s11711_s12 + $0x12e8] ss:$20 sps:$4 sm:$0xff]  }
 0x123   : > { %7019 = vmatpush1.bf16.msra.mxu0 %v10277_v57  ;;  %v10357_v57 = vld [vmem:[%s11711_s12 + $0x1044] ss:$20 sps:$4 sm:$0xff]  }
 0x124   : > { %7060 = vmatpush1.bf16.msra.mxu1 %v10280_v58  ;;  %7020 = vmatprep.subr.bf16.mxu0 %v10285_v59  ;;  %v10360_v58 = vld [vmem:[%s11711_s12 + $0x12c4] ss:$20 sps:$4 sm:$0xff]   ;;  %v10355_v59 = vld [vmem:[%s11711_s12 + $0x1040] ss:$20 sps:$4 sm:$0xff]  }
 0x125   : > { %7061 = vmatprep.subr.bf16.mxu1 %v10288_v60  ;;  %v10358_v60 = vld [vmem:[%s11711_s12 + $0x12c0] ss:$20 sps:$4 sm:$0xff]  }
 0x127   : > { %7021 = vmatpush1.bf16.msra.mxu0 %v10283_v61  ;;  %v330_v61 = vld [vmem:[%s11730_s5 + $0x60] sm:$0xff] }
 0x128   : > { %7062 = vmatpush1.bf16.msra.mxu1 %v10286_v62  ;;  %7022 = vmatprep.subr.bf16.mxu0 %v10291_v63  ;;  %v10363_v62 = vld [vmem:[%s11711_s12 + $0x151c] ss:$20 sps:$4 sm:$0xff]   ;;  %v332_v63 = vld [vmem:[%s11730_s5 + $0x70] sm:$0xff] }
 0x129   : > { %7063 = vmatprep.subr.bf16.mxu1 %v10294_v0  ;;  %v10366_v0 = vld [vmem:[%s11711_s12 + $0x179c] ss:$20 sps:$4 sm:$0xff]  }
 0x12b   : > { %7023 = vmatpush1.bf16.msra.mxu0 %v10289_v1  ;;  %v10361_v1 = vld [vmem:[%s11711_s12 + $0x1518] ss:$20 sps:$4 sm:$0xff]  }
 0x12c   : > { %7064 = vmatpush1.bf16.msra.mxu1 %v10292_v2  ;;  %7024 = vmatprep.subr.bf16.mxu0 %v10297_v3  ;;  %v10364_v2 = vld [vmem:[%s11711_s12 + $0x1798] ss:$20 sps:$4 sm:$0xff]   ;;  %v12056_v3 = vpack.c.bf16 %v330_v61, %v330_v61  ;;  %v10411_v61 = vld [vmem:[%s11711_s12 + $0x165c] ss:$20 sps:$4 sm:$0xff]  }
 0x12d   : > { %7065 = vmatprep.subr.bf16.mxu1 %v10300_v4  ;;  %v12058_v4 = vpack.c.bf16 %v332_v63, %v332_v63  ;;  %v10409_v63 = vld [vmem:[%s11711_s12 + $0x1658] ss:$20 sps:$4 sm:$0xff]  }
 0x12f   : > { %7025 = vmatpush1.bf16.msra.mxu0 %v10295_v5  ;;  %v335_v5 = vld [vmem:[%s11730_s5 + $0x88] sm:$0xff] }
 0x130   : > { %7066 = vmatpush1.bf16.msra.mxu1 %v10298_v6  ;;  %7026 = vmatprep.subr.bf16.mxu0 %v10303_v7  ;;  %v337_v6 = vld [vmem:[%s11730_s5 + $0x98] sm:$0xff] }
 0x131   : > { %7067 = vmatprep.subr.bf16.mxu1 %v10306_v8  ;;  %v10369_v7 = vld [vmem:[%s11711_s12 + $0x14f4] ss:$20 sps:$4 sm:$0xff]  }
 0x132   : > { %v10372_v8 = vld [vmem:[%s11711_s12 + $0x1774] ss:$20 sps:$4 sm:$0xff]  }
 0x133   : > { %7027 = vmatpush1.bf16.msra.mxu0 %v10301_v11  ;;  %v12064_v11 = vpack.c.bf16 %v335_v5, %v335_v5  ;;  %v10415_v5 = vld [vmem:[%s11711_s12 + $0x1630] ss:$20 sps:$4 sm:$0xff]  }
 0x134   : > { %7068 = vmatpush1.bf16.msra.mxu1 %v10304_v12  ;;  %7028 = vmatprep.subr.bf16.mxu0 %v10309_v13  ;;  %v12066_v12 = vpack.c.bf16 %v337_v6, %v337_v6  ;;  %v10418_v6 = vld [vmem:[%s11711_s12 + $0x18b0] ss:$20 sps:$4 sm:$0xff]  }
 0x135   : > { %7069 = vmatprep.subr.bf16.mxu1 %v10312_v14 }
 0x137   : > { %7029 = vmatpush1.bf16.msra.mxu0 %v10307_v15  ;;  %v10367_v15 = vld [vmem:[%s11711_s12 + $0x14f0] ss:$20 sps:$4 sm:$0xff]  }
 0x138   : > { %7070 = vmatpush1.bf16.msra.mxu1 %v10310_v16  ;;  %7030 = vmatprep.subr.bf16.mxu0 %v10315_v17  ;;  %v10370_v16 = vld [vmem:[%s11711_s12 + $0x1770] ss:$20 sps:$4 sm:$0xff]  }
 0x139   : > { %7071 = vmatprep.subr.bf16.mxu1 %v10318_v18  ;;  %v10375_v18 = vld [vmem:[%s11711_s12 + $0x14cc] ss:$20 sps:$4 sm:$0xff]  }
 0x13b   : > { %7031 = vmatpush2.bf16.msra.mxu0 %v10313_v19 }
 0x13c   : > { %7072 = vmatpush2.bf16.msra.mxu1 %v10316_v20  ;;  %7032 = vmatprep.subr.bf16.mxu0 %v10321_v22  ;;  %v10378_v22 = vld [vmem:[%s11711_s12 + $0x174c] ss:$20 sps:$4 sm:$0xff]  }
 0x13d   : > { %7073 = vmatprep.subr.bf16.mxu1 %v10324_v23 }
 0x13f   : > { %7033 = vmatpush2.bf16.msra.mxu0 %v10319_v25 }
 0x140   : > { %7074 = vmatpush2.bf16.msra.mxu1 %v10322_v26  ;;  %7034 = vmatprep.subr.bf16.mxu0 %v10327_v27  ;;  %v10373_v26 = vld [vmem:[%s11711_s12 + $0x14c8] ss:$20 sps:$4 sm:$0xff]  }
 0x141   : > { %7075 = vmatprep.subr.bf16.mxu1 %v10330_v28  ;;  %v10376_v28 = vld [vmem:[%s11711_s12 + $0x1748] ss:$20 sps:$4 sm:$0xff]  }
 0x143   : > { %7035 = vmatpush2.bf16.msra.mxu0 %v10325_v30  ;;  %v10381_v30 = vld [vmem:[%s11711_s12 + $0x14a4] ss:$20 sps:$4 sm:$0xff]  }
 0x144   : > { %7076 = vmatpush2.bf16.msra.mxu1 %v10328_v31  ;;  %7036 = vmatprep.subr.bf16.mxu0 %v10333_v32  ;;  %v10384_v32 = vld [vmem:[%s11711_s12 + $0x1724] ss:$20 sps:$4 sm:$0xff]  }
 0x145   : > { %7077 = vmatprep.subr.bf16.mxu1 %v10336_v34 }
 0x147   : > { %7037 = vmatpush2.bf16.msra.mxu0 %v10331_v35  ;;  %v10379_v35 = vld [vmem:[%s11711_s12 + $0x14a0] ss:$20 sps:$4 sm:$0xff]  }
 0x148   : > { %7078 = vmatpush2.bf16.msra.mxu1 %v10334_v36  ;;  %7038 = vmatprep.subr.bf16.mxu0 %v10339_v38  ;;  %v10382_v36 = vld [vmem:[%s11711_s12 + $0x1720] ss:$20 sps:$4 sm:$0xff]   ;;  %v10387_v38 = vld [vmem:[%s11711_s12 + $0x147c] ss:$20 sps:$4 sm:$0xff]  }
 0x149   : > { %7079 = vmatprep.subr.bf16.mxu1 %v10342_v39  ;;  %v10390_v39 = vld [vmem:[%s11711_s12 + $0x16fc] ss:$20 sps:$4 sm:$0xff]  }
 0x14b   : > { %7039 = vmatpush2.bf16.msra.mxu0 %v10337_v40  ;;  %v10385_v40 = vld [vmem:[%s11711_s12 + $0x1478] ss:$20 sps:$4 sm:$0xff]  }
 0x14c   : > { %7080 = vmatpush2.bf16.msra.mxu1 %v10340_v42  ;;  %7040 = vmatprep.subr.bf16.mxu0 %v10345_v45  ;;  %v10388_v42 = vld [vmem:[%s11711_s12 + $0x16f8] ss:$20 sps:$4 sm:$0xff]   ;;  %v10393_v45 = vld [vmem:[%s11711_s12 + $0x1454] ss:$20 sps:$4 sm:$0xff]  }
 0x14d   : > { %7081 = vmatprep.subr.bf16.mxu1 %v10348_v46  ;;  %v10396_v46 = vld [vmem:[%s11711_s12 + $0x16d4] ss:$20 sps:$4 sm:$0xff]  }
 0x14f   : > { %7041 = vmatpush2.bf16.msra.mxu0 %v10343_v47  ;;  %v10391_v47 = vld [vmem:[%s11711_s12 + $0x1450] ss:$20 sps:$4 sm:$0xff]  }
 0x150   : > { %7082 = vmatpush2.bf16.msra.mxu1 %v10346_v48  ;;  %7042 = vmatprep.subr.bf16.mxu0 %v10351_v52  ;;  %v10394_v48 = vld [vmem:[%s11711_s12 + $0x16d0] ss:$20 sps:$4 sm:$0xff]   ;;  %v10399_v52 = vld [vmem:[%s11711_s12 + $0x142c] ss:$20 sps:$4 sm:$0xff]  }
 0x151   : > { %7083 = vmatprep.subr.bf16.mxu1 %v10354_v54  ;;  %v10402_v54 = vld [vmem:[%s11711_s12 + $0x16ac] ss:$20 sps:$4 sm:$0xff]  }
 0x153   : > { %7043 = vmatpush2.bf16.msra.mxu0 %v10349_v55  ;;  %v10397_v55 = vld [vmem:[%s11711_s12 + $0x1428] ss:$20 sps:$4 sm:$0xff]  }
 0x154   : > { %7084 = vmatpush2.bf16.msra.mxu1 %v10352_v56  ;;  %7044 = vmatprep.subr.bf16.mxu0 %v10357_v57  ;;  %v10400_v56 = vld [vmem:[%s11711_s12 + $0x16a8] ss:$20 sps:$4 sm:$0xff]   ;;  %v10405_v57 = vld [vmem:[%s11711_s12 + $0x1404] ss:$20 sps:$4 sm:$0xff]  }
 0x155   : > { %7085 = vmatprep.subr.bf16.mxu1 %v10360_v58  ;;  %v10408_v58 = vld [vmem:[%s11711_s12 + $0x1684] ss:$20 sps:$4 sm:$0xff]  }
 0x157   : > { %7045 = vmatpush2.bf16.msra.mxu0 %v10355_v59  ;;  %v10403_v59 = vld [vmem:[%s11711_s12 + $0x1400] ss:$20 sps:$4 sm:$0xff]  }
 0x158   : > { %7086 = vmatpush2.bf16.msra.mxu1 %v10358_v60  ;;  %7096 = vmatprep.subr.bf16.mxu0 %v10363_v62  ;;  %v10406_v60 = vld [vmem:[%s11711_s12 + $0x1680] ss:$20 sps:$4 sm:$0xff]   ;;  %v10414_v62 = vld [vmem:[%s11711_s12 + $0x18dc] ss:$20 sps:$4 sm:$0xff]  }
 0x159   : > { %7137 = vmatprep.subr.bf16.mxu1 %v10366_v0  ;;  %v10412_v0 = vld [vmem:[%s11711_s12 + $0x18d8] ss:$20 sps:$4 sm:$0xff]  }
 0x15a   : > { %v6802_v13 = vpop.f32.mrf.mxu0  ;;  %7047 = vmatmul.mubr.bf16.vlgmr.msra.gmra.mxu0 %v12056_v3 }
 0x15b   : > { %v6843_v14 = vpop.f32.mrf.mxu1  ;;  %7088 = vmatmul.mubr.bf16.vlgmr.msra.gmra.mxu1 %v12058_v4  ;;  %7097 = vmatpush1.bf16.msra.mxu0 %v10361_v1  ;;  %v10417_v1 = vld [vmem:[%s11711_s12 + $0x1634] ss:$20 sps:$4 sm:$0xff]  }
 0x15c   : > { %v12072_v17 = vadd.f32 %v6843_v14, %v6802_v13  ;;  %7138 = vmatpush1.bf16.msra.mxu1 %v10364_v2  ;;  %v6804_v19 = vpop.f32.mrf.mxu0  ;;  %7098 = vmatprep.subr.bf16.mxu0 %v10369_v7  ;;  %v10420_v2 = vld [vmem:[%s11711_s12 + $0x18b4] ss:$20 sps:$4 sm:$0xff]   ;;  %v10423_v7 = vld [vmem:[%s11711_s12 + $0x160c] ss:$20 sps:$4 sm:$0xff]  }
 0x15d   : > { %v6845_v20 = vpop.f32.mrf.mxu1  ;;  %7139 = vmatprep.subr.bf16.mxu1 %v10372_v8  ;;  %7128 = vmatprep.mubr.bf16.mxu0 %v12064_v11  ;;  %v10426_v8 = vld [vmem:[%s11711_s12 + $0x188c] ss:$20 sps:$4 sm:$0xff]   ;;  %v10421_v13 = vld [vmem:[%s11711_s12 + $0x1608] ss:$20 sps:$4 sm:$0xff]  }
 0x15e   : > { %v12076_v23 = vadd.f32 %v6845_v20, %v6804_v19  ;;  %7169 = vmatprep.mubr.bf16.mxu1 %v12066_v12  ;;  %v6806_v25 = vpop.f32.mrf.mxu0  ;;  %v10424_v14 = vld [vmem:[%s11711_s12 + $0x1888] ss:$20 sps:$4 sm:$0xff]   ;;  %v10430_v19 = vld [vmem:[%s11711_s12 + $0x1860] ss:$20 sps:$4 sm:$0xff]  }
 0x15f   : > { %v6847_v27 = vpop.f32.mrf.mxu1  ;;  %7099 = vmatpush1.bf16.msra.mxu0 %v10367_v15  ;;  %v10429_v15 = vld [vmem:[%s11711_s12 + $0x15e4] ss:$20 sps:$4 sm:$0xff]   ;;  %v10435_v20 = vld [vmem:[%s11711_s12 + $0x15bc] ss:$20 sps:$4 sm:$0xff]  }
 0x160   : > { %7140 = vmatpush1.bf16.msra.mxu1 %v10370_v16  ;;  %v6807_v31 = vpop.f32.mrf.mxu0  ;;  %7100 = vmatprep.subr.bf16.mxu0 %v10375_v18  ;;  %v10432_v16 = vld [vmem:[%s11711_s12 + $0x1864] ss:$20 sps:$4 sm:$0xff]   ;;  %v10427_v18 = vld [vmem:[%s11711_s12 + $0x15e0] ss:$20 sps:$4 sm:$0xff]  }
 0x161   : > { %7141 = vmatprep.subr.bf16.mxu1 %v10378_v22  ;;  %v6848_v34 = vpop.f32.mrf.mxu1  ;;  %v10438_v22 = vld [vmem:[%s11711_s12 + $0x183c] ss:$20 sps:$4 sm:$0xff]   ;;  %v10433_v25 = vld [vmem:[%s11711_s12 + $0x15b8] ss:$20 sps:$4 sm:$0xff]   ;;  %v10441_v27 = vld [vmem:[%s11711_s12 + $0x1594] ss:$20 sps:$4 sm:$0xff]  }
 0x162   : > { %v10442_v31 = vld [vmem:[%s11711_s12 + $0x1810] ss:$20 sps:$4 sm:$0xff]   ;;  %v10450_v34 = vld [vmem:[%s11711_s12 + $0x17ec] ss:$20 sps:$4 sm:$0xff]  }
 0x163   : > { %7101 = vmatpush1.bf16.msra.mxu0 %v10373_v26  ;;  %v10436_v26 = vld [vmem:[%s11711_s12 + $0x1838] ss:$20 sps:$4 sm:$0xff]  }
 0x164   : > { %7142 = vmatpush1.bf16.msra.mxu1 %v10376_v28  ;;  %7102 = vmatprep.subr.bf16.mxu0 %v10381_v30  ;;  %v10444_v28 = vld [vmem:[%s11711_s12 + $0x1814] ss:$20 sps:$4 sm:$0xff]   ;;  %v10439_v30 = vld [vmem:[%s11711_s12 + $0x1590] ss:$20 sps:$4 sm:$0xff]  }
 0x165   : > { %7143 = vmatprep.subr.bf16.mxu1 %v10384_v32  ;;  %v10447_v32 = vld [vmem:[%s11711_s12 + $0x156c] ss:$20 sps:$4 sm:$0xff]  }
 0x167   : > { %7103 = vmatpush1.bf16.msra.mxu0 %v10379_v35  ;;  %v10445_v35 = vld [vmem:[%s11711_s12 + $0x1568] ss:$20 sps:$4 sm:$0xff]  }
 0x168   : > { %7144 = vmatpush1.bf16.msra.mxu1 %v10382_v36  ;;  %7104 = vmatprep.subr.bf16.mxu0 %v10387_v38  ;;  %v10448_v36 = vld [vmem:[%s11711_s12 + $0x17e8] ss:$20 sps:$4 sm:$0xff]   ;;  %v10453_v38 = vld [vmem:[%s11711_s12 + $0x1544] ss:$20 sps:$4 sm:$0xff]  }
 0x169   : > { %7145 = vmatprep.subr.bf16.mxu1 %v10390_v39  ;;  %v10456_v39 = vld [vmem:[%s11711_s12 + $0x17c4] ss:$20 sps:$4 sm:$0xff]  }
 0x16b   : > { %7105 = vmatpush1.bf16.msra.mxu0 %v10385_v40  ;;  %v10451_v40 = vld [vmem:[%s11711_s12 + $0x1540] ss:$20 sps:$4 sm:$0xff]  }
 0x16c   : > { %7146 = vmatpush1.bf16.msra.mxu1 %v10388_v42  ;;  %7106 = vmatprep.subr.bf16.mxu0 %v10393_v45  ;;  %v10454_v42 = vld [vmem:[%s11711_s12 + $0x17c0] ss:$20 sps:$4 sm:$0xff]   ;;  %v334_v45 = vld [vmem:[%s11730_s5 + $0x80] sm:$0xff] }
 0x16d   : > { %7147 = vmatprep.subr.bf16.mxu1 %v10396_v46  ;;  %v10459_v46 = vld [vmem:[%s11711_s12 + $0x1a1c] ss:$20 sps:$4 sm:$0xff]  }
 0x16f   : > { %7107 = vmatpush1.bf16.msra.mxu0 %v10391_v47  ;;  %v10462_v47 = vld [vmem:[%s11711_s12 + $0x1c9c] ss:$20 sps:$4 sm:$0xff]  }
 0x170   : > { %7148 = vmatpush1.bf16.msra.mxu1 %v10394_v48  ;;  %7108 = vmatprep.subr.bf16.mxu0 %v10399_v52  ;;  %v336_v48 = vld [vmem:[%s11730_s5 + $0x90] sm:$0xff]  ;;  %v339_v52 = vld [vmem:[%s11730_s5 + $0xa8] sm:$0xff] }
 0x171   : > { %7149 = vmatprep.subr.bf16.mxu1 %v10402_v54  ;;  %v341_v54 = vld [vmem:[%s11730_s5 + $0xb8] sm:$0xff] }
 0x173   : > { %7109 = vmatpush1.bf16.msra.mxu0 %v10397_v55  ;;  %v10457_v55 = vld [vmem:[%s11711_s12 + $0x1a18] ss:$20 sps:$4 sm:$0xff]  }
 0x174   : > { %7150 = vmatpush1.bf16.msra.mxu1 %v10400_v56  ;;  %7110 = vmatprep.subr.bf16.mxu0 %v10405_v57  ;;  %v10460_v56 = vld [vmem:[%s11711_s12 + $0x1c98] ss:$20 sps:$4 sm:$0xff]   ;;  %v12142_v57 = vpack.c.bf16 %v334_v45, %v334_v45  ;;  %v10493_v45 = vld [vmem:[%s11711_s12 + $0x1928] ss:$20 sps:$4 sm:$0xff]  }
 0x175   : > { %7151 = vmatprep.subr.bf16.mxu1 %v10408_v58  ;;  %v12144_v58 = vpack.c.bf16 %v336_v48, %v336_v48  ;;  %v10504_v48 = vld [vmem:[%s11711_s12 + $0x1b84] ss:$20 sps:$4 sm:$0xff]  }
 0x177   : > { %7111 = vmatpush1.bf16.msra.mxu0 %v10403_v59  ;;  %v10465_v59 = vld [vmem:[%s11711_s12 + $0x19f4] ss:$20 sps:$4 sm:$0xff]  }
 0x178   : > { %7152 = vmatpush1.bf16.msra.mxu1 %v10406_v60  ;;  %7112 = vmatprep.subr.bf16.mxu0 %v10411_v61  ;;  %v10468_v60 = vld [vmem:[%s11711_s12 + $0x1c74] ss:$20 sps:$4 sm:$0xff]   ;;  %v10463_v61 = vld [vmem:[%s11711_s12 + $0x19f0] ss:$20 sps:$4 sm:$0xff]  }
 0x179   : > { %7153 = vmatprep.subr.bf16.mxu1 %v10414_v62  ;;  %v10466_v62 = vld [vmem:[%s11711_s12 + $0x1c70] ss:$20 sps:$4 sm:$0xff]  }
 0x17b   : > { %7113 = vmatpush2.bf16.msra.mxu0 %v10409_v63  ;;  %v12150_v63 = vpack.c.bf16 %v339_v52, %v339_v52  ;;  %v10499_v52 = vld [vmem:[%s11711_s12 + $0x1900] ss:$20 sps:$4 sm:$0xff]  }
 0x17c   : > { %7154 = vmatpush2.bf16.msra.mxu1 %v10412_v0  ;;  %7114 = vmatprep.subr.bf16.mxu0 %v10417_v1  ;;  %v12152_v0 = vpack.c.bf16 %v341_v54, %v341_v54  ;;  %v10502_v54 = vld [vmem:[%s11711_s12 + $0x1b80] ss:$20 sps:$4 sm:$0xff]  }
 0x17d   : > { %7155 = vmatprep.subr.bf16.mxu1 %v10420_v2 }
 0x17f   : > { %7115 = vmatpush2.bf16.msra.mxu0 %v10415_v5 }
 0x180   : > { %7156 = vmatpush2.bf16.msra.mxu1 %v10418_v6  ;;  %7116 = vmatprep.subr.bf16.mxu0 %v10423_v7 }
 0x181   : > { %7157 = vmatprep.subr.bf16.mxu1 %v10426_v8  ;;  %v10471_v8 = vld [vmem:[%s11711_s12 + $0x19cc] ss:$20 sps:$4 sm:$0xff]  }
 0x183   : > { %7117 = vmatpush2.bf16.msra.mxu0 %v10421_v13  ;;  %v10474_v13 = vld [vmem:[%s11711_s12 + $0x1c4c] ss:$20 sps:$4 sm:$0xff]  }
 0x184   : > { %7158 = vmatpush2.bf16.msra.mxu1 %v10424_v14  ;;  %7118 = vmatprep.subr.bf16.mxu0 %v10429_v15 }
 0x185   : > { %7159 = vmatprep.subr.bf16.mxu1 %v10432_v16  ;;  %v10469_v16 = vld [vmem:[%s11711_s12 + $0x19c8] ss:$20 sps:$4 sm:$0xff]  }
 0x187   : > { %7119 = vmatpush2.bf16.msra.mxu0 %v10427_v18  ;;  %v10472_v18 = vld [vmem:[%s11711_s12 + $0x1c48] ss:$20 sps:$4 sm:$0xff]  }
 0x188   : > { %7160 = vmatpush2.bf16.msra.mxu1 %v10430_v19  ;;  %7120 = vmatprep.subr.bf16.mxu0 %v10435_v20 }
 0x189   : > { %7161 = vmatprep.subr.bf16.mxu1 %v10438_v22 }
 0x18b   : > { %7121 = vmatpush2.bf16.msra.mxu0 %v10433_v25  ;;  %v10480_v25 = vld [vmem:[%s11711_s12 + $0x1c24] ss:$20 sps:$4 sm:$0xff]  }
 0x18c   : > { %7162 = vmatpush2.bf16.msra.mxu1 %v10436_v26  ;;  %7122 = vmatprep.subr.bf16.mxu0 %v10441_v27  ;;  %v10475_v27 = vld [vmem:[%s11711_s12 + $0x19a0] ss:$20 sps:$4 sm:$0xff]  }
 0x18d   : > { %7163 = vmatprep.subr.bf16.mxu1 %v10444_v28  ;;  %v10478_v28 = vld [vmem:[%s11711_s12 + $0x1c20] ss:$20 sps:$4 sm:$0xff]  }
 0x18f   : > { %7123 = vmatpush2.bf16.msra.mxu0 %v10439_v30  ;;  %v10483_v30 = vld [vmem:[%s11711_s12 + $0x197c] ss:$20 sps:$4 sm:$0xff]  }
 0x190   : > { %7164 = vmatpush2.bf16.msra.mxu1 %v10442_v31  ;;  %7124 = vmatprep.subr.bf16.mxu0 %v10447_v32  ;;  %v10486_v31 = vld [vmem:[%s11711_s12 + $0x1bfc] ss:$20 sps:$4 sm:$0xff]   ;;  %v10481_v32 = vld [vmem:[%s11711_s12 + $0x1978] ss:$20 sps:$4 sm:$0xff]  }
 0x191   : > { %7165 = vmatprep.subr.bf16.mxu1 %v10450_v34  ;;  %v10484_v34 = vld [vmem:[%s11711_s12 + $0x1bf8] ss:$20 sps:$4 sm:$0xff]  }
 0x193   : > { %7125 = vmatpush2.bf16.msra.mxu0 %v10445_v35  ;;  %v10489_v35 = vld [vmem:[%s11711_s12 + $0x1954] ss:$20 sps:$4 sm:$0xff]  }
 0x194   : > { %7166 = vmatpush2.bf16.msra.mxu1 %v10448_v36  ;;  %7126 = vmatprep.subr.bf16.mxu0 %v10453_v38  ;;  %v10492_v36 = vld [vmem:[%s11711_s12 + $0x1bd4] ss:$20 sps:$4 sm:$0xff]   ;;  %v10487_v38 = vld [vmem:[%s11711_s12 + $0x1950] ss:$20 sps:$4 sm:$0xff]  }
 0x195   : > { %7167 = vmatprep.subr.bf16.mxu1 %v10456_v39  ;;  %v10490_v39 = vld [vmem:[%s11711_s12 + $0x1bd0] ss:$20 sps:$4 sm:$0xff]  }
 0x197   : > { %7127 = vmatpush2.bf16.msra.mxu0 %v10451_v40  ;;  %v10495_v40 = vld [vmem:[%s11711_s12 + $0x192c] ss:$20 sps:$4 sm:$0xff]  }
 0x198   : > { %7168 = vmatpush2.bf16.msra.mxu1 %v10454_v42  ;;  %7178 = vmatprep.subr.bf16.mxu0 %v10459_v46  ;;  %v10498_v42 = vld [vmem:[%s11711_s12 + $0x1bac] ss:$20 sps:$4 sm:$0xff]   ;;  %v10496_v46 = vld [vmem:[%s11711_s12 + $0x1ba8] ss:$20 sps:$4 sm:$0xff]  }
 0x199   : > { %7219 = vmatprep.subr.bf16.mxu1 %v10462_v47  ;;  %v10501_v47 = vld [vmem:[%s11711_s12 + $0x1904] ss:$20 sps:$4 sm:$0xff]  }
 0x19a   : > { %v6884_v1 = vpop.f32.mrf.mxu0  ;;  %7129 = vmatmul.mubr.bf16.vlgmr.msra.gmra.mxu0 %v12142_v57 }
 0x19b   : > { %7170 = vmatmul.mubr.bf16.vlgmr.msra.gmra.mxu1 %v12144_v58  ;;  %v6925_v2 = vpop.f32.mrf.mxu1  ;;  %v6885_v5 = vadd.f32 %v6884_v1, %v12072_v17  ;;  %7179 = vmatpush1.bf16.msra.mxu0 %v10457_v55  ;;  %v10507_v55 = vld [vmem:[%s11711_s12 + $0x1b5c] ss:$20 sps:$4 sm:$0xff]  }
 0x19c   : > { %7220 = vmatpush1.bf16.msra.mxu1 %v10460_v56  ;;  %v6886_v6 = vpop.f32.mrf.mxu0  ;;  %7180 = vmatprep.subr.bf16.mxu0 %v10465_v59  ;;  %v10510_v56 = vld [vmem:[%s11711_s12 + $0x1ddc] ss:$20 sps:$4 sm:$0xff]   ;;  %v10505_v59 = vld [vmem:[%s11711_s12 + $0x1b58] ss:$20 sps:$4 sm:$0xff]  }
 0x19d   : > { %v6927_v7 = vpop.f32.mrf.mxu1  ;;  %7221 = vmatprep.subr.bf16.mxu1 %v10468_v60  ;;  %v6887_v14 = vadd.f32 %v6886_v6, %v12076_v23  ;;  %v12160_v15 = vadd.f32 %v6925_v2, %v6885_v5  ;;  %7210 = vmatprep.mubr.bf16.mxu0 %v12150_v63  ;;  %v10477_v23 = vld [vmem:[%s11711_s12 + $0x19a4] ss:$20 sps:$4 sm:$0xff]   ;;  %v10519_v5 = vld [vmem:[%s11711_s12 + $0x1b0c] ss:$20 sps:$4 sm:$0xff]  }
 0x19e   : > { %7251 = vmatprep.mubr.bf16.mxu1 %v12152_v0  ;;  %v6888_v17 = vpop.f32.mrf.mxu0  ;;  %v10508_v60 = vld [vmem:[%s11711_s12 + $0x1dd8] ss:$20 sps:$4 sm:$0xff]   ;;  %v10511_v1 = vld [vmem:[%s11711_s12 + $0x1b30] ss:$20 sps:$4 sm:$0xff]  }
 0x19f   : > { %v6929_v19 = vpop.f32.mrf.mxu1  ;;  %v12166_v20 = vadd.f32 %v6927_v7, %v6887_v14  ;;  %7181 = vmatpush1.bf16.msra.mxu0 %v10463_v61  ;;  %v10513_v61 = vld [vmem:[%s11711_s12 + $0x1b34] ss:$20 sps:$4 sm:$0xff]   ;;  %v10514_v2 = vld [vmem:[%s11711_s12 + $0x1db0] ss:$20 sps:$4 sm:$0xff]   ;;  %v10522_v6 = vld [vmem:[%s11711_s12 + $0x1d8c] ss:$20 sps:$4 sm:$0xff]  }
 0x1a0   : > { %7222 = vmatpush1.bf16.msra.mxu1 %v10466_v62  ;;  %v6889_v22 = vpop.f32.mrf.mxu0  ;;  %7182 = vmatprep.subr.bf16.mxu0 %v10471_v8  ;;  %v10516_v62 = vld [vmem:[%s11711_s12 + $0x1db4] ss:$20 sps:$4 sm:$0xff]   ;;  %v10528_v14 = vld [vmem:[%s11711_s12 + $0x1d64] ss:$20 sps:$4 sm:$0xff]   ;;  %v10531_v17 = vld [vmem:[%s11711_s12 + $0x1abc] ss:$20 sps:$4 sm:$0xff]  }
 0x1a1   : > { %7223 = vmatprep.subr.bf16.mxu1 %v10474_v13  ;;  %v6930_v26 = vpop.f32.mrf.mxu1  ;;  %v10517_v7 = vld [vmem:[%s11711_s12 + $0x1b08] ss:$20 sps:$4 sm:$0xff]   ;;  %v10525_v13 = vld [vmem:[%s11711_s12 + $0x1ae4] ss:$20 sps:$4 sm:$0xff]  }
 0x1a2   : > { %v10520_v8 = vld [vmem:[%s11711_s12 + $0x1d88] ss:$20 sps:$4 sm:$0xff]   ;;  %v10529_v22 = vld [vmem:[%s11711_s12 + $0x1ab8] ss:$20 sps:$4 sm:$0xff]  }
 0x1a3   : > { %7183 = vmatpush1.bf16.msra.mxu0 %v10469_v16  ;;  %v10523_v16 = vld [vmem:[%s11711_s12 + $0x1ae0] ss:$20 sps:$4 sm:$0xff]   ;;  %v10534_v19 = vld [vmem:[%s11711_s12 + $0x1d3c] ss:$20 sps:$4 sm:$0xff]  }
 0x1a4   : > { %7224 = vmatpush1.bf16.msra.mxu1 %v10472_v18  ;;  %7184 = vmatprep.subr.bf16.mxu0 %v10477_v23  ;;  %v10526_v18 = vld [vmem:[%s11711_s12 + $0x1d60] ss:$20 sps:$4 sm:$0xff]   ;;  %v10532_v23 = vld [vmem:[%s11711_s12 + $0x1d38] ss:$20 sps:$4 sm:$0xff]  }
 0x1a5   : > { %7225 = vmatprep.subr.bf16.mxu1 %v10480_v25  ;;  %v10537_v25 = vld [vmem:[%s11711_s12 + $0x1a94] ss:$20 sps:$4 sm:$0xff]  }
 0x1a6   : > { %v10540_v26 = vld [vmem:[%s11711_s12 + $0x1d14] ss:$20 sps:$4 sm:$0xff]  }
 0x1a7   : > { %7185 = vmatpush1.bf16.msra.mxu0 %v10475_v27  ;;  %v10535_v27 = vld [vmem:[%s11711_s12 + $0x1a90] ss:$20 sps:$4 sm:$0xff]  }
 0x1a8   : > { %7226 = vmatpush1.bf16.msra.mxu1 %v10478_v28  ;;  %7186 = vmatprep.subr.bf16.mxu0 %v10483_v30  ;;  %v10538_v28 = vld [vmem:[%s11711_s12 + $0x1d10] ss:$20 sps:$4 sm:$0xff]   ;;  %v10543_v30 = vld [vmem:[%s11711_s12 + $0x1a6c] ss:$20 sps:$4 sm:$0xff]  }
 0x1a9   : > { %7227 = vmatprep.subr.bf16.mxu1 %v10486_v31  ;;  %v10546_v31 = vld [vmem:[%s11711_s12 + $0x1cec] ss:$20 sps:$4 sm:$0xff]  }
 0x1ab   : > { %7187 = vmatpush1.bf16.msra.mxu0 %v10481_v32  ;;  %v10541_v32 = vld [vmem:[%s11711_s12 + $0x1a68] ss:$20 sps:$4 sm:$0xff]  }
 0x1ac   : > { %7228 = vmatpush1.bf16.msra.mxu1 %v10484_v34  ;;  %7188 = vmatprep.subr.bf16.mxu0 %v10489_v35  ;;  %v10544_v34 = vld [vmem:[%s11711_s12 + $0x1ce8] ss:$20 sps:$4 sm:$0xff]   ;;  %v10549_v35 = vld [vmem:[%s11711_s12 + $0x1a44] ss:$20 sps:$4 sm:$0xff]  }
 0x1ad   : > { %7229 = vmatprep.subr.bf16.mxu1 %v10492_v36  ;;  %v10552_v36 = vld [vmem:[%s11711_s12 + $0x1cc4] ss:$20 sps:$4 sm:$0xff]  }
 0x1af   : > { %7189 = vmatpush1.bf16.msra.mxu0 %v10487_v38  ;;  %v10547_v38 = vld [vmem:[%s11711_s12 + $0x1a40] ss:$20 sps:$4 sm:$0xff]  }
 0x1b0   : > { %7230 = vmatpush1.bf16.msra.mxu1 %v10490_v39  ;;  %7190 = vmatprep.subr.bf16.mxu0 %v10495_v40  ;;  %v10550_v39 = vld [vmem:[%s11711_s12 + $0x1cc0] ss:$20 sps:$4 sm:$0xff]   ;;  %v338_v40 = vld [vmem:[%s11730_s5 + $0xa0] sm:$0xff] }
 0x1b1   : > { %7231 = vmatprep.subr.bf16.mxu1 %v10498_v42  ;;  %v340_v42 = vld [vmem:[%s11730_s5 + $0xb0] sm:$0xff] }
 0x1b3   : > { %7191 = vmatpush1.bf16.msra.mxu0 %v10493_v45  ;;  %v10555_v45 = vld [vmem:[%s11711_s12 + $0x1f1c] ss:$20 sps:$4 sm:$0xff]  }
 0x1b4   : > { %7232 = vmatpush1.bf16.msra.mxu1 %v10496_v46  ;;  %7192 = vmatprep.subr.bf16.mxu0 %v10501_v47  ;;  %v10558_v46 = vld [vmem:[%s11711_s12 + $0x124] ss:$20 sps:$4 sm:$0xff]  }
 0x1b5   : > { %7233 = vmatprep.subr.bf16.mxu1 %v10504_v48  ;;  %v10553_v47 = vld [vmem:[%s11711_s12 + $0x1f18] ss:$20 sps:$4 sm:$0xff]   ;;  %v10556_v48 = vld [vmem:[%s11711_s12 + $0x120] ss:$20 sps:$4 sm:$0xff]  }
 0x1b7   : > { %7193 = vmatpush1.bf16.msra.mxu0 %v10499_v52  ;;  %v12226_v52 = vpack.c.bf16 %v338_v40, %v338_v40  ;;  %v10594_v40 = vld [vmem:[%s11711_s12 + $0x34] ss:$20 sps:$4 sm:$0xff]  }
 0x1b8   : > { %7234 = vmatpush1.bf16.msra.mxu1 %v10502_v54  ;;  %7194 = vmatprep.subr.bf16.mxu0 %v10507_v55  ;;  %v12228_v54 = vpack.c.bf16 %v340_v42, %v340_v42  ;;  %v10561_v55 = vld [vmem:[%s11711_s12 + $0x1ef4] ss:$20 sps:$4 sm:$0xff]  }
 0x1b9   : > { %7235 = vmatprep.subr.bf16.mxu1 %v10510_v56  ;;  %v10564_v56 = vld [vmem:[%s11711_s12 + $0xfc] ss:$20 sps:$4 sm:$0xff]  }
 0x1ba   : > { %v10589_v42 = vld [vmem:[%s11711_s12 + $0x1e28] ss:$20 sps:$4 sm:$0xff]  }
 0x1bb   : > { %7195 = vmatpush2.bf16.msra.mxu0 %v10505_v59  ;;  %v10559_v59 = vld [vmem:[%s11711_s12 + $0x1ef0] ss:$20 sps:$4 sm:$0xff]  }
 0x1bc   : > { %7236 = vmatpush2.bf16.msra.mxu1 %v10508_v60  ;;  %7196 = vmatprep.subr.bf16.mxu0 %v10513_v61  ;;  %v10562_v60 = vld [vmem:[%s11711_s12 + $0xf8] ss:$20 sps:$4 sm:$0xff]  }
 0x1bd   : > { %7237 = vmatprep.subr.bf16.mxu1 %v10516_v62 }
 0x1bf   : > { %7197 = vmatpush2.bf16.msra.mxu0 %v10511_v1 }
 0x1c0   : > { %7238 = vmatpush2.bf16.msra.mxu1 %v10514_v2  ;;  %7198 = vmatprep.subr.bf16.mxu0 %v10519_v5 }
 0x1c1   : > { %7239 = vmatprep.subr.bf16.mxu1 %v10522_v6  ;;  %v10567_v6 = vld [vmem:[%s11711_s12 + $0x1ecc] ss:$20 sps:$4 sm:$0xff]  }
 0x1c3   : > { %7199 = vmatpush2.bf16.msra.mxu0 %v10517_v7  ;;  %v10570_v7 = vld [vmem:[%s11711_s12 + $0xd4] ss:$20 sps:$4 sm:$0xff]  }
 0x1c4   : > { %7240 = vmatpush2.bf16.msra.mxu1 %v10520_v8  ;;  %7200 = vmatprep.subr.bf16.mxu0 %v10525_v13 }
 0x1c5   : > { %7241 = vmatprep.subr.bf16.mxu1 %v10528_v14  ;;  %v10565_v14 = vld [vmem:[%s11711_s12 + $0x1ec8] ss:$20 sps:$4 sm:$0xff]  }
 0x1c7   : > { %7201 = vmatpush2.bf16.msra.mxu0 %v10523_v16  ;;  %v10568_v16 = vld [vmem:[%s11711_s12 + $0xd0] ss:$20 sps:$4 sm:$0xff]  }
 0x1c8   : > { %7242 = vmatpush2.bf16.msra.mxu1 %v10526_v18  ;;  %7202 = vmatprep.subr.bf16.mxu0 %v10531_v17  ;;  %v11535_v18 = vmov 0  }
 0x1c9   : > { %7243 = vmatprep.subr.bf16.mxu1 %v10534_v19 }
 0x1cb   : > { %7203 = vmatpush2.bf16.msra.mxu0 %v10529_v22  ;;  %v10573_v22 = vld [vmem:[%s11711_s12 + $0x1ea4] ss:$20 sps:$4 sm:$0xff]  }
 0x1cc   : > { %7244 = vmatpush2.bf16.msra.mxu1 %v10532_v23  ;;  %7204 = vmatprep.subr.bf16.mxu0 %v10537_v25  ;;  %v10576_v23 = vld [vmem:[%s11711_s12 + $0xac] ss:$20 sps:$4 sm:$0xff]  }
 0x1cd   : > { %7245 = vmatprep.subr.bf16.mxu1 %v10540_v26  ;;  %v10571_v26 = vld [vmem:[%s11711_s12 + $0x1ea0] ss:$20 sps:$4 sm:$0xff]  }
 0x1cf   : > { %7205 = vmatpush2.bf16.msra.mxu0 %v10535_v27  ;;  %v10574_v27 = vld [vmem:[%s11711_s12 + $0xa8] ss:$20 sps:$4 sm:$0xff]  }
 0x1d0   : > { %7246 = vmatpush2.bf16.msra.mxu1 %v10538_v28  ;;  %7206 = vmatprep.subr.bf16.mxu0 %v10543_v30  ;;  %v10579_v28 = vld [vmem:[%s11711_s12 + $0x1e7c] ss:$20 sps:$4 sm:$0xff]   ;;  %v10582_v30 = vld [vmem:[%s11711_s12 + $0x84] ss:$20 sps:$4 sm:$0xff]  }
 0x1d1   : > { %7247 = vmatprep.subr.bf16.mxu1 %v10546_v31  ;;  %v10577_v31 = vld [vmem:[%s11711_s12 + $0x1e78] ss:$20 sps:$4 sm:$0xff]  }
 0x1d3   : > { %7207 = vmatpush2.bf16.msra.mxu0 %v10541_v32  ;;  %v10580_v32 = vld [vmem:[%s11711_s12 + $0x80] ss:$20 sps:$4 sm:$0xff]  }
 0x1d4   : > { %7248 = vmatpush2.bf16.msra.mxu1 %v10544_v34  ;;  %7208 = vmatprep.subr.bf16.mxu0 %v10549_v35  ;;  %v10585_v34 = vld [vmem:[%s11711_s12 + $0x1e54] ss:$20 sps:$4 sm:$0xff]   ;;  %v10588_v35 = vld [vmem:[%s11711_s12 + $0x5c] ss:$20 sps:$4 sm:$0xff]  }
 0x1d5   : > { %7249 = vmatprep.subr.bf16.mxu1 %v10552_v36  ;;  %v10583_v36 = vld [vmem:[%s11711_s12 + $0x1e50] ss:$20 sps:$4 sm:$0xff]  }
 0x1d7   : > { %7209 = vmatpush2.bf16.msra.mxu0 %v10547_v38  ;;  %v10586_v38 = vld [vmem:[%s11711_s12 + $0x58] ss:$20 sps:$4 sm:$0xff]  }
 0x1d8   : > { %7250 = vmatpush2.bf16.msra.mxu1 %v10550_v39  ;;  %7260 = vmatprep.subr.bf16.mxu0 %v10555_v45  ;;  %v10591_v39 = vld [vmem:[%s11711_s12 + $0x1e2c] ss:$20 sps:$4 sm:$0xff]   ;;  %v10592_v45 = vld [vmem:[%s11711_s12 + $0x30] ss:$20 sps:$4 sm:$0xff]  }
 0x1d9   : > { %7301 = vmatprep.subr.bf16.mxu1 %v10558_v46  ;;  %v10597_v46 = vld [vmem:[%s11711_s12 + $0x1e04] ss:$20 sps:$4 sm:$0xff]  }
 0x1da   : > { %v6966_v61 = vpop.f32.mrf.mxu0  ;;  %7211 = vmatmul.mubr.bf16.vlgmr.msra.gmra.mxu0 %v12226_v52 }
 0x1db   : > { %7252 = vmatmul.mubr.bf16.vlgmr.msra.gmra.mxu1 %v12228_v54  ;;  %v7007_v62 = vpop.f32.mrf.mxu1  ;;  %v6967_v1 = vadd.f32 %v6966_v61, %v12160_v15  ;;  %7261 = vmatpush1.bf16.msra.mxu0 %v10553_v47  ;;  %v10600_v47 = vld [vmem:[%s11711_s12 + $0xc] ss:$20 sps:$4 sm:$0xff]  }
 0x1dc   : > { %7302 = vmatpush1.bf16.msra.mxu1 %v10556_v48  ;;  %v6968_v2 = vpop.f32.mrf.mxu0  ;;  %7262 = vmatprep.subr.bf16.mxu0 %v10561_v55  ;;  %v10595_v48 = vld [vmem:[%s11711_s12 + $0x1e00] ss:$20 sps:$4 sm:$0xff]   ;;  %v10598_v55 = vld [vmem:[%s11711_s12 + $0x8] ss:$20 sps:$4 sm:$0xff]  }
 0x1dd   : > { %v7009_v5 = vpop.f32.mrf.mxu1  ;;  %7303 = vmatprep.subr.bf16.mxu1 %v10564_v56  ;;  %v6969_v8 = vadd.f32 %v6968_v2, %v12166_v20  ;;  %v12240_v13 = vadd.f32 %v7007_v62, %v6967_v1  ;;  %7292 = vmatprep.mubr.bf16.mxu0 %v11535_v18  ;;  %v342_v56 = vld [vmem:[%s11730_s5 + $0xc0] sm:$0xff]  ;;  %v10601_v61 = vld [vmem:[%s11711_s12 + $0x260] ss:$20 sps:$4 sm:$0xff]  }
 0x1de   : > { %7333 = vmatprep.mubr.bf16.mxu1 %v11787_v50  ;;  %v6970_v15 = vpop.f32.mrf.mxu0  ;;  %v10604_v62 = vld [vmem:[%s11711_s12 + $0x3a0] ss:$20 sps:$4 sm:$0xff]   ;;  %v12273_v1 = vpack.c.bf16 %v342_v56, %v342_v56  ;;  %v10609_v2 = vld [vmem:[%s11711_s12 + $0x23c] ss:$20 sps:$4 sm:$0xff]  }
 0x1df   : > { %v7011_v17 = vpop.f32.mrf.mxu1  ;;  %v12246_v19 = vadd.f32 %v7009_v5, %v6969_v8  ;;  %7263 = vmatpush1.bf16.msra.mxu0 %v10559_v59  ;;  %v10603_v59 = vld [vmem:[%s11711_s12 + $0x264] ss:$20 sps:$4 sm:$0xff]   ;;  %v10612_v5 = vld [vmem:[%s11711_s12 + $0x37c] ss:$20 sps:$4 sm:$0xff]   ;;  %v10615_v8 = vld [vmem:[%s11711_s12 + $0x214] ss:$20 sps:$4 sm:$0xff]  }
 0x1e0   : > { %7304 = vmatpush1.bf16.msra.mxu1 %v10562_v60  ;;  %v6971_v20 = vpop.f32.mrf.mxu0  ;;  %7264 = vmatprep.subr.bf16.mxu0 %v10567_v6  ;;  %v10606_v60 = vld [vmem:[%s11711_s12 + $0x3a4] ss:$20 sps:$4 sm:$0xff]   ;;  %v10621_v17 = vld [vmem:[%s11711_s12 + $0x1ec] ss:$20 sps:$4 sm:$0xff]  }
 0x1e1   : > { %7305 = vmatprep.subr.bf16.mxu1 %v10570_v7  ;;  %v7012_v25 = vpop.f32.mrf.mxu1  ;;  %v10607_v6 = vld [vmem:[%s11711_s12 + $0x238] ss:$20 sps:$4 sm:$0xff]   ;;  %v10616_v15 = vld [vmem:[%s11711_s12 + $0x350] ss:$20 sps:$4 sm:$0xff]   ;;  %v10652_v56 = vld [vmem:[%s11711_s12 + $0x620] ss:$20 sps:$4 sm:$0xff]  }
 0x1e2   : > { %v10610_v7 = vld [vmem:[%s11711_s12 + $0x378] ss:$20 sps:$4 sm:$0xff]  }
 0x1e3   : > { %7265 = vmatpush1.bf16.msra.mxu0 %v10565_v14  ;;  %v10618_v14 = vld [vmem:[%s11711_s12 + $0x354] ss:$20 sps:$4 sm:$0xff]   ;;  %v10624_v20 = vld [vmem:[%s11711_s12 + $0x32c] ss:$20 sps:$4 sm:$0xff]   ;;  %v10627_v25 = vld [vmem:[%s11711_s12 + $0x1c4] ss:$20 sps:$4 sm:$0xff]  }
 0x1e4   : > { %7306 = vmatpush1.bf16.msra.mxu1 %v10568_v16  ;;  %7266 = vmatprep.subr.bf16.mxu0 %v10573_v22  ;;  %v10613_v16 = vld [vmem:[%s11711_s12 + $0x210] ss:$20 sps:$4 sm:$0xff]   ;;  %v10619_v22 = vld [vmem:[%s11711_s12 + $0x1e8] ss:$20 sps:$4 sm:$0xff]  }
 0x1e5   : > { %7307 = vmatprep.subr.bf16.mxu1 %v10576_v23  ;;  %v10622_v23 = vld [vmem:[%s11711_s12 + $0x328] ss:$20 sps:$4 sm:$0xff]  }
 0x1e7   : > { %7267 = vmatpush1.bf16.msra.mxu0 %v10571_v26  ;;  %v10630_v26 = vld [vmem:[%s11711_s12 + $0x304] ss:$20 sps:$4 sm:$0xff]  }
 0x1e8   : > { %7308 = vmatpush1.bf16.msra.mxu1 %v10574_v27  ;;  %7268 = vmatprep.subr.bf16.mxu0 %v10579_v28  ;;  %v10625_v27 = vld [vmem:[%s11711_s12 + $0x1c0] ss:$20 sps:$4 sm:$0xff]  }
 0x1e9   : > { %7309 = vmatprep.subr.bf16.mxu1 %v10582_v30  ;;  %v10628_v28 = vld [vmem:[%s11711_s12 + $0x300] ss:$20 sps:$4 sm:$0xff]   ;;  %v10633_v30 = vld [vmem:[%s11711_s12 + $0x19c] ss:$20 sps:$4 sm:$0xff]  }
 0x1eb   : > { %7269 = vmatpush1.bf16.msra.mxu0 %v10577_v31  ;;  %v10636_v31 = vld [vmem:[%s11711_s12 + $0x2dc] ss:$20 sps:$4 sm:$0xff]  }
 0x1ec   : > { %7310 = vmatpush1.bf16.msra.mxu1 %v10580_v32  ;;  %7270 = vmatprep.subr.bf16.mxu0 %v10585_v34  ;;  %v10631_v32 = vld [vmem:[%s11711_s12 + $0x198] ss:$20 sps:$4 sm:$0xff]  }
 0x1ed   : > { %7311 = vmatprep.subr.bf16.mxu1 %v10588_v35  ;;  %v10634_v34 = vld [vmem:[%s11711_s12 + $0x2d8] ss:$20 sps:$4 sm:$0xff]   ;;  %v10639_v35 = vld [vmem:[%s11711_s12 + $0x174] ss:$20 sps:$4 sm:$0xff]  }
 0x1ef   : > { %7271 = vmatpush1.bf16.msra.mxu0 %v10583_v36  ;;  %v10642_v36 = vld [vmem:[%s11711_s12 + $0x2b4] ss:$20 sps:$4 sm:$0xff]  }
 0x1f0   : > { %7312 = vmatpush1.bf16.msra.mxu1 %v10586_v38  ;;  %7272 = vmatprep.subr.bf16.mxu0 %v10591_v39  ;;  %v10637_v38 = vld [vmem:[%s11711_s12 + $0x170] ss:$20 sps:$4 sm:$0xff]  }
 0x1f1   : > { %7313 = vmatprep.subr.bf16.mxu1 %v10594_v40  ;;  %v10640_v39 = vld [vmem:[%s11711_s12 + $0x2b0] ss:$20 sps:$4 sm:$0xff]   ;;  %v10645_v40 = vld [vmem:[%s11711_s12 + $0x14c] ss:$20 sps:$4 sm:$0xff]  }
 0x1f3   : > { %7273 = vmatpush1.bf16.msra.mxu0 %v10589_v42  ;;  %v10648_v42 = vld [vmem:[%s11711_s12 + $0x28c] ss:$20 sps:$4 sm:$0xff]  }
 0x1f4   : > { %7314 = vmatpush1.bf16.msra.mxu1 %v10592_v45  ;;  %7274 = vmatprep.subr.bf16.mxu0 %v10597_v46  ;;  %v10643_v45 = vld [vmem:[%s11711_s12 + $0x148] ss:$20 sps:$4 sm:$0xff]  }
 0x1f5   : > { %7315 = vmatprep.subr.bf16.mxu1 %v10600_v47  ;;  %v10646_v46 = vld [vmem:[%s11711_s12 + $0x288] ss:$20 sps:$4 sm:$0xff]   ;;  %v10651_v47 = vld [vmem:[%s11711_s12 + $0x4e4] ss:$20 sps:$4 sm:$0xff]  }
 0x1f7   : > { %7275 = vmatpush1.bf16.msra.mxu0 %v10595_v48  ;;  %v10654_v48 = vld [vmem:[%s11711_s12 + $0x624] ss:$20 sps:$4 sm:$0xff]  }
 0x1f8   : > { %7316 = vmatpush1.bf16.msra.mxu1 %v10598_v55  ;;  %7342 = vmatprep.subr.bf16.mxu0 %v10606_v60  ;;  %v10649_v55 = vld [vmem:[%s11711_s12 + $0x4e0] ss:$20 sps:$4 sm:$0xff]   ;;  %v10660_v60 = vld [vmem:[%s11711_s12 + $0x5fc] ss:$20 sps:$4 sm:$0xff]  }
 0x1f9   : > { %7317 = vmatprep.subr.bf16.mxu1 %v10603_v59  ;;  %v10657_v59 = vld [vmem:[%s11711_s12 + $0x4bc] ss:$20 sps:$4 sm:$0xff]  }
 0x1fa   : > { %7293 = vmatmul.mubr.bf16.vlgmr.msra.gmra.mxu0 %v12273_v1 }
 0x1fb   : > { %7343 = vmatpush1.bf16.msra.mxu0 %v10604_v62  ;;  %7374 = vmatprep.mubr.bf16.mxu0 %v11791_v53  ;;  %v10658_v62 = vld [vmem:[%s11711_s12 + $0x5f8] ss:$20 sps:$4 sm:$0xff]  }
 0x1fc   : > { %7318 = vmatpush2.bf16.msra.mxu1 %v10601_v61  ;;  %7344 = vmatprep.subr.bf16.mxu0 %v10612_v5  ;;  %v10655_v61 = vld [vmem:[%s11711_s12 + $0x4b8] ss:$20 sps:$4 sm:$0xff]  }
 0x1fd   : > { %7319 = vmatprep.subr.bf16.mxu1 %v10609_v2 }
 0x1ff   : > { %7345 = vmatpush1.bf16.msra.mxu0 %v10610_v7 }
 0x200   : > { %7320 = vmatpush2.bf16.msra.mxu1 %v10607_v6  ;;  %7346 = vmatprep.subr.bf16.mxu0 %v10618_v14  ;;  %v10663_v14 = vld [vmem:[%s11711_s12 + $0x494] ss:$20 sps:$4 sm:$0xff]  }
 0x201   : > { %7321 = vmatprep.subr.bf16.mxu1 %v10615_v8 }
 0x203   : > { %7347 = vmatpush1.bf16.msra.mxu0 %v10616_v15 }
 0x204   : > { %7322 = vmatpush2.bf16.msra.mxu1 %v10613_v16  ;;  %7348 = vmatprep.subr.bf16.mxu0 %v10624_v20  ;;  %v10666_v16 = vld [vmem:[%s11711_s12 + $0x5d4] ss:$20 sps:$4 sm:$0xff]   ;;  %v10661_v20 = vld [vmem:[%s11711_s12 + $0x490] ss:$20 sps:$4 sm:$0xff]  }
 0x205   : > { %7323 = vmatprep.subr.bf16.mxu1 %v10621_v17 }
 0x207   : > { %7349 = vmatpush1.bf16.msra.mxu0 %v10622_v23 }
 0x208   : > { %7324 = vmatpush2.bf16.msra.mxu1 %v10619_v22  ;;  %7350 = vmatprep.subr.bf16.mxu0 %v10630_v26  ;;  %v10664_v22 = vld [vmem:[%s11711_s12 + $0x5d0] ss:$20 sps:$4 sm:$0xff]  }
 0x209   : > { %7325 = vmatprep.subr.bf16.mxu1 %v10627_v25 }
 0x20b   : > { %7351 = vmatpush1.bf16.msra.mxu0 %v10628_v28 }
 0x20c   : > { %7326 = vmatpush2.bf16.msra.mxu1 %v10625_v27  ;;  %7352 = vmatprep.subr.bf16.mxu0 %v10636_v31  ;;  %v10672_v27 = vld [vmem:[%s11711_s12 + $0x5ac] ss:$20 sps:$4 sm:$0xff]   ;;  %v10670_v31 = vld [vmem:[%s11711_s12 + $0x5a8] ss:$20 sps:$4 sm:$0xff]  }
 0x20d   : > { %7327 = vmatprep.subr.bf16.mxu1 %v10633_v30  ;;  %v10667_v30 = vld [vmem:[%s11711_s12 + $0x468] ss:$20 sps:$4 sm:$0xff]  }
 0x20f   : > { %7353 = vmatpush1.bf16.msra.mxu0 %v10634_v34  ;;  %v10678_v34 = vld [vmem:[%s11711_s12 + $0x584] ss:$20 sps:$4 sm:$0xff]  }
 0x210   : > { %7328 = vmatpush2.bf16.msra.mxu1 %v10631_v32  ;;  %7354 = vmatprep.subr.bf16.mxu0 %v10642_v36  ;;  %v10675_v32 = vld [vmem:[%s11711_s12 + $0x444] ss:$20 sps:$4 sm:$0xff]   ;;  %v10676_v36 = vld [vmem:[%s11711_s12 + $0x580] ss:$20 sps:$4 sm:$0xff]  }
 0x211   : > { %7329 = vmatprep.subr.bf16.mxu1 %v10639_v35  ;;  %v10673_v35 = vld [vmem:[%s11711_s12 + $0x440] ss:$20 sps:$4 sm:$0xff]  }
 0x213   : > { %7355 = vmatpush1.bf16.msra.mxu0 %v10640_v39  ;;  %v10684_v39 = vld [vmem:[%s11711_s12 + $0x55c] ss:$20 sps:$4 sm:$0xff]  }
 0x214   : > { %7330 = vmatpush2.bf16.msra.mxu1 %v10637_v38  ;;  %7356 = vmatprep.subr.bf16.mxu0 %v10648_v42  ;;  %v10681_v38 = vld [vmem:[%s11711_s12 + $0x41c] ss:$20 sps:$4 sm:$0xff]   ;;  %v10682_v42 = vld [vmem:[%s11711_s12 + $0x558] ss:$20 sps:$4 sm:$0xff]  }
 0x215   : > { %7331 = vmatprep.subr.bf16.mxu1 %v10645_v40  ;;  %v10679_v40 = vld [vmem:[%s11711_s12 + $0x418] ss:$20 sps:$4 sm:$0xff]  }
 0x217   : > { %7357 = vmatpush1.bf16.msra.mxu0 %v10646_v46  ;;  %v10690_v46 = vld [vmem:[%s11711_s12 + $0x534] ss:$20 sps:$4 sm:$0xff]  }
 0x218   : > { %7332 = vmatpush2.bf16.msra.mxu1 %v10643_v45  ;;  %7358 = vmatprep.subr.bf16.mxu0 %v10651_v47  ;;  %v10687_v45 = vld [vmem:[%s11711_s12 + $0x3f4] ss:$20 sps:$4 sm:$0xff]   ;;  %v10685_v47 = vld [vmem:[%s11711_s12 + $0x3f0] ss:$20 sps:$4 sm:$0xff]  }
 0x219   : > { %7383 = vmatprep.subr.bf16.mxu1 %v10654_v48  ;;  %v10688_v48 = vld [vmem:[%s11711_s12 + $0x530] ss:$20 sps:$4 sm:$0xff]  }
 0x21a   : > { %v7048_v2 = vpop.f32.mrf.mxu0 }
 0x21b   : > { %7334 = vmatmul.mubr.bf16.vlgmr.msra.gmra.mxu1 %v11814_v9  ;;  %v7089_v5 = vpop.f32.mrf.mxu1  ;;  %v7049_v6 = vadd.f32 %v7048_v2, %v12240_v13  ;;  %7359 = vmatpush2.bf16.msra.mxu0 %v10649_v55  ;;  %v10693_v55 = vld [vmem:[%s11711_s12 + $0x3cc] ss:$20 sps:$4 sm:$0xff]  }
 0x21c   : > { %7384 = vmatpush1.bf16.msra.mxu1 %v10652_v56  ;;  %v7050_v7 = vpop.f32.mrf.mxu0  ;;  %7360 = vmatprep.subr.bf16.mxu0 %v10657_v59  ;;  %v10696_v56 = vld [vmem:[%s11711_s12 + $0x50c] ss:$20 sps:$4 sm:$0xff]   ;;  %v10691_v59 = vld [vmem:[%s11711_s12 + $0x3c8] ss:$20 sps:$4 sm:$0xff]  }
 0x21d   : > { %v7091_v8 = vpop.f32.mrf.mxu1  ;;  %7385 = vmatprep.subr.bf16.mxu1 %v10660_v60  ;;  %v7051_v15 = vadd.f32 %v7050_v7, %v12246_v19  ;;  %v12318_v17 = vadd.f32 %v7089_v5, %v7049_v6  ;;  %7415 = vmatprep.mubr.bf16.mxu1 %v11846_v37  ;;  %v10669_v19 = vld [vmem:[%s11711_s12 + $0x46c] ss:$20 sps:$4 sm:$0xff]   ;;  %v10694_v60 = vld [vmem:[%s11711_s12 + $0x508] ss:$20 sps:$4 sm:$0xff]  }
 0x21e   : > { %v7052_v13 = vpop.f32.mrf.mxu0  ;;  %v10697_v2 = vld [vmem:[%s11711_s12 + $0x760] ss:$20 sps:$4 sm:$0xff]   ;;  %v10705_v6 = vld [vmem:[%s11711_s12 + $0x73c] ss:$20 sps:$4 sm:$0xff]  }
 0x21f   : > { %v7093_v23 = vpop.f32.mrf.mxu1  ;;  %v12323_v25 = vadd.f32 %v7091_v8, %v7051_v15  ;;  %7361 = vmatpush2.bf16.msra.mxu0 %v10655_v61  ;;  %v10699_v61 = vld [vmem:[%s11711_s12 + $0x764] ss:$20 sps:$4 sm:$0xff]   ;;  %v10700_v5 = vld [vmem:[%s11711_s12 + $0x8a0] ss:$20 sps:$4 sm:$0xff]   ;;  %v10708_v7 = vld [vmem:[%s11711_s12 + $0x87c] ss:$20 sps:$4 sm:$0xff]  }
 0x220   : > { %7386 = vmatpush1.bf16.msra.mxu1 %v10658_v62  ;;  %v7053_v26 = vpop.f32.mrf.mxu0  ;;  %7362 = vmatprep.subr.bf16.mxu0 %v10663_v14  ;;  %v10702_v62 = vld [vmem:[%s11711_s12 + $0x8a4] ss:$20 sps:$4 sm:$0xff]   ;;  %v10714_v15 = vld [vmem:[%s11711_s12 + $0x854] ss:$20 sps:$4 sm:$0xff]   ;;  %v10717_v13 = vld [vmem:[%s11711_s12 + $0x6ec] ss:$20 sps:$4 sm:$0xff]  }
 0x221   : > { %7387 = vmatprep.subr.bf16.mxu1 %v10666_v16  ;;  %v7094_v28 = vpop.f32.mrf.mxu1  ;;  %v10703_v8 = vld [vmem:[%s11711_s12 + $0x738] ss:$20 sps:$4 sm:$0xff]   ;;  %v10711_v16 = vld [vmem:[%s11711_s12 + $0x714] ss:$20 sps:$4 sm:$0xff]  }
 0x222   : > { %v10706_v14 = vld [vmem:[%s11711_s12 + $0x878] ss:$20 sps:$4 sm:$0xff]   ;;  %v10715_v26 = vld [vmem:[%s11711_s12 + $0x6e8] ss:$20 sps:$4 sm:$0xff]  }
 0x223   : > { %7363 = vmatpush2.bf16.msra.mxu0 %v10661_v20  ;;  %v10709_v20 = vld [vmem:[%s11711_s12 + $0x710] ss:$20 sps:$4 sm:$0xff]   ;;  %v10720_v23 = vld [vmem:[%s11711_s12 + $0x82c] ss:$20 sps:$4 sm:$0xff]  }
 0x224   : > { %7388 = vmatpush1.bf16.msra.mxu1 %v10664_v22  ;;  %7364 = vmatprep.subr.bf16.mxu0 %v10669_v19  ;;  %v10712_v22 = vld [vmem:[%s11711_s12 + $0x850] ss:$20 sps:$4 sm:$0xff]   ;;  %v10718_v19 = vld [vmem:[%s11711_s12 + $0x828] ss:$20 sps:$4 sm:$0xff]  }
 0x225   : > { %7389 = vmatprep.subr.bf16.mxu1 %v10672_v27  ;;  %v10723_v27 = vld [vmem:[%s11711_s12 + $0x6c4] ss:$20 sps:$4 sm:$0xff]  }
 0x226   : > { %v10726_v28 = vld [vmem:[%s11711_s12 + $0x804] ss:$20 sps:$4 sm:$0xff]  }
 0x227   : > { %7365 = vmatpush2.bf16.msra.mxu0 %v10667_v30  ;;  %v10721_v30 = vld [vmem:[%s11711_s12 + $0x6c0] ss:$20 sps:$4 sm:$0xff]  }
 0x228   : > { %7390 = vmatpush1.bf16.msra.mxu1 %v10670_v31  ;;  %7366 = vmatprep.subr.bf16.mxu0 %v10675_v32  ;;  %v10724_v31 = vld [vmem:[%s11711_s12 + $0x800] ss:$20 sps:$4 sm:$0xff]   ;;  %v10729_v32 = vld [vmem:[%s11711_s12 + $0x69c] ss:$20 sps:$4 sm:$0xff]  }
 0x229   : > { %7391 = vmatprep.subr.bf16.mxu1 %v10678_v34  ;;  %v10732_v34 = vld [vmem:[%s11711_s12 + $0x7dc] ss:$20 sps:$4 sm:$0xff]  }
 0x22b   : > { %7367 = vmatpush2.bf16.msra.mxu0 %v10673_v35  ;;  %v10727_v35 = vld [vmem:[%s11711_s12 + $0x698] ss:$20 sps:$4 sm:$0xff]  }
 0x22c   : > { %7392 = vmatpush1.bf16.msra.mxu1 %v10676_v36  ;;  %7368 = vmatprep.subr.bf16.mxu0 %v10681_v38  ;;  %v10730_v36 = vld [vmem:[%s11711_s12 + $0x7d8] ss:$20 sps:$4 sm:$0xff]   ;;  %v10735_v38 = vld [vmem:[%s11711_s12 + $0x674] ss:$20 sps:$4 sm:$0xff]  }
 0x22d   : > { %7393 = vmatprep.subr.bf16.mxu1 %v10684_v39  ;;  %v10738_v39 = vld [vmem:[%s11711_s12 + $0x7b4] ss:$20 sps:$4 sm:$0xff]  }
 0x22f   : > { %7369 = vmatpush2.bf16.msra.mxu0 %v10679_v40  ;;  %v10733_v40 = vld [vmem:[%s11711_s12 + $0x670] ss:$20 sps:$4 sm:$0xff]  }
 0x230   : > { %7394 = vmatpush1.bf16.msra.mxu1 %v10682_v42  ;;  %7370 = vmatprep.subr.bf16.mxu0 %v10687_v45  ;;  %v10736_v42 = vld [vmem:[%s11711_s12 + $0x7b0] ss:$20 sps:$4 sm:$0xff]   ;;  %v10741_v45 = vld [vmem:[%s11711_s12 + $0x64c] ss:$20 sps:$4 sm:$0xff]  }
 0x231   : > { %7395 = vmatprep.subr.bf16.mxu1 %v10690_v46  ;;  %v10744_v46 = vld [vmem:[%s11711_s12 + $0x78c] ss:$20 sps:$4 sm:$0xff]  }
 0x233   : > { %7371 = vmatpush2.bf16.msra.mxu0 %v10685_v47  ;;  %v10739_v47 = vld [vmem:[%s11711_s12 + $0x648] ss:$20 sps:$4 sm:$0xff]  }
 0x234   : > { %7396 = vmatpush1.bf16.msra.mxu1 %v10688_v48  ;;  %7372 = vmatprep.subr.bf16.mxu0 %v10693_v55  ;;  %v10742_v48 = vld [vmem:[%s11711_s12 + $0x788] ss:$20 sps:$4 sm:$0xff]   ;;  %v10747_v55 = vld [vmem:[%s11711_s12 + $0x9e4] ss:$20 sps:$4 sm:$0xff]  }
 0x235   : > { %7397 = vmatprep.subr.bf16.mxu1 %v10696_v56  ;;  %v10750_v56 = vld [vmem:[%s11711_s12 + $0xb24] ss:$20 sps:$4 sm:$0xff]  }
 0x237   : > { %7373 = vmatpush2.bf16.msra.mxu0 %v10691_v59  ;;  %v10745_v59 = vld [vmem:[%s11711_s12 + $0x9e0] ss:$20 sps:$4 sm:$0xff]  }
 0x238   : > { %7398 = vmatpush1.bf16.msra.mxu1 %v10694_v60  ;;  %7424 = vmatprep.subr.bf16.mxu0 %v10702_v62  ;;  %v10748_v60 = vld [vmem:[%s11711_s12 + $0xb20] ss:$20 sps:$4 sm:$0xff]   ;;  %v10756_v62 = vld [vmem:[%s11711_s12 + $0xafc] ss:$20 sps:$4 sm:$0xff]  }
 0x239   : > { %7399 = vmatprep.subr.bf16.mxu1 %v10699_v61  ;;  %v10753_v61 = vld [vmem:[%s11711_s12 + $0x9bc] ss:$20 sps:$4 sm:$0xff]  }
 0x23a   : > { %7375 = vmatmul.mubr.bf16.vlgmr.msra.gmra.mxu0 %v11816_v10 }
 0x23b   : > { %7425 = vmatpush1.bf16.msra.mxu0 %v10700_v5  ;;  %7456 = vmatprep.mubr.bf16.mxu0 %v11851_v41 }
 0x23c   : > { %7400 = vmatpush2.bf16.msra.mxu1 %v10697_v2  ;;  %7426 = vmatprep.subr.bf16.mxu0 %v10708_v7  ;;  %v10751_v7 = vld [vmem:[%s11711_s12 + $0x9b8] ss:$20 sps:$4 sm:$0xff]  }
 0x23d   : > { %7401 = vmatprep.subr.bf16.mxu1 %v10705_v6 }
 0x23f   : > { %7427 = vmatpush1.bf16.msra.mxu0 %v10706_v14 }
 0x240   : > { %7402 = vmatpush2.bf16.msra.mxu1 %v10703_v8  ;;  %7428 = vmatprep.subr.bf16.mxu0 %v10714_v15  ;;  %v10754_v8 = vld [vmem:[%s11711_s12 + $0xaf8] ss:$20 sps:$4 sm:$0xff]   ;;  %v10759_v15 = vld [vmem:[%s11711_s12 + $0x994] ss:$20 sps:$4 sm:$0xff]  }
 0x241   : > { %7403 = vmatprep.subr.bf16.mxu1 %v10711_v16 }
 0x243   : > { %7429 = vmatpush1.bf16.msra.mxu0 %v10712_v22 }
 0x244   : > { %7404 = vmatpush2.bf16.msra.mxu1 %v10709_v20  ;;  %7430 = vmatprep.subr.bf16.mxu0 %v10720_v23  ;;  %v10762_v20 = vld [vmem:[%s11711_s12 + $0xad4] ss:$20 sps:$4 sm:$0xff]  }
 0x245   : > { %7405 = vmatprep.subr.bf16.mxu1 %v10717_v13 }
 0x247   : > { %7431 = vmatpush1.bf16.msra.mxu0 %v10718_v19  ;;  %v10757_v19 = vld [vmem:[%s11711_s12 + $0x990] ss:$20 sps:$4 sm:$0xff]  }
 0x248   : > { %7406 = vmatpush2.bf16.msra.mxu1 %v10715_v26  ;;  %7432 = vmatprep.subr.bf16.mxu0 %v10726_v28 }
 0x249   : > { %7407 = vmatprep.subr.bf16.mxu1 %v10723_v27  ;;  %v10760_v27 = vld [vmem:[%s11711_s12 + $0xad0] ss:$20 sps:$4 sm:$0xff]  }
 0x24b   : > { %7433 = vmatpush1.bf16.msra.mxu0 %v10724_v31 }
 0x24c   : > { %7408 = vmatpush2.bf16.msra.mxu1 %v10721_v30  ;;  %7434 = vmatprep.subr.bf16.mxu0 %v10732_v34  ;;  %v10768_v30 = vld [vmem:[%s11711_s12 + $0xaac] ss:$20 sps:$4 sm:$0xff]   ;;  %v10766_v34 = vld [vmem:[%s11711_s12 + $0xaa8] ss:$20 sps:$4 sm:$0xff]  }
 0x24d   : > { %7409 = vmatprep.subr.bf16.mxu1 %v10729_v32  ;;  %v10763_v32 = vld [vmem:[%s11711_s12 + $0x968] ss:$20 sps:$4 sm:$0xff]  }
 0x24f   : > { %7435 = vmatpush1.bf16.msra.mxu0 %v10730_v36  ;;  %v10774_v36 = vld [vmem:[%s11711_s12 + $0xa84] ss:$20 sps:$4 sm:$0xff]  }
 0x250   : > { %7410 = vmatpush2.bf16.msra.mxu1 %v10727_v35  ;;  %7436 = vmatprep.subr.bf16.mxu0 %v10738_v39  ;;  %v10771_v35 = vld [vmem:[%s11711_s12 + $0x944] ss:$20 sps:$4 sm:$0xff]   ;;  %v10772_v39 = vld [vmem:[%s11711_s12 + $0xa80] ss:$20 sps:$4 sm:$0xff]  }
 0x251   : > { %7411 = vmatprep.subr.bf16.mxu1 %v10735_v38  ;;  %v10769_v38 = vld [vmem:[%s11711_s12 + $0x940] ss:$20 sps:$4 sm:$0xff]  }
 0x253   : > { %7437 = vmatpush1.bf16.msra.mxu0 %v10736_v42  ;;  %v10780_v42 = vld [vmem:[%s11711_s12 + $0xa5c] ss:$20 sps:$4 sm:$0xff]  }
 0x254   : > { %7412 = vmatpush2.bf16.msra.mxu1 %v10733_v40  ;;  %7438 = vmatprep.subr.bf16.mxu0 %v10744_v46  ;;  %v10777_v40 = vld [vmem:[%s11711_s12 + $0x91c] ss:$20 sps:$4 sm:$0xff]   ;;  %v10778_v46 = vld [vmem:[%s11711_s12 + $0xa58] ss:$20 sps:$4 sm:$0xff]  }
 0x255   : > { %7413 = vmatprep.subr.bf16.mxu1 %v10741_v45  ;;  %v10775_v45 = vld [vmem:[%s11711_s12 + $0x918] ss:$20 sps:$4 sm:$0xff]  }
 0x257   : > { %7439 = vmatpush1.bf16.msra.mxu0 %v10742_v48  ;;  %v10786_v48 = vld [vmem:[%s11711_s12 + $0xa34] ss:$20 sps:$4 sm:$0xff]  }
 0x258   : > { %7414 = vmatpush2.bf16.msra.mxu1 %v10739_v47  ;;  %7440 = vmatprep.subr.bf16.mxu0 %v10747_v55  ;;  %v10783_v47 = vld [vmem:[%s11711_s12 + $0x8f4] ss:$20 sps:$4 sm:$0xff]   ;;  %v10781_v55 = vld [vmem:[%s11711_s12 + $0x8f0] ss:$20 sps:$4 sm:$0xff]  }
 0x259   : > { %7465 = vmatprep.subr.bf16.mxu1 %v10750_v56  ;;  %v10784_v56 = vld [vmem:[%s11711_s12 + $0xa30] ss:$20 sps:$4 sm:$0xff]  }
 0x25a   : > { %v7130_v2 = vpop.f32.mrf.mxu0 }
 0x25b   : > { %7416 = vmatmul.mubr.bf16.vlgmr.msra.gmra.mxu1 %v11894_v21  ;;  %v7171_v5 = vpop.f32.mrf.mxu1  ;;  %v7131_v6 = vadd.f32 %v7130_v2, %v12318_v17  ;;  %7441 = vmatpush2.bf16.msra.mxu0 %v10745_v59  ;;  %v10789_v59 = vld [vmem:[%s11711_s12 + $0x8cc] ss:$20 sps:$4 sm:$0xff]   ;;  %v10795_v2 = vld [vmem:[%s11711_s12 + $0xc64] ss:$20 sps:$4 sm:$0xff]  }
 0x25c   : > { %7466 = vmatpush1.bf16.msra.mxu1 %v10748_v60  ;;  %v7132_v14 = vpop.f32.mrf.mxu0  ;;  %7442 = vmatprep.subr.bf16.mxu0 %v10753_v61  ;;  %v10792_v60 = vld [vmem:[%s11711_s12 + $0xa0c] ss:$20 sps:$4 sm:$0xff]   ;;  %v10787_v61 = vld [vmem:[%s11711_s12 + $0x8c8] ss:$20 sps:$4 sm:$0xff]  }
 0x25d   : > { %v7173_v16 = vpop.f32.mrf.mxu1  ;;  %7467 = vmatprep.subr.bf16.mxu1 %v10756_v62  ;;  %v7133_v22 = vadd.f32 %v7132_v14, %v12323_v25  ;;  %v12392_v13 = vadd.f32 %v7171_v5, %v7131_v6  ;;  %7497 = vmatprep.mubr.bf16.mxu1 %v11906_v29  ;;  %v10765_v25 = vld [vmem:[%s11711_s12 + $0x96c] ss:$20 sps:$4 sm:$0xff]   ;;  %v10790_v62 = vld [vmem:[%s11711_s12 + $0xa08] ss:$20 sps:$4 sm:$0xff]   ;;  %v10798_v5 = vld [vmem:[%s11711_s12 + $0xda4] ss:$20 sps:$4 sm:$0xff]  }
 0x25e   : > { %v7134_v17 = vpop.f32.mrf.mxu0  ;;  %v10793_v6 = vld [vmem:[%s11711_s12 + $0xc60] ss:$20 sps:$4 sm:$0xff]   ;;  %v10804_v14 = vld [vmem:[%s11711_s12 + $0xd7c] ss:$20 sps:$4 sm:$0xff]  }
 0x25f   : > { %v7175_v23 = vpop.f32.mrf.mxu1  ;;  %v12395_v26 = vadd.f32 %v7173_v16, %v7133_v22  ;;  %7443 = vmatpush2.bf16.msra.mxu0 %v10751_v7  ;;  %v10796_v7 = vld [vmem:[%s11711_s12 + $0xda0] ss:$20 sps:$4 sm:$0xff]   ;;  %v10799_v16 = vld [vmem:[%s11711_s12 + $0xc38] ss:$20 sps:$4 sm:$0xff]   ;;  %v10805_v17 = vld [vmem:[%s11711_s12 + $0xc10] ss:$20 sps:$4 sm:$0xff]  }
 0x260   : > { %7468 = vmatpush1.bf16.msra.mxu1 %v10754_v8  ;;  %v7135_v28 = vpop.f32.mrf.mxu0  ;;  %7444 = vmatprep.subr.bf16.mxu0 %v10759_v15  ;;  %v10801_v8 = vld [vmem:[%s11711_s12 + $0xc3c] ss:$20 sps:$4 sm:$0xff]   ;;  %v10802_v15 = vld [vmem:[%s11711_s12 + $0xd78] ss:$20 sps:$4 sm:$0xff]   ;;  %v10810_v22 = vld [vmem:[%s11711_s12 + $0xd54] ss:$20 sps:$4 sm:$0xff]  }
 0x261   : > { %7469 = vmatprep.subr.bf16.mxu1 %v10762_v20  ;;  %v7176_v31 = vpop.f32.mrf.mxu1  ;;  %v10807_v20 = vld [vmem:[%s11711_s12 + $0xc14] ss:$20 sps:$4 sm:$0xff]   ;;  %v10808_v23 = vld [vmem:[%s11711_s12 + $0xd50] ss:$20 sps:$4 sm:$0xff]  }
 0x262   : > { %v10811_v28 = vld [vmem:[%s11711_s12 + $0xbe8] ss:$20 sps:$4 sm:$0xff]   ;;  %v10822_v31 = vld [vmem:[%s11711_s12 + $0xd04] ss:$20 sps:$4 sm:$0xff]  }
 0x263   : > { %7445 = vmatpush2.bf16.msra.mxu0 %v10757_v19  ;;  %v10813_v19 = vld [vmem:[%s11711_s12 + $0xbec] ss:$20 sps:$4 sm:$0xff]  }
 0x264   : > { %7470 = vmatpush1.bf16.msra.mxu1 %v10760_v27  ;;  %7446 = vmatprep.subr.bf16.mxu0 %v10765_v25  ;;  %v10816_v27 = vld [vmem:[%s11711_s12 + $0xd2c] ss:$20 sps:$4 sm:$0xff]   ;;  %v10814_v25 = vld [vmem:[%s11711_s12 + $0xd28] ss:$20 sps:$4 sm:$0xff]  }
 0x265   : > { %7471 = vmatprep.subr.bf16.mxu1 %v10768_v30  ;;  %v10819_v30 = vld [vmem:[%s11711_s12 + $0xbc4] ss:$20 sps:$4 sm:$0xff]  }
 0x267   : > { %7447 = vmatpush2.bf16.msra.mxu0 %v10763_v32  ;;  %v10817_v32 = vld [vmem:[%s11711_s12 + $0xbc0] ss:$20 sps:$4 sm:$0xff]  }
 0x268   : > { %7472 = vmatpush1.bf16.msra.mxu1 %v10766_v34  ;;  %7448 = vmatprep.subr.bf16.mxu0 %v10771_v35  ;;  %v10820_v34 = vld [vmem:[%s11711_s12 + $0xd00] ss:$20 sps:$4 sm:$0xff]   ;;  %v10825_v35 = vld [vmem:[%s11711_s12 + $0xb9c] ss:$20 sps:$4 sm:$0xff]  }
 0x269   : > { %7473 = vmatprep.subr.bf16.mxu1 %v10774_v36  ;;  %v10828_v36 = vld [vmem:[%s11711_s12 + $0xcdc] ss:$20 sps:$4 sm:$0xff]  }
 0x26b   : > { %7449 = vmatpush2.bf16.msra.mxu0 %v10769_v38  ;;  %v10823_v38 = vld [vmem:[%s11711_s12 + $0xb98] ss:$20 sps:$4 sm:$0xff]  }
 0x26c   : > { %7474 = vmatpush1.bf16.msra.mxu1 %v10772_v39  ;;  %7450 = vmatprep.subr.bf16.mxu0 %v10777_v40  ;;  %v10826_v39 = vld [vmem:[%s11711_s12 + $0xcd8] ss:$20 sps:$4 sm:$0xff]   ;;  %v10831_v40 = vld [vmem:[%s11711_s12 + $0xb74] ss:$20 sps:$4 sm:$0xff]  }
 0x26d   : > { %7475 = vmatprep.subr.bf16.mxu1 %v10780_v42  ;;  %v10834_v42 = vld [vmem:[%s11711_s12 + $0xcb4] ss:$20 sps:$4 sm:$0xff]  }
 0x26f   : > { %7451 = vmatpush2.bf16.msra.mxu0 %v10775_v45  ;;  %v10829_v45 = vld [vmem:[%s11711_s12 + $0xb70] ss:$20 sps:$4 sm:$0xff]  }
 0x270   : > { %7476 = vmatpush1.bf16.msra.mxu1 %v10778_v46  ;;  %7452 = vmatprep.subr.bf16.mxu0 %v10783_v47  ;;  %v10832_v46 = vld [vmem:[%s11711_s12 + $0xcb0] ss:$20 sps:$4 sm:$0xff]   ;;  %v10837_v47 = vld [vmem:[%s11711_s12 + $0xb4c] ss:$20 sps:$4 sm:$0xff]  }
 0x271   : > { %7477 = vmatprep.subr.bf16.mxu1 %v10786_v48  ;;  %v10840_v48 = vld [vmem:[%s11711_s12 + $0xc8c] ss:$20 sps:$4 sm:$0xff]  }
 0x273   : > { %7453 = vmatpush2.bf16.msra.mxu0 %v10781_v55  ;;  %v10835_v55 = vld [vmem:[%s11711_s12 + $0xb48] ss:$20 sps:$4 sm:$0xff]  }
 0x274   : > { %7478 = vmatpush1.bf16.msra.mxu1 %v10784_v56  ;;  %7454 = vmatprep.subr.bf16.mxu0 %v10789_v59  ;;  %v10838_v56 = vld [vmem:[%s11711_s12 + $0xc88] ss:$20 sps:$4 sm:$0xff]   ;;  %v10843_v59 = vld [vmem:[%s11711_s12 + $0xee4] ss:$20 sps:$4 sm:$0xff]  }
 0x275   : > { %7479 = vmatprep.subr.bf16.mxu1 %v10792_v60  ;;  %v10846_v60 = vld [vmem:[%s11711_s12 + $0x1024] ss:$20 sps:$4 sm:$0xff]  }
 0x277   : > { %7455 = vmatpush2.bf16.msra.mxu0 %v10787_v61  ;;  %v10841_v61 = vld [vmem:[%s11711_s12 + $0xee0] ss:$20 sps:$4 sm:$0xff]  }
 0x278   : > { %7480 = vmatpush1.bf16.msra.mxu1 %v10790_v62  ;;  %7506 = vmatprep.subr.bf16.mxu0 %v10798_v5  ;;  %v10844_v62 = vld [vmem:[%s11711_s12 + $0x1020] ss:$20 sps:$4 sm:$0xff]   ;;  %v10852_v5 = vld [vmem:[%s11711_s12 + $0xffc] ss:$20 sps:$4 sm:$0xff]  }
 0x279   : > { %7481 = vmatprep.subr.bf16.mxu1 %v10795_v2  ;;  %v10849_v2 = vld [vmem:[%s11711_s12 + $0xebc] ss:$20 sps:$4 sm:$0xff]  }
 0x27a   : > { %7457 = vmatmul.mubr.bf16.vlgmr.msra.gmra.mxu0 %v11898_v24 }
 0x27b   : > { %7507 = vmatpush1.bf16.msra.mxu0 %v10796_v7  ;;  %7538 = vmatprep.mubr.bf16.mxu0 %v11911_v33  ;;  %v10850_v7 = vld [vmem:[%s11711_s12 + $0xff8] ss:$20 sps:$4 sm:$0xff]  }
 0x27c   : > { %7482 = vmatpush2.bf16.msra.mxu1 %v10793_v6  ;;  %7508 = vmatprep.subr.bf16.mxu0 %v10804_v14  ;;  %v10847_v6 = vld [vmem:[%s11711_s12 + $0xeb8] ss:$20 sps:$4 sm:$0xff]  }
 0x27d   : > { %7483 = vmatprep.subr.bf16.mxu1 %v10801_v8 }
 0x27f   : > { %7509 = vmatpush1.bf16.msra.mxu0 %v10802_v15 }
 0x280   : > { %7484 = vmatpush2.bf16.msra.mxu1 %v10799_v16  ;;  %7510 = vmatprep.subr.bf16.mxu0 %v10810_v22  ;;  %v10858_v22 = vld [vmem:[%s11711_s12 + $0xfd4] ss:$20 sps:$4 sm:$0xff]  }
 0x281   : > { %7485 = vmatprep.subr.bf16.mxu1 %v10807_v20  ;;  %v10855_v20 = vld [vmem:[%s11711_s12 + $0xe94] ss:$20 sps:$4 sm:$0xff]  }
 0x283   : > { %7511 = vmatpush1.bf16.msra.mxu0 %v10808_v23 }
 0x284   : > { %7486 = vmatpush2.bf16.msra.mxu1 %v10805_v17  ;;  %7512 = vmatprep.subr.bf16.mxu0 %v10816_v27  ;;  %v10856_v27 = vld [vmem:[%s11711_s12 + $0xfd0] ss:$20 sps:$4 sm:$0xff]  }
 0x285   : > { %7487 = vmatprep.subr.bf16.mxu1 %v10813_v19  ;;  %v10853_v19 = vld [vmem:[%s11711_s12 + $0xe90] ss:$20 sps:$4 sm:$0xff]  }
 0x287   : > { %7513 = vmatpush1.bf16.msra.mxu0 %v10814_v25  ;;  %v10861_v25 = vld [vmem:[%s11711_s12 + $0xe6c] ss:$20 sps:$4 sm:$0xff]  }
 0x288   : > { %7488 = vmatpush2.bf16.msra.mxu1 %v10811_v28  ;;  %7514 = vmatprep.subr.bf16.mxu0 %v10822_v31 }
 0x289   : > { %7489 = vmatprep.subr.bf16.mxu1 %v10819_v30  ;;  %v10864_v30 = vld [vmem:[%s11711_s12 + $0xfac] ss:$20 sps:$4 sm:$0xff]  }
 0x28b   : > { %7515 = vmatpush1.bf16.msra.mxu0 %v10820_v34  ;;  %v10862_v34 = vld [vmem:[%s11711_s12 + $0xfa8] ss:$20 sps:$4 sm:$0xff]  }
 0x28c   : > { %7490 = vmatpush2.bf16.msra.mxu1 %v10817_v32  ;;  %7516 = vmatprep.subr.bf16.mxu0 %v10828_v36  ;;  %v10859_v32 = vld [vmem:[%s11711_s12 + $0xe68] ss:$20 sps:$4 sm:$0xff]   ;;  %v10870_v36 = vld [vmem:[%s11711_s12 + $0xf84] ss:$20 sps:$4 sm:$0xff]  }
 0x28d   : > { %7491 = vmatprep.subr.bf16.mxu1 %v10825_v35  ;;  %v10867_v35 = vld [vmem:[%s11711_s12 + $0xe44] ss:$20 sps:$4 sm:$0xff]  }
 0x28f   : > { %7517 = vmatpush1.bf16.msra.mxu0 %v10826_v39  ;;  %v10868_v39 = vld [vmem:[%s11711_s12 + $0xf80] ss:$20 sps:$4 sm:$0xff]  }
 0x290   : > { %7492 = vmatpush2.bf16.msra.mxu1 %v10823_v38  ;;  %7518 = vmatprep.subr.bf16.mxu0 %v10834_v42  ;;  %v10865_v38 = vld [vmem:[%s11711_s12 + $0xe40] ss:$20 sps:$4 sm:$0xff]   ;;  %v10876_v42 = vld [vmem:[%s11711_s12 + $0xf5c] ss:$20 sps:$4 sm:$0xff]  }
 0x291   : > { %7493 = vmatprep.subr.bf16.mxu1 %v10831_v40  ;;  %v10873_v40 = vld [vmem:[%s11711_s12 + $0xe1c] ss:$20 sps:$4 sm:$0xff]  }
 0x293   : > { %7519 = vmatpush1.bf16.msra.mxu0 %v10832_v46  ;;  %v10874_v46 = vld [vmem:[%s11711_s12 + $0xf58] ss:$20 sps:$4 sm:$0xff]  }
 0x294   : > { %7494 = vmatpush2.bf16.msra.mxu1 %v10829_v45  ;;  %7520 = vmatprep.subr.bf16.mxu0 %v10840_v48  ;;  %v10871_v45 = vld [vmem:[%s11711_s12 + $0xe18] ss:$20 sps:$4 sm:$0xff]   ;;  %v10882_v48 = vld [vmem:[%s11711_s12 + $0xf34] ss:$20 sps:$4 sm:$0xff]  }
 0x295   : > { %7495 = vmatprep.subr.bf16.mxu1 %v10837_v47  ;;  %v10879_v47 = vld [vmem:[%s11711_s12 + $0xdf4] ss:$20 sps:$4 sm:$0xff]  }
 0x297   : > { %7521 = vmatpush1.bf16.msra.mxu0 %v10838_v56  ;;  %v10880_v56 = vld [vmem:[%s11711_s12 + $0xf30] ss:$20 sps:$4 sm:$0xff]  }
 0x298   : > { %7496 = vmatpush2.bf16.msra.mxu1 %v10835_v55  ;;  %7522 = vmatprep.subr.bf16.mxu0 %v10843_v59  ;;  %v10877_v55 = vld [vmem:[%s11711_s12 + $0xdf0] ss:$20 sps:$4 sm:$0xff]   ;;  %v10885_v59 = vld [vmem:[%s11711_s12 + $0xdcc] ss:$20 sps:$4 sm:$0xff]  }
 0x299   : > { %7547 = vmatprep.subr.bf16.mxu1 %v10846_v60  ;;  %v10888_v60 = vld [vmem:[%s11711_s12 + $0xf0c] ss:$20 sps:$4 sm:$0xff]  }
 0x29a   : > { %v12461_v8 = vpop.f32.mrf.mxu0 }
 0x29b   : > { %7498 = vmatmul.mubr.bf16.vlgmr.msra.gmra.mxu1 %v11976_v43  ;;  %v12464_v14 = vpop.f32.mrf.mxu1  ;;  %7523 = vmatpush2.bf16.msra.mxu0 %v10841_v61  ;;  %v10883_v61 = vld [vmem:[%s11711_s12 + $0xdc8] ss:$20 sps:$4 sm:$0xff]  }
 0x29c   : > { %7548 = vmatpush1.bf16.msra.mxu1 %v10844_v62  ;;  %v7214_v16 = vpop.f32.mrf.mxu0  ;;  %7524 = vmatprep.subr.bf16.mxu0 %v10849_v2  ;;  %v10886_v62 = vld [vmem:[%s11711_s12 + $0xf08] ss:$20 sps:$4 sm:$0xff]   ;;  %v10891_v2 = vld [vmem:[%s11711_s12 + $0x1164] ss:$20 sps:$4 sm:$0xff]  }
 0x29d   : > { %v12466_v15 = vpop.f32.mrf.mxu1  ;;  %7549 = vmatprep.subr.bf16.mxu1 %v10852_v5  ;;  %7579 = vmatprep.mubr.bf16.mxu1 %v11984_v49  ;;  %v10894_v5 = vld [vmem:[%s11711_s12 + $0x12a4] ss:$20 sps:$4 sm:$0xff]  }
 0x29e   : > { %v7216_v17 = vpop.f32.mrf.mxu0 }
 0x29f   : > { %v7257_v23 = vpop.f32.mrf.mxu1  ;;  %7525 = vmatpush2.bf16.msra.mxu0 %v10847_v6  ;;  %v7213_v6 = vadd.f32 %v12461_v8, %v12392_v13  ;;  %v313_v17 = vld [vmem:[#allocation2 + $0x8] sm:$0xff]  ;;  %v314_v8 = vld [vmem:[#allocation2] sm:$0xff] }
 0x2a0   : > { %7550 = vmatpush1.bf16.msra.mxu1 %v10850_v7  ;;  %v7217_v28 = vpop.f32.mrf.mxu0  ;;  %7526 = vmatprep.subr.bf16.mxu0 %v10855_v20  ;;  %v10889_v7 = vld [vmem:[%s11711_s12 + $0x1160] ss:$20 sps:$4 sm:$0xff]   ;;  %v10897_v23 = vld [vmem:[%s11711_s12 + $0x113c] ss:$20 sps:$4 sm:$0xff]  }
 0x2a1   : > { %7551 = vmatprep.subr.bf16.mxu1 %v10858_v22  ;;  %v7258_v31 = vpop.f32.mrf.mxu1  ;;  %v10892_v20 = vld [vmem:[%s11711_s12 + $0x12a0] ss:$20 sps:$4 sm:$0xff]   ;;  %v7215_v22 = vadd.f32 %v7214_v16, %v12395_v26  ;;  %v10895_v28 = vld [vmem:[%s11711_s12 + $0x1138] ss:$20 sps:$4 sm:$0xff]  }
 0x2a2   : > { %v10903_v31 = vld [vmem:[%s11711_s12 + $0x1114] ss:$20 sps:$4 sm:$0xff]  }
 0x2a3   : > { %7527 = vmatpush2.bf16.msra.mxu0 %v10853_v19  ;;  %v10900_v19 = vld [vmem:[%s11711_s12 + $0x127c] ss:$20 sps:$4 sm:$0xff]   ;;  %v7256_v26 = vadd.f32 %v12466_v15, %v7215_v22  ;;  %v10936_v22 = vld [vmem:[%s11711_s12 + $0x118c] ss:$20 sps:$4 sm:$0xff]  }
 0x2a4   : > { %7552 = vmatpush1.bf16.msra.mxu1 %v10856_v27  ;;  %7528 = vmatprep.subr.bf16.mxu0 %v10861_v25  ;;  %v7254_v27 = vadd.f32 %v12464_v14, %v7213_v6  ;;  %v10898_v25 = vld [vmem:[%s11711_s12 + $0x1278] ss:$20 sps:$4 sm:$0xff]   ;;  %v10906_v14 = vld [vmem:[%s11711_s12 + $0x1254] ss:$20 sps:$4 sm:$0xff]   ;;  %v10925_v6 = vld [vmem:[%s11711_s12 + $0x1070] ss:$20 sps:$4 sm:$0xff]  }
 0x2a5   : > { %7553 = vmatprep.subr.bf16.mxu1 %v10864_v30 }
 0x2a7   : > { %7529 = vmatpush2.bf16.msra.mxu0 %v10859_v32 }
 0x2a8   : > { %7554 = vmatpush1.bf16.msra.mxu1 %v10862_v34  ;;  %7530 = vmatprep.subr.bf16.mxu0 %v10867_v35  ;;  %v10901_v35 = vld [vmem:[%s11711_s12 + $0x1110] ss:$20 sps:$4 sm:$0xff]  }
 0x2a9   : > { %7555 = vmatprep.subr.bf16.mxu1 %v10870_v36  ;;  %v10904_v36 = vld [vmem:[%s11711_s12 + $0x1250] ss:$20 sps:$4 sm:$0xff]  }
 0x2ab   : > { %7531 = vmatpush2.bf16.msra.mxu0 %v10865_v38 }
 0x2ac   : > { %7556 = vmatpush1.bf16.msra.mxu1 %v10868_v39  ;;  %7532 = vmatprep.subr.bf16.mxu0 %v10873_v40  ;;  %v10909_v40 = vld [vmem:[%s11711_s12 + $0x10ec] ss:$20 sps:$4 sm:$0xff]  }
 0x2ad   : > { %7557 = vmatprep.subr.bf16.mxu1 %v10876_v42  ;;  %v10912_v42 = vld [vmem:[%s11711_s12 + $0x122c] ss:$20 sps:$4 sm:$0xff]  }
 0x2af   : > { %7533 = vmatpush2.bf16.msra.mxu0 %v10871_v45  ;;  %v10907_v45 = vld [vmem:[%s11711_s12 + $0x10e8] ss:$20 sps:$4 sm:$0xff]  }
 0x2b0   : > { %7558 = vmatpush1.bf16.msra.mxu1 %v10874_v46  ;;  %7534 = vmatprep.subr.bf16.mxu0 %v10879_v47  ;;  %v10910_v46 = vld [vmem:[%s11711_s12 + $0x1228] ss:$20 sps:$4 sm:$0xff]   ;;  %v10915_v47 = vld [vmem:[%s11711_s12 + $0x10c4] ss:$20 sps:$4 sm:$0xff]  }
 0x2b1   : > { %7559 = vmatprep.subr.bf16.mxu1 %v10882_v48  ;;  %v10918_v48 = vld [vmem:[%s11711_s12 + $0x1204] ss:$20 sps:$4 sm:$0xff]  }
 0x2b3   : > { %7535 = vmatpush2.bf16.msra.mxu0 %v10877_v55  ;;  %v10913_v55 = vld [vmem:[%s11711_s12 + $0x10c0] ss:$20 sps:$4 sm:$0xff]  }
 0x2b4   : > { %7560 = vmatpush1.bf16.msra.mxu1 %v10880_v56  ;;  %7536 = vmatprep.subr.bf16.mxu0 %v10885_v59  ;;  %v10916_v56 = vld [vmem:[%s11711_s12 + $0x1200] ss:$20 sps:$4 sm:$0xff]   ;;  %v10921_v59 = vld [vmem:[%s11711_s12 + $0x109c] ss:$20 sps:$4 sm:$0xff]  }
 0x2b5   : > { %7561 = vmatprep.subr.bf16.mxu1 %v10888_v60  ;;  %v10924_v60 = vld [vmem:[%s11711_s12 + $0x11dc] ss:$20 sps:$4 sm:$0xff]  }
 0x2b7   : > { %7537 = vmatpush2.bf16.msra.mxu0 %v10883_v61  ;;  %v10919_v61 = vld [vmem:[%s11711_s12 + $0x1098] ss:$20 sps:$4 sm:$0xff]  }
 0x2b8   : > { %7562 = vmatpush1.bf16.msra.mxu1 %v10886_v62  ;;  %7588 = vmatprep.subr.bf16.mxu0 %v10894_v5  ;;  %v10922_v62 = vld [vmem:[%s11711_s12 + $0x11d8] ss:$20 sps:$4 sm:$0xff]   ;;  %v10930_v5 = vld [vmem:[%s11711_s12 + $0x11b4] ss:$20 sps:$4 sm:$0xff]  }
 0x2b9   : > { %7563 = vmatprep.subr.bf16.mxu1 %v10891_v2  ;;  %v10927_v2 = vld [vmem:[%s11711_s12 + $0x1074] ss:$20 sps:$4 sm:$0xff]  }
 0x2ba   : > { %v7294_v13 = vpop.f32.mrf.mxu0  ;;  %7539 = vmatmul.mubr.bf16.vlgmr.msra.gmra.mxu0 %v11978_v44 }
 0x2bb   : > { %v7295_v16 = vadd.f32 %v7294_v13, %v7254_v27  ;;  %7589 = vmatpush1.bf16.msra.mxu0 %v10892_v20  ;;  %7620 = vmatprep.mubr.bf16.mxu0 %v11986_v51  ;;  %v10933_v20 = vld [vmem:[%s11711_s12 + $0x104c] ss:$20 sps:$4 sm:$0xff]   ;;  %v10942_v27 = vld [vmem:[%s11711_s12 + $0x1524] ss:$20 sps:$4 sm:$0xff]   ;;  %v10945_v13 = vld [vmem:[%s11711_s12 + $0x13bc] ss:$20 sps:$4 sm:$0xff]  }
 0x2bc   : > { %7564 = vmatpush2.bf16.msra.mxu1 %v10889_v7  ;;  %v7296_v30 = vpop.f32.mrf.mxu0  ;;  %7590 = vmatprep.subr.bf16.mxu0 %v10900_v19  ;;  %v10928_v7 = vld [vmem:[%s11711_s12 + $0x11b0] ss:$20 sps:$4 sm:$0xff]  }
 0x2bd   : > { %7565 = vmatprep.subr.bf16.mxu1 %v10897_v23  ;;  %v8354_v32 = vadd.f32 %v7295_v16, %v313_v17  ;;  %v7297_v34 = vadd.f32 %v7296_v30, %v7256_v26  ;;  %v10931_v17 = vld [vmem:[%s11711_s12 + $0x1048] ss:$20 sps:$4 sm:$0xff]   ;;  %v10939_v19 = vld [vmem:[%s11711_s12 + $0x13e4] ss:$20 sps:$4 sm:$0xff]  }
 0x2be   : > { %v7298_v38 = vpop.f32.mrf.mxu0  ;;  %v10934_v23 = vld [vmem:[%s11711_s12 + $0x1188] ss:$20 sps:$4 sm:$0xff]   ;;  %v10943_v26 = vld [vmem:[%s11711_s12 + $0x13b8] ss:$20 sps:$4 sm:$0xff]  }
 0x2bf   : > { %8359 = vst [vmem:[#allocation2 + $0x8] sm:$0xff] %v8354_v32  ;;  %v8355_v15 = vadd.f32 %v7297_v34, %v314_v8  ;;  %7591 = vmatpush1.bf16.msra.mxu0 %v10898_v25  ;;  %v10940_v25 = vld [vmem:[%s11711_s12 + $0x1520] ss:$20 sps:$4 sm:$0xff]   ;;  %v10948_v8 = vld [vmem:[%s11711_s12 + $0x14fc] ss:$20 sps:$4 sm:$0xff]  }
 0x2c0   : > { %7566 = vmatpush2.bf16.msra.mxu1 %v10895_v28  ;;  %v7299_v39 = vpop.f32.mrf.mxu0  ;;  %7592 = vmatprep.subr.bf16.mxu0 %v10906_v14  ;;  %v10937_v28 = vld [vmem:[%s11711_s12 + $0x13e0] ss:$20 sps:$4 sm:$0xff]   ;;  %v10946_v16 = vld [vmem:[%s11711_s12 + $0x14f8] ss:$20 sps:$4 sm:$0xff]  }
 0x2c1   : > { %7567 = vmatprep.subr.bf16.mxu1 %v10903_v31  ;;  %8360 = vst [vmem:[#allocation2] sm:$0xff] %v8355_v15  ;;  %v10951_v31 = vld [vmem:[%s11711_s12 + $0x1394] ss:$20 sps:$4 sm:$0xff]   ;;  %v10957_v38 = vld [vmem:[%s11711_s12 + $0x136c] ss:$20 sps:$4 sm:$0xff]  }
 0x2c2   : > { %v10954_v14 = vld [vmem:[%s11711_s12 + $0x14d4] ss:$20 sps:$4 sm:$0xff]   ;;  %v10960_v15 = vld [vmem:[%s11711_s12 + $0x14ac] ss:$20 sps:$4 sm:$0xff]  }
 0x2c3   : > { %7593 = vmatpush1.bf16.msra.mxu0 %v10904_v36  ;;  %v10952_v36 = vld [vmem:[%s11711_s12 + $0x14d0] ss:$20 sps:$4 sm:$0xff]  }
 0x2c4   : > { %7568 = vmatpush2.bf16.msra.mxu1 %v10901_v35  ;;  %7594 = vmatprep.subr.bf16.mxu0 %v10912_v42  ;;  %v10949_v35 = vld [vmem:[%s11711_s12 + $0x1390] ss:$20 sps:$4 sm:$0xff]   ;;  %v10958_v42 = vld [vmem:[%s11711_s12 + $0x14a8] ss:$20 sps:$4 sm:$0xff]  }
 0x2c5   : > { %7569 = vmatprep.subr.bf16.mxu1 %v10909_v40  ;;  %v10955_v40 = vld [vmem:[%s11711_s12 + $0x1368] ss:$20 sps:$4 sm:$0xff]  }
 0x2c7   : > { %7595 = vmatpush1.bf16.msra.mxu0 %v10910_v46  ;;  %v10966_v46 = vld [vmem:[%s11711_s12 + $0x1484] ss:$20 sps:$4 sm:$0xff]  }
 0x2c8   : > { %7570 = vmatpush2.bf16.msra.mxu1 %v10907_v45  ;;  %7596 = vmatprep.subr.bf16.mxu0 %v10918_v48  ;;  %v10963_v45 = vld [vmem:[%s11711_s12 + $0x1344] ss:$20 sps:$4 sm:$0xff]   ;;  %v10964_v48 = vld [vmem:[%s11711_s12 + $0x1480] ss:$20 sps:$4 sm:$0xff]  }
 0x2c9   : > { %7571 = vmatprep.subr.bf16.mxu1 %v10915_v47  ;;  %v10961_v47 = vld [vmem:[%s11711_s12 + $0x1340] ss:$20 sps:$4 sm:$0xff]  }
 0x2cb   : > { %7597 = vmatpush1.bf16.msra.mxu0 %v10916_v56  ;;  %v10972_v56 = vld [vmem:[%s11711_s12 + $0x145c] ss:$20 sps:$4 sm:$0xff]  }
 0x2cc   : > { %7572 = vmatpush2.bf16.msra.mxu1 %v10913_v55  ;;  %7598 = vmatprep.subr.bf16.mxu0 %v10924_v60  ;;  %v10969_v55 = vld [vmem:[%s11711_s12 + $0x131c] ss:$20 sps:$4 sm:$0xff]   ;;  %v10970_v60 = vld [vmem:[%s11711_s12 + $0x1458] ss:$20 sps:$4 sm:$0xff]  }
 0x2cd   : > { %7573 = vmatprep.subr.bf16.mxu1 %v10921_v59  ;;  %v10967_v59 = vld [vmem:[%s11711_s12 + $0x1318] ss:$20 sps:$4 sm:$0xff]  }
 0x2cf   : > { %7599 = vmatpush1.bf16.msra.mxu0 %v10922_v62  ;;  %v10978_v62 = vld [vmem:[%s11711_s12 + $0x1434] ss:$20 sps:$4 sm:$0xff]  }
 0x2d0   : > { %7574 = vmatpush2.bf16.msra.mxu1 %v10919_v61  ;;  %7600 = vmatprep.subr.bf16.mxu0 %v10930_v5  ;;  %v10975_v61 = vld [vmem:[%s11711_s12 + $0x12f4] ss:$20 sps:$4 sm:$0xff]   ;;  %v10976_v5 = vld [vmem:[%s11711_s12 + $0x1430] ss:$20 sps:$4 sm:$0xff]  }
 0x2d1   : > { %7575 = vmatprep.subr.bf16.mxu1 %v10927_v2  ;;  %v10973_v2 = vld [vmem:[%s11711_s12 + $0x12f0] ss:$20 sps:$4 sm:$0xff]  }
 0x2d3   : > { %7601 = vmatpush1.bf16.msra.mxu0 %v10928_v7  ;;  %v10984_v7 = vld [vmem:[%s11711_s12 + $0x140c] ss:$20 sps:$4 sm:$0xff]  }
 0x2d4   : > { %7576 = vmatpush2.bf16.msra.mxu1 %v10925_v6  ;;  %7602 = vmatprep.subr.bf16.mxu0 %v10936_v22  ;;  %v10981_v6 = vld [vmem:[%s11711_s12 + $0x12cc] ss:$20 sps:$4 sm:$0xff]   ;;  %v10982_v22 = vld [vmem:[%s11711_s12 + $0x1408] ss:$20 sps:$4 sm:$0xff]  }
 0x2d5   : > { %7577 = vmatprep.subr.bf16.mxu1 %v10933_v20  ;;  %v10979_v20 = vld [vmem:[%s11711_s12 + $0x12c8] ss:$20 sps:$4 sm:$0xff]  }
 0x2d7   : > { %7603 = vmatpush1.bf16.msra.mxu0 %v10934_v23  ;;  %v10990_v23 = vld [vmem:[%s11711_s12 + $0x17a4] ss:$20 sps:$4 sm:$0xff]  }
 0x2d8   : > { %7578 = vmatpush2.bf16.msra.mxu1 %v10931_v17  ;;  %7604 = vmatprep.subr.bf16.mxu0 %v10939_v19  ;;  %v10987_v17 = vld [vmem:[%s11711_s12 + $0x1664] ss:$20 sps:$4 sm:$0xff]   ;;  %v10985_v19 = vld [vmem:[%s11711_s12 + $0x1660] ss:$20 sps:$4 sm:$0xff]  }
 0x2d9   : > { %7629 = vmatprep.subr.bf16.mxu1 %v10942_v27  ;;  %v10988_v27 = vld [vmem:[%s11711_s12 + $0x17a0] ss:$20 sps:$4 sm:$0xff]  }
 0x2db   : > { %7580 = vmatmul.mubr.bf16.vlgmr.msra.gmra.mxu1 %v12056_v3  ;;  %v12541_v30 = vpop.f32.mrf.mxu1  ;;  %7605 = vmatpush2.bf16.msra.mxu0 %v10937_v28  ;;  %v10993_v28 = vld [vmem:[%s11711_s12 + $0x163c] ss:$20 sps:$4 sm:$0xff]  }
 0x2dc   : > { %7630 = vmatpush1.bf16.msra.mxu1 %v10940_v25  ;;  %7606 = vmatprep.subr.bf16.mxu0 %v10945_v13  ;;  %v10996_v25 = vld [vmem:[%s11711_s12 + $0x177c] ss:$20 sps:$4 sm:$0xff]   ;;  %v10991_v13 = vld [vmem:[%s11711_s12 + $0x1638] ss:$20 sps:$4 sm:$0xff]  }
 0x2dd   : > { %7631 = vmatprep.subr.bf16.mxu1 %v10948_v8  ;;  %v12545_v32 = vpop.f32.mrf.mxu1  ;;  %7661 = vmatprep.mubr.bf16.mxu1 %v12064_v11  ;;  %v10994_v8 = vld [vmem:[%s11711_s12 + $0x1778] ss:$20 sps:$4 sm:$0xff]  }
 0x2df   : > { %v7339_v34 = vpop.f32.mrf.mxu1  ;;  %7607 = vmatpush2.bf16.msra.mxu0 %v10943_v26 }
 0x2e0   : > { %7632 = vmatpush1.bf16.msra.mxu1 %v10946_v16  ;;  %7608 = vmatprep.subr.bf16.mxu0 %v10951_v31  ;;  %v11002_v34 = vld [vmem:[%s11711_s12 + $0x1754] ss:$20 sps:$4 sm:$0xff]  }
 0x2e1   : > { %7633 = vmatprep.subr.bf16.mxu1 %v10954_v14  ;;  %v7340_v39 = vpop.f32.mrf.mxu1  ;;  %v10999_v14 = vld [vmem:[%s11711_s12 + $0x1614] ss:$20 sps:$4 sm:$0xff]  }
 0x2e2   : > { %v11005_v39 = vld [vmem:[%s11711_s12 + $0x15ec] ss:$20 sps:$4 sm:$0xff]  }
 0x2e3   : > { %7609 = vmatpush2.bf16.msra.mxu0 %v10949_v35 }
 0x2e4   : > { %7634 = vmatpush1.bf16.msra.mxu1 %v10952_v36  ;;  %7610 = vmatprep.subr.bf16.mxu0 %v10957_v38  ;;  %v11000_v38 = vld [vmem:[%s11711_s12 + $0x1750] ss:$20 sps:$4 sm:$0xff]  }
 0x2e5   : > { %7635 = vmatprep.subr.bf16.mxu1 %v10960_v15 }
 0x2e7   : > { %7611 = vmatpush2.bf16.msra.mxu0 %v10955_v40  ;;  %v11008_v40 = vld [vmem:[%s11711_s12 + $0x172c] ss:$20 sps:$4 sm:$0xff]  }
 0x2e8   : > { %7636 = vmatpush1.bf16.msra.mxu1 %v10958_v42  ;;  %7612 = vmatprep.subr.bf16.mxu0 %v10963_v45  ;;  %v11006_v42 = vld [vmem:[%s11711_s12 + $0x1728] ss:$20 sps:$4 sm:$0xff]   ;;  %v11011_v45 = vld [vmem:[%s11711_s12 + $0x15c4] ss:$20 sps:$4 sm:$0xff]  }
 0x2e9   : > { %7637 = vmatprep.subr.bf16.mxu1 %v10966_v46  ;;  %v11014_v46 = vld [vmem:[%s11711_s12 + $0x1704] ss:$20 sps:$4 sm:$0xff]  }
 0x2eb   : > { %7613 = vmatpush2.bf16.msra.mxu0 %v10961_v47  ;;  %v11009_v47 = vld [vmem:[%s11711_s12 + $0x15c0] ss:$20 sps:$4 sm:$0xff]  }
 0x2ec   : > { %7638 = vmatpush1.bf16.msra.mxu1 %v10964_v48  ;;  %7614 = vmatprep.subr.bf16.mxu0 %v10969_v55  ;;  %v11012_v48 = vld [vmem:[%s11711_s12 + $0x1700] ss:$20 sps:$4 sm:$0xff]   ;;  %v11017_v55 = vld [vmem:[%s11711_s12 + $0x159c] ss:$20 sps:$4 sm:$0xff]  }
 0x2ed   : > { %7639 = vmatprep.subr.bf16.mxu1 %v10972_v56  ;;  %v11020_v56 = vld [vmem:[%s11711_s12 + $0x16dc] ss:$20 sps:$4 sm:$0xff]  }
 0x2ef   : > { %7615 = vmatpush2.bf16.msra.mxu0 %v10967_v59  ;;  %v11015_v59 = vld [vmem:[%s11711_s12 + $0x1598] ss:$20 sps:$4 sm:$0xff]  }
 0x2f0   : > { %7640 = vmatpush1.bf16.msra.mxu1 %v10970_v60  ;;  %7616 = vmatprep.subr.bf16.mxu0 %v10975_v61  ;;  %v11018_v60 = vld [vmem:[%s11711_s12 + $0x16d8] ss:$20 sps:$4 sm:$0xff]   ;;  %v11023_v61 = vld [vmem:[%s11711_s12 + $0x1574] ss:$20 sps:$4 sm:$0xff]  }
 0x2f1   : > { %7641 = vmatprep.subr.bf16.mxu1 %v10978_v62  ;;  %v11026_v62 = vld [vmem:[%s11711_s12 + $0x16b4] ss:$20 sps:$4 sm:$0xff]  }
 0x2f3   : > { %7617 = vmatpush2.bf16.msra.mxu0 %v10973_v2  ;;  %v11021_v2 = vld [vmem:[%s11711_s12 + $0x1570] ss:$20 sps:$4 sm:$0xff]  }
 0x2f4   : > { %7642 = vmatpush1.bf16.msra.mxu1 %v10976_v5  ;;  %7618 = vmatprep.subr.bf16.mxu0 %v10981_v6  ;;  %v11024_v5 = vld [vmem:[%s11711_s12 + $0x16b0] ss:$20 sps:$4 sm:$0xff]   ;;  %v11029_v6 = vld [vmem:[%s11711_s12 + $0x154c] ss:$20 sps:$4 sm:$0xff]  }
 0x2f5   : > { %7643 = vmatprep.subr.bf16.mxu1 %v10984_v7  ;;  %v11032_v7 = vld [vmem:[%s11711_s12 + $0x168c] ss:$20 sps:$4 sm:$0xff]  }
 0x2f7   : > { %7619 = vmatpush2.bf16.msra.mxu0 %v10979_v20  ;;  %v11027_v20 = vld [vmem:[%s11711_s12 + $0x1548] ss:$20 sps:$4 sm:$0xff]  }
 0x2f8   : > { %7644 = vmatpush1.bf16.msra.mxu1 %v10982_v22  ;;  %7670 = vmatprep.subr.bf16.mxu0 %v10990_v23  ;;  %v11030_v22 = vld [vmem:[%s11711_s12 + $0x1688] ss:$20 sps:$4 sm:$0xff]   ;;  %v11038_v23 = vld [vmem:[%s11711_s12 + $0x1a24] ss:$20 sps:$4 sm:$0xff]  }
 0x2f9   : > { %7645 = vmatprep.subr.bf16.mxu1 %v10987_v17  ;;  %v11035_v17 = vld [vmem:[%s11711_s12 + $0x18e4] ss:$20 sps:$4 sm:$0xff]  }
 0x2fa   : > { %v7376_v26 = vpop.f32.mrf.mxu0  ;;  %7621 = vmatmul.mubr.bf16.vlgmr.msra.gmra.mxu0 %v12058_v4 }
 0x2fb   : > { %v12580_v16 = vadd.f32 %v7376_v26, %v12541_v30  ;;  %7671 = vmatpush1.bf16.msra.mxu0 %v10988_v27  ;;  %7702 = vmatprep.mubr.bf16.mxu0 %v12066_v12  ;;  %v10997_v30 = vld [vmem:[%s11711_s12 + $0x1610] ss:$20 sps:$4 sm:$0xff]   ;;  %v11036_v27 = vld [vmem:[%s11711_s12 + $0x1a20] ss:$20 sps:$4 sm:$0xff]   ;;  %v11039_v26 = vld [vmem:[%s11711_s12 + $0x18b8] ss:$20 sps:$4 sm:$0xff]  }
 0x2fc   : > { %7646 = vmatpush2.bf16.msra.mxu1 %v10985_v19  ;;  %v7378_v31 = vpop.f32.mrf.mxu0  ;;  %7672 = vmatprep.subr.bf16.mxu0 %v10996_v25  ;;  %v11033_v19 = vld [vmem:[%s11711_s12 + $0x18e0] ss:$20 sps:$4 sm:$0xff]   ;;  %v11044_v25 = vld [vmem:[%s11711_s12 + $0x19fc] ss:$20 sps:$4 sm:$0xff]  }
 0x2fd   : > { %7647 = vmatprep.subr.bf16.mxu1 %v10993_v28  ;;  %v12585_v35 = vadd.f32 %v7378_v31, %v12545_v32  ;;  %v11003_v32 = vld [vmem:[%s11711_s12 + $0x15e8] ss:$20 sps:$4 sm:$0xff]   ;;  %v11042_v31 = vld [vmem:[%s11711_s12 + $0x19f8] ss:$20 sps:$4 sm:$0xff]  }
 0x2fe   : > { %v7380_v36 = vpop.f32.mrf.mxu0  ;;  %v11041_v28 = vld [vmem:[%s11711_s12 + $0x18bc] ss:$20 sps:$4 sm:$0xff]  }
 0x2ff   : > { %7673 = vmatpush1.bf16.msra.mxu0 %v10994_v8  ;;  %v11050_v36 = vld [vmem:[%s11711_s12 + $0x19d4] ss:$20 sps:$4 sm:$0xff]  }
 0x300   : > { %7648 = vmatpush2.bf16.msra.mxu1 %v10991_v13  ;;  %v7381_v15 = vpop.f32.mrf.mxu0  ;;  %7674 = vmatprep.subr.bf16.mxu0 %v11002_v34  ;;  %v11047_v34 = vld [vmem:[%s11711_s12 + $0x1894] ss:$20 sps:$4 sm:$0xff]  }
 0x301   : > { %7649 = vmatprep.subr.bf16.mxu1 %v10999_v14  ;;  %v11048_v15 = vld [vmem:[%s11711_s12 + $0x19d0] ss:$20 sps:$4 sm:$0xff]  }
 0x303   : > { %7675 = vmatpush1.bf16.msra.mxu0 %v11000_v38  ;;  %v11045_v38 = vld [vmem:[%s11711_s12 + $0x1890] ss:$20 sps:$4 sm:$0xff]  }
 0x304   : > { %7650 = vmatpush2.bf16.msra.mxu1 %v10997_v30  ;;  %7676 = vmatprep.subr.bf16.mxu0 %v11008_v40  ;;  %v11056_v40 = vld [vmem:[%s11711_s12 + $0x19ac] ss:$20 sps:$4 sm:$0xff]  }
 0x305   : > { %7651 = vmatprep.subr.bf16.mxu1 %v11005_v39  ;;  %v11053_v39 = vld [vmem:[%s11711_s12 + $0x186c] ss:$20 sps:$4 sm:$0xff]  }
 0x307   : > { %7677 = vmatpush1.bf16.msra.mxu0 %v11006_v42  ;;  %v11054_v42 = vld [vmem:[%s11711_s12 + $0x19a8] ss:$20 sps:$4 sm:$0xff]  }
 0x308   : > { %7652 = vmatpush2.bf16.msra.mxu1 %v11003_v32  ;;  %7678 = vmatprep.subr.bf16.mxu0 %v11014_v46  ;;  %v11062_v46 = vld [vmem:[%s11711_s12 + $0x1984] ss:$20 sps:$4 sm:$0xff]  }
 0x309   : > { %7653 = vmatprep.subr.bf16.mxu1 %v11011_v45  ;;  %v11059_v45 = vld [vmem:[%s11711_s12 + $0x1844] ss:$20 sps:$4 sm:$0xff]  }
 0x30b   : > { %7679 = vmatpush1.bf16.msra.mxu0 %v11012_v48  ;;  %v11060_v48 = vld [vmem:[%s11711_s12 + $0x1980] ss:$20 sps:$4 sm:$0xff]  }
 0x30c   : > { %7654 = vmatpush2.bf16.msra.mxu1 %v11009_v47  ;;  %7680 = vmatprep.subr.bf16.mxu0 %v11020_v56  ;;  %v11057_v47 = vld [vmem:[%s11711_s12 + $0x1840] ss:$20 sps:$4 sm:$0xff]   ;;  %v11068_v56 = vld [vmem:[%s11711_s12 + $0x195c] ss:$20 sps:$4 sm:$0xff]  }
 0x30d   : > { %7655 = vmatprep.subr.bf16.mxu1 %v11017_v55  ;;  %v11065_v55 = vld [vmem:[%s11711_s12 + $0x181c] ss:$20 sps:$4 sm:$0xff]  }
 0x30f   : > { %7681 = vmatpush1.bf16.msra.mxu0 %v11018_v60  ;;  %v11066_v60 = vld [vmem:[%s11711_s12 + $0x1958] ss:$20 sps:$4 sm:$0xff]  }
 0x310   : > { %7656 = vmatpush2.bf16.msra.mxu1 %v11015_v59  ;;  %7682 = vmatprep.subr.bf16.mxu0 %v11026_v62  ;;  %v11063_v59 = vld [vmem:[%s11711_s12 + $0x1818] ss:$20 sps:$4 sm:$0xff]   ;;  %v11074_v62 = vld [vmem:[%s11711_s12 + $0x1934] ss:$20 sps:$4 sm:$0xff]  }
 0x311   : > { %7657 = vmatprep.subr.bf16.mxu1 %v11023_v61  ;;  %v11071_v61 = vld [vmem:[%s11711_s12 + $0x17f4] ss:$20 sps:$4 sm:$0xff]  }
 0x313   : > { %7683 = vmatpush1.bf16.msra.mxu0 %v11024_v5  ;;  %v11072_v5 = vld [vmem:[%s11711_s12 + $0x1930] ss:$20 sps:$4 sm:$0xff]  }
 0x314   : > { %7658 = vmatpush2.bf16.msra.mxu1 %v11021_v2  ;;  %7684 = vmatprep.subr.bf16.mxu0 %v11032_v7  ;;  %v11069_v2 = vld [vmem:[%s11711_s12 + $0x17f0] ss:$20 sps:$4 sm:$0xff]   ;;  %v11080_v7 = vld [vmem:[%s11711_s12 + $0x190c] ss:$20 sps:$4 sm:$0xff]  }
 0x315   : > { %7659 = vmatprep.subr.bf16.mxu1 %v11029_v6  ;;  %v11077_v6 = vld [vmem:[%s11711_s12 + $0x17cc] ss:$20 sps:$4 sm:$0xff]  }
 0x317   : > { %7685 = vmatpush1.bf16.msra.mxu0 %v11030_v22  ;;  %v11078_v22 = vld [vmem:[%s11711_s12 + $0x1908] ss:$20 sps:$4 sm:$0xff]  }
 0x318   : > { %7660 = vmatpush2.bf16.msra.mxu1 %v11027_v20  ;;  %7686 = vmatprep.subr.bf16.mxu0 %v11035_v17  ;;  %v11075_v20 = vld [vmem:[%s11711_s12 + $0x17c8] ss:$20 sps:$4 sm:$0xff]   ;;  %v11083_v17 = vld [vmem:[%s11711_s12 + $0x1b64] ss:$20 sps:$4 sm:$0xff]  }
 0x319   : > { %7711 = vmatprep.subr.bf16.mxu1 %v11038_v23  ;;  %v11086_v23 = vld [vmem:[%s11711_s12 + $0x1ca4] ss:$20 sps:$4 sm:$0xff]  }
 0x31b   : > { %v7417_v13 = vpop.f32.mrf.mxu1  ;;  %7662 = vmatmul.mubr.bf16.vlgmr.msra.gmra.mxu1 %v12142_v57  ;;  %7687 = vmatpush2.bf16.msra.mxu0 %v11033_v19  ;;  %v11081_v19 = vld [vmem:[%s11711_s12 + $0x1b60] ss:$20 sps:$4 sm:$0xff]  }
 0x31c   : > { %v12618_v8 = vadd.f32 %v7417_v13, %v12580_v16  ;;  %7712 = vmatpush1.bf16.msra.mxu1 %v11036_v27  ;;  %7688 = vmatprep.subr.bf16.mxu0 %v11041_v28  ;;  %v11084_v27 = vld [vmem:[%s11711_s12 + $0x1ca0] ss:$20 sps:$4 sm:$0xff]   ;;  %v11089_v28 = vld [vmem:[%s11711_s12 + $0x1b3c] ss:$20 sps:$4 sm:$0xff]  }
 0x31d   : > { %v7419_v14 = vpop.f32.mrf.mxu1  ;;  %7713 = vmatprep.subr.bf16.mxu1 %v11044_v25  ;;  %7743 = vmatprep.mubr.bf16.mxu1 %v12150_v63  ;;  %v11092_v25 = vld [vmem:[%s11711_s12 + $0x1c7c] ss:$20 sps:$4 sm:$0xff]  }
 0x31e   : > { %v12625_v30 = vadd.f32 %v7419_v14, %v12585_v35  ;;  %v11051_v35 = vld [vmem:[%s11711_s12 + $0x1868] ss:$20 sps:$4 sm:$0xff]   ;;  %v11090_v14 = vld [vmem:[%s11711_s12 + $0x1c78] ss:$20 sps:$4 sm:$0xff]  }
 0x31f   : > { %v7421_v16 = vpop.f32.mrf.mxu1  ;;  %7689 = vmatpush2.bf16.msra.mxu0 %v11039_v26 }
 0x320   : > { %7714 = vmatpush1.bf16.msra.mxu1 %v11042_v31  ;;  %7690 = vmatprep.subr.bf16.mxu0 %v11047_v34  ;;  %v11087_v31 = vld [vmem:[%s11711_s12 + $0x1b38] ss:$20 sps:$4 sm:$0xff]   ;;  %v11098_v16 = vld [vmem:[%s11711_s12 + $0x1c54] ss:$20 sps:$4 sm:$0xff]  }
 0x321   : > { %7715 = vmatprep.subr.bf16.mxu1 %v11050_v36  ;;  %v7422_v32 = vpop.f32.mrf.mxu1  ;;  %v11095_v36 = vld [vmem:[%s11711_s12 + $0x1b14] ss:$20 sps:$4 sm:$0xff]  }
 0x322   : > { %v11101_v32 = vld [vmem:[%s11711_s12 + $0x1aec] ss:$20 sps:$4 sm:$0xff]  }
 0x323   : > { %7691 = vmatpush2.bf16.msra.mxu0 %v11045_v38 }
 0x324   : > { %7716 = vmatpush1.bf16.msra.mxu1 %v11048_v15  ;;  %7692 = vmatprep.subr.bf16.mxu0 %v11053_v39  ;;  %v11093_v15 = vld [vmem:[%s11711_s12 + $0x1b10] ss:$20 sps:$4 sm:$0xff]  }
 0x325   : > { %7717 = vmatprep.subr.bf16.mxu1 %v11056_v40  ;;  %v11096_v39 = vld [vmem:[%s11711_s12 + $0x1c50] ss:$20 sps:$4 sm:$0xff]  }
 0x327   : > { %7693 = vmatpush2.bf16.msra.mxu0 %v11051_v35  ;;  %v11104_v35 = vld [vmem:[%s11711_s12 + $0x1c2c] ss:$20 sps:$4 sm:$0xff]  }
 0x328   : > { %7718 = vmatpush1.bf16.msra.mxu1 %v11054_v42  ;;  %7694 = vmatprep.subr.bf16.mxu0 %v11059_v45  ;;  %v11102_v42 = vld [vmem:[%s11711_s12 + $0x1c28] ss:$20 sps:$4 sm:$0xff]   ;;  %v11107_v45 = vld [vmem:[%s11711_s12 + $0x1ac4] ss:$20 sps:$4 sm:$0xff]  }
 0x329   : > { %7719 = vmatprep.subr.bf16.mxu1 %v11062_v46  ;;  %v11110_v46 = vld [vmem:[%s11711_s12 + $0x1c04] ss:$20 sps:$4 sm:$0xff]  }
 0x32b   : > { %7695 = vmatpush2.bf16.msra.mxu0 %v11057_v47  ;;  %v11105_v47 = vld [vmem:[%s11711_s12 + $0x1ac0] ss:$20 sps:$4 sm:$0xff]  }
 0x32c   : > { %7720 = vmatpush1.bf16.msra.mxu1 %v11060_v48  ;;  %7696 = vmatprep.subr.bf16.mxu0 %v11065_v55  ;;  %v11108_v48 = vld [vmem:[%s11711_s12 + $0x1c00] ss:$20 sps:$4 sm:$0xff]   ;;  %v11113_v55 = vld [vmem:[%s11711_s12 + $0x1a9c] ss:$20 sps:$4 sm:$0xff]  }
 0x32d   : > { %7721 = vmatprep.subr.bf16.mxu1 %v11068_v56  ;;  %v11116_v56 = vld [vmem:[%s11711_s12 + $0x1bdc] ss:$20 sps:$4 sm:$0xff]  }
 0x32f   : > { %7697 = vmatpush2.bf16.msra.mxu0 %v11063_v59  ;;  %v11111_v59 = vld [vmem:[%s11711_s12 + $0x1a98] ss:$20 sps:$4 sm:$0xff]  }
 0x330   : > { %7722 = vmatpush1.bf16.msra.mxu1 %v11066_v60  ;;  %7698 = vmatprep.subr.bf16.mxu0 %v11071_v61  ;;  %v11114_v60 = vld [vmem:[%s11711_s12 + $0x1bd8] ss:$20 sps:$4 sm:$0xff]   ;;  %v11119_v61 = vld [vmem:[%s11711_s12 + $0x1a74] ss:$20 sps:$4 sm:$0xff]  }
 0x331   : > { %7723 = vmatprep.subr.bf16.mxu1 %v11074_v62  ;;  %v11122_v62 = vld [vmem:[%s11711_s12 + $0x1bb4] ss:$20 sps:$4 sm:$0xff]  }
 0x333   : > { %7699 = vmatpush2.bf16.msra.mxu0 %v11069_v2  ;;  %v11117_v2 = vld [vmem:[%s11711_s12 + $0x1a70] ss:$20 sps:$4 sm:$0xff]  }
 0x334   : > { %7724 = vmatpush1.bf16.msra.mxu1 %v11072_v5  ;;  %7700 = vmatprep.subr.bf16.mxu0 %v11077_v6  ;;  %v11120_v5 = vld [vmem:[%s11711_s12 + $0x1bb0] ss:$20 sps:$4 sm:$0xff]   ;;  %v11125_v6 = vld [vmem:[%s11711_s12 + $0x1a4c] ss:$20 sps:$4 sm:$0xff]  }
 0x335   : > { %7725 = vmatprep.subr.bf16.mxu1 %v11080_v7  ;;  %v11128_v7 = vld [vmem:[%s11711_s12 + $0x1b8c] ss:$20 sps:$4 sm:$0xff]  }
 0x337   : > { %7701 = vmatpush2.bf16.msra.mxu0 %v11075_v20  ;;  %v11123_v20 = vld [vmem:[%s11711_s12 + $0x1a48] ss:$20 sps:$4 sm:$0xff]  }
 0x338   : > { %7726 = vmatpush1.bf16.msra.mxu1 %v11078_v22  ;;  %7752 = vmatprep.subr.bf16.mxu0 %v11086_v23  ;;  %v11126_v22 = vld [vmem:[%s11711_s12 + $0x1b88] ss:$20 sps:$4 sm:$0xff]   ;;  %v11134_v23 = vld [vmem:[%s11711_s12 + $0x1f24] ss:$20 sps:$4 sm:$0xff]  }
 0x339   : > { %7727 = vmatprep.subr.bf16.mxu1 %v11083_v17  ;;  %v11131_v17 = vld [vmem:[%s11711_s12 + $0x1de4] ss:$20 sps:$4 sm:$0xff]  }
 0x33a   : > { %v7458_v13 = vpop.f32.mrf.mxu0  ;;  %7703 = vmatmul.mubr.bf16.vlgmr.msra.gmra.mxu0 %v12144_v58 }
 0x33b   : > { %v12658_v26 = vadd.f32 %v7458_v13, %v12618_v8  ;;  %7753 = vmatpush1.bf16.msra.mxu0 %v11084_v27  ;;  %7784 = vmatprep.mubr.bf16.mxu0 %v12152_v0  ;;  %v11132_v27 = vld [vmem:[%s11711_s12 + $0x1f20] ss:$20 sps:$4 sm:$0xff]  }
 0x33c   : > { %7728 = vmatpush2.bf16.msra.mxu1 %v11081_v19  ;;  %v7460_v34 = vpop.f32.mrf.mxu0  ;;  %7754 = vmatprep.subr.bf16.mxu0 %v11092_v25  ;;  %v11129_v19 = vld [vmem:[%s11711_s12 + $0x1de0] ss:$20 sps:$4 sm:$0xff]   ;;  %v11140_v25 = vld [vmem:[%s11711_s12 + $0x1efc] ss:$20 sps:$4 sm:$0xff]  }
 0x33d   : > { %7729 = vmatprep.subr.bf16.mxu1 %v11089_v28  ;;  %v12665_v38 = vadd.f32 %v7460_v34, %v12625_v30  ;;  %v11099_v30 = vld [vmem:[%s11711_s12 + $0x1ae8] ss:$20 sps:$4 sm:$0xff]   ;;  %v11138_v34 = vld [vmem:[%s11711_s12 + $0x1ef8] ss:$20 sps:$4 sm:$0xff]  }
 0x33e   : > { %v7462_v8 = vpop.f32.mrf.mxu0  ;;  %v11137_v28 = vld [vmem:[%s11711_s12 + $0x1dbc] ss:$20 sps:$4 sm:$0xff]  }
 0x33f   : > { %7755 = vmatpush1.bf16.msra.mxu0 %v11090_v14  ;;  %v11135_v14 = vld [vmem:[%s11711_s12 + $0x1db8] ss:$20 sps:$4 sm:$0xff]   ;;  %v11146_v8 = vld [vmem:[%s11711_s12 + $0x1ed4] ss:$20 sps:$4 sm:$0xff]  }
 0x340   : > { %7730 = vmatpush2.bf16.msra.mxu1 %v11087_v31  ;;  %v7463_v40 = vpop.f32.mrf.mxu0  ;;  %7756 = vmatprep.subr.bf16.mxu0 %v11098_v16  ;;  %v11143_v16 = vld [vmem:[%s11711_s12 + $0x1d94] ss:$20 sps:$4 sm:$0xff]  }
 0x341   : > { %7731 = vmatprep.subr.bf16.mxu1 %v11095_v36  ;;  %v11144_v40 = vld [vmem:[%s11711_s12 + $0x1ed0] ss:$20 sps:$4 sm:$0xff]  }
 0x343   : > { %7757 = vmatpush1.bf16.msra.mxu0 %v11096_v39  ;;  %v11141_v39 = vld [vmem:[%s11711_s12 + $0x1d90] ss:$20 sps:$4 sm:$0xff]  }
 0x344   : > { %7732 = vmatpush2.bf16.msra.mxu1 %v11093_v15  ;;  %7758 = vmatprep.subr.bf16.mxu0 %v11104_v35  ;;  %v11152_v35 = vld [vmem:[%s11711_s12 + $0x1eac] ss:$20 sps:$4 sm:$0xff]  }
 0x345   : > { %7733 = vmatprep.subr.bf16.mxu1 %v11101_v32  ;;  %v11149_v32 = vld [vmem:[%s11711_s12 + $0x1d6c] ss:$20 sps:$4 sm:$0xff]  }
 0x347   : > { %7759 = vmatpush1.bf16.msra.mxu0 %v11102_v42  ;;  %v11155_v42 = vld [vmem:[%s11711_s12 + $0x1d44] ss:$20 sps:$4 sm:$0xff]  }
 0x348   : > { %7734 = vmatpush2.bf16.msra.mxu1 %v11099_v30  ;;  %7760 = vmatprep.subr.bf16.mxu0 %v11110_v46  ;;  %v11153_v46 = vld [vmem:[%s11711_s12 + $0x1d40] ss:$20 sps:$4 sm:$0xff]  }
 0x349   : > { %7735 = vmatprep.subr.bf16.mxu1 %v11107_v45  ;;  %v11158_v45 = vld [vmem:[%s11711_s12 + $0x1e84] ss:$20 sps:$4 sm:$0xff]  }
 0x34b   : > { %7761 = vmatpush1.bf16.msra.mxu0 %v11108_v48  ;;  %v11161_v48 = vld [vmem:[%s11711_s12 + $0x1d1c] ss:$20 sps:$4 sm:$0xff]  }
 0x34c   : > { %7736 = vmatpush2.bf16.msra.mxu1 %v11105_v47  ;;  %7762 = vmatprep.subr.bf16.mxu0 %v11116_v56  ;;  %v11156_v47 = vld [vmem:[%s11711_s12 + $0x1e80] ss:$20 sps:$4 sm:$0xff]   ;;  %v11159_v56 = vld [vmem:[%s11711_s12 + $0x1d18] ss:$20 sps:$4 sm:$0xff]  }
 0x34d   : > { %7737 = vmatprep.subr.bf16.mxu1 %v11113_v55  ;;  %v11164_v55 = vld [vmem:[%s11711_s12 + $0x1e5c] ss:$20 sps:$4 sm:$0xff]  }
 0x34f   : > { %7763 = vmatpush1.bf16.msra.mxu0 %v11114_v60  ;;  %v11167_v60 = vld [vmem:[%s11711_s12 + $0x1cf4] ss:$20 sps:$4 sm:$0xff]  }
 0x350   : > { %7738 = vmatpush2.bf16.msra.mxu1 %v11111_v59  ;;  %7764 = vmatprep.subr.bf16.mxu0 %v11122_v62  ;;  %v11162_v59 = vld [vmem:[%s11711_s12 + $0x1e58] ss:$20 sps:$4 sm:$0xff]   ;;  %v11165_v62 = vld [vmem:[%s11711_s12 + $0x1cf0] ss:$20 sps:$4 sm:$0xff]  }
 0x351   : > { %7739 = vmatprep.subr.bf16.mxu1 %v11119_v61  ;;  %v11170_v61 = vld [vmem:[%s11711_s12 + $0x1e34] ss:$20 sps:$4 sm:$0xff]  }
 0x353   : > { %7765 = vmatpush1.bf16.msra.mxu0 %v11120_v5  ;;  %v11173_v5 = vld [vmem:[%s11711_s12 + $0x1ccc] ss:$20 sps:$4 sm:$0xff]  }
 0x354   : > { %7740 = vmatpush2.bf16.msra.mxu1 %v11117_v2  ;;  %7766 = vmatprep.subr.bf16.mxu0 %v11128_v7  ;;  %v11168_v2 = vld [vmem:[%s11711_s12 + $0x1e30] ss:$20 sps:$4 sm:$0xff]   ;;  %v11171_v7 = vld [vmem:[%s11711_s12 + $0x1cc8] ss:$20 sps:$4 sm:$0xff]  }
 0x355   : > { %7741 = vmatprep.subr.bf16.mxu1 %v11125_v6  ;;  %v11176_v6 = vld [vmem:[%s11711_s12 + $0x1e0c] ss:$20 sps:$4 sm:$0xff]  }
 0x357   : > { %7767 = vmatpush1.bf16.msra.mxu0 %v11126_v22  ;;  %v11177_v22 = vld [vmem:[%s11711_s12 + $0x268] ss:$20 sps:$4 sm:$0xff]  }
 0x358   : > { %7742 = vmatpush2.bf16.msra.mxu1 %v11123_v20  ;;  %7768 = vmatprep.subr.bf16.mxu0 %v11131_v17  ;;  %v11174_v20 = vld [vmem:[%s11711_s12 + $0x1e08] ss:$20 sps:$4 sm:$0xff]  }
 0x359   : > { %7793 = vmatprep.subr.bf16.mxu1 %v11134_v23  ;;  %v11178_v17 = vld [vmem:[%s11711_s12 + $0x4e8] ss:$20 sps:$4 sm:$0xff]  }
 0x35a   : > { %v11179_v23 = vld [vmem:[%s11711_s12 + $0x128] ss:$20 sps:$4 sm:$0xff]  }
 0x35b   : > { %v7499_v13 = vpop.f32.mrf.mxu1  ;;  %7744 = vmatmul.mubr.bf16.vlgmr.msra.gmra.mxu1 %v12226_v52  ;;  %7769 = vmatpush2.bf16.msra.mxu0 %v11129_v19  ;;  %v11180_v19 = vld [vmem:[%s11711_s12 + $0x3a8] ss:$20 sps:$4 sm:$0xff]  }
 0x35c   : > { %v12698_v31 = vadd.f32 %v7499_v13, %v12658_v26  ;;  %7794 = vmatpush1.bf16.msra.mxu1 %v11132_v27  ;;  %7770 = vmatprep.subr.bf16.mxu0 %v11137_v28  ;;  %v11181_v27 = vld [vmem:[%s11711_s12 + $0x240] ss:$20 sps:$4 sm:$0xff]  }
 0x35d   : > { %v7501_v36 = vpop.f32.mrf.mxu1  ;;  %7795 = vmatprep.subr.bf16.mxu1 %v11140_v25  ;;  %7825 = vmatprep.mubr.bf16.mxu1 %v11535_v18  ;;  %v11150_v18 = vld [vmem:[%s11711_s12 + $0x1ea8] ss:$20 sps:$4 sm:$0xff]   ;;  %v11182_v28 = vld [vmem:[%s11711_s12 + $0x4c0] ss:$20 sps:$4 sm:$0xff]  }
 0x35e   : > { %v12705_v15 = vadd.f32 %v7501_v36, %v12665_v38  ;;  %v11147_v38 = vld [vmem:[%s11711_s12 + $0x1d68] ss:$20 sps:$4 sm:$0xff]  }
 0x35f   : > { %v7503_v26 = vpop.f32.mrf.mxu1  ;;  %7771 = vmatpush2.bf16.msra.mxu0 %v11135_v14  ;;  %v11183_v14 = vld [vmem:[%s11711_s12 + $0x100] ss:$20 sps:$4 sm:$0xff]  }
 0x360   : > { %7796 = vmatpush1.bf16.msra.mxu1 %v11138_v34  ;;  %7772 = vmatprep.subr.bf16.mxu0 %v11143_v16  ;;  %v11184_v34 = vld [vmem:[%s11711_s12 + $0x380] ss:$20 sps:$4 sm:$0xff]   ;;  %v11185_v16 = vld [vmem:[%s11711_s12 + $0x218] ss:$20 sps:$4 sm:$0xff]  }
 0x361   : > { %7797 = vmatprep.subr.bf16.mxu1 %v11146_v8  ;;  %v7504_v30 = vpop.f32.mrf.mxu1  ;;  %v11186_v8 = vld [vmem:[%s11711_s12 + $0x498] ss:$20 sps:$4 sm:$0xff]  }
 0x362   : > { %v11193_v30 = vld [vmem:[%s11711_s12 + $0x1c8] ss:$20 sps:$4 sm:$0xff]  }
 0x363   : > { %7773 = vmatpush2.bf16.msra.mxu0 %v11141_v39  ;;  %v11187_v39 = vld [vmem:[%s11711_s12 + $0xd8] ss:$20 sps:$4 sm:$0xff]  }
 0x364   : > { %7798 = vmatpush1.bf16.msra.mxu1 %v11144_v40  ;;  %7774 = vmatprep.subr.bf16.mxu0 %v11149_v32  ;;  %v11188_v40 = vld [vmem:[%s11711_s12 + $0x358] ss:$20 sps:$4 sm:$0xff]  }
 0x365   : > { %7799 = vmatprep.subr.bf16.mxu1 %v11152_v35  ;;  %v11189_v35 = vld [vmem:[%s11711_s12 + $0x1f0] ss:$20 sps:$4 sm:$0xff]  }
 0x367   : > { %7775 = vmatpush2.bf16.msra.mxu0 %v11147_v38  ;;  %v11194_v38 = vld [vmem:[%s11711_s12 + $0x448] ss:$20 sps:$4 sm:$0xff]  }
 0x368   : > { %7800 = vmatpush1.bf16.msra.mxu1 %v11150_v18  ;;  %7776 = vmatprep.subr.bf16.mxu0 %v11155_v42  ;;  %v11195_v18 = vld [vmem:[%s11711_s12 + $0x88] ss:$20 sps:$4 sm:$0xff]  }
 0x369   : > { %7801 = vmatprep.subr.bf16.mxu1 %v11158_v45  ;;  %v11196_v42 = vld [vmem:[%s11711_s12 + $0x308] ss:$20 sps:$4 sm:$0xff]   ;;  %v11197_v45 = vld [vmem:[%s11711_s12 + $0x1a0] ss:$20 sps:$4 sm:$0xff]  }
 0x36b   : > { %7777 = vmatpush2.bf16.msra.mxu0 %v11153_v46  ;;  %v11198_v46 = vld [vmem:[%s11711_s12 + $0x420] ss:$20 sps:$4 sm:$0xff]  }
 0x36c   : > { %7802 = vmatpush1.bf16.msra.mxu1 %v11156_v47  ;;  %7778 = vmatprep.subr.bf16.mxu0 %v11161_v48  ;;  %v11199_v47 = vld [vmem:[%s11711_s12 + $0x60] ss:$20 sps:$4 sm:$0xff]  }
 0x36d   : > { %7803 = vmatprep.subr.bf16.mxu1 %v11164_v55  ;;  %v11200_v48 = vld [vmem:[%s11711_s12 + $0x2e0] ss:$20 sps:$4 sm:$0xff]   ;;  %v11201_v55 = vld [vmem:[%s11711_s12 + $0x178] ss:$20 sps:$4 sm:$0xff]  }
 0x36f   : > { %7779 = vmatpush2.bf16.msra.mxu0 %v11159_v56  ;;  %v11202_v56 = vld [vmem:[%s11711_s12 + $0x3f8] ss:$20 sps:$4 sm:$0xff]  }
 0x370   : > { %7804 = vmatpush1.bf16.msra.mxu1 %v11162_v59  ;;  %7780 = vmatprep.subr.bf16.mxu0 %v11167_v60  ;;  %v11203_v59 = vld [vmem:[%s11711_s12 + $0x38] ss:$20 sps:$4 sm:$0xff]  }
 0x371   : > { %7805 = vmatprep.subr.bf16.mxu1 %v11170_v61  ;;  %v11204_v60 = vld [vmem:[%s11711_s12 + $0x2b8] ss:$20 sps:$4 sm:$0xff]   ;;  %v11205_v61 = vld [vmem:[%s11711_s12 + $0x150] ss:$20 sps:$4 sm:$0xff]  }
 0x373   : > { %7781 = vmatpush2.bf16.msra.mxu0 %v11165_v62  ;;  %v11206_v62 = vld [vmem:[%s11711_s12 + $0x3d0] ss:$20 sps:$4 sm:$0xff]  }
 0x374   : > { %7806 = vmatpush1.bf16.msra.mxu1 %v11168_v2  ;;  %7782 = vmatprep.subr.bf16.mxu0 %v11173_v5  ;;  %v11207_v2 = vld [vmem:[%s11711_s12 + $0x10] ss:$20 sps:$4 sm:$0xff]  }
 0x375   : > { %7807 = vmatprep.subr.bf16.mxu1 %v11176_v6  ;;  %v11208_v5 = vld [vmem:[%s11711_s12 + $0x290] ss:$20 sps:$4 sm:$0xff]   ;;  %v11209_v6 = vld [vmem:[%s11711_s12 + $0x768] ss:$20 sps:$4 sm:$0xff]  }
 0x377   : > { %7783 = vmatpush2.bf16.msra.mxu0 %v11171_v7  ;;  %v11211_v7 = vld [vmem:[%s11711_s12 + $0x9e8] ss:$20 sps:$4 sm:$0xff]  }
 0x378   : > { %7808 = vmatpush1.bf16.msra.mxu1 %v11174_v20  ;;  %9571 = vmatprep.subr.bf16.mxu0 %v11177_v22  ;;  %v11210_v20 = vld [vmem:[%s11711_s12 + $0x628] ss:$20 sps:$4 sm:$0xff]  }
 0x379   : > { %9593 = vmatprep.subr.bf16.mxu1 %v11178_v17  ;;  %v11212_v22 = vld [vmem:[%s11711_s12 + $0x8a8] ss:$20 sps:$4 sm:$0xff]   ;;  %v11213_v17 = vld [vmem:[%s11711_s12 + $0x740] ss:$20 sps:$4 sm:$0xff]  }
 0x37a   : > { %v7540_v25 = vpop.f32.mrf.mxu0  ;;  %7785 = vmatmul.mubr.bf16.vlgmr.msra.gmra.mxu0 %v12228_v54 }
 0x37b   : > { %7826 = vmatmul.mubr.bf16.vlgmr.msra.gmra.mxu1 %v12273_v1  ;;  %v12739_v13 = vadd.f32 %v7540_v25, %v12698_v31  ;;  %9572 = vmatpush3.bf16.msra.mxu0 %v11179_v23  ;;  %v11215_v23 = vld [vmem:[%s11711_s12 + $0x9c0] ss:$20 sps:$4 sm:$0xff]  }
 0x37c   : > { %9594 = vmatpush3.bf16.msra.mxu1 %v11180_v19  ;;  %v7542_v36 = vpop.f32.mrf.mxu0  ;;  %9573 = vmatprep.subr.bf16.mxu0 %v11181_v27  ;;  %v11216_v25 = vld [vmem:[%s11711_s12 + $0x880] ss:$20 sps:$4 sm:$0xff]  }
 0x37d   : > { %9595 = vmatprep.subr.bf16.mxu1 %v11182_v28  ;;  %v12746_v26 = vadd.f32 %v7542_v36, %v12705_v15  ;;  %7866 = vmatprep.mubr.bf16.mxu0 %v11787_v50  ;;  %v11190_v15 = vld [vmem:[%s11711_s12 + $0x470] ss:$20 sps:$4 sm:$0xff]   ;;  %v11214_v28 = vld [vmem:[%s11711_s12 + $0x600] ss:$20 sps:$4 sm:$0xff]   ;;  %v11219_v36 = vld [vmem:[%s11711_s12 + $0x998] ss:$20 sps:$4 sm:$0xff]  }
 0x37e   : > { %7906 = vmatprep.mubr.bf16.mxu1 %v11791_v53  ;;  %v7544_v31 = vpop.f32.mrf.mxu0  ;;  %v11191_v50 = vld [vmem:[%s11711_s12 + $0xb0] ss:$20 sps:$4 sm:$0xff]  }
 0x37f   : > { %9574 = vmatpush3.bf16.msra.mxu0 %v11183_v14  ;;  %v11192_v53 = vld [vmem:[%s11711_s12 + $0x330] ss:$20 sps:$4 sm:$0xff]  }
 0x380   : > { %9596 = vmatpush3.bf16.msra.mxu1 %v11184_v34  ;;  %v7545_v32 = vpop.f32.mrf.mxu0  ;;  %9575 = vmatprep.subr.bf16.mxu0 %v11185_v16  ;;  %v11217_v34 = vld [vmem:[%s11711_s12 + $0x718] ss:$20 sps:$4 sm:$0xff]   ;;  %v11223_v31 = vld [vmem:[%s11711_s12 + $0x970] ss:$20 sps:$4 sm:$0xff]  }
 0x381   : > { %9597 = vmatprep.subr.bf16.mxu1 %v11186_v8  ;;  %v11220_v16 = vld [vmem:[%s11711_s12 + $0x858] ss:$20 sps:$4 sm:$0xff]   ;;  %v11221_v8 = vld [vmem:[%s11711_s12 + $0x6f0] ss:$20 sps:$4 sm:$0xff]   ;;  %v11226_v32 = vld [vmem:[%s11711_s12 + $0x588] ss:$20 sps:$4 sm:$0xff]  }
 0x383   : > { %9576 = vmatpush3.bf16.msra.mxu0 %v11187_v39  ;;  %v11225_v39 = vld [vmem:[%s11711_s12 + $0x6c8] ss:$20 sps:$4 sm:$0xff]  }
 0x384   : > { %9598 = vmatpush3.bf16.msra.mxu1 %v11188_v40  ;;  %9577 = vmatprep.subr.bf16.mxu0 %v11189_v35  ;;  %v11227_v40 = vld [vmem:[%s11711_s12 + $0x948] ss:$20 sps:$4 sm:$0xff]  }
 0x385   : > { %9599 = vmatprep.subr.bf16.mxu1 %v11190_v15  ;;  %v11228_v35 = vld [vmem:[%s11711_s12 + $0x808] ss:$20 sps:$4 sm:$0xff]   ;;  %v11229_v15 = vld [vmem:[%s11711_s12 + $0x6a0] ss:$20 sps:$4 sm:$0xff]  }
 0x387   : > { %9578 = vmatpush3.bf16.msra.mxu0 %v11191_v50  ;;  %v11231_v50 = vld [vmem:[%s11711_s12 + $0x920] ss:$20 sps:$4 sm:$0xff]  }
 0x388   : > { %9600 = vmatpush3.bf16.msra.mxu1 %v11192_v53  ;;  %9579 = vmatprep.subr.bf16.mxu0 %v11193_v30  ;;  %v11230_v53 = vld [vmem:[%s11711_s12 + $0x560] ss:$20 sps:$4 sm:$0xff]  }
 0x389   : > { %9601 = vmatprep.subr.bf16.mxu1 %v11194_v38  ;;  %v11232_v30 = vld [vmem:[%s11711_s12 + $0x7e0] ss:$20 sps:$4 sm:$0xff]   ;;  %v11233_v38 = vld [vmem:[%s11711_s12 + $0x678] ss:$20 sps:$4 sm:$0xff]  }
 0x38b   : > { %9580 = vmatpush3.bf16.msra.mxu0 %v11195_v18  ;;  %v11235_v18 = vld [vmem:[%s11711_s12 + $0x8f8] ss:$20 sps:$4 sm:$0xff]  }
 0x38c   : > { %9602 = vmatpush3.bf16.msra.mxu1 %v11196_v42  ;;  %9581 = vmatprep.subr.bf16.mxu0 %v11197_v45  ;;  %v11234_v42 = vld [vmem:[%s11711_s12 + $0x538] ss:$20 sps:$4 sm:$0xff]  }
 0x38d   : > { %9603 = vmatprep.subr.bf16.mxu1 %v11198_v46  ;;  %v11236_v45 = vld [vmem:[%s11711_s12 + $0x7b8] ss:$20 sps:$4 sm:$0xff]   ;;  %v11237_v46 = vld [vmem:[%s11711_s12 + $0x650] ss:$20 sps:$4 sm:$0xff]  }
 0x38f   : > { %9582 = vmatpush3.bf16.msra.mxu0 %v11199_v47  ;;  %v11239_v47 = vld [vmem:[%s11711_s12 + $0x8d0] ss:$20 sps:$4 sm:$0xff]  }
 0x390   : > { %9604 = vmatpush3.bf16.msra.mxu1 %v11200_v48  ;;  %9583 = vmatprep.subr.bf16.mxu0 %v11201_v55  ;;  %v11238_v48 = vld [vmem:[%s11711_s12 + $0x510] ss:$20 sps:$4 sm:$0xff]  }
 0x391   : > { %9605 = vmatprep.subr.bf16.mxu1 %v11202_v56  ;;  %v11240_v55 = vld [vmem:[%s11711_s12 + $0x790] ss:$20 sps:$4 sm:$0xff]   ;;  %v11241_v56 = vld [vmem:[%s11711_s12 + $0xc68] ss:$20 sps:$4 sm:$0xff]  }
 0x393   : > { %9584 = vmatpush3.bf16.msra.mxu0 %v11203_v59  ;;  %v11243_v59 = vld [vmem:[%s11711_s12 + $0xee8] ss:$20 sps:$4 sm:$0xff]  }
 0x394   : > { %9606 = vmatpush3.bf16.msra.mxu1 %v11204_v60  ;;  %9585 = vmatprep.subr.bf16.mxu0 %v11205_v61  ;;  %v11242_v60 = vld [vmem:[%s11711_s12 + $0xb28] ss:$20 sps:$4 sm:$0xff]  }
 0x395   : > { %9607 = vmatprep.subr.bf16.mxu1 %v11206_v62  ;;  %v11244_v61 = vld [vmem:[%s11711_s12 + $0xda8] ss:$20 sps:$4 sm:$0xff]   ;;  %v11245_v62 = vld [vmem:[%s11711_s12 + $0xc40] ss:$20 sps:$4 sm:$0xff]  }
 0x397   : > { %9586 = vmatpush3.bf16.msra.mxu0 %v11207_v2  ;;  %v11247_v2 = vld [vmem:[%s11711_s12 + $0xec0] ss:$20 sps:$4 sm:$0xff]  }
 0x398   : > { %9608 = vmatpush3.bf16.msra.mxu1 %v11208_v5  ;;  %9615 = vmatprep.subr.bf16.mxu0 %v11209_v6 }
 0x399   : > { %9637 = vmatprep.subr.bf16.mxu1 %v11211_v7  ;;  %v11246_v7 = vld [vmem:[%s11711_s12 + $0xb00] ss:$20 sps:$4 sm:$0xff]  }
 0x39a   : > { %7867 = vmatmul.mubr.bf16.vlgmr.msra.gmra.mxu0 %v11814_v9 }
 0x39b   : > { %v7581_v19 = vpop.f32.mrf.mxu1  ;;  %7907 = vmatmul.mubr.bf16.vlgmr.msra.gmra.mxu1 %v11816_v10  ;;  %9616 = vmatpush3.bf16.msra.mxu0 %v11210_v20  ;;  %v11248_v20 = vld [vmem:[%s11711_s12 + $0xd80] ss:$20 sps:$4 sm:$0xff]  }
 0x39c   : > { %v12781_v27 = vadd.f32 %v7581_v19, %v12739_v13  ;;  %9638 = vmatpush3.bf16.msra.mxu1 %v11212_v22  ;;  %9617 = vmatprep.subr.bf16.mxu0 %v11213_v17  ;;  %v11218_v13 = vld [vmem:[%s11711_s12 + $0x5d8] ss:$20 sps:$4 sm:$0xff]  }
 0x39d   : > { %v7583_v14 = vpop.f32.mrf.mxu1  ;;  %9639 = vmatprep.subr.bf16.mxu1 %v11215_v23  ;;  %7946 = vmatprep.mubr.bf16.mxu0 %v11846_v37  ;;  %v11222_v37 = vld [vmem:[%s11711_s12 + $0x5b0] ss:$20 sps:$4 sm:$0xff]   ;;  %v11249_v17 = vld [vmem:[%s11711_s12 + $0xc18] ss:$20 sps:$4 sm:$0xff]  }
 0x39e   : > { %v12788_v9 = vadd.f32 %v7583_v14, %v12746_v26  ;;  %7986 = vmatprep.mubr.bf16.mxu1 %v11851_v41  ;;  %v11224_v41 = vld [vmem:[%s11711_s12 + $0x830] ss:$20 sps:$4 sm:$0xff]   ;;  %v11251_v23 = vld [vmem:[%s11711_s12 + $0xe98] ss:$20 sps:$4 sm:$0xff]  }
 0x39f   : > { %v7585_v10 = vpop.f32.mrf.mxu1  ;;  %9618 = vmatpush3.bf16.msra.mxu0 %v11214_v28  ;;  %v11250_v19 = vld [vmem:[%s11711_s12 + $0xad8] ss:$20 sps:$4 sm:$0xff]   ;;  %v11255_v14 = vld [vmem:[%s11711_s12 + $0xe70] ss:$20 sps:$4 sm:$0xff]  }
 0x3a0   : > { %9640 = vmatpush3.bf16.msra.mxu1 %v11216_v25  ;;  %9619 = vmatprep.subr.bf16.mxu0 %v11217_v34  ;;  %v11253_v25 = vld [vmem:[%s11711_s12 + $0xbf0] ss:$20 sps:$4 sm:$0xff]   ;;  %v11257_v34 = vld [vmem:[%s11711_s12 + $0xbc8] ss:$20 sps:$4 sm:$0xff]  }
 0x3a1   : > { %9641 = vmatprep.subr.bf16.mxu1 %v11219_v36  ;;  %v7586_v26 = vpop.f32.mrf.mxu1  ;;  %v11259_v36 = vld [vmem:[%s11711_s12 + $0xe48] ss:$20 sps:$4 sm:$0xff]  }
 0x3a2   : > { %v11260_v10 = vld [vmem:[%s11711_s12 + $0xd08] ss:$20 sps:$4 sm:$0xff]   ;;  %v11265_v26 = vld [vmem:[%s11711_s12 + $0xb78] ss:$20 sps:$4 sm:$0xff]  }
 0x3a3   : > { %9620 = vmatpush3.bf16.msra.mxu0 %v11218_v13  ;;  %v11261_v13 = vld [vmem:[%s11711_s12 + $0xba0] ss:$20 sps:$4 sm:$0xff]  }
 0x3a4   : > { %9642 = vmatpush3.bf16.msra.mxu1 %v11220_v16  ;;  %9621 = vmatprep.subr.bf16.mxu0 %v11221_v8  ;;  %v11263_v16 = vld [vmem:[%s11711_s12 + $0xe20] ss:$20 sps:$4 sm:$0xff]  }
 0x3a5   : > { %9643 = vmatprep.subr.bf16.mxu1 %v11223_v31  ;;  %v11262_v8 = vld [vmem:[%s11711_s12 + $0xa60] ss:$20 sps:$4 sm:$0xff]  }
 0x3a6   : > { %v11264_v31 = vld [vmem:[%s11711_s12 + $0xce0] ss:$20 sps:$4 sm:$0xff]  }
 0x3a7   : > { %9622 = vmatpush3.bf16.msra.mxu0 %v11222_v37  ;;  %v11267_v37 = vld [vmem:[%s11711_s12 + $0xdf8] ss:$20 sps:$4 sm:$0xff]  }
 0x3a8   : > { %9644 = vmatpush3.bf16.msra.mxu1 %v11224_v41  ;;  %9623 = vmatprep.subr.bf16.mxu0 %v11225_v39  ;;  %v11266_v41 = vld [vmem:[%s11711_s12 + $0xa38] ss:$20 sps:$4 sm:$0xff]  }
 0x3a9   : > { %9645 = vmatprep.subr.bf16.mxu1 %v11227_v40  ;;  %v11268_v39 = vld [vmem:[%s11711_s12 + $0xcb8] ss:$20 sps:$4 sm:$0xff]   ;;  %v11269_v40 = vld [vmem:[%s11711_s12 + $0xb50] ss:$20 sps:$4 sm:$0xff]  }
 0x3ab   : > { %9624 = vmatpush3.bf16.msra.mxu0 %v11226_v32  ;;  %v11271_v32 = vld [vmem:[%s11711_s12 + $0xdd0] ss:$20 sps:$4 sm:$0xff]  }
 0x3ac   : > { %9646 = vmatpush3.bf16.msra.mxu1 %v11228_v35  ;;  %9625 = vmatprep.subr.bf16.mxu0 %v11229_v15  ;;  %v11270_v35 = vld [vmem:[%s11711_s12 + $0xa10] ss:$20 sps:$4 sm:$0xff]  }
 0x3ad   : > { %9647 = vmatprep.subr.bf16.mxu1 %v11231_v50  ;;  %v11272_v15 = vld [vmem:[%s11711_s12 + $0xc90] ss:$20 sps:$4 sm:$0xff]   ;;  %v11273_v50 = vld [vmem:[%s11711_s12 + $0x1168] ss:$20 sps:$4 sm:$0xff]  }
 0x3af   : > { %9626 = vmatpush3.bf16.msra.mxu0 %v11230_v53  ;;  %v11275_v53 = vld [vmem:[%s11711_s12 + $0x13e8] ss:$20 sps:$4 sm:$0xff]  }
 0x3b0   : > { %9648 = vmatpush3.bf16.msra.mxu1 %v11232_v30  ;;  %9627 = vmatprep.subr.bf16.mxu0 %v11233_v38  ;;  %v11274_v30 = vld [vmem:[%s11711_s12 + $0x1028] ss:$20 sps:$4 sm:$0xff]  }
 0x3b1   : > { %9649 = vmatprep.subr.bf16.mxu1 %v11235_v18  ;;  %v11276_v38 = vld [vmem:[%s11711_s12 + $0x12a8] ss:$20 sps:$4 sm:$0xff]   ;;  %v11277_v18 = vld [vmem:[%s11711_s12 + $0x1140] ss:$20 sps:$4 sm:$0xff]  }
 0x3b3   : > { %9628 = vmatpush3.bf16.msra.mxu0 %v11234_v42  ;;  %v11279_v42 = vld [vmem:[%s11711_s12 + $0x13c0] ss:$20 sps:$4 sm:$0xff]  }
 0x3b4   : > { %9650 = vmatpush3.bf16.msra.mxu1 %v11236_v45  ;;  %9629 = vmatprep.subr.bf16.mxu0 %v11237_v46 }
 0x3b5   : > { %9651 = vmatprep.subr.bf16.mxu1 %v11239_v47  ;;  %v11278_v47 = vld [vmem:[%s11711_s12 + $0x1000] ss:$20 sps:$4 sm:$0xff]  }
 0x3b7   : > { %9630 = vmatpush3.bf16.msra.mxu0 %v11238_v48  ;;  %v11280_v48 = vld [vmem:[%s11711_s12 + $0x1280] ss:$20 sps:$4 sm:$0xff]  }
 0x3b8   : > { %9652 = vmatpush3.bf16.msra.mxu1 %v11240_v55  ;;  %9659 = vmatprep.subr.bf16.mxu0 %v11241_v56  ;;  %v11281_v56 = vld [vmem:[%s11711_s12 + $0x1118] ss:$20 sps:$4 sm:$0xff]  }
 0x3b9   : > { %9681 = vmatprep.subr.bf16.mxu1 %v11243_v59  ;;  %v11283_v59 = vld [vmem:[%s11711_s12 + $0x1398] ss:$20 sps:$4 sm:$0xff]  }
 0x3ba   : > { %v7622_v5 = vpop.f32.mrf.mxu0  ;;  %7947 = vmatmul.mubr.bf16.vlgmr.msra.gmra.mxu0 %v11894_v21 }
 0x3bb   : > { %7987 = vmatmul.mubr.bf16.vlgmr.msra.gmra.mxu1 %v11898_v24  ;;  %v12823_v6 = vadd.f32 %v7622_v5, %v12781_v27  ;;  %9660 = vmatpush3.bf16.msra.mxu0 %v11242_v60  ;;  %v11252_v27 = vld [vmem:[%s11711_s12 + $0xd58] ss:$20 sps:$4 sm:$0xff]  }
 0x3bc   : > { %9682 = vmatpush3.bf16.msra.mxu1 %v11244_v61  ;;  %v7624_v22 = vpop.f32.mrf.mxu0  ;;  %9661 = vmatprep.subr.bf16.mxu0 %v11245_v62  ;;  %v11282_v60 = vld [vmem:[%s11711_s12 + $0xfd8] ss:$20 sps:$4 sm:$0xff]   ;;  %v11285_v62 = vld [vmem:[%s11711_s12 + $0x10f0] ss:$20 sps:$4 sm:$0xff]  }
 0x3bd   : > { %9683 = vmatprep.subr.bf16.mxu1 %v11247_v2  ;;  %v12830_v21 = vadd.f32 %v7624_v22, %v12788_v9  ;;  %8026 = vmatprep.mubr.bf16.mxu0 %v11906_v29  ;;  %v11254_v29 = vld [vmem:[%s11711_s12 + $0xab0] ss:$20 sps:$4 sm:$0xff]   ;;  %v11258_v9 = vld [vmem:[%s11711_s12 + $0xa88] ss:$20 sps:$4 sm:$0xff]   ;;  %v11284_v61 = vld [vmem:[%s11711_s12 + $0x1258] ss:$20 sps:$4 sm:$0xff]  }
 0x3be   : > { %8066 = vmatprep.mubr.bf16.mxu1 %v11911_v33  ;;  %v7626_v24 = vpop.f32.mrf.mxu0  ;;  %v11256_v33 = vld [vmem:[%s11711_s12 + $0xd30] ss:$20 sps:$4 sm:$0xff]   ;;  %v11292_v22 = vld [vmem:[%s11711_s12 + $0x1208] ss:$20 sps:$4 sm:$0xff]  }
 0x3bf   : > { %9662 = vmatpush3.bf16.msra.mxu0 %v11246_v7  ;;  %v11287_v2 = vld [vmem:[%s11711_s12 + $0x1370] ss:$20 sps:$4 sm:$0xff]   ;;  %v11291_v7 = vld [vmem:[%s11711_s12 + $0x1348] ss:$20 sps:$4 sm:$0xff]   ;;  %v11296_v24 = vld [vmem:[%s11711_s12 + $0x11e0] ss:$20 sps:$4 sm:$0xff]  }
 0x3c0   : > { %9684 = vmatpush3.bf16.msra.mxu1 %v11248_v20  ;;  %v7627_v28 = vpop.f32.mrf.mxu0  ;;  %9663 = vmatprep.subr.bf16.mxu0 %v11249_v17  ;;  %v11290_v20 = vld [vmem:[%s11711_s12 + $0xf88] ss:$20 sps:$4 sm:$0xff]   ;;  %v11293_v17 = vld [vmem:[%s11711_s12 + $0x10a0] ss:$20 sps:$4 sm:$0xff]  }
 0x3c1   : > { %9685 = vmatprep.subr.bf16.mxu1 %v11251_v23  ;;  %v11295_v23 = vld [vmem:[%s11711_s12 + $0x1320] ss:$20 sps:$4 sm:$0xff]   ;;  %v11298_v28 = vld [vmem:[%s11711_s12 + $0xf38] ss:$20 sps:$4 sm:$0xff]  }
 0x3c3   : > { %9664 = vmatpush3.bf16.msra.mxu0 %v11250_v19  ;;  %v11297_v19 = vld [vmem:[%s11711_s12 + $0x1078] ss:$20 sps:$4 sm:$0xff]  }
 0x3c4   : > { %9686 = vmatpush3.bf16.msra.mxu1 %v11252_v27  ;;  %9665 = vmatprep.subr.bf16.mxu0 %v11253_v25  ;;  %v11299_v27 = vld [vmem:[%s11711_s12 + $0x12f8] ss:$20 sps:$4 sm:$0xff]  }
 0x3c5   : > { %9687 = vmatprep.subr.bf16.mxu1 %v11255_v14  ;;  %v11300_v25 = vld [vmem:[%s11711_s12 + $0x11b8] ss:$20 sps:$4 sm:$0xff]   ;;  %v11301_v14 = vld [vmem:[%s11711_s12 + $0x1050] ss:$20 sps:$4 sm:$0xff]  }
 0x3c7   : > { %9666 = vmatpush3.bf16.msra.mxu0 %v11254_v29  ;;  %v11303_v29 = vld [vmem:[%s11711_s12 + $0x12d0] ss:$20 sps:$4 sm:$0xff]  }
 0x3c8   : > { %9688 = vmatpush3.bf16.msra.mxu1 %v11256_v33  ;;  %9667 = vmatprep.subr.bf16.mxu0 %v11257_v34  ;;  %v11302_v33 = vld [vmem:[%s11711_s12 + $0xf10] ss:$20 sps:$4 sm:$0xff]  }
 0x3c9   : > { %9689 = vmatprep.subr.bf16.mxu1 %v11259_v36  ;;  %v11304_v34 = vld [vmem:[%s11711_s12 + $0x1190] ss:$20 sps:$4 sm:$0xff]   ;;  %v11305_v36 = vld [vmem:[%s11711_s12 + $0x1668] ss:$20 sps:$4 sm:$0xff]  }
 0x3cb   : > { %9668 = vmatpush3.bf16.msra.mxu0 %v11258_v9  ;;  %v11307_v9 = vld [vmem:[%s11711_s12 + $0x18e8] ss:$20 sps:$4 sm:$0xff]  }
 0x3cc   : > { %9690 = vmatpush3.bf16.msra.mxu1 %v11260_v10  ;;  %9669 = vmatprep.subr.bf16.mxu0 %v11261_v13  ;;  %v11306_v10 = vld [vmem:[%s11711_s12 + $0x1528] ss:$20 sps:$4 sm:$0xff]  }
 0x3cd   : > { %9691 = vmatprep.subr.bf16.mxu1 %v11263_v16  ;;  %v11308_v13 = vld [vmem:[%s11711_s12 + $0x17a8] ss:$20 sps:$4 sm:$0xff]   ;;  %v11309_v16 = vld [vmem:[%s11711_s12 + $0x1640] ss:$20 sps:$4 sm:$0xff]  }
 0x3cf   : > { %9670 = vmatpush3.bf16.msra.mxu0 %v11262_v8  ;;  %v11311_v8 = vld [vmem:[%s11711_s12 + $0x18c0] ss:$20 sps:$4 sm:$0xff]  }
 0x3d0   : > { %9692 = vmatpush3.bf16.msra.mxu1 %v11264_v31  ;;  %9671 = vmatprep.subr.bf16.mxu0 %v11265_v26  ;;  %v11310_v26 = vld [vmem:[%s11711_s12 + $0x1500] ss:$20 sps:$4 sm:$0xff]  }
 0x3d1   : > { %9693 = vmatprep.subr.bf16.mxu1 %v11267_v37  ;;  %v11312_v37 = vld [vmem:[%s11711_s12 + $0x1780] ss:$20 sps:$4 sm:$0xff]  }
 0x3d3   : > { %9672 = vmatpush3.bf16.msra.mxu0 %v11266_v41 }
 0x3d4   : > { %9694 = vmatpush3.bf16.msra.mxu1 %v11268_v39  ;;  %9673 = vmatprep.subr.bf16.mxu0 %v11269_v40  ;;  %v11313_v39 = vld [vmem:[%s11711_s12 + $0x1618] ss:$20 sps:$4 sm:$0xff]  }
 0x3d5   : > { %9695 = vmatprep.subr.bf16.mxu1 %v11271_v32  ;;  %v11315_v40 = vld [vmem:[%s11711_s12 + $0x1898] ss:$20 sps:$4 sm:$0xff]  }
 0x3d6   : > { %v11316_v32 = vld [vmem:[%s11711_s12 + $0x1758] ss:$20 sps:$4 sm:$0xff]  }
 0x3d7   : > { %9674 = vmatpush3.bf16.msra.mxu0 %v11270_v35 }
 0x3d8   : > { %9696 = vmatpush3.bf16.msra.mxu1 %v11272_v15  ;;  %9703 = vmatprep.subr.bf16.mxu0 %v11273_v50  ;;  %v11317_v15 = vld [vmem:[%s11711_s12 + $0x15f0] ss:$20 sps:$4 sm:$0xff]  }
 0x3d9   : > { %9725 = vmatprep.subr.bf16.mxu1 %v11275_v53  ;;  %v11319_v50 = vld [vmem:[%s11711_s12 + $0x1870] ss:$20 sps:$4 sm:$0xff]   ;;  %v11321_v53 = vld [vmem:[%s11711_s12 + $0x15c8] ss:$20 sps:$4 sm:$0xff]  }
 0x3da   : > { %8027 = vmatmul.mubr.bf16.vlgmr.msra.gmra.mxu0 %v11976_v43 }
 0x3db   : > { %v7663_v45 = vpop.f32.mrf.mxu1  ;;  %8067 = vmatmul.mubr.bf16.vlgmr.msra.gmra.mxu1 %v11978_v44  ;;  %9704 = vmatpush3.bf16.msra.mxu0 %v11274_v30  ;;  %v11323_v30 = vld [vmem:[%s11711_s12 + $0x1848] ss:$20 sps:$4 sm:$0xff]  }
 0x3dc   : > { %v12865_v46 = vadd.f32 %v7663_v45, %v12823_v6  ;;  %9726 = vmatpush3.bf16.msra.mxu1 %v11276_v38  ;;  %9705 = vmatprep.subr.bf16.mxu0 %v11277_v18  ;;  %v11289_v6 = vld [vmem:[%s11711_s12 + $0x10c8] ss:$20 sps:$4 sm:$0xff]   ;;  %v11327_v45 = vld [vmem:[%s11711_s12 + $0x1820] ss:$20 sps:$4 sm:$0xff]  }
 0x3dd   : > { %v7665_v55 = vpop.f32.mrf.mxu1  ;;  %9727 = vmatprep.subr.bf16.mxu1 %v11279_v42  ;;  %8106 = vmatprep.mubr.bf16.mxu0 %v11984_v49  ;;  %v11286_v49 = vld [vmem:[%s11711_s12 + $0xfb0] ss:$20 sps:$4 sm:$0xff]   ;;  %v11322_v38 = vld [vmem:[%s11711_s12 + $0x1488] ss:$20 sps:$4 sm:$0xff]   ;;  %v11325_v42 = vld [vmem:[%s11711_s12 + $0x15a0] ss:$20 sps:$4 sm:$0xff]  }
 0x3de   : > { %v12872_v43 = vadd.f32 %v7665_v55, %v12830_v21  ;;  %8146 = vmatprep.mubr.bf16.mxu1 %v11986_v51  ;;  %v11288_v51 = vld [vmem:[%s11711_s12 + $0x1230] ss:$20 sps:$4 sm:$0xff]   ;;  %v11294_v21 = vld [vmem:[%s11711_s12 + $0xf60] ss:$20 sps:$4 sm:$0xff]   ;;  %v11324_v18 = vld [vmem:[%s11711_s12 + $0x1708] ss:$20 sps:$4 sm:$0xff]  }
 0x3df   : > { %v7667_v44 = vpop.f32.mrf.mxu1  ;;  %9706 = vmatpush3.bf16.msra.mxu0 %v11278_v47  ;;  %v11326_v47 = vld [vmem:[%s11711_s12 + $0x1460] ss:$20 sps:$4 sm:$0xff]   ;;  %v11329_v55 = vld [vmem:[%s11711_s12 + $0x1578] ss:$20 sps:$4 sm:$0xff]  }
 0x3e0   : > { %9728 = vmatpush3.bf16.msra.mxu1 %v11280_v48  ;;  %9707 = vmatprep.subr.bf16.mxu0 %v11281_v56  ;;  %v11328_v48 = vld [vmem:[%s11711_s12 + $0x16e0] ss:$20 sps:$4 sm:$0xff]   ;;  %v11331_v56 = vld [vmem:[%s11711_s12 + $0x17f8] ss:$20 sps:$4 sm:$0xff]  }
 0x3e1   : > { %9729 = vmatprep.subr.bf16.mxu1 %v11283_v59  ;;  %v7668_v5 = vpop.f32.mrf.mxu1  ;;  %v11330_v59 = vld [vmem:[%s11711_s12 + $0x1438] ss:$20 sps:$4 sm:$0xff]  }
 0x3e2   : > { %v11332_v44 = vld [vmem:[%s11711_s12 + $0x16b8] ss:$20 sps:$4 sm:$0xff]   ;;  %v11337_v5 = vld [vmem:[%s11711_s12 + $0x1b68] ss:$20 sps:$4 sm:$0xff]  }
 0x3e3   : > { %9708 = vmatpush3.bf16.msra.mxu0 %v11282_v60  ;;  %v11333_v60 = vld [vmem:[%s11711_s12 + $0x1550] ss:$20 sps:$4 sm:$0xff]  }
 0x3e4   : > { %9730 = vmatpush3.bf16.msra.mxu1 %v11284_v61  ;;  %9709 = vmatprep.subr.bf16.mxu0 %v11285_v62  ;;  %v11335_v61 = vld [vmem:[%s11711_s12 + $0x17d0] ss:$20 sps:$4 sm:$0xff]  }
 0x3e5   : > { %9731 = vmatprep.subr.bf16.mxu1 %v11287_v2  ;;  %v11334_v62 = vld [vmem:[%s11711_s12 + $0x1410] ss:$20 sps:$4 sm:$0xff]  }
 0x3e6   : > { %v11336_v2 = vld [vmem:[%s11711_s12 + $0x1690] ss:$20 sps:$4 sm:$0xff]  }
 0x3e7   : > { %9710 = vmatpush3.bf16.msra.mxu0 %v11286_v49  ;;  %v11339_v49 = vld [vmem:[%s11711_s12 + $0x1de8] ss:$20 sps:$4 sm:$0xff]  }
 0x3e8   : > { %9732 = vmatpush3.bf16.msra.mxu1 %v11288_v51  ;;  %9711 = vmatprep.subr.bf16.mxu0 %v11289_v6  ;;  %v11338_v51 = vld [vmem:[%s11711_s12 + $0x1a28] ss:$20 sps:$4 sm:$0xff]  }
 0x3e9   : > { %9733 = vmatprep.subr.bf16.mxu1 %v11291_v7  ;;  %v11340_v6 = vld [vmem:[%s11711_s12 + $0x1ca8] ss:$20 sps:$4 sm:$0xff]   ;;  %v11341_v7 = vld [vmem:[%s11711_s12 + $0x1b40] ss:$20 sps:$4 sm:$0xff]  }
 0x3eb   : > { %9712 = vmatpush3.bf16.msra.mxu0 %v11290_v20  ;;  %v11343_v20 = vld [vmem:[%s11711_s12 + $0x1dc0] ss:$20 sps:$4 sm:$0xff]  }
 0x3ec   : > { %9734 = vmatpush3.bf16.msra.mxu1 %v11292_v22  ;;  %9713 = vmatprep.subr.bf16.mxu0 %v11293_v17  ;;  %v11342_v17 = vld [vmem:[%s11711_s12 + $0x1a00] ss:$20 sps:$4 sm:$0xff]  }
 0x3ed   : > { %9735 = vmatprep.subr.bf16.mxu1 %v11295_v23  ;;  %v11344_v23 = vld [vmem:[%s11711_s12 + $0x1c80] ss:$20 sps:$4 sm:$0xff]  }
 0x3ef   : > { %9714 = vmatpush3.bf16.msra.mxu0 %v11294_v21 }
 0x3f0   : > { %9736 = vmatpush3.bf16.msra.mxu1 %v11296_v24  ;;  %9715 = vmatprep.subr.bf16.mxu0 %v11297_v19  ;;  %v11345_v24 = vld [vmem:[%s11711_s12 + $0x1b18] ss:$20 sps:$4 sm:$0xff]  }
 0x3f1   : > { %9737 = vmatprep.subr.bf16.mxu1 %v11299_v27  ;;  %v11347_v19 = vld [vmem:[%s11711_s12 + $0x1d98] ss:$20 sps:$4 sm:$0xff]  }
 0x3f2   : > { %v11348_v27 = vld [vmem:[%s11711_s12 + $0x1c58] ss:$20 sps:$4 sm:$0xff]  }
 0x3f3   : > { %9716 = vmatpush3.bf16.msra.mxu0 %v11298_v28  ;;  %v11349_v28 = vld [vmem:[%s11711_s12 + $0x1af0] ss:$20 sps:$4 sm:$0xff]  }
 0x3f4   : > { %9738 = vmatpush3.bf16.msra.mxu1 %v11300_v25  ;;  %9717 = vmatprep.subr.bf16.mxu0 %v11301_v14  ;;  %v11351_v25 = vld [vmem:[%s11711_s12 + $0x1d70] ss:$20 sps:$4 sm:$0xff]  }
 0x3f5   : > { %9739 = vmatprep.subr.bf16.mxu1 %v11303_v29  ;;  %v11353_v29 = vld [vmem:[%s11711_s12 + $0x1ac8] ss:$20 sps:$4 sm:$0xff]  }
 0x3f7   : > { %9718 = vmatpush3.bf16.msra.mxu0 %v11302_v33  ;;  %v11355_v33 = vld [vmem:[%s11711_s12 + $0x1d48] ss:$20 sps:$4 sm:$0xff]  }
 0x3f8   : > { %9740 = vmatpush3.bf16.msra.mxu1 %v11304_v34  ;;  %9747 = vmatprep.subr.bf16.mxu0 %v11305_v36  ;;  %v11354_v34 = vld [vmem:[%s11711_s12 + $0x1988] ss:$20 sps:$4 sm:$0xff]  }
 0x3f9   : > { %9769 = vmatprep.subr.bf16.mxu1 %v11307_v9  ;;  %v11356_v36 = vld [vmem:[%s11711_s12 + $0x1c08] ss:$20 sps:$4 sm:$0xff]   ;;  %v11357_v9 = vld [vmem:[%s11711_s12 + $0x1aa0] ss:$20 sps:$4 sm:$0xff]  }
 0x3fa   : > { %v12904_v31 = vpop.f32.mrf.mxu0  ;;  %8107 = vmatmul.mubr.bf16.vlgmr.msra.gmra.mxu0 %v12056_v3 }
 0x3fb   : > { %8147 = vmatmul.mubr.bf16.vlgmr.msra.gmra.mxu1 %v12058_v4  ;;  %9748 = vmatpush3.bf16.msra.mxu0 %v11306_v10  ;;  %v11314_v4 = vld [vmem:[%s11711_s12 + $0x14d8] ss:$20 sps:$4 sm:$0xff]   ;;  %v11359_v10 = vld [vmem:[%s11711_s12 + $0x1d20] ss:$20 sps:$4 sm:$0xff]  }
 0x3fc   : > { %9770 = vmatpush3.bf16.msra.mxu1 %v11308_v13  ;;  %v12910_v41 = vpop.f32.mrf.mxu0  ;;  %9749 = vmatprep.subr.bf16.mxu0 %v11309_v16  ;;  %v11358_v13 = vld [vmem:[%s11711_s12 + $0x1960] ss:$20 sps:$4 sm:$0xff]  }
 0x3fd   : > { %9771 = vmatprep.subr.bf16.mxu1 %v11311_v8  ;;  %8186 = vmatprep.mubr.bf16.mxu0 %v12064_v11  ;;  %v11318_v11 = vld [vmem:[%s11711_s12 + $0x14b0] ss:$20 sps:$4 sm:$0xff]   ;;  %v11360_v16 = vld [vmem:[%s11711_s12 + $0x1be0] ss:$20 sps:$4 sm:$0xff]   ;;  %v11361_v8 = vld [vmem:[%s11711_s12 + $0x1a78] ss:$20 sps:$4 sm:$0xff]  }
 0x3fe   : > { %8226 = vmatprep.mubr.bf16.mxu1 %v12066_v12  ;;  %v7708_v3 = vpop.f32.mrf.mxu0  ;;  %v11320_v12 = vld [vmem:[%s11711_s12 + $0x1730] ss:$20 sps:$4 sm:$0xff]  }
 0x3ff   : > { %9750 = vmatpush3.bf16.msra.mxu0 %v11310_v26  ;;  %v11363_v26 = vld [vmem:[%s11711_s12 + $0x1cf8] ss:$20 sps:$4 sm:$0xff]   ;;  %v11367_v3 = vld [vmem:[%s11711_s12 + $0x1cd0] ss:$20 sps:$4 sm:$0xff]  }
 0x400   : > { %9772 = vmatpush3.bf16.msra.mxu1 %v11312_v37  ;;  %v7709_v35 = vpop.f32.mrf.mxu0  ;;  %9751 = vmatprep.subr.bf16.mxu0 %v11313_v39  ;;  %v11362_v37 = vld [vmem:[%s11711_s12 + $0x1938] ss:$20 sps:$4 sm:$0xff]  }
 0x401   : > { %9773 = vmatprep.subr.bf16.mxu1 %v11315_v40  ;;  %v11364_v39 = vld [vmem:[%s11711_s12 + $0x1bb8] ss:$20 sps:$4 sm:$0xff]   ;;  %v11365_v40 = vld [vmem:[%s11711_s12 + $0x1a50] ss:$20 sps:$4 sm:$0xff]   ;;  %v7705_v35 = vadd.f32 %v12904_v31, %v12865_v46  ;;  %v11370_v46 = vld [vmem:[%s11711_s12 + $0x1f00] ss:$20 sps:$4 sm:$0xff]  }
 0x403   : > { %9752 = vmatpush3.bf16.msra.mxu0 %v11314_v4  ;;  %v11366_v4 = vld [vmem:[%s11711_s12 + $0x1910] ss:$20 sps:$4 sm:$0xff]  }
 0x404   : > { %9774 = vmatpush3.bf16.msra.mxu1 %v11316_v32  ;;  %9753 = vmatprep.subr.bf16.mxu0 %v11317_v15  ;;  %v11368_v32 = vld [vmem:[%s11711_s12 + $0x1b90] ss:$20 sps:$4 sm:$0xff]   ;;  %v11369_v15 = vld [vmem:[%s11711_s12 + $0x1f28] ss:$20 sps:$4 sm:$0xff]  }
 0x405   : > { %9775 = vmatprep.subr.bf16.mxu1 %v11319_v50  ;;  %v11536_v50 = vmov 0.0  }
 0x407   : > { %9754 = vmatpush3.bf16.msra.mxu0 %v11318_v11  ;;  %v7707_v11 = vadd.f32 %v12910_v41, %v12872_v43 }
 0x408   : > { %9776 = vmatpush3.bf16.msra.mxu1 %v11320_v12  ;;  %9755 = vmatprep.subr.bf16.mxu0 %v11321_v53 }
 0x409   : > { %9777 = vmatprep.subr.bf16.mxu1 %v11323_v30 }
 0x40b   : > { %9756 = vmatpush3.bf16.msra.mxu0 %v11322_v38 }
 0x40c   : > { %9778 = vmatpush3.bf16.msra.mxu1 %v11324_v18  ;;  %9757 = vmatprep.subr.bf16.mxu0 %v11325_v42  ;;  %v315_v42 = vld [vmem:[#allocation2 + $0x20] sm:$0xff] }
 0x40d   : > { %9779 = vmatprep.subr.bf16.mxu1 %v11327_v45 }
 0x40f   : > { %9758 = vmatpush3.bf16.msra.mxu0 %v11326_v47 }
 0x410   : > { %9780 = vmatpush3.bf16.msra.mxu1 %v11328_v48  ;;  %9759 = vmatprep.subr.bf16.mxu0 %v11329_v55 }
 0x411   : > { %9781 = vmatprep.subr.bf16.mxu1 %v11331_v56  ;;  %v11371_v56 = vld [vmem:[%s11711_s12 + $0x1ed8] ss:$20 sps:$4 sm:$0xff]  }
 0x413   : > { %9760 = vmatpush3.bf16.msra.mxu0 %v11330_v59 }
 0x414   : > { %9782 = vmatpush3.bf16.msra.mxu1 %v11332_v44  ;;  %9761 = vmatprep.subr.bf16.mxu0 %v11333_v60 }
 0x415   : > { %9783 = vmatprep.subr.bf16.mxu1 %v11335_v61  ;;  %v11372_v61 = vld [vmem:[%s11711_s12 + $0x1eb0] ss:$20 sps:$4 sm:$0xff]  }
 0x417   : > { %9762 = vmatpush3.bf16.msra.mxu0 %v11334_v62  ;;  %v11373_v62 = vld [vmem:[%s11711_s12 + $0x1e88] ss:$20 sps:$4 sm:$0xff]  }
 0x418   : > { %9784 = vmatpush3.bf16.msra.mxu1 %v11336_v2  ;;  %9791 = vmatprep.subr.bf16.mxu0 %v11337_v5  ;;  %v11374_v2 = vld [vmem:[%s11711_s12 + $0x1e60] ss:$20 sps:$4 sm:$0xff]   ;;  %v11375_v5 = vld [vmem:[%s11711_s12 + $0x1e38] ss:$20 sps:$4 sm:$0xff]  }
 0x419   : > { %9813 = vmatprep.subr.bf16.mxu1 %v11339_v49  ;;  %v11376_v49 = vld [vmem:[%s11711_s12 + $0x1e10] ss:$20 sps:$4 sm:$0xff]  }
 0x41a   : > { %8187 = vmatmul.mubr.bf16.vlgmr.msra.gmra.mxu0 %v12142_v57 }
 0x41b   : > { %v12944_v22 = vpop.f32.mrf.mxu1  ;;  %8227 = vmatmul.mubr.bf16.vlgmr.msra.gmra.mxu1 %v12144_v58  ;;  %9792 = vmatpush3.bf16.msra.mxu0 %v11338_v51  ;;  %v11346_v58 = vld [vmem:[%s11711_s12 + $0x19d8] ss:$20 sps:$4 sm:$0xff]  }
 0x41c   : > { %9814 = vmatpush3.bf16.msra.mxu1 %v11340_v6  ;;  %9793 = vmatprep.subr.bf16.mxu0 %v11341_v7  ;;  %v7746_v12 = vadd.f32 %v12944_v22, %v7705_v35 }
 0x41d   : > { %v12950_v21 = vpop.f32.mrf.mxu1  ;;  %9815 = vmatprep.subr.bf16.mxu1 %v11343_v20  ;;  %8266 = vmatprep.mubr.bf16.mxu0 %v12150_v63  ;;  %v11350_v63 = vld [vmem:[%s11711_s12 + $0x19b0] ss:$20 sps:$4 sm:$0xff]  }
 0x41e   : > { %8306 = vmatprep.mubr.bf16.mxu1 %v12152_v0  ;;  %v11352_v0 = vld [vmem:[%s11711_s12 + $0x1c30] ss:$20 sps:$4 sm:$0xff]   ;;  %v7748_v38 = vadd.f32 %v12950_v21, %v7707_v11 }
 0x41f   : > { %v7749_v57 = vpop.f32.mrf.mxu1  ;;  %9794 = vmatpush3.bf16.msra.mxu0 %v11342_v17 }
 0x420   : > { %9816 = vmatpush3.bf16.msra.mxu1 %v11344_v23  ;;  %9795 = vmatprep.subr.bf16.mxu0 %v11345_v24 }
 0x421   : > { %9817 = vmatprep.subr.bf16.mxu1 %v11347_v19  ;;  %v7750_v14 = vpop.f32.mrf.mxu1 }
 0x423   : > { %9796 = vmatpush3.bf16.msra.mxu0 %v11346_v58 }
 0x424   : > { %9818 = vmatpush3.bf16.msra.mxu1 %v11348_v27  ;;  %9797 = vmatprep.subr.bf16.mxu0 %v11349_v28 }
 0x425   : > { %9819 = vmatprep.subr.bf16.mxu1 %v11351_v25 }
 0x427   : > { %9798 = vmatpush3.bf16.msra.mxu0 %v11350_v63 }
 0x428   : > { %9820 = vmatpush3.bf16.msra.mxu1 %v11352_v0  ;;  %9799 = vmatprep.subr.bf16.mxu0 %v11353_v29 }
 0x429   : > { %9821 = vmatprep.subr.bf16.mxu1 %v11355_v33 }
 0x42b   : > { %9800 = vmatpush3.bf16.msra.mxu0 %v11354_v34 }
 0x42c   : > { %9822 = vmatpush3.bf16.msra.mxu1 %v11356_v36  ;;  %9801 = vmatprep.subr.bf16.mxu0 %v11357_v9 }
 0x42d   : > { %9823 = vmatprep.subr.bf16.mxu1 %v11359_v10 }
 0x42f   : > { %9802 = vmatpush3.bf16.msra.mxu0 %v11358_v13 }
 0x430   : > { %9824 = vmatpush3.bf16.msra.mxu1 %v11360_v16  ;;  %9803 = vmatprep.subr.bf16.mxu0 %v11361_v8 }
 0x431   : > { %9825 = vmatprep.subr.bf16.mxu1 %v11363_v26 }
 0x433   : > { %9804 = vmatpush3.bf16.msra.mxu0 %v11362_v37 }
 0x434   : > { %9826 = vmatpush3.bf16.msra.mxu1 %v11364_v39  ;;  %9805 = vmatprep.subr.bf16.mxu0 %v11365_v40 }
 0x435   : > { %9827 = vmatprep.subr.bf16.mxu1 %v11367_v3 }
 0x437   : > { %9806 = vmatpush3.bf16.msra.mxu0 %v11366_v4 }
 0x438   : > { %9828 = vmatpush3.bf16.msra.mxu1 %v11368_v32  ;;  %9844 = vmatprep.subr.bf16.mxu0 %v11536_v50 }
 0x43a   : > { %v7786_v53 = vpop.f32.mrf.mxu0  ;;  %8267 = vmatmul.mubr.bf16.vlgmr.msra.gmra.mxu0 %v12226_v52  ;;  %v316_v52 = vld [vmem:[#allocation2 + $0x10] sm:$0xff] }
 0x43b   : > { %v7827_v30 = vpop.f32.mrf.mxu1  ;;  %8307 = vmatmul.mubr.bf16.vlgmr.msra.gmra.mxu1 %v12228_v54  ;;  %v7787_v18 = vadd.f32 %v7786_v53, %v7746_v12  ;;  %9845 = vmatpush3.bf16.msra.mxu0 %v11369_v15 }
 0x43c   : > { %9860 = vmatprep.mubr.msk.bf16.mxu0 %vm11537_vm0, %v11536_v50  ;;  %v7788_v31 = vpop.f32.mrf.mxu0  ;;  %9846 = vmatprep.subr.bf16.mxu0 %v11536_v50 }
 0x43d   : > { %v7829_v45 = vpop.f32.mrf.mxu1  ;;  %v7789_v43 = vadd.f32 %v7788_v31, %v7748_v38  ;;  %v7828_v41 = vadd.f32 %v7827_v30, %v7787_v18 }
 0x43e   : > { %v7790_v47 = vpop.f32.mrf.mxu0 }
 0x43f   : > { %v7831_v48 = vpop.f32.mrf.mxu1  ;;  %v8356_v54 = vadd.f32 %v7828_v41, %v315_v42  ;;  %v7830_v55 = vadd.f32 %v7829_v45, %v7789_v43  ;;  %9847 = vmatpush3.bf16.msra.mxu0 %v11370_v46 }
 0x440   : > { %v7791_v59 = vpop.f32.mrf.mxu0  ;;  %9848 = vmatprep.subr.bf16.mxu0 %v11536_v50 }
 0x441   : > { %v7832_v44 = vpop.f32.mrf.mxu1  ;;  %8361 = vst [vmem:[#allocation2 + $0x20] sm:$0xff] %v8356_v54  ;;  %v8357_v60 = vadd.f32 %v7830_v55, %v316_v52 }
 0x443   : > { %8362 = vst [vmem:[#allocation2 + $0x10] sm:$0xff] %v8357_v60  ;;  %9849 = vmatpush3.bf16.msra.mxu0 %v11371_v56 }
 0x444   : > { %9850 = vmatprep.subr.bf16.mxu0 %v11536_v50 }
 0x447   : > { %9851 = vmatpush3.bf16.msra.mxu0 %v11372_v61 }
 0x448   : > { %9852 = vmatprep.subr.bf16.mxu0 %v11536_v50 }
 0x44b   : > { %9853 = vmatpush3.bf16.msra.mxu0 %v11373_v62 }
 0x44c   : > { %9854 = vmatprep.subr.bf16.mxu0 %v11536_v50 }
 0x44f   : > { %9855 = vmatpush3.bf16.msra.mxu0 %v11374_v2 }
 0x450   : > { %9856 = vmatprep.subr.bf16.mxu0 %v11536_v50 }
 0x453   : > { %9857 = vmatpush3.bf16.msra.mxu0 %v11375_v5 }
 0x454   : > { %9858 = vmatprep.subr.bf16.mxu0 %v11536_v50 }
 0x457   : > { %9859 = vmatpush3.bf16.msra.mxu0 %v11376_v49 }
 0x45a   : > { %v9587_v51 = vpop.f32.mrf.mxu0  ;;  %9861 = vmatmul.mubr.bf16.vlgmr.msra.gmra.mxu0 %v12273_v1 }
 0x45b   : > { %v9609_v6 = vpop.f32.mrf.mxu1 }
 0x45c   : > { %v9588_v7 = vpop.f32.mrf.mxu0 }
 0x45d   : > { %v9610_v20 = vpop.f32.mrf.mxu1  ;;  %v9589_v22 = vadd.f32 %v9588_v7, %v9587_v51 }
 0x45e   : > { %v9611_v17 = vadd.f32 %v9610_v20, %v9609_v6  ;;  %v9590_v23 = vpop.f32.mrf.mxu0 }
 0x45f   : > { %v9612_v21 = vpop.f32.mrf.mxu1 }
 0x460   : > { %v7909_v24 = vadd.f32 %v9611_v17, %v9589_v22  ;;  %v9591_v19 = vpop.f32.mrf.mxu0  ;;  %v317_v21 = vld [vmem:[#allocation2 + $0x18] sm:$0xff] }
 0x461   : > { %v9613_v57 = vpop.f32.mrf.mxu1 }
 0x47a   : > { %v9631_v58 = vpop.f32.mrf.mxu0 }
 0x47b   : > { %v9653_v27 = vpop.f32.mrf.mxu1 }
 0x47c   : > { %v9632_v28 = vpop.f32.mrf.mxu0 }
 0x47d   : > { %v9654_v25 = vpop.f32.mrf.mxu1  ;;  %v9633_v14 = vadd.f32 %v9632_v28, %v9631_v58 }
 0x47e   : > { %v9655_v63 = vadd.f32 %v9654_v25, %v9653_v27  ;;  %v9634_v0 = vpop.f32.mrf.mxu0 }
 0x47f   : > { %v9656_v29 = vpop.f32.mrf.mxu1  ;;  %v7949_v33 = vadd.f32 %v9633_v14, %v7909_v24 }
 0x480   : > { %v9635_v34 = vpop.f32.mrf.mxu0 }
 0x481   : > { %v9657_v1 = vpop.f32.mrf.mxu1  ;;  %v7989_v36 = vadd.f32 %v9655_v63, %v7949_v33 }
 0x49a   : > { %v9675_v9 = vpop.f32.mrf.mxu0 }
 0x49b   : > { %v9697_v10 = vpop.f32.mrf.mxu1 }
 0x49c   : > { %v9676_v13 = vpop.f32.mrf.mxu0 }
 0x49d   : > { %v9698_v16 = vpop.f32.mrf.mxu1  ;;  %v9677_v8 = vadd.f32 %v9676_v13, %v9675_v9 }
 0x49e   : > { %v9699_v26 = vadd.f32 %v9698_v16, %v9697_v10  ;;  %v9678_v37 = vpop.f32.mrf.mxu0 }
 0x49f   : > { %v9700_v39 = vpop.f32.mrf.mxu1  ;;  %v8029_v40 = vadd.f32 %v9677_v8, %v7989_v36 }
 0x4a0   : > { %v9679_v3 = vpop.f32.mrf.mxu0 }
 0x4a1   : > { %v9701_v4 = vpop.f32.mrf.mxu1  ;;  %v8069_v32 = vadd.f32 %v9699_v26, %v8029_v40 }
 0x4ba   : > { %v9719_v35 = vpop.f32.mrf.mxu0 }
 0x4bb   : > { %v9741_v15 = vpop.f32.mrf.mxu1 }
 0x4bc   : > { %v9720_v50 = vpop.f32.mrf.mxu0 }
 0x4bd   : > { %v9742_v11 = vpop.f32.mrf.mxu1  ;;  %v9721_v12 = vadd.f32 %v9720_v50, %v9719_v35 }
 0x4be   : > { %v9743_v53 = vadd.f32 %v9742_v11, %v9741_v15  ;;  %v9722_v30 = vpop.f32.mrf.mxu0 }
 0x4bf   : > { %v9744_v38 = vpop.f32.mrf.mxu1  ;;  %v8109_v18 = vadd.f32 %v9721_v12, %v8069_v32 }
 0x4c0   : > { %v9723_v46 = vpop.f32.mrf.mxu0 }
 0x4c1   : > { %v9745_v31 = vpop.f32.mrf.mxu1  ;;  %v8149_v42 = vadd.f32 %v9743_v53, %v8109_v18 }
 0x4da   : > { %v9763_v45 = vpop.f32.mrf.mxu0 }
 0x4db   : > { %v9785_v43 = vpop.f32.mrf.mxu1 }
 0x4dc   : > { %v9764_v41 = vpop.f32.mrf.mxu0 }
 0x4dd   : > { %v9786_v47 = vpop.f32.mrf.mxu1  ;;  %v9765_v49 = vadd.f32 %v9764_v41, %v9763_v45 }
 0x4de   : > { %v9766_v52 = vpop.f32.mrf.mxu0  ;;  %v9787_v6 = vadd.f32 %v9786_v47, %v9785_v43 }
 0x4df   : > { %v9788_v48 = vpop.f32.mrf.mxu1  ;;  %v8189_v51 = vadd.f32 %v9765_v49, %v8149_v42 }
 0x4e0   : > { %v9767_v54 = vpop.f32.mrf.mxu0 }
 0x4e1   : > { %v9789_v55 = vpop.f32.mrf.mxu1  ;;  %v8229_v20 = vadd.f32 %v9787_v6, %v8189_v51 }
 0x4fa   : > { %v9807_v56 = vpop.f32.mrf.mxu0 }
 0x4fb   : > { %v9829_v59 = vpop.f32.mrf.mxu1 }
 0x4fc   : > { %v9808_v44 = vpop.f32.mrf.mxu0 }
 0x4fd   : > { %v9830_v60 = vpop.f32.mrf.mxu1  ;;  %v9809_v7 = vadd.f32 %v9808_v44, %v9807_v56 }
 0x4fe   : > { %v9810_v61 = vpop.f32.mrf.mxu0  ;;  %v9831_v17 = vadd.f32 %v9830_v60, %v9829_v59 }
 0x4ff   : > { %v9832_v62 = vpop.f32.mrf.mxu1  ;;  %v8269_v22 = vadd.f32 %v9809_v7, %v8229_v20 }
 0x500   : > { %v9811_v2 = vpop.f32.mrf.mxu0 }
 0x501   : > { %v9833_v5 = vpop.f32.mrf.mxu1  ;;  %v8309_v23 = vadd.f32 %v9831_v17, %v8269_v22 }
 0x51a   : > { %v8348_v24 = vpop.f32.mrf.mxu0 }
 0x51b   : > { %v8349_v19 = vadd.f32 %v8348_v24, %v8309_v23 }
 0x51c   : > { %v9862_v57 = vpop.f32.mrf.mxu0  ;;  %8367 = sbr.rel (%p9567_p13) target bundleno = 1328 (0x530), region = 48 }
 0x51d   : > { %v8358_v58 = vadd.f32 %v8349_v19, %v317_v21 }
 0x51e   : > { %v8351_v27 = vpop.f32.mrf.mxu0 }
 0x51f   : > { %8363 = vst [vmem:[#allocation2 + $0x18] sm:$0xff] %v8358_v58 }
 0x520   : > { %v9863_v28 = vpop.f32.mrf.mxu0 }
 0x521   : > { %v8375_v25 = vlaneseq  ;;  %v8373_v63 = vld [vmem:[%s239_s3] sm:$0x1f]  ;;  %v8369_v36 = vld [vmem:[#allocation2] sm:$0xff] }
 0x522   : > { %v8368_v0 = vld [vmem:[#allocation2 + $0x8] sm:$0xff]  ;;  %v8370_v9 = vld [vmem:[#allocation2 + $0x20] sm:$0xff]  ;;  %v8371_v10 = vld [vmem:[#allocation2 + $0x10] sm:$0xff] }
 0x523   : > { %v8376_v14 = vshrl.u32 %v8375_v25, 7 }
 0x525   : > { %v8377_v29 = vsub.s32 0, %v8376_v14  ;;  %v8381_v33 = vsub.s32 1, %v8376_v14  ;;  %v8385_v34 = vsub.s32 2, %v8376_v14  ;;  %v8389_v1 = vsub.s32 3, %v8376_v14 }
 0x526   : > { %v8393_v13 = vsub.s32 4, %v8376_v14  ;;  %v8372_v39 = vld [vmem:[#allocation2 + $0x18] sm:$0xff] }
 0x527   : > { %v8378_v16 = vrot.slane %v8373_v63, %v8377_v29  ;;  %v8382_v8 = vrot.slane %v8373_v63, %v8381_v33  ;;  %v8386_v26 = vrot.slane %v8373_v63, %v8385_v34  ;;  %v8390_v37 = vrot.slane %v8373_v63, %v8389_v1 }
 0x528   : > { %v8394_v40 = vrot.slane %v8373_v63, %v8393_v13 }
 0x529   : > { %v8400_v3 = vadd.f32 %v8378_v16, %v8368_v0  ;;  %v8401_v4 = vadd.f32 %v8382_v8, %v8369_v36  ;;  %v8402_v32 = vadd.f32 %v8386_v26, %v8370_v9  ;;  %v8403_v35 = vadd.f32 %v8390_v37, %v8371_v10 }
 0x52a   : > { %v8404_v15 = vadd.f32 %v8394_v40, %v8372_v39 }
 0x52b   : > { %v8405_v50 = vmax.f32 %v8400_v3, 0.0  ;;  %v8406_v11 = vmax.f32 %v8401_v4, 0.0  ;;  %v8407_v12 = vmax.f32 %v8402_v32, 0.0  ;;  %v8408_v53 = vmax.f32 %v8403_v35, 0.0 }
 0x52c   : > { %v8409_v30 = vmax.f32 %v8404_v15, 0.0 }
 0x52d   : > { %8410 = vst [vmem:[%s11735_s15] sm:$0xff] %v8405_v50  ;;  %8411 = vst [vmem:[%s11735_s15 + $0x8] sm:$0xff] %v8406_v11 }
 0x52e   : > { %8412 = vst [vmem:[%s11735_s15 + $0x10] sm:$0xff] %v8407_v12  ;;  %8413 = vst [vmem:[%s11735_s15 + $0x18] sm:$0xff] %v8408_v53 }
 0x52f   : > { %8414 = vst [vmem:[%s11735_s15 + $0x20] sm:$0xff] %v8409_v30 }
 0x530 PF: > { %s19_s22 = sadd.s32 1, %s11527_s22   ;;  %s13055_s29 = sld [smem:[#allocation9_spill]] }
 0x531   : > { %p16_p1 = scmp.ge.s32.totalorder %s19_s22, 10   ;;  %s13056_s12 = smov %s11491_s13 }
 0x532   : > { %s13057_s13 = smov %s11495_s14  ;;  %s13058_s14 = smov %s11686_s8 }
 0x533   : > { %s13059_s15 = smov %s11503_s16  ;;  %s13060_s16 = smov %s11507_s17 }
 0x534   : > { %s13061_s17 = smov %s11691_s10  ;;  %s13062_s18 = smov %s11519_s20 }
 0x535   : > { %s13063_s19 = smov %s11523_s21  ;;  %s13064_s20 = smov %s13067_s4 }
 0x536   : > { %s13065_s21 = smov %s13055_s29  ;;  %18 = sbr.rel (!%p16_p1) target bundleno = 12 (0xc), region = 96 }
 0x53b   :  { %8445 = vsyncpa [#allocation4], 1 }
 0x53c   :  { %8447 = vsyncpa [#allocation4 + $0x1], 1 }
 0x53d   :  { %8448 = vsyncpa [#allocation6], 1 }
 0x53e   :  { %8450 = vsyncpa [#allocation6 + $0x1], 1 }

// kernel: simple_nn_forward.4
= control target key start
LH: loop header
LB: loop body
LE: loop exit
PB: predicated region body
PF: predicated region fallthrough
CT: control target
= control target key end

     0   :  { %8 = vsyncpa [#allocation4], 0  ;;  %s15466_s0 = inlined_call_operand.vmem [shape: f32[8,784], index: 0, kind: input, shape index: {}]   ;;  %s15467_s1 = inlined_call_operand.hbm [shape: bf16[784,12800], index: 1, kind: input, shape index: {}]   ;;  %s15468_s2 = inlined_call_operand.hbm [shape: f32[1,12800], index: 2, kind: input, shape index: {}]   ;;  %s15469_s3 = inlined_call_operand.vmem [shape: f32[8,12800], index: 3, kind: output, shape index: {}]  }
   0x1   :  { %10 = vsyncpa [#allocation4 + $0x1], 0 }
   0x2   :  { %11 = vsyncpa [#allocation6], 0 }
   0x3   :  { %13 = vsyncpa [#allocation6 + $0x1], 0  ;;  %s13731_s12 = smov 0   ;;  %s13733_s13 = smov 0  }
   0x4   :  { %s13735_s14 = smov 0   ;;  %s13737_s15 = smov 0  }
   0x5   :  { %s13739_s16 = smov 0   ;;  %s13741_s17 = smov 0  }
   0x6 LB: > { %s10380_s18 = sadd.s32 4294967295, %s13701_s17   ;;  %s34_s19 = sadd.s32 1, %s13697_s16  ;;  %s13701_s17 = sphi %s13741_s17, %s19_s17   ;;  %s13697_s16 = sphi %s13739_s16, %s15477_s16   ;;  %s13693_s15 = sphi %s13737_s15, %s15476_s15   ;;  %s13689_s14 = sphi %s13735_s14, %s15475_s14   ;;  %s13685_s13 = sphi %s13733_s13, %s15474_s13   ;;  %s13681_s12 = sphi %s13731_s12, %s15473_s12  }
   0x7   : > { %p36_p0 = scmp.ge.s32.totalorder %s34_s19, 4  ;;  %s75_s20 = sadd.s32 1, %s13689_s14 }
   0x8   : > { %p82_p1 = scmp.ne.s32.totalorder %s13689_s14, %s13685_s13  ;;  %p83_p2 = scmp.eq.s32.totalorder %s13701_s17, 0 }
   0x9   : > { %s15479_s19 = smov (%p36_p0, %s34_s19), 0  ;;  %p88_p4 = scmp.ne.s32.totalorder %s13685_s13, %s13681_s12 }
   0xa   : > { %p84_p3 = por %p83_p2, %p82_p1  ;;  %s71_s21 = ssub.s32 %s13697_s16, %s15479_s19 }
   0xb   : > { %p89_p5 = scmp.eq.s32.totalorder %s10380_s18, 0  ;;  %p73_p6 = scmp.eq.s32.totalorder %s71_s21, 0 }
   0xc   : > { %p11721_p8 = scmp.lt.s32.totalorder %s13701_s17, 4  ;;  %s13779_s24 = sand.u32 1, %s13689_s14  }
   0xd   : > { %p13770_p7 = por %p89_p5, %p88_p4  ;;  %s11630_s25 = smul.u32 1600, %s13697_s16 }
   0xe   : > { %s13776_s23 = scalar_select %p73_p6, %s13689_s14, %s75_s20  }
   0xf   : > { %s11706_s26 = smul.u32 9800, %s13779_s24  ;;  %s192_s29 = scalar_lea.hbm %s15467_s1, %s11630_s25 }
  0x10   : > { %p13786_p9 = pnand %p11721_p8, %p84_p3  ;;  %p10387_p10 = scmp.ge.s32.totalorder %s13701_s17, 1 }
  0x11   : > { %s183_s4 = scalar_lea.vmem [#allocation3], %s11706_s26  ;;  %s180_s6 = scalar_lea.sflag [#allocation4], %s13779_s24 }
  0x12   : > { %s193_s5 = sshll.u32 %s183_s4, 4  ;;  %p13593_p11 = pneg %p13786_p9  ;;  %s194_s5 = int_to_ptr.vmem [resolvable:$true] %s193_s5 }
  0x13   : > { %s13604_s7 = scalar_lea.vmem %s194_s5, 156800  ;;  %s13703_s8 = smov [#allocation3]  }
  0x14   : > { %p13605_p12 = scmp.ne.s32.totalorder %s194_s5, %s13604_s7  ;;  %s13609_s9 = sshll.u32 %s13703_s8, 4  ;;  %s13610_s9 = int_to_ptr.vmem [resolvable:$false] %s13609_s9 }
  0x15   : > { %s13611_s10 = scalar_lea.vmem %s13610_s9, 313600  ;;  %p13612_p1 = scmp.lt.s32.totalorder %s194_s5, %s13610_s9 }
  0x16   : > { %p13607_p13 = pnand %p13605_p12, %p13593_p11  ;;  %p13613_p2 = scmp.lt.s32.totalorder %s13611_s10, %s13604_s7 }
  0x18   : > { %p13608_p0 = pneg %p13607_p13  ;;  %p13614_p3 = por %p13613_p2, %p13612_p1 }
  0x1a   : > { %p13615_p4 = pnand %p13614_p3, %p13608_p0 }
  0x1c   : > { %13618 = shalt.err (!%p13615_p4)
}
  0x1d   : > { %s13704_s11 = smov 6400   ;;  %s13705_s12 = smov 1600  }
  0x1e   : > { %s13706_s18 = smov 100   ;;  %p220_p5 = scmp.lt.s32.totalorder %s13701_s17, 5 }
  0x1f   : > { %11717 = dma.hbm_to_vmem [thread:$0]  (!%p13786_p9), %s192_s29, 156800, %s194_s5, %s180_s6, %s13704_s11, %s13705_s12, %s13706_s18  }
  0x20   : > { %s11707_s20 = smul.u32 25, %s13779_s24  ;;  %p13803_p6 = pnand %p10387_p10, %p220_p5 }
  0x21   : > { %s11631_s25 = smul.u32 400, %s13697_s16  ;;  %s204_s8 = scalar_lea.sflag [#allocation6], %s13779_s24 }
  0x22   : > { %s207_s4 = scalar_lea.vmem [#allocation5], %s11707_s20  ;;  %s13707_s29 = smov [#allocation5]  }
  0x23   : > { %s213_s28 = scalar_lea.hbm %s15468_s2, %s11631_s25  ;;  %s215_s7 = sshll.u32 %s207_s4, 4  ;;  %s216_s7 = int_to_ptr.vmem [resolvable:$true] %s215_s7 }
  0x24   : > { %s13632_s9 = scalar_lea.vmem %s216_s7, 400  ;;  %s13637_s5 = sshll.u32 %s13707_s29, 4  ;;  %s13638_s5 = int_to_ptr.vmem [resolvable:$false] %s13637_s5 }
  0x25   : > { %p13633_p8 = scmp.ne.s32.totalorder %s216_s7, %s13632_s9  ;;  %s13639_s6 = scalar_lea.vmem %s13638_s5, 800 }
  0x26   : > { %p13640_p10 = scmp.lt.s32.totalorder %s216_s7, %s13638_s5  ;;  %p13641_p0 = scmp.lt.s32.totalorder %s13639_s6, %s13632_s9 }
  0x27   : > { %p13635_p12 = pnand %p13633_p8, %p13593_p11 }
  0x28   : > { %p13642_p1 = por %p13641_p0, %p13640_p10 }
  0x29   : > { %p13636_p13 = pneg %p13635_p12 }
  0x2b   : > { %p13643_p2 = pnand %p13642_p1, %p13636_p13 }
  0x2d   : > { %13646 = shalt.err (!%p13643_p2)
}
  0x2e   : > { %11720 = dma.hbm_to_vmem [thread:$0]  (!%p13786_p9), %s213_s28, 400, %s216_s7, %s204_s8  }
  0x2f   : > { %224 = sbr.rel (%p13803_p6) target bundleno = 1521 (0x5f1), region = 32  ;;  %s226_s24 = sand.u32 (!%p13803_p6), 1, %s13685_s13  }
  0x30   : > { %s11708_s10 = smul.u32 (!%p13803_p6), 9800, %s226_s24  ;;  %s227_s11 = scalar_lea.sflag (!%p13803_p6), [#allocation4], %s226_s24 }
  0x32   : > { %s13820_s12 = scalar_lea.vmem (!%p13803_p6), [#allocation3], %s11708_s10 }
  0x34   : > { %13672 = dma.done.wait (%p13770_p7), %s227_s11, 156800  }
  0x35   : > { %13674 = vsyncadd (%p13770_p7), %s227_s11, 4294810496  ;;  %s11709_s18 = smul.u32 25, %s226_s24  ;;  %s236_s20 = scalar_lea.sflag [#allocation6], %s226_s24 }
  0x37   : > { %s13826_s30 = scalar_lea.vmem [#allocation5], %s11709_s18 }
  0x38   : > { %13676 = dma.done.wait (%p13770_p7), %s236_s20, 400  }
  0x39   : > { %13678 = vsyncadd (%p13770_p7), %s236_s20, 4294966896  ;;  %v11776_v0 = vld [vmem:[%s13820_s12 + $0x57c] ss:$100 sps:$4 sm:$0xff]   ;;  %v11782_v4 = vld [vmem:[%s13820_s12 + $0x4b4] ss:$100 sps:$4 sm:$0xff]   ;;  %vm7820_vm0 = vcmask 130048  }
  0x3a   : > { %v11778_v1 = vld [vmem:[%s13820_s12 + $0x11fc] ss:$100 sps:$4 sm:$0xff]   ;;  %7824 = vmatprep.subr.bf16.mxu0 %v11776_v0  ;;  %v11784_v5 = vld [vmem:[%s13820_s12 + $0x1134] ss:$100 sps:$4 sm:$0xff]   ;;  %v11788_v8 = vld [vmem:[%s13820_s12 + $0x3ec] ss:$100 sps:$4 sm:$0xff]  }
  0x3b   : > { %v11780_v2 = vld [vmem:[%s13820_s12 + $0x578] ss:$100 sps:$4 sm:$0xff]   ;;  %7865 = vmatprep.subr.bf16.mxu1 %v11778_v1  ;;  %v11786_v6 = vld [vmem:[%s13820_s12 + $0x4b0] ss:$100 sps:$4 sm:$0xff]   ;;  %v11792_v10 = vld [vmem:[%s13820_s12 + $0x3e8] ss:$100 sps:$4 sm:$0xff]  }
  0x3c   : > { %v11781_v3 = vld [vmem:[%s13820_s12 + $0x11f8] ss:$100 sps:$4 sm:$0xff]   ;;  %7825 = vmatpush1.bf16.msra.mxu0 %v11780_v2  ;;  %v11787_v7 = vld [vmem:[%s13820_s12 + $0x1130] ss:$100 sps:$4 sm:$0xff]   ;;  %v11793_v11 = vld [vmem:[%s13820_s12 + $0x1068] ss:$100 sps:$4 sm:$0xff]  }
  0x3d   : > { %7866 = vmatpush1.bf16.msra.mxu1 %v11781_v3  ;;  %7826 = vmatprep.subr.bf16.mxu0 %v11782_v4  ;;  %v11790_v9 = vld [vmem:[%s13820_s12 + $0x106c] ss:$100 sps:$4 sm:$0xff]   ;;  %v11794_v12 = vld [vmem:[%s13820_s12 + $0x324] ss:$100 sps:$4 sm:$0xff]   ;;  %v11800_v16 = vld [vmem:[%s13820_s12 + $0x25c] ss:$100 sps:$4 sm:$0xff]  }
  0x3e   : > { %7867 = vmatprep.subr.bf16.mxu1 %v11784_v5  ;;  %v11796_v13 = vld [vmem:[%s13820_s12 + $0xfa4] ss:$100 sps:$4 sm:$0xff]   ;;  %v11802_v17 = vld [vmem:[%s13820_s12 + $0xedc] ss:$100 sps:$4 sm:$0xff]   ;;  %v11806_v20 = vld [vmem:[%s13820_s12 + $0x194] ss:$100 sps:$4 sm:$0xff]  }
  0x3f   : > { %v11798_v14 = vld [vmem:[%s13820_s12 + $0x320] ss:$100 sps:$4 sm:$0xff]   ;;  %v11804_v18 = vld [vmem:[%s13820_s12 + $0x258] ss:$100 sps:$4 sm:$0xff]   ;;  %v11810_v22 = vld [vmem:[%s13820_s12 + $0x190] ss:$100 sps:$4 sm:$0xff]  }
  0x40   : > { %7827 = vmatpush1.bf16.msra.mxu0 %v11786_v6  ;;  %v11799_v15 = vld [vmem:[%s13820_s12 + $0xfa0] ss:$100 sps:$4 sm:$0xff]   ;;  %v11805_v19 = vld [vmem:[%s13820_s12 + $0xed8] ss:$100 sps:$4 sm:$0xff]   ;;  %v11811_v23 = vld [vmem:[%s13820_s12 + $0xe10] ss:$100 sps:$4 sm:$0xff]  }
  0x41   : > { %7868 = vmatpush1.bf16.msra.mxu1 %v11787_v7  ;;  %7828 = vmatprep.subr.bf16.mxu0 %v11788_v8  ;;  %v11808_v21 = vld [vmem:[%s13820_s12 + $0xe14] ss:$100 sps:$4 sm:$0xff]   ;;  %v11812_v24 = vld [vmem:[%s13820_s12 + $0xcc] ss:$100 sps:$4 sm:$0xff]   ;;  %v11818_v28 = vld [vmem:[%s13820_s12 + $0x4] ss:$100 sps:$4 sm:$0xff]  }
  0x42   : > { %7869 = vmatprep.subr.bf16.mxu1 %v11790_v9  ;;  %v11814_v25 = vld [vmem:[%s13820_s12 + $0xd4c] ss:$100 sps:$4 sm:$0xff]   ;;  %v11820_v29 = vld [vmem:[%s13820_s12 + $0xc84] ss:$100 sps:$4 sm:$0xff]   ;;  %v11824_v32 = vld [vmem:[%s13820_s12 + $0xbbc] ss:$100 sps:$4 sm:$0xff]  }
  0x43   : > { %v11816_v26 = vld [vmem:[%s13820_s12 + $0xc8] ss:$100 sps:$4 sm:$0xff]   ;;  %v11822_v30 = vld [vmem:[%s13820_s12] ss:$100 sps:$4 sm:$0xff]   ;;  %v11828_v34 = vld [vmem:[%s13820_s12 + $0xbb8] ss:$100 sps:$4 sm:$0xff]  }
  0x44   : > { %7829 = vmatpush1.bf16.msra.mxu0 %v11792_v10  ;;  %v11817_v27 = vld [vmem:[%s13820_s12 + $0xd48] ss:$100 sps:$4 sm:$0xff]   ;;  %v11823_v31 = vld [vmem:[%s13820_s12 + $0xc80] ss:$100 sps:$4 sm:$0xff]   ;;  %v11829_v35 = vld [vmem:[%s13820_s12 + $0x1838] ss:$100 sps:$4 sm:$0xff]  }
  0x45   : > { %7870 = vmatpush1.bf16.msra.mxu1 %v11793_v11  ;;  %7830 = vmatprep.subr.bf16.mxu0 %v11794_v12  ;;  %v11826_v33 = vld [vmem:[%s13820_s12 + $0x183c] ss:$100 sps:$4 sm:$0xff]   ;;  %v11830_v36 = vld [vmem:[%s13820_s12 + $0xaf4] ss:$100 sps:$4 sm:$0xff]   ;;  %v11836_v40 = vld [vmem:[%s13820_s12 + $0xa2c] ss:$100 sps:$4 sm:$0xff]  }
  0x46   : > { %7871 = vmatprep.subr.bf16.mxu1 %v11796_v13  ;;  %v11832_v37 = vld [vmem:[%s13820_s12 + $0x1774] ss:$100 sps:$4 sm:$0xff]   ;;  %v11838_v41 = vld [vmem:[%s13820_s12 + $0x16ac] ss:$100 sps:$4 sm:$0xff]   ;;  %v11842_v44 = vld [vmem:[%s13820_s12 + $0x964] ss:$100 sps:$4 sm:$0xff]  }
  0x47   : > { %v11834_v38 = vld [vmem:[%s13820_s12 + $0xaf0] ss:$100 sps:$4 sm:$0xff]   ;;  %v11840_v42 = vld [vmem:[%s13820_s12 + $0xa28] ss:$100 sps:$4 sm:$0xff]   ;;  %v11846_v47 = vld [vmem:[%s13820_s12 + $0x960] ss:$100 sps:$4 sm:$0xff]  }
  0x48   : > { %7831 = vmatpush1.bf16.msra.mxu0 %v11798_v14  ;;  %v11835_v39 = vld [vmem:[%s13820_s12 + $0x1770] ss:$100 sps:$4 sm:$0xff]   ;;  %v11841_v43 = vld [vmem:[%s13820_s12 + $0x16a8] ss:$100 sps:$4 sm:$0xff]   ;;  %v11847_v48 = vld [vmem:[%s13820_s12 + $0x15e0] ss:$100 sps:$4 sm:$0xff]  }
  0x49   : > { %7872 = vmatpush1.bf16.msra.mxu1 %v11799_v15  ;;  %7832 = vmatprep.subr.bf16.mxu0 %v11800_v16  ;;  %v11844_v45 = vld [vmem:[%s13820_s12 + $0x15e4] ss:$100 sps:$4 sm:$0xff]   ;;  %v361_v50 = vld [vmem:[%s15466_s0 + $0x18] sm:$0xff]  ;;  %v13708_v16 = vmov 0   ;;  %s293_s10 = smul.u32 25, %s13693_s15  ;;  %vm13710_vm1 = vmmov 0  }
  0x4a   : > { %7873 = vmatprep.subr.bf16.mxu1 %v11802_v17  ;;  %v359_v46 = vld [vmem:[%s15466_s0 + $0x8] sm:$0xff]  ;;  %v13889_v52 = vpack.c.bf16 %v361_v50, %v361_v50  ;;  %v11852_v54 = vld [vmem:[%s13820_s12 + $0x898] ss:$100 sps:$4 sm:$0xff]   ;;  %v11858_v58 = vld [vmem:[%s13820_s12 + $0x7d0] ss:$100 sps:$4 sm:$0xff]  }
  0x4b   : > { %v13883_v49 = vpack.c.bf16 %v359_v46, %v359_v46  ;;  %v11848_v51 = vld [vmem:[%s13820_s12 + $0x89c] ss:$100 sps:$4 sm:$0xff]   ;;  %v11854_v56 = vld [vmem:[%s13820_s12 + $0x7d4] ss:$100 sps:$4 sm:$0xff]   ;;  %v11860_v60 = vld [vmem:[%s13820_s12 + $0x70c] ss:$100 sps:$4 sm:$0xff]  }
  0x4c   : > { %7833 = vmatpush1.bf16.msra.mxu0 %v11804_v18  ;;  %v11850_v53 = vld [vmem:[%s13820_s12 + $0x151c] ss:$100 sps:$4 sm:$0xff]   ;;  %7897 = vmatprep.mubr.bf16.mxu1 %v13889_v52  ;;  %v11856_v57 = vld [vmem:[%s13820_s12 + $0x1454] ss:$100 sps:$4 sm:$0xff]   ;;  %v11862_v61 = vld [vmem:[%s13820_s12 + $0x138c] ss:$100 sps:$4 sm:$0xff]  }
  0x4d   : > { %7874 = vmatpush1.bf16.msra.mxu1 %v11805_v19  ;;  %7834 = vmatprep.subr.bf16.mxu0 %v11806_v20  ;;  %v11853_v55 = vld [vmem:[%s13820_s12 + $0x1518] ss:$100 sps:$4 sm:$0xff]   ;;  %v11859_v59 = vld [vmem:[%s13820_s12 + $0x1450] ss:$100 sps:$4 sm:$0xff]   ;;  %v11864_v62 = vld [vmem:[%s13820_s12 + $0x708] ss:$100 sps:$4 sm:$0xff]  }
  0x4e   : > { %7875 = vmatprep.subr.bf16.mxu1 %v11808_v21  ;;  %7856 = vmatprep.mubr.bf16.mxu0 %v13883_v49  ;;  %v11865_v63 = vld [vmem:[%s13820_s12 + $0x1388] ss:$100 sps:$4 sm:$0xff]   ;;  %v11870_v2 = vld [vmem:[%s13820_s12 + $0x640] ss:$100 sps:$4 sm:$0xff]   ;;  %v11872_v10 = vld [vmem:[%s13820_s12 + $0x1e78] ss:$100 sps:$4 sm:$0xff]  }
  0x4f   : > { %v11866_v0 = vld [vmem:[%s13820_s12 + $0x644] ss:$100 sps:$4 sm:$0xff]   ;;  %v11874_v6 = vld [vmem:[%s13820_s12 + $0x1e7c] ss:$100 sps:$4 sm:$0xff]   ;;  %v11880_v12 = vld [vmem:[%s13820_s12 + $0x1db4] ss:$100 sps:$4 sm:$0xff]  }
  0x50   : > { %7835 = vmatpush1.bf16.msra.mxu0 %v11810_v22  ;;  %v11868_v1 = vld [vmem:[%s13820_s12 + $0x12c4] ss:$100 sps:$4 sm:$0xff]   ;;  %v11878_v14 = vld [vmem:[%s13820_s12 + $0x1db0] ss:$100 sps:$4 sm:$0xff]   ;;  %v11889_v21 = vld [vmem:[%s13820_s12 + $0x4bc] ss:$100 sps:$4 sm:$0xff]  }
  0x51   : > { %7876 = vmatpush1.bf16.msra.mxu1 %v11811_v23  ;;  %7836 = vmatprep.subr.bf16.mxu0 %v11812_v24  ;;  %v11871_v3 = vld [vmem:[%s13820_s12 + $0x12c0] ss:$100 sps:$4 sm:$0xff]   ;;  %v360_v5 = vld [vmem:[%s15466_s0 + $0x10] sm:$0xff]  ;;  %v11887_v23 = vld [vmem:[%s13820_s12 + $0x4b8] ss:$100 sps:$4 sm:$0xff]   ;;  %p296_p7 = scmp.lt.s32.totalorder %s293_s10, 99 }
  0x52   : > { %7877 = vmatprep.subr.bf16.mxu1 %v11814_v25  ;;  %v358_v4 = vld [vmem:[%s15466_s0] sm:$0xff]  ;;  %v13918_v9 = vpack.c.bf16 %v360_v5, %v360_v5  ;;  %v364_v15 = vld [vmem:[%s15466_s0 + $0x30] sm:$0xff] }
  0x53   : > { %v11877_v7 = vld [vmem:[%s13820_s12 + $0x2584] ss:$100 sps:$4 sm:$0xff]   ;;  %v13916_v8 = vpack.c.bf16 %v358_v4, %v358_v4  ;;  %v11886_v17 = vld [vmem:[%s13820_s12 + $0x1cec] ss:$100 sps:$4 sm:$0xff]   ;;  %v13933_v19 = vpack.c.bf16 %v364_v15, %v364_v15  ;;  %v11895_v25 = vld [vmem:[%s13820_s12 + $0x3f4] ss:$100 sps:$4 sm:$0xff]  }
  0x54   : > { %7837 = vmatpush1.bf16.msra.mxu0 %v11816_v26  ;;  %v11875_v11 = vld [vmem:[%s13820_s12 + $0x2580] ss:$100 sps:$4 sm:$0xff]   ;;  %v11884_v20 = vld [vmem:[%s13820_s12 + $0x1ce8] ss:$100 sps:$4 sm:$0xff]   ;;  %v11920_v46 = vld [vmem:[%s13820_s12 + $0x24b8] ss:$100 sps:$4 sm:$0xff]  }
  0x55   : > { %7878 = vmatpush1.bf16.msra.mxu1 %v11817_v27  ;;  %7838 = vmatprep.subr.bf16.mxu0 %v11818_v28  ;;  %v11883_v13 = vld [vmem:[%s13820_s12 + $0x584] ss:$100 sps:$4 sm:$0xff]   ;;  %v11898_v26 = vld [vmem:[%s13820_s12 + $0x1b5c] ss:$100 sps:$4 sm:$0xff]   ;;  %v11893_v27 = vld [vmem:[%s13820_s12 + $0x3f0] ss:$100 sps:$4 sm:$0xff]  }
  0x56   : > { %7879 = vmatprep.subr.bf16.mxu1 %v11820_v29  ;;  %v11881_v18 = vld [vmem:[%s13820_s12 + $0x580] ss:$100 sps:$4 sm:$0xff]   ;;  %v11896_v28 = vld [vmem:[%s13820_s12 + $0x1b58] ss:$100 sps:$4 sm:$0xff]   ;;  %v11901_v29 = vld [vmem:[%s13820_s12 + $0x32c] ss:$100 sps:$4 sm:$0xff]  }
  0x57   : > { %v11892_v22 = vld [vmem:[%s13820_s12 + $0x1c24] ss:$100 sps:$4 sm:$0xff]   ;;  %v11950_v4 = vld [vmem:[%s13820_s12 + $0x20d0] ss:$100 sps:$4 sm:$0xff]   ;;  %s15481_s10 = smov (!%p296_p7, %s293_s10), 99 }
  0x58   : > { %7839 = vmatpush1.bf16.msra.mxu0 %v11822_v30  ;;  %v11890_v24 = vld [vmem:[%s13820_s12 + $0x1c20] ss:$100 sps:$4 sm:$0xff]   ;;  %v11904_v30 = vld [vmem:[%s13820_s12 + $0x1a94] ss:$100 sps:$4 sm:$0xff]   ;;  %v11923_v50 = vld [vmem:[%s13820_s12 + $0x8] ss:$100 sps:$4 sm:$0xff]  }
  0x59   : > { %7880 = vmatpush1.bf16.msra.mxu1 %v11823_v31  ;;  %7840 = vmatprep.subr.bf16.mxu0 %v11824_v32  ;;  %v11899_v31 = vld [vmem:[%s13820_s12 + $0x328] ss:$100 sps:$4 sm:$0xff]   ;;  %v11902_v32 = vld [vmem:[%s13820_s12 + $0x1a90] ss:$100 sps:$4 sm:$0xff]   ;;  %s10388_s15 = sshll.u32 %s15481_s10, 3 }
  0x5a   : > { %7881 = vmatprep.subr.bf16.mxu1 %v11826_v33  ;;  %v11907_v33 = vld [vmem:[%s13820_s12 + $0x264] ss:$100 sps:$4 sm:$0xff]   ;;  %v11967_v15 = vld [vmem:[%s13820_s12 + $0x714] ss:$100 sps:$4 sm:$0xff]   ;;  %s14264_s20 = scalar_lea.vmem %s15469_s3, %s10388_s15 }
  0x5b   : > { %v11955_v5 = vld [vmem:[%s13820_s12 + $0x8a4] ss:$100 sps:$4 sm:$0xff]  }
  0x5c   : > { %7841 = vmatpush2.bf16.msra.mxu0 %v11828_v34  ;;  %v11910_v34 = vld [vmem:[%s13820_s12 + $0x19cc] ss:$100 sps:$4 sm:$0xff]  }
  0x5d   : > { %7882 = vmatpush2.bf16.msra.mxu1 %v11829_v35  ;;  %7842 = vmatprep.subr.bf16.mxu0 %v11830_v36  ;;  %v363_v35 = vld [vmem:[%s15466_s0 + $0x28] sm:$0xff] }
  0x5e   : > { %7883 = vmatprep.subr.bf16.mxu1 %v11832_v37  ;;  %v13956_v36 = vpack.c.bf16 %v363_v35, %v363_v35  ;;  %v11905_v37 = vld [vmem:[%s13820_s12 + $0x260] ss:$100 sps:$4 sm:$0xff]   ;;  %v11991_v35 = vld [vmem:[%s13820_s12 + $0x1cf4] ss:$100 sps:$4 sm:$0xff]  }
  0x60   : > { %7843 = vmatpush2.bf16.msra.mxu0 %v11834_v38  ;;  %v11908_v38 = vld [vmem:[%s13820_s12 + $0x19c8] ss:$100 sps:$4 sm:$0xff]  }
  0x61   : > { %7884 = vmatpush2.bf16.msra.mxu1 %v11835_v39  ;;  %7844 = vmatprep.subr.bf16.mxu0 %v11836_v40  ;;  %v11913_v39 = vld [vmem:[%s13820_s12 + $0x19c] ss:$100 sps:$4 sm:$0xff]   ;;  %v11916_v40 = vld [vmem:[%s13820_s12 + $0x1904] ss:$100 sps:$4 sm:$0xff]  }
  0x62   : > { %7885 = vmatprep.subr.bf16.mxu1 %v11838_v41  ;;  %v11911_v41 = vld [vmem:[%s13820_s12 + $0x198] ss:$100 sps:$4 sm:$0xff]  }
  0x64   : > { %7845 = vmatpush2.bf16.msra.mxu0 %v11840_v42  ;;  %v11914_v42 = vld [vmem:[%s13820_s12 + $0x1900] ss:$100 sps:$4 sm:$0xff]  }
  0x65   : > { %7886 = vmatpush2.bf16.msra.mxu1 %v11841_v43  ;;  %7846 = vmatprep.subr.bf16.mxu0 %v11842_v44  ;;  %v11919_v43 = vld [vmem:[%s13820_s12 + $0xd4] ss:$100 sps:$4 sm:$0xff]   ;;  %v11922_v44 = vld [vmem:[%s13820_s12 + $0x24bc] ss:$100 sps:$4 sm:$0xff]  }
  0x66   : > { %7887 = vmatprep.subr.bf16.mxu1 %v11844_v45  ;;  %v11917_v45 = vld [vmem:[%s13820_s12 + $0xd0] ss:$100 sps:$4 sm:$0xff]  }
  0x68   : > { %7847 = vmatpush2.bf16.msra.mxu0 %v11846_v47  ;;  %v11925_v47 = vld [vmem:[%s13820_s12 + $0xc] ss:$100 sps:$4 sm:$0xff]  }
  0x69   : > { %7888 = vmatpush2.bf16.msra.mxu1 %v11847_v48  ;;  %7848 = vmatprep.subr.bf16.mxu0 %v11848_v51  ;;  %v11928_v48 = vld [vmem:[%s13820_s12 + $0x23f4] ss:$100 sps:$4 sm:$0xff]  }
  0x6a   : > { %7889 = vmatprep.subr.bf16.mxu1 %v11850_v53  ;;  %v11926_v51 = vld [vmem:[%s13820_s12 + $0x23f0] ss:$100 sps:$4 sm:$0xff]   ;;  %v11931_v53 = vld [vmem:[%s13820_s12 + $0xbc4] ss:$100 sps:$4 sm:$0xff]  }
  0x6c   : > { %7849 = vmatpush2.bf16.msra.mxu0 %v11852_v54  ;;  %v11934_v54 = vld [vmem:[%s13820_s12 + $0x232c] ss:$100 sps:$4 sm:$0xff]  }
  0x6d   : > { %7890 = vmatpush2.bf16.msra.mxu1 %v11853_v55  ;;  %7850 = vmatprep.subr.bf16.mxu0 %v11854_v56  ;;  %v11929_v55 = vld [vmem:[%s13820_s12 + $0xbc0] ss:$100 sps:$4 sm:$0xff]   ;;  %v11932_v56 = vld [vmem:[%s13820_s12 + $0x2328] ss:$100 sps:$4 sm:$0xff]  }
  0x6e   : > { %7891 = vmatprep.subr.bf16.mxu1 %v11856_v57  ;;  %v11937_v57 = vld [vmem:[%s13820_s12 + $0xafc] ss:$100 sps:$4 sm:$0xff]  }
  0x70   : > { %7851 = vmatpush2.bf16.msra.mxu0 %v11858_v58  ;;  %v11940_v58 = vld [vmem:[%s13820_s12 + $0x2264] ss:$100 sps:$4 sm:$0xff]  }
  0x71   : > { %7892 = vmatpush2.bf16.msra.mxu1 %v11859_v59  ;;  %7852 = vmatprep.subr.bf16.mxu0 %v11860_v60  ;;  %v11935_v59 = vld [vmem:[%s13820_s12 + $0xaf8] ss:$100 sps:$4 sm:$0xff]   ;;  %v11938_v60 = vld [vmem:[%s13820_s12 + $0x2260] ss:$100 sps:$4 sm:$0xff]  }
  0x72   : > { %7893 = vmatprep.subr.bf16.mxu1 %v11862_v61  ;;  %v11943_v61 = vld [vmem:[%s13820_s12 + $0xa34] ss:$100 sps:$4 sm:$0xff]  }
  0x74   : > { %7853 = vmatpush2.bf16.msra.mxu0 %v11864_v62  ;;  %v11946_v62 = vld [vmem:[%s13820_s12 + $0x219c] ss:$100 sps:$4 sm:$0xff]  }
  0x75   : > { %7894 = vmatpush2.bf16.msra.mxu1 %v11865_v63  ;;  %7854 = vmatprep.subr.bf16.mxu0 %v11866_v0  ;;  %v11941_v63 = vld [vmem:[%s13820_s12 + $0xa30] ss:$100 sps:$4 sm:$0xff]   ;;  %v11944_v0 = vld [vmem:[%s13820_s12 + $0x2198] ss:$100 sps:$4 sm:$0xff]  }
  0x76   : > { %7895 = vmatprep.subr.bf16.mxu1 %v11868_v1  ;;  %v11949_v1 = vld [vmem:[%s13820_s12 + $0x96c] ss:$100 sps:$4 sm:$0xff]  }
  0x78   : > { %7855 = vmatpush2.bf16.msra.mxu0 %v11870_v2  ;;  %v11952_v2 = vld [vmem:[%s13820_s12 + $0x20d4] ss:$100 sps:$4 sm:$0xff]  }
  0x79   : > { %7896 = vmatpush2.bf16.msra.mxu1 %v11871_v3  ;;  %7906 = vmatprep.subr.bf16.mxu0 %v11874_v6  ;;  %v11947_v3 = vld [vmem:[%s13820_s12 + $0x968] ss:$100 sps:$4 sm:$0xff]  }
  0x7a   : > { %7961 = vmatprep.subr.bf16.mxu1 %v11877_v7  ;;  %v11958_v6 = vld [vmem:[%s13820_s12 + $0x200c] ss:$100 sps:$4 sm:$0xff]   ;;  %v11953_v7 = vld [vmem:[%s13820_s12 + $0x8a0] ss:$100 sps:$4 sm:$0xff]  }
  0x7b   : > { %7857 = vmatmul.mubr.bf16.vlgmr.msra.gmra.mxu0 %v13916_v8 }
  0x7c   : > { %7898 = vmatmul.mubr.bf16.vlgmr.msra.gmra.mxu1 %v13918_v9  ;;  %7907 = vmatpush1.bf16.msra.mxu0 %v11872_v10  ;;  %v11956_v10 = vld [vmem:[%s13820_s12 + $0x2008] ss:$100 sps:$4 sm:$0xff]  }
  0x7d   : > { %7962 = vmatpush1.bf16.msra.mxu1 %v11875_v11  ;;  %7908 = vmatprep.subr.bf16.mxu0 %v11880_v12  ;;  %v11961_v11 = vld [vmem:[%s13820_s12 + $0x7dc] ss:$100 sps:$4 sm:$0xff]   ;;  %v11964_v12 = vld [vmem:[%s13820_s12 + $0x1f44] ss:$100 sps:$4 sm:$0xff]  }
  0x7e   : > { %7979 = vmatprep.mubr.bf16.mxu1 %v13708_v16  ;;  %7988 = vmatprep.subr.bf16.mxu1 %v11883_v13  ;;  %v11959_v13 = vld [vmem:[%s13820_s12 + $0x7d8] ss:$100 sps:$4 sm:$0xff]  }
  0x7f   : > { %7938 = vmatprep.mubr.bf16.mxu0 %v13956_v36 }
  0x80   : > { %7909 = vmatpush1.bf16.msra.mxu0 %v11878_v14  ;;  %v11962_v14 = vld [vmem:[%s13820_s12 + $0x1f40] ss:$100 sps:$4 sm:$0xff]  }
  0x81   : > { %7910 = vmatprep.subr.bf16.mxu0 %v11886_v17  ;;  %v362_v17 = vld [vmem:[%s15466_s0 + $0x20] sm:$0xff] }
  0x84   : > { %11614 = vmatmul.mubr.msk.bf16.vlgmr.msra.gmra.mxu1 %vm7820_vm0, %v13933_v19  ;;  %7911 = vmatpush1.bf16.msra.mxu0 %v11884_v20  ;;  %v11965_v20 = vld [vmem:[%s13820_s12 + $0x710] ss:$100 sps:$4 sm:$0xff]  }
  0x85   : > { %7989 = vmatpush1.bf16.msra.mxu1 %v11881_v18  ;;  %7912 = vmatprep.subr.bf16.mxu0 %v11892_v22  ;;  %v11970_v18 = vld [vmem:[%s13820_s12 + $0x1204] ss:$100 sps:$4 sm:$0xff]  }
  0x86   : > { %7990 = vmatprep.subr.bf16.mxu1 %v11889_v21  ;;  %8020 = vmatprep.mubr.bf16.mxu1 %v13883_v49  ;;  %v14003_v21 = vpack.c.bf16 %v362_v17, %v362_v17  ;;  %v11968_v22 = vld [vmem:[%s13820_s12 + $0x1200] ss:$100 sps:$4 sm:$0xff]  }
  0x87   : > { %v12051_v17 = vld [vmem:[%s13820_s12 + $0x21a4] ss:$100 sps:$4 sm:$0xff]  }
  0x88   : > { %7913 = vmatpush1.bf16.msra.mxu0 %v11890_v24  ;;  %v11976_v24 = vld [vmem:[%s13820_s12 + $0x113c] ss:$100 sps:$4 sm:$0xff]  }
  0x89   : > { %7991 = vmatpush1.bf16.msra.mxu1 %v11887_v23  ;;  %7914 = vmatprep.subr.bf16.mxu0 %v11898_v26  ;;  %v11973_v23 = vld [vmem:[%s13820_s12 + $0x64c] ss:$100 sps:$4 sm:$0xff]   ;;  %v11974_v26 = vld [vmem:[%s13820_s12 + $0x1138] ss:$100 sps:$4 sm:$0xff]  }
  0x8a   : > { %7992 = vmatprep.subr.bf16.mxu1 %v11895_v25  ;;  %v11971_v25 = vld [vmem:[%s13820_s12 + $0x648] ss:$100 sps:$4 sm:$0xff]  }
  0x8c   : > { %7915 = vmatpush1.bf16.msra.mxu0 %v11896_v28  ;;  %v11982_v28 = vld [vmem:[%s13820_s12 + $0x1074] ss:$100 sps:$4 sm:$0xff]  }
  0x8d   : > { %7993 = vmatpush1.bf16.msra.mxu1 %v11893_v27  ;;  %7916 = vmatprep.subr.bf16.mxu0 %v11904_v30  ;;  %v11979_v27 = vld [vmem:[%s13820_s12 + $0x1e84] ss:$100 sps:$4 sm:$0xff]   ;;  %v11980_v30 = vld [vmem:[%s13820_s12 + $0x1070] ss:$100 sps:$4 sm:$0xff]  }
  0x8e   : > { %7994 = vmatprep.subr.bf16.mxu1 %v11901_v29  ;;  %v11977_v29 = vld [vmem:[%s13820_s12 + $0x1e80] ss:$100 sps:$4 sm:$0xff]  }
  0x90   : > { %7917 = vmatpush1.bf16.msra.mxu0 %v11902_v32  ;;  %v11988_v32 = vld [vmem:[%s13820_s12 + $0xfac] ss:$100 sps:$4 sm:$0xff]  }
  0x91   : > { %7995 = vmatpush1.bf16.msra.mxu1 %v11899_v31  ;;  %7918 = vmatprep.subr.bf16.mxu0 %v11910_v34  ;;  %v11985_v31 = vld [vmem:[%s13820_s12 + $0x1dbc] ss:$100 sps:$4 sm:$0xff]   ;;  %v11986_v34 = vld [vmem:[%s13820_s12 + $0xfa8] ss:$100 sps:$4 sm:$0xff]  }
  0x92   : > { %7996 = vmatprep.subr.bf16.mxu1 %v11907_v33  ;;  %v11983_v33 = vld [vmem:[%s13820_s12 + $0x1db8] ss:$100 sps:$4 sm:$0xff]  }
  0x94   : > { %7919 = vmatpush1.bf16.msra.mxu0 %v11908_v38  ;;  %v11989_v38 = vld [vmem:[%s13820_s12 + $0x1cf0] ss:$100 sps:$4 sm:$0xff]  }
  0x95   : > { %7997 = vmatpush1.bf16.msra.mxu1 %v11905_v37  ;;  %7920 = vmatprep.subr.bf16.mxu0 %v11916_v40  ;;  %v11994_v37 = vld [vmem:[%s13820_s12 + $0xee4] ss:$100 sps:$4 sm:$0xff]   ;;  %v11997_v40 = vld [vmem:[%s13820_s12 + $0x1c2c] ss:$100 sps:$4 sm:$0xff]  }
  0x96   : > { %7998 = vmatprep.subr.bf16.mxu1 %v11913_v39  ;;  %v11992_v39 = vld [vmem:[%s13820_s12 + $0xee0] ss:$100 sps:$4 sm:$0xff]  }
  0x98   : > { %7921 = vmatpush1.bf16.msra.mxu0 %v11914_v42  ;;  %v11995_v42 = vld [vmem:[%s13820_s12 + $0x1c28] ss:$100 sps:$4 sm:$0xff]  }
  0x99   : > { %7999 = vmatpush1.bf16.msra.mxu1 %v11911_v41  ;;  %7922 = vmatprep.subr.bf16.mxu0 %v11922_v44  ;;  %v12000_v41 = vld [vmem:[%s13820_s12 + $0xe1c] ss:$100 sps:$4 sm:$0xff]   ;;  %v12003_v44 = vld [vmem:[%s13820_s12 + $0x1b64] ss:$100 sps:$4 sm:$0xff]  }
  0x9a   : > { %8000 = vmatprep.subr.bf16.mxu1 %v11919_v43  ;;  %v11998_v43 = vld [vmem:[%s13820_s12 + $0xe18] ss:$100 sps:$4 sm:$0xff]  }
  0x9c   : > { %7923 = vmatpush2.bf16.msra.mxu0 %v11920_v46  ;;  %v12001_v46 = vld [vmem:[%s13820_s12 + $0x1b60] ss:$100 sps:$4 sm:$0xff]  }
  0x9d   : > { %8001 = vmatpush1.bf16.msra.mxu1 %v11917_v45  ;;  %7924 = vmatprep.subr.bf16.mxu0 %v11928_v48  ;;  %v12006_v45 = vld [vmem:[%s13820_s12 + $0xd54] ss:$100 sps:$4 sm:$0xff]   ;;  %v12009_v48 = vld [vmem:[%s13820_s12 + $0x1a9c] ss:$100 sps:$4 sm:$0xff]  }
  0x9e   : > { %8002 = vmatprep.subr.bf16.mxu1 %v11925_v47  ;;  %v12004_v47 = vld [vmem:[%s13820_s12 + $0xd50] ss:$100 sps:$4 sm:$0xff]  }
  0xa0   : > { %7925 = vmatpush2.bf16.msra.mxu0 %v11926_v51  ;;  %v12007_v51 = vld [vmem:[%s13820_s12 + $0x1a98] ss:$100 sps:$4 sm:$0xff]  }
  0xa1   : > { %8003 = vmatpush1.bf16.msra.mxu1 %v11923_v50  ;;  %7926 = vmatprep.subr.bf16.mxu0 %v11934_v54  ;;  %v12012_v50 = vld [vmem:[%s13820_s12 + $0xc8c] ss:$100 sps:$4 sm:$0xff]   ;;  %v12015_v54 = vld [vmem:[%s13820_s12 + $0x19d4] ss:$100 sps:$4 sm:$0xff]  }
  0xa2   : > { %8004 = vmatprep.subr.bf16.mxu1 %v11931_v53  ;;  %v12010_v53 = vld [vmem:[%s13820_s12 + $0xc88] ss:$100 sps:$4 sm:$0xff]  }
  0xa4   : > { %7927 = vmatpush2.bf16.msra.mxu0 %v11932_v56  ;;  %v12013_v56 = vld [vmem:[%s13820_s12 + $0x19d0] ss:$100 sps:$4 sm:$0xff]  }
  0xa5   : > { %8005 = vmatpush2.bf16.msra.mxu1 %v11929_v55  ;;  %7928 = vmatprep.subr.bf16.mxu0 %v11940_v58  ;;  %v12018_v55 = vld [vmem:[%s13820_s12 + $0x1844] ss:$100 sps:$4 sm:$0xff]   ;;  %v12021_v58 = vld [vmem:[%s13820_s12 + $0x190c] ss:$100 sps:$4 sm:$0xff]  }
  0xa6   : > { %8006 = vmatprep.subr.bf16.mxu1 %v11937_v57  ;;  %v12016_v57 = vld [vmem:[%s13820_s12 + $0x1840] ss:$100 sps:$4 sm:$0xff]  }
  0xa8   : > { %7929 = vmatpush2.bf16.msra.mxu0 %v11938_v60  ;;  %v12019_v60 = vld [vmem:[%s13820_s12 + $0x1908] ss:$100 sps:$4 sm:$0xff]  }
  0xa9   : > { %8007 = vmatpush2.bf16.msra.mxu1 %v11935_v59  ;;  %7930 = vmatprep.subr.bf16.mxu0 %v11946_v62  ;;  %v12024_v59 = vld [vmem:[%s13820_s12 + $0x177c] ss:$100 sps:$4 sm:$0xff]   ;;  %v12027_v62 = vld [vmem:[%s13820_s12 + $0x24c4] ss:$100 sps:$4 sm:$0xff]  }
  0xaa   : > { %8008 = vmatprep.subr.bf16.mxu1 %v11943_v61  ;;  %v12022_v61 = vld [vmem:[%s13820_s12 + $0x1778] ss:$100 sps:$4 sm:$0xff]  }
  0xac   : > { %7931 = vmatpush2.bf16.msra.mxu0 %v11944_v0  ;;  %v12025_v0 = vld [vmem:[%s13820_s12 + $0x24c0] ss:$100 sps:$4 sm:$0xff]  }
  0xad   : > { %8009 = vmatpush2.bf16.msra.mxu1 %v11941_v63  ;;  %7932 = vmatprep.subr.bf16.mxu0 %v11952_v2  ;;  %v12030_v63 = vld [vmem:[%s13820_s12 + $0x16b4] ss:$100 sps:$4 sm:$0xff]   ;;  %v12033_v2 = vld [vmem:[%s13820_s12 + $0x23fc] ss:$100 sps:$4 sm:$0xff]  }
  0xae   : > { %8010 = vmatprep.subr.bf16.mxu1 %v11949_v1  ;;  %v12028_v1 = vld [vmem:[%s13820_s12 + $0x16b0] ss:$100 sps:$4 sm:$0xff]  }
  0xb0   : > { %7933 = vmatpush2.bf16.msra.mxu0 %v11950_v4  ;;  %v12031_v4 = vld [vmem:[%s13820_s12 + $0x23f8] ss:$100 sps:$4 sm:$0xff]  }
  0xb1   : > { %8011 = vmatpush2.bf16.msra.mxu1 %v11947_v3  ;;  %7934 = vmatprep.subr.bf16.mxu0 %v11958_v6  ;;  %v12036_v3 = vld [vmem:[%s13820_s12 + $0x15ec] ss:$100 sps:$4 sm:$0xff]   ;;  %v12039_v6 = vld [vmem:[%s13820_s12 + $0x2334] ss:$100 sps:$4 sm:$0xff]  }
  0xb2   : > { %8012 = vmatprep.subr.bf16.mxu1 %v11955_v5  ;;  %v12034_v5 = vld [vmem:[%s13820_s12 + $0x15e8] ss:$100 sps:$4 sm:$0xff]  }
  0xb4   : > { %7935 = vmatpush2.bf16.msra.mxu0 %v11956_v10  ;;  %v12037_v10 = vld [vmem:[%s13820_s12 + $0x2330] ss:$100 sps:$4 sm:$0xff]  }
  0xb5   : > { %8013 = vmatpush2.bf16.msra.mxu1 %v11953_v7  ;;  %7936 = vmatprep.subr.bf16.mxu0 %v11964_v12  ;;  %v12042_v7 = vld [vmem:[%s13820_s12 + $0x1524] ss:$100 sps:$4 sm:$0xff]   ;;  %v12045_v12 = vld [vmem:[%s13820_s12 + $0x226c] ss:$100 sps:$4 sm:$0xff]  }
  0xb6   : > { %8014 = vmatprep.subr.bf16.mxu1 %v11961_v11  ;;  %v12040_v11 = vld [vmem:[%s13820_s12 + $0x1520] ss:$100 sps:$4 sm:$0xff]  }
  0xb8   : > { %7937 = vmatpush2.bf16.msra.mxu0 %v11962_v14  ;;  %v12043_v14 = vld [vmem:[%s13820_s12 + $0x2268] ss:$100 sps:$4 sm:$0xff]  }
  0xb9   : > { %8015 = vmatpush2.bf16.msra.mxu1 %v11959_v13  ;;  %8029 = vmatprep.subr.bf16.mxu0 %v11970_v18  ;;  %v12048_v13 = vld [vmem:[%s13820_s12 + $0x145c] ss:$100 sps:$4 sm:$0xff]   ;;  %v12054_v18 = vld [vmem:[%s13820_s12 + $0x1394] ss:$100 sps:$4 sm:$0xff]  }
  0xba   : > { %8016 = vmatprep.subr.bf16.mxu1 %v11967_v15  ;;  %v12046_v15 = vld [vmem:[%s13820_s12 + $0x1458] ss:$100 sps:$4 sm:$0xff]  }
  0xbb   : > { %7939 = vmatmul.mubr.bf16.vlgmr.msra.gmra.mxu0 %v14003_v21 }
  0xbc   : > { %8030 = vmatpush1.bf16.msra.mxu0 %v11968_v22  ;;  %8061 = vmatprep.mubr.bf16.mxu0 %v13889_v52  ;;  %v12052_v22 = vld [vmem:[%s13820_s12 + $0x1390] ss:$100 sps:$4 sm:$0xff]  }
  0xbd   : > { %8017 = vmatpush2.bf16.msra.mxu1 %v11965_v20  ;;  %8031 = vmatprep.subr.bf16.mxu0 %v11976_v24  ;;  %v12049_v20 = vld [vmem:[%s13820_s12 + $0x21a0] ss:$100 sps:$4 sm:$0xff]   ;;  %v12060_v24 = vld [vmem:[%s13820_s12 + $0x12cc] ss:$100 sps:$4 sm:$0xff]  }
  0xbe   : > { %8018 = vmatprep.subr.bf16.mxu1 %v11973_v23  ;;  %v12057_v23 = vld [vmem:[%s13820_s12 + $0x20dc] ss:$100 sps:$4 sm:$0xff]  }
  0xc0   : > { %8032 = vmatpush1.bf16.msra.mxu0 %v11974_v26  ;;  %v12058_v26 = vld [vmem:[%s13820_s12 + $0x12c8] ss:$100 sps:$4 sm:$0xff]  }
  0xc1   : > { %8019 = vmatpush2.bf16.msra.mxu1 %v11971_v25  ;;  %8033 = vmatprep.subr.bf16.mxu0 %v11982_v28  ;;  %v12055_v25 = vld [vmem:[%s13820_s12 + $0x20d8] ss:$100 sps:$4 sm:$0xff]   ;;  %v12066_v28 = vld [vmem:[%s13820_s12 + $0x58c] ss:$100 sps:$4 sm:$0xff]  }
  0xc2   : > { %8070 = vmatprep.subr.bf16.mxu1 %v11979_v27  ;;  %v12063_v27 = vld [vmem:[%s13820_s12 + $0x2014] ss:$100 sps:$4 sm:$0xff]  }
  0xc4   : > { %8021 = vmatmul.mubr.bf16.vlgmr.msra.gmra.mxu1 %v13916_v8  ;;  %8034 = vmatpush1.bf16.msra.mxu0 %v11980_v30  ;;  %v12064_v30 = vld [vmem:[%s13820_s12 + $0x588] ss:$100 sps:$4 sm:$0xff]  }
  0xc5   : > { %8071 = vmatpush1.bf16.msra.mxu1 %v11977_v29  ;;  %8035 = vmatprep.subr.bf16.mxu0 %v11988_v32  ;;  %v12061_v29 = vld [vmem:[%s13820_s12 + $0x2010] ss:$100 sps:$4 sm:$0xff]   ;;  %v12072_v32 = vld [vmem:[%s13820_s12 + $0x4c4] ss:$100 sps:$4 sm:$0xff]  }
  0xc6   : > { %8072 = vmatprep.subr.bf16.mxu1 %v11985_v31  ;;  %8102 = vmatprep.mubr.bf16.mxu1 %v13956_v36  ;;  %v12069_v31 = vld [vmem:[%s13820_s12 + $0x1f4c] ss:$100 sps:$4 sm:$0xff]  }
  0xc8   : > { %8036 = vmatpush1.bf16.msra.mxu0 %v11986_v34  ;;  %v12070_v34 = vld [vmem:[%s13820_s12 + $0x4c0] ss:$100 sps:$4 sm:$0xff]  }
  0xc9   : > { %8073 = vmatpush1.bf16.msra.mxu1 %v11983_v33  ;;  %8037 = vmatprep.subr.bf16.mxu0 %v11994_v37  ;;  %v12067_v33 = vld [vmem:[%s13820_s12 + $0x1f48] ss:$100 sps:$4 sm:$0xff]  }
  0xca   : > { %8074 = vmatprep.subr.bf16.mxu1 %v11991_v35  ;;  %v12075_v35 = vld [vmem:[%s13820_s12 + $0x3fc] ss:$100 sps:$4 sm:$0xff]   ;;  %v12078_v37 = vld [vmem:[%s13820_s12 + $0x258c] ss:$100 sps:$4 sm:$0xff]  }
  0xcc   : > { %8038 = vmatpush1.bf16.msra.mxu0 %v11992_v39  ;;  %v12076_v39 = vld [vmem:[%s13820_s12 + $0x2588] ss:$100 sps:$4 sm:$0xff]  }
  0xcd   : > { %8075 = vmatpush1.bf16.msra.mxu1 %v11989_v38  ;;  %8039 = vmatprep.subr.bf16.mxu0 %v12000_v41  ;;  %v12073_v38 = vld [vmem:[%s13820_s12 + $0x3f8] ss:$100 sps:$4 sm:$0xff]   ;;  %v12084_v41 = vld [vmem:[%s13820_s12 + $0x120c] ss:$100 sps:$4 sm:$0xff]  }
  0xce   : > { %8076 = vmatprep.subr.bf16.mxu1 %v11997_v40  ;;  %v12081_v40 = vld [vmem:[%s13820_s12 + $0x334] ss:$100 sps:$4 sm:$0xff]  }
  0xd0   : > { %8040 = vmatpush1.bf16.msra.mxu0 %v11998_v43  ;;  %v12087_v43 = vld [vmem:[%s13820_s12 + $0x26c] ss:$100 sps:$4 sm:$0xff]  }
  0xd1   : > { %8077 = vmatpush1.bf16.msra.mxu1 %v11995_v42  ;;  %8041 = vmatprep.subr.bf16.mxu0 %v12006_v45  ;;  %v12079_v42 = vld [vmem:[%s13820_s12 + $0x330] ss:$100 sps:$4 sm:$0xff]   ;;  %v12085_v45 = vld [vmem:[%s13820_s12 + $0x268] ss:$100 sps:$4 sm:$0xff]  }
  0xd2   : > { %8078 = vmatprep.subr.bf16.mxu1 %v12003_v44  ;;  %v12082_v44 = vld [vmem:[%s13820_s12 + $0x1208] ss:$100 sps:$4 sm:$0xff]  }
  0xd4   : > { %8042 = vmatpush1.bf16.msra.mxu0 %v12004_v47  ;;  %v12093_v47 = vld [vmem:[%s13820_s12 + $0x1a4] ss:$100 sps:$4 sm:$0xff]  }
  0xd5   : > { %8079 = vmatpush1.bf16.msra.mxu1 %v12001_v46  ;;  %8043 = vmatprep.subr.bf16.mxu0 %v12012_v50  ;;  %v12090_v46 = vld [vmem:[%s13820_s12 + $0x1144] ss:$100 sps:$4 sm:$0xff]  }
  0xd6   : > { %8080 = vmatprep.subr.bf16.mxu1 %v12009_v48  ;;  %v12088_v48 = vld [vmem:[%s13820_s12 + $0x1140] ss:$100 sps:$4 sm:$0xff]  }
  0xd7   : > { %v12091_v50 = vld [vmem:[%s13820_s12 + $0x1a0] ss:$100 sps:$4 sm:$0xff]  }
  0xd8   : > { %8044 = vmatpush1.bf16.msra.mxu0 %v12010_v53  ;;  %v12099_v53 = vld [vmem:[%s13820_s12 + $0xdc] ss:$100 sps:$4 sm:$0xff]  }
  0xd9   : > { %8081 = vmatpush1.bf16.msra.mxu1 %v12007_v51  ;;  %8045 = vmatprep.subr.bf16.mxu0 %v12018_v55  ;;  %v12096_v51 = vld [vmem:[%s13820_s12 + $0x107c] ss:$100 sps:$4 sm:$0xff]  }
  0xda   : > { %8082 = vmatprep.subr.bf16.mxu1 %v12015_v54  ;;  %v12094_v54 = vld [vmem:[%s13820_s12 + $0x1078] ss:$100 sps:$4 sm:$0xff]  }
  0xdb   : > { %v12097_v55 = vld [vmem:[%s13820_s12 + $0xd8] ss:$100 sps:$4 sm:$0xff]  }
  0xdc   : > { %8046 = vmatpush2.bf16.msra.mxu0 %v12016_v57  ;;  %v12105_v57 = vld [vmem:[%s13820_s12 + $0x14] ss:$100 sps:$4 sm:$0xff]  }
  0xdd   : > { %8083 = vmatpush1.bf16.msra.mxu1 %v12013_v56  ;;  %8047 = vmatprep.subr.bf16.mxu0 %v12024_v59  ;;  %v12102_v56 = vld [vmem:[%s13820_s12 + $0xfb4] ss:$100 sps:$4 sm:$0xff]  }
  0xde   : > { %8084 = vmatprep.subr.bf16.mxu1 %v12021_v58  ;;  %v12100_v58 = vld [vmem:[%s13820_s12 + $0xfb0] ss:$100 sps:$4 sm:$0xff]  }
  0xdf   : > { %v12103_v59 = vld [vmem:[%s13820_s12 + $0x10] ss:$100 sps:$4 sm:$0xff]  }
  0xe0   : > { %8048 = vmatpush2.bf16.msra.mxu0 %v12022_v61  ;;  %v12111_v61 = vld [vmem:[%s13820_s12 + $0xbcc] ss:$100 sps:$4 sm:$0xff]  }
  0xe1   : > { %8085 = vmatpush1.bf16.msra.mxu1 %v12019_v60  ;;  %8049 = vmatprep.subr.bf16.mxu0 %v12030_v63  ;;  %v12108_v60 = vld [vmem:[%s13820_s12 + $0xeec] ss:$100 sps:$4 sm:$0xff]  }
  0xe2   : > { %8086 = vmatprep.subr.bf16.mxu1 %v12027_v62  ;;  %v12106_v62 = vld [vmem:[%s13820_s12 + $0xee8] ss:$100 sps:$4 sm:$0xff]  }
  0xe3   : > { %v12109_v63 = vld [vmem:[%s13820_s12 + $0xbc8] ss:$100 sps:$4 sm:$0xff]  }
  0xe4   : > { %8050 = vmatpush2.bf16.msra.mxu0 %v12028_v1  ;;  %v12117_v1 = vld [vmem:[%s13820_s12 + $0xb04] ss:$100 sps:$4 sm:$0xff]  }
  0xe5   : > { %8087 = vmatpush2.bf16.msra.mxu1 %v12025_v0  ;;  %8051 = vmatprep.subr.bf16.mxu0 %v12036_v3  ;;  %v12114_v0 = vld [vmem:[%s13820_s12 + $0xe24] ss:$100 sps:$4 sm:$0xff]  }
  0xe6   : > { %8088 = vmatprep.subr.bf16.mxu1 %v12033_v2  ;;  %v12112_v2 = vld [vmem:[%s13820_s12 + $0xe20] ss:$100 sps:$4 sm:$0xff]  }
  0xe7   : > { %v12115_v3 = vld [vmem:[%s13820_s12 + $0xb00] ss:$100 sps:$4 sm:$0xff]  }
  0xe8   : > { %8052 = vmatpush2.bf16.msra.mxu0 %v12034_v5  ;;  %v12123_v5 = vld [vmem:[%s13820_s12 + $0xa3c] ss:$100 sps:$4 sm:$0xff]  }
  0xe9   : > { %8089 = vmatpush2.bf16.msra.mxu1 %v12031_v4  ;;  %8053 = vmatprep.subr.bf16.mxu0 %v12042_v7  ;;  %v12120_v4 = vld [vmem:[%s13820_s12 + $0xd5c] ss:$100 sps:$4 sm:$0xff]  }
  0xea   : > { %8090 = vmatprep.subr.bf16.mxu1 %v12039_v6  ;;  %v12118_v6 = vld [vmem:[%s13820_s12 + $0xd58] ss:$100 sps:$4 sm:$0xff]  }
  0xeb   : > { %v12121_v7 = vld [vmem:[%s13820_s12 + $0xa38] ss:$100 sps:$4 sm:$0xff]  }
  0xec   : > { %8054 = vmatpush2.bf16.msra.mxu0 %v12040_v11  ;;  %v12129_v11 = vld [vmem:[%s13820_s12 + $0x974] ss:$100 sps:$4 sm:$0xff]  }
  0xed   : > { %8091 = vmatpush2.bf16.msra.mxu1 %v12037_v10  ;;  %8055 = vmatprep.subr.bf16.mxu0 %v12048_v13  ;;  %v12126_v10 = vld [vmem:[%s13820_s12 + $0xc94] ss:$100 sps:$4 sm:$0xff]  }
  0xee   : > { %8092 = vmatprep.subr.bf16.mxu1 %v12045_v12  ;;  %v12124_v12 = vld [vmem:[%s13820_s12 + $0xc90] ss:$100 sps:$4 sm:$0xff]  }
  0xef   : > { %v12127_v13 = vld [vmem:[%s13820_s12 + $0x970] ss:$100 sps:$4 sm:$0xff]  }
  0xf0   : > { %8056 = vmatpush2.bf16.msra.mxu0 %v12046_v15  ;;  %v12135_v15 = vld [vmem:[%s13820_s12 + $0x8ac] ss:$100 sps:$4 sm:$0xff]  }
  0xf1   : > { %8093 = vmatpush2.bf16.msra.mxu1 %v12043_v14  ;;  %8057 = vmatprep.subr.bf16.mxu0 %v12054_v18  ;;  %v12132_v14 = vld [vmem:[%s13820_s12 + $0x184c] ss:$100 sps:$4 sm:$0xff]  }
  0xf2   : > { %8094 = vmatprep.subr.bf16.mxu1 %v12051_v17  ;;  %v12130_v17 = vld [vmem:[%s13820_s12 + $0x1848] ss:$100 sps:$4 sm:$0xff]  }
  0xf3   : > { %v12133_v18 = vld [vmem:[%s13820_s12 + $0x8a8] ss:$100 sps:$4 sm:$0xff]  }
  0xf4   : > { %8058 = vmatpush2.bf16.msra.mxu0 %v12052_v22  ;;  %v12141_v22 = vld [vmem:[%s13820_s12 + $0x7e4] ss:$100 sps:$4 sm:$0xff]  }
  0xf5   : > { %8095 = vmatpush2.bf16.msra.mxu1 %v12049_v20  ;;  %8059 = vmatprep.subr.bf16.mxu0 %v12060_v24  ;;  %v12138_v20 = vld [vmem:[%s13820_s12 + $0x1784] ss:$100 sps:$4 sm:$0xff]  }
  0xf6   : > { %8096 = vmatprep.subr.bf16.mxu1 %v12057_v23  ;;  %v12136_v23 = vld [vmem:[%s13820_s12 + $0x1780] ss:$100 sps:$4 sm:$0xff]  }
  0xf7   : > { %v12139_v24 = vld [vmem:[%s13820_s12 + $0x7e0] ss:$100 sps:$4 sm:$0xff]  }
  0xf8   : > { %8060 = vmatpush2.bf16.msra.mxu0 %v12058_v26  ;;  %v12147_v26 = vld [vmem:[%s13820_s12 + $0x71c] ss:$100 sps:$4 sm:$0xff]  }
  0xf9   : > { %8097 = vmatpush2.bf16.msra.mxu1 %v12055_v25  ;;  %8152 = vmatprep.subr.bf16.mxu0 %v12066_v28  ;;  %v12144_v25 = vld [vmem:[%s13820_s12 + $0x16bc] ss:$100 sps:$4 sm:$0xff]  }
  0xfa   : > { %8098 = vmatprep.subr.bf16.mxu1 %v12063_v27  ;;  %v12142_v27 = vld [vmem:[%s13820_s12 + $0x16b8] ss:$100 sps:$4 sm:$0xff]  }
  0xfb   : > { %8062 = vmatmul.mubr.bf16.vlgmr.msra.gmra.mxu0 %v13918_v9  ;;  %v12145_v28 = vld [vmem:[%s13820_s12 + $0x718] ss:$100 sps:$4 sm:$0xff]  }
  0xfc   : > { %8153 = vmatpush1.bf16.msra.mxu0 %v12064_v30  ;;  %8184 = vmatprep.mubr.bf16.mxu0 %v13883_v49  ;;  %v12153_v30 = vld [vmem:[%s13820_s12 + $0x654] ss:$100 sps:$4 sm:$0xff]  }
  0xfd   : > { %8099 = vmatpush2.bf16.msra.mxu1 %v12061_v29  ;;  %8154 = vmatprep.subr.bf16.mxu0 %v12072_v32  ;;  %v12150_v29 = vld [vmem:[%s13820_s12 + $0x15f4] ss:$100 sps:$4 sm:$0xff]  }
  0xfe   : > { %8100 = vmatprep.subr.bf16.mxu1 %v12069_v31  ;;  %v12148_v31 = vld [vmem:[%s13820_s12 + $0x15f0] ss:$100 sps:$4 sm:$0xff]  }
  0xff   : > { %v12151_v32 = vld [vmem:[%s13820_s12 + $0x650] ss:$100 sps:$4 sm:$0xff]  }
 0x100   : > { %8155 = vmatpush1.bf16.msra.mxu0 %v12070_v34  ;;  %v12159_v34 = vld [vmem:[%s13820_s12 + $0x1e8c] ss:$100 sps:$4 sm:$0xff]  }
 0x101   : > { %8101 = vmatpush2.bf16.msra.mxu1 %v12067_v33  ;;  %8156 = vmatprep.subr.bf16.mxu0 %v12075_v35  ;;  %v12156_v33 = vld [vmem:[%s13820_s12 + $0x152c] ss:$100 sps:$4 sm:$0xff]  }
 0x102   : > { %8125 = vmatprep.subr.bf16.mxu1 %v12078_v37  ;;  %v12154_v35 = vld [vmem:[%s13820_s12 + $0x1528] ss:$100 sps:$4 sm:$0xff]  }
 0x103   : > { %v12157_v37 = vld [vmem:[%s13820_s12 + $0x1e88] ss:$100 sps:$4 sm:$0xff]  }
 0x104   : > { %8103 = vmatmul.mubr.bf16.vlgmr.msra.gmra.mxu1 %v14003_v21  ;;  %8157 = vmatpush1.bf16.msra.mxu0 %v12073_v38  ;;  %v12162_v38 = vld [vmem:[%s13820_s12 + $0x1464] ss:$100 sps:$4 sm:$0xff]  }
 0x105   : > { %8126 = vmatpush1.bf16.msra.mxu1 %v12076_v39  ;;  %8158 = vmatprep.subr.bf16.mxu0 %v12081_v40  ;;  %v12165_v39 = vld [vmem:[%s13820_s12 + $0x1dc4] ss:$100 sps:$4 sm:$0xff]  }
 0x106   : > { %8143 = vmatprep.mubr.bf16.mxu1 %v13708_v16  ;;  %8193 = vmatprep.subr.bf16.mxu1 %v12084_v41 }
 0x108   : > { %8159 = vmatpush1.bf16.msra.mxu0 %v12079_v42  ;;  %v12160_v42 = vld [vmem:[%s13820_s12 + $0x1460] ss:$100 sps:$4 sm:$0xff]  }
 0x109   : > { %8160 = vmatprep.subr.bf16.mxu0 %v12087_v43  ;;  %v12163_v43 = vld [vmem:[%s13820_s12 + $0x1dc0] ss:$100 sps:$4 sm:$0xff]  }
 0x10c   : > { %11615 = vmatmul.mubr.msk.bf16.vlgmr.msra.gmra.mxu1 %vm7820_vm0, %v13933_v19  ;;  %8161 = vmatpush1.bf16.msra.mxu0 %v12085_v45 }
 0x10d   : > { %8194 = vmatpush1.bf16.msra.mxu1 %v12082_v44  ;;  %8162 = vmatprep.subr.bf16.mxu0 %v12093_v47  ;;  %v12168_v44 = vld [vmem:[%s13820_s12 + $0x139c] ss:$100 sps:$4 sm:$0xff]  }
 0x10e   : > { %8195 = vmatprep.subr.bf16.mxu1 %v12090_v46  ;;  %8225 = vmatprep.mubr.bf16.mxu1 %v13889_v52  ;;  %v12171_v47 = vld [vmem:[%s13820_s12 + $0x1cfc] ss:$100 sps:$4 sm:$0xff]  }
 0x110   : > { %8163 = vmatpush1.bf16.msra.mxu0 %v12091_v50  ;;  %v12169_v50 = vld [vmem:[%s13820_s12 + $0x1cf8] ss:$100 sps:$4 sm:$0xff]  }
 0x111   : > { %8196 = vmatpush1.bf16.msra.mxu1 %v12088_v48  ;;  %8164 = vmatprep.subr.bf16.mxu0 %v12099_v53  ;;  %v12166_v48 = vld [vmem:[%s13820_s12 + $0x1398] ss:$100 sps:$4 sm:$0xff]  }
 0x112   : > { %8197 = vmatprep.subr.bf16.mxu1 %v12096_v51 }
 0x114   : > { %8165 = vmatpush1.bf16.msra.mxu0 %v12097_v55  ;;  %v12177_v55 = vld [vmem:[%s13820_s12 + $0x1c34] ss:$100 sps:$4 sm:$0xff]  }
 0x115   : > { %8198 = vmatpush1.bf16.msra.mxu1 %v12094_v54  ;;  %8166 = vmatprep.subr.bf16.mxu0 %v12105_v57  ;;  %v12174_v54 = vld [vmem:[%s13820_s12 + $0x12d4] ss:$100 sps:$4 sm:$0xff]  }
 0x116   : > { %8199 = vmatprep.subr.bf16.mxu1 %v12102_v56 }
 0x118   : > { %8167 = vmatpush1.bf16.msra.mxu0 %v12103_v59  ;;  %v12175_v59 = vld [vmem:[%s13820_s12 + $0x1c30] ss:$100 sps:$4 sm:$0xff]  }
 0x119   : > { %8200 = vmatpush1.bf16.msra.mxu1 %v12100_v58  ;;  %8168 = vmatprep.subr.bf16.mxu0 %v12111_v61  ;;  %v12172_v58 = vld [vmem:[%s13820_s12 + $0x12d0] ss:$100 sps:$4 sm:$0xff]  }
 0x11a   : > { %8201 = vmatprep.subr.bf16.mxu1 %v12108_v60  ;;  %v12180_v61 = vld [vmem:[%s13820_s12 + $0x1b6c] ss:$100 sps:$4 sm:$0xff]  }
 0x11c   : > { %8169 = vmatpush2.bf16.msra.mxu0 %v12109_v63 }
 0x11d   : > { %8202 = vmatpush1.bf16.msra.mxu1 %v12106_v62  ;;  %8170 = vmatprep.subr.bf16.mxu0 %v12117_v1  ;;  %v12183_v62 = vld [vmem:[%s13820_s12 + $0x2594] ss:$100 sps:$4 sm:$0xff]  }
 0x11e   : > { %8203 = vmatprep.subr.bf16.mxu1 %v12114_v0  ;;  %v12178_v0 = vld [vmem:[%s13820_s12 + $0x1b68] ss:$100 sps:$4 sm:$0xff]  }
 0x120   : > { %8171 = vmatpush2.bf16.msra.mxu0 %v12115_v3  ;;  %v12186_v3 = vld [vmem:[%s13820_s12 + $0x1aa4] ss:$100 sps:$4 sm:$0xff]  }
 0x121   : > { %8204 = vmatpush1.bf16.msra.mxu1 %v12112_v2  ;;  %8172 = vmatprep.subr.bf16.mxu0 %v12123_v5  ;;  %v12181_v2 = vld [vmem:[%s13820_s12 + $0x2590] ss:$100 sps:$4 sm:$0xff]  }
 0x122   : > { %8205 = vmatprep.subr.bf16.mxu1 %v12120_v4  ;;  %v12189_v4 = vld [vmem:[%s13820_s12 + $0x594] ss:$100 sps:$4 sm:$0xff]  }
 0x124   : > { %8173 = vmatpush2.bf16.msra.mxu0 %v12121_v7  ;;  %v12192_v7 = vld [vmem:[%s13820_s12 + $0x19dc] ss:$100 sps:$4 sm:$0xff]  }
 0x125   : > { %8206 = vmatpush1.bf16.msra.mxu1 %v12118_v6  ;;  %8174 = vmatprep.subr.bf16.mxu0 %v12129_v11  ;;  %v12184_v6 = vld [vmem:[%s13820_s12 + $0x1aa0] ss:$100 sps:$4 sm:$0xff]   ;;  %v12190_v11 = vld [vmem:[%s13820_s12 + $0x19d8] ss:$100 sps:$4 sm:$0xff]  }
 0x126   : > { %8207 = vmatprep.subr.bf16.mxu1 %v12126_v10  ;;  %v12187_v10 = vld [vmem:[%s13820_s12 + $0x590] ss:$100 sps:$4 sm:$0xff]  }
 0x128   : > { %8175 = vmatpush2.bf16.msra.mxu0 %v12127_v13  ;;  %v12198_v13 = vld [vmem:[%s13820_s12 + $0x1914] ss:$100 sps:$4 sm:$0xff]  }
 0x129   : > { %8208 = vmatpush1.bf16.msra.mxu1 %v12124_v12  ;;  %8176 = vmatprep.subr.bf16.mxu0 %v12135_v15  ;;  %v12195_v12 = vld [vmem:[%s13820_s12 + $0x4cc] ss:$100 sps:$4 sm:$0xff]  }
 0x12a   : > { %8209 = vmatprep.subr.bf16.mxu1 %v12132_v14  ;;  %v12193_v14 = vld [vmem:[%s13820_s12 + $0x4c8] ss:$100 sps:$4 sm:$0xff]   ;;  %v12196_v15 = vld [vmem:[%s13820_s12 + $0x1910] ss:$100 sps:$4 sm:$0xff]  }
 0x12c   : > { %8177 = vmatpush2.bf16.msra.mxu0 %v12133_v18  ;;  %v12204_v18 = vld [vmem:[%s13820_s12 + $0x24cc] ss:$100 sps:$4 sm:$0xff]  }
 0x12d   : > { %8210 = vmatpush2.bf16.msra.mxu1 %v12130_v17  ;;  %8178 = vmatprep.subr.bf16.mxu0 %v12141_v22  ;;  %v12201_v17 = vld [vmem:[%s13820_s12 + $0x404] ss:$100 sps:$4 sm:$0xff]  }
 0x12e   : > { %8211 = vmatprep.subr.bf16.mxu1 %v12138_v20  ;;  %v12199_v20 = vld [vmem:[%s13820_s12 + $0x400] ss:$100 sps:$4 sm:$0xff]   ;;  %v12202_v22 = vld [vmem:[%s13820_s12 + $0x24c8] ss:$100 sps:$4 sm:$0xff]  }
 0x130   : > { %8179 = vmatpush2.bf16.msra.mxu0 %v12139_v24  ;;  %v12210_v24 = vld [vmem:[%s13820_s12 + $0x2404] ss:$100 sps:$4 sm:$0xff]  }
 0x131   : > { %8212 = vmatpush2.bf16.msra.mxu1 %v12136_v23  ;;  %8180 = vmatprep.subr.bf16.mxu0 %v12147_v26  ;;  %v12207_v23 = vld [vmem:[%s13820_s12 + $0x33c] ss:$100 sps:$4 sm:$0xff]  }
 0x132   : > { %8213 = vmatprep.subr.bf16.mxu1 %v12144_v25  ;;  %v12205_v25 = vld [vmem:[%s13820_s12 + $0x338] ss:$100 sps:$4 sm:$0xff]   ;;  %v12208_v26 = vld [vmem:[%s13820_s12 + $0x2400] ss:$100 sps:$4 sm:$0xff]  }
 0x134   : > { %8181 = vmatpush2.bf16.msra.mxu0 %v12145_v28  ;;  %v12216_v28 = vld [vmem:[%s13820_s12 + $0x233c] ss:$100 sps:$4 sm:$0xff]  }
 0x135   : > { %8214 = vmatpush2.bf16.msra.mxu1 %v12142_v27  ;;  %8182 = vmatprep.subr.bf16.mxu0 %v12153_v30  ;;  %v12213_v27 = vld [vmem:[%s13820_s12 + $0x274] ss:$100 sps:$4 sm:$0xff]  }
 0x136   : > { %8215 = vmatprep.subr.bf16.mxu1 %v12150_v29  ;;  %v12211_v29 = vld [vmem:[%s13820_s12 + $0x270] ss:$100 sps:$4 sm:$0xff]   ;;  %v12214_v30 = vld [vmem:[%s13820_s12 + $0x2338] ss:$100 sps:$4 sm:$0xff]  }
 0x138   : > { %8183 = vmatpush2.bf16.msra.mxu0 %v12151_v32  ;;  %v12222_v32 = vld [vmem:[%s13820_s12 + $0x2274] ss:$100 sps:$4 sm:$0xff]  }
 0x139   : > { %8216 = vmatpush2.bf16.msra.mxu1 %v12148_v31  ;;  %8234 = vmatprep.subr.bf16.mxu0 %v12159_v34  ;;  %v12219_v31 = vld [vmem:[%s13820_s12 + $0x1ac] ss:$100 sps:$4 sm:$0xff]  }
 0x13a   : > { %8217 = vmatprep.subr.bf16.mxu1 %v12156_v33  ;;  %v12217_v33 = vld [vmem:[%s13820_s12 + $0x1a8] ss:$100 sps:$4 sm:$0xff]   ;;  %v12220_v34 = vld [vmem:[%s13820_s12 + $0x2270] ss:$100 sps:$4 sm:$0xff]  }
 0x13b   : > { %v14145_v40 = vpop.f32.mrf.mxu0  ;;  %8185 = vmatmul.mubr.bf16.vlgmr.msra.gmra.mxu0 %v13916_v8 }
 0x13c   : > { %v14147_v41 = vpop.f32.mrf.mxu1  ;;  %8235 = vmatpush1.bf16.msra.mxu0 %v12157_v37  ;;  %8266 = vmatprep.mubr.bf16.mxu0 %v13956_v36  ;;  %v12228_v37 = vld [vmem:[%s13820_s12 + $0x21ac] ss:$100 sps:$4 sm:$0xff]  }
 0x13d   : > { %8218 = vmatpush2.bf16.msra.mxu1 %v12154_v35  ;;  %v14153_v45 = vpop.f32.mrf.mxu0  ;;  %8236 = vmatprep.subr.bf16.mxu0 %v12165_v39  ;;  %v12225_v35 = vld [vmem:[%s13820_s12 + $0xe4] ss:$100 sps:$4 sm:$0xff]  }
 0x13e   : > { %v14155_v46 = vpop.f32.mrf.mxu1  ;;  %8219 = vmatprep.subr.bf16.mxu1 %v12162_v38  ;;  %v12223_v38 = vld [vmem:[%s13820_s12 + $0xe0] ss:$100 sps:$4 sm:$0xff]   ;;  %v12226_v39 = vld [vmem:[%s13820_s12 + $0x21a8] ss:$100 sps:$4 sm:$0xff]  }
 0x13f   : > { %v7862_v51 = vpop.f32.mrf.mxu0 }
 0x140   : > { %v7903_v53 = vpop.f32.mrf.mxu1  ;;  %8237 = vmatpush1.bf16.msra.mxu0 %v12163_v43  ;;  %v12234_v43 = vld [vmem:[%s13820_s12 + $0x20e4] ss:$100 sps:$4 sm:$0xff]   ;;  %v12235_v51 = vld [vmem:[%s13820_s12 + $0xbd0] ss:$100 sps:$4 sm:$0xff]  }
 0x141   : > { %8220 = vmatpush2.bf16.msra.mxu1 %v12160_v42  ;;  %v7863_v56 = vpop.f32.mrf.mxu0  ;;  %8238 = vmatprep.subr.bf16.mxu0 %v12171_v47  ;;  %v12231_v42 = vld [vmem:[%s13820_s12 + $0x1c] ss:$100 sps:$4 sm:$0xff]   ;;  %v10038_v53 = vlaneseq }
 0x142   : > { %8221 = vmatprep.subr.bf16.mxu1 %v12168_v44  ;;  %v7904_v57 = vpop.f32.mrf.mxu1  ;;  %v12229_v44 = vld [vmem:[%s13820_s12 + $0x18] ss:$100 sps:$4 sm:$0xff]   ;;  %v12232_v47 = vld [vmem:[%s13820_s12 + $0x20e0] ss:$100 sps:$4 sm:$0xff]  }
 0x143   : > { %v12246_v56 = vld [vmem:[%s13820_s12 + $0x1f54] ss:$100 sps:$4 sm:$0xff]   ;;  %v12241_v57 = vld [vmem:[%s13820_s12 + $0xb08] ss:$100 sps:$4 sm:$0xff]  }
 0x144   : > { %v14165_v60 = vpop.f32.mrf.mxu1  ;;  %8239 = vmatpush1.bf16.msra.mxu0 %v12169_v50  ;;  %v12240_v50 = vld [vmem:[%s13820_s12 + $0x201c] ss:$100 sps:$4 sm:$0xff]  }
 0x145   : > { %8222 = vmatpush2.bf16.msra.mxu1 %v12166_v48  ;;  %8240 = vmatprep.subr.bf16.mxu0 %v12177_v55  ;;  %v12237_v48 = vld [vmem:[%s13820_s12 + $0xbd4] ss:$100 sps:$4 sm:$0xff]   ;;  %v12243_v55 = vld [vmem:[%s13820_s12 + $0xb0c] ss:$100 sps:$4 sm:$0xff]  }
 0x146   : > { %8223 = vmatprep.subr.bf16.mxu1 %v12174_v54  ;;  %v14169_v63 = vpop.f32.mrf.mxu1  ;;  %v12238_v54 = vld [vmem:[%s13820_s12 + $0x2018] ss:$100 sps:$4 sm:$0xff]  }
 0x148   : > { %v7985_v1 = vpop.f32.mrf.mxu1  ;;  %8241 = vmatpush1.bf16.msra.mxu0 %v12175_v59  ;;  %v12244_v59 = vld [vmem:[%s13820_s12 + $0x1f50] ss:$100 sps:$4 sm:$0xff]  }
 0x149   : > { %8224 = vmatpush2.bf16.msra.mxu1 %v12172_v58  ;;  %8242 = vmatprep.subr.bf16.mxu0 %v12180_v61  ;;  %v14220_v58 = vshrl.u32 %v10038_v53, 7  ;;  %v12249_v61 = vld [vmem:[%s13820_s12 + $0xa44] ss:$100 sps:$4 sm:$0xff]   ;;  %v12283_v53 = vld [vmem:[%s13820_s12 + $0x1e90] ss:$100 sps:$4 sm:$0xff]  }
 0x14a   : > { %8289 = vmatprep.subr.bf16.mxu1 %v12183_v62  ;;  %v7986_v5 = vpop.f32.mrf.mxu1  ;;  %v12252_v62 = vld [vmem:[%s13820_s12 + $0x1214] ss:$100 sps:$4 sm:$0xff]  }
 0x14b   : > { %v14227_v1 = vld [vmem:[%s13826_s30] sm:$0xff] }
 0x14c   : > { %8226 = vmatmul.mubr.bf16.vlgmr.msra.gmra.mxu1 %v13918_v9  ;;  %8243 = vmatpush1.bf16.msra.mxu0 %v12178_v0  ;;  %v12247_v0 = vld [vmem:[%s13820_s12 + $0xa40] ss:$100 sps:$4 sm:$0xff]   ;;  %v12258_v5 = vld [vmem:[%s13820_s12 + $0x114c] ss:$100 sps:$4 sm:$0xff]  }
 0x14d   : > { %8290 = vmatpush1.bf16.msra.mxu1 %v12181_v2  ;;  %8244 = vmatprep.subr.bf16.mxu0 %v12186_v3  ;;  %v14230_v2 = vsub.s32 0, %v14220_v58  ;;  %v12250_v3 = vld [vmem:[%s13820_s12 + $0x1210] ss:$100 sps:$4 sm:$0xff]  }
 0x14e   : > { %8307 = vmatprep.mubr.bf16.mxu1 %v13708_v16  ;;  %8316 = vmatprep.subr.bf16.mxu1 %v12189_v4  ;;  %v12255_v4 = vld [vmem:[%s13820_s12 + $0x97c] ss:$100 sps:$4 sm:$0xff]  }
 0x150   : > { %8245 = vmatpush1.bf16.msra.mxu0 %v12184_v6  ;;  %v7900_v6 = vadd.f32 %v14147_v41, %v14145_v40  ;;  %v12256_v40 = vld [vmem:[%s13820_s12 + $0x1148] ss:$100 sps:$4 sm:$0xff]   ;;  %v12261_v41 = vld [vmem:[%s13820_s12 + $0x8b4] ss:$100 sps:$4 sm:$0xff]  }
 0x151   : > { %8246 = vmatprep.subr.bf16.mxu0 %v12192_v7  ;;  %v14240_v7 = vsub.s32 1, %v14220_v58 }
 0x154   : > { %11616 = vmatmul.mubr.msk.bf16.vlgmr.msra.gmra.mxu1 %vm7820_vm0, %v13933_v19  ;;  %8247 = vmatpush1.bf16.msra.mxu0 %v12190_v11  ;;  %v12253_v11 = vld [vmem:[%s13820_s12 + $0x978] ss:$100 sps:$4 sm:$0xff]  }
 0x155   : > { %8317 = vmatpush1.bf16.msra.mxu1 %v12187_v10  ;;  %8248 = vmatprep.subr.bf16.mxu0 %v12198_v13 }
 0x156   : > { %8318 = vmatprep.subr.bf16.mxu1 %v12195_v12  ;;  %8348 = vmatprep.mubr.bf16.mxu1 %v13883_v49  ;;  %v7902_v12 = vadd.f32 %v14155_v46, %v14153_v45  ;;  %v10045_v46 = vrot.slane %v14227_v1, %v14240_v7 }
 0x158   : > { %8249 = vmatpush1.bf16.msra.mxu0 %v12196_v15  ;;  %v12264_v15 = vld [vmem:[%s13820_s12 + $0x1084] ss:$100 sps:$4 sm:$0xff]  }
 0x159   : > { %8319 = vmatpush1.bf16.msra.mxu1 %v12193_v14  ;;  %8250 = vmatprep.subr.bf16.mxu0 %v12204_v18  ;;  %v10041_v14 = vrot.slane %v14227_v1, %v14230_v2 }
 0x15a   : > { %8320 = vmatprep.subr.bf16.mxu1 %v12201_v17 }
 0x15c   : > { %8251 = vmatpush2.bf16.msra.mxu0 %v12202_v22  ;;  %v12259_v22 = vld [vmem:[%s13820_s12 + $0x8b0] ss:$100 sps:$4 sm:$0xff]  }
 0x15d   : > { %8321 = vmatpush1.bf16.msra.mxu1 %v12199_v20  ;;  %8252 = vmatprep.subr.bf16.mxu0 %v12210_v24 }
 0x15e   : > { %8322 = vmatprep.subr.bf16.mxu1 %v12207_v23 }
 0x160   : > { %8253 = vmatpush2.bf16.msra.mxu0 %v12208_v26  ;;  %v12267_v26 = vld [vmem:[%s13820_s12 + $0x7ec] ss:$100 sps:$4 sm:$0xff]  }
 0x161   : > { %8323 = vmatpush1.bf16.msra.mxu1 %v12205_v25  ;;  %8254 = vmatprep.subr.bf16.mxu0 %v12216_v28  ;;  %v12262_v25 = vld [vmem:[%s13820_s12 + $0x1080] ss:$100 sps:$4 sm:$0xff]  }
 0x162   : > { %8324 = vmatprep.subr.bf16.mxu1 %v12213_v27  ;;  %v12270_v27 = vld [vmem:[%s13820_s12 + $0xfbc] ss:$100 sps:$4 sm:$0xff]  }
 0x164   : > { %8255 = vmatpush2.bf16.msra.mxu0 %v12214_v30 }
 0x165   : > { %8325 = vmatpush1.bf16.msra.mxu1 %v12211_v29  ;;  %8256 = vmatprep.subr.bf16.mxu0 %v12222_v32  ;;  %v12265_v29 = vld [vmem:[%s13820_s12 + $0x7e8] ss:$100 sps:$4 sm:$0xff]   ;;  %v12268_v32 = vld [vmem:[%s13820_s12 + $0xfb8] ss:$100 sps:$4 sm:$0xff]  }
 0x166   : > { %8326 = vmatprep.subr.bf16.mxu1 %v12219_v31 }
 0x168   : > { %8257 = vmatpush2.bf16.msra.mxu0 %v12220_v34  ;;  %v12276_v34 = vld [vmem:[%s13820_s12 + $0xef4] ss:$100 sps:$4 sm:$0xff]  }
 0x169   : > { %8327 = vmatpush1.bf16.msra.mxu1 %v12217_v33  ;;  %8258 = vmatprep.subr.bf16.mxu0 %v12228_v37  ;;  %v12273_v33 = vld [vmem:[%s13820_s12 + $0x724] ss:$100 sps:$4 sm:$0xff]  }
 0x16a   : > { %8328 = vmatprep.subr.bf16.mxu1 %v12225_v35  ;;  %v12271_v37 = vld [vmem:[%s13820_s12 + $0x720] ss:$100 sps:$4 sm:$0xff]  }
 0x16c   : > { %8259 = vmatpush2.bf16.msra.mxu0 %v12226_v39  ;;  %v12274_v39 = vld [vmem:[%s13820_s12 + $0xef0] ss:$100 sps:$4 sm:$0xff]  }
 0x16d   : > { %8329 = vmatpush1.bf16.msra.mxu1 %v12223_v38  ;;  %8260 = vmatprep.subr.bf16.mxu0 %v12234_v43  ;;  %v12282_v43 = vld [vmem:[%s13820_s12 + $0xe2c] ss:$100 sps:$4 sm:$0xff]  }
 0x16e   : > { %8330 = vmatprep.subr.bf16.mxu1 %v12231_v42  ;;  %v12279_v42 = vld [vmem:[%s13820_s12 + $0x65c] ss:$100 sps:$4 sm:$0xff]  }
 0x170   : > { %8261 = vmatpush2.bf16.msra.mxu0 %v12232_v47  ;;  %v12277_v47 = vld [vmem:[%s13820_s12 + $0x658] ss:$100 sps:$4 sm:$0xff]  }
 0x171   : > { %8331 = vmatpush1.bf16.msra.mxu1 %v12229_v44  ;;  %8262 = vmatprep.subr.bf16.mxu0 %v12240_v50  ;;  %v12285_v50 = vld [vmem:[%s13820_s12 + $0x1e94] ss:$100 sps:$4 sm:$0xff]  }
 0x172   : > { %8332 = vmatprep.subr.bf16.mxu1 %v12237_v48  ;;  %v12280_v48 = vld [vmem:[%s13820_s12 + $0xe28] ss:$100 sps:$4 sm:$0xff]  }
 0x174   : > { %8263 = vmatpush2.bf16.msra.mxu0 %v12238_v54  ;;  %v12286_v54 = vld [vmem:[%s13820_s12 + $0xd60] ss:$100 sps:$4 sm:$0xff]  }
 0x175   : > { %8333 = vmatpush2.bf16.msra.mxu1 %v12235_v51  ;;  %8264 = vmatprep.subr.bf16.mxu0 %v12246_v56  ;;  %v12288_v51 = vld [vmem:[%s13820_s12 + $0xd64] ss:$100 sps:$4 sm:$0xff]   ;;  %v12294_v56 = vld [vmem:[%s13820_s12 + $0xc9c] ss:$100 sps:$4 sm:$0xff]  }
 0x176   : > { %8334 = vmatprep.subr.bf16.mxu1 %v12243_v55  ;;  %v12291_v55 = vld [vmem:[%s13820_s12 + $0x1dcc] ss:$100 sps:$4 sm:$0xff]  }
 0x178   : > { %8265 = vmatpush2.bf16.msra.mxu0 %v12244_v59  ;;  %v12292_v59 = vld [vmem:[%s13820_s12 + $0xc98] ss:$100 sps:$4 sm:$0xff]  }
 0x179   : > { %8335 = vmatpush2.bf16.msra.mxu1 %v12241_v57  ;;  %8357 = vmatprep.subr.bf16.mxu0 %v12252_v62  ;;  %v12289_v57 = vld [vmem:[%s13820_s12 + $0x1dc8] ss:$100 sps:$4 sm:$0xff]   ;;  %v12300_v62 = vld [vmem:[%s13820_s12 + $0x1854] ss:$100 sps:$4 sm:$0xff]  }
 0x17a   : > { %8336 = vmatprep.subr.bf16.mxu1 %v12249_v61  ;;  %v12297_v61 = vld [vmem:[%s13820_s12 + $0x1d04] ss:$100 sps:$4 sm:$0xff]  }
 0x17b   : > { %v7940_v10 = vpop.f32.mrf.mxu0  ;;  %8267 = vmatmul.mubr.bf16.vlgmr.msra.gmra.mxu0 %v14003_v21 }
 0x17c   : > { %v7941_v13 = vadd.f32 %v7940_v10, %v7900_v6  ;;  %8358 = vmatpush1.bf16.msra.mxu0 %v12250_v3  ;;  %8389 = vmatprep.mubr.bf16.mxu0 %v13889_v52  ;;  %v12298_v3 = vld [vmem:[%s13820_s12 + $0x1850] ss:$100 sps:$4 sm:$0xff]   ;;  %v12301_v6 = vld [vmem:[%s13820_s12 + $0x1c38] ss:$100 sps:$4 sm:$0xff]   ;;  %v12304_v10 = vld [vmem:[%s13820_s12 + $0x1788] ss:$100 sps:$4 sm:$0xff]  }
 0x17d   : > { %8337 = vmatpush2.bf16.msra.mxu1 %v12247_v0  ;;  %v7942_v17 = vpop.f32.mrf.mxu0  ;;  %8359 = vmatprep.subr.bf16.mxu0 %v12258_v5  ;;  %v12295_v0 = vld [vmem:[%s13820_s12 + $0x1d00] ss:$100 sps:$4 sm:$0xff]   ;;  %v12306_v5 = vld [vmem:[%s13820_s12 + $0x178c] ss:$100 sps:$4 sm:$0xff]  }
 0x17e   : > { %8338 = vmatprep.subr.bf16.mxu1 %v12255_v4  ;;  %v7982_v18 = vadd.f32 %v14165_v60, %v7941_v13  ;;  %v7943_v45 = vadd.f32 %v7942_v17, %v7902_v12  ;;  %v12303_v4 = vld [vmem:[%s13820_s12 + $0x1c3c] ss:$100 sps:$4 sm:$0xff]   ;;  %v12312_v12 = vld [vmem:[%s13820_s12 + $0x16c4] ss:$100 sps:$4 sm:$0xff]   ;;  %v12307_v13 = vld [vmem:[%s13820_s12 + $0x1b70] ss:$100 sps:$4 sm:$0xff]  }
 0x17f   : > { %v7944_v20 = vpop.f32.mrf.mxu0  ;;  %v12316_v17 = vld [vmem:[%s13820_s12 + $0x15f8] ss:$100 sps:$4 sm:$0xff]  }
 0x180   : > { %v10163_v23 = vadd.f32 %v10041_v14, %v7982_v18  ;;  %v7984_v24 = vadd.f32 %v14169_v63, %v7943_v45  ;;  %8360 = vmatpush1.bf16.msra.mxu0 %v12256_v40  ;;  %v12310_v14 = vld [vmem:[%s13820_s12 + $0x16c0] ss:$100 sps:$4 sm:$0xff]   ;;  %v12315_v40 = vld [vmem:[%s13820_s12 + $0x1aac] ss:$100 sps:$4 sm:$0xff]   ;;  %v12324_v45 = vld [vmem:[%s13820_s12 + $0x1534] ss:$100 sps:$4 sm:$0xff]  }
 0x181   : > { %8339 = vmatpush2.bf16.msra.mxu1 %v12253_v11  ;;  %v7945_v60 = vpop.f32.mrf.mxu0  ;;  %8361 = vmatprep.subr.bf16.mxu0 %v12264_v15  ;;  %v12309_v11 = vld [vmem:[%s13820_s12 + $0x1b74] ss:$100 sps:$4 sm:$0xff]   ;;  %v12313_v15 = vld [vmem:[%s13820_s12 + $0x1aa8] ss:$100 sps:$4 sm:$0xff]  }
 0x182   : > { %8340 = vmatprep.subr.bf16.mxu1 %v12261_v41  ;;  %v10188_v63 = vmax.f32 %v10163_v23, 0.0  ;;  %v10164_v28 = vadd.f32 %v10045_v46, %v7984_v24  ;;  %v12318_v41 = vld [vmem:[%s13820_s12 + $0x15fc] ss:$100 sps:$4 sm:$0xff]   ;;  %v12321_v18 = vld [vmem:[%s13820_s12 + $0x19e4] ss:$100 sps:$4 sm:$0xff]  }
 0x183   : > { %v12319_v46 = vld [vmem:[%s13820_s12 + $0x19e0] ss:$100 sps:$4 sm:$0xff]   ;;  %v12322_v20 = vld [vmem:[%s13820_s12 + $0x1530] ss:$100 sps:$4 sm:$0xff]   ;;  %v12325_v24 = vld [vmem:[%s13820_s12 + $0x1918] ss:$100 sps:$4 sm:$0xff]  }
 0x184   : > { %v14267_v30 = vpop.f32.mrf.mxu1  ;;  %10213 = vst [vmem:[%s14264_s20] sm:$0xff] %v10188_v63  ;;  %v10189_v31 = vmax.f32 %v10164_v28, 0.0  ;;  %8362 = vmatpush1.bf16.msra.mxu0 %v12262_v25  ;;  %v12330_v23 = vld [vmem:[%s13820_s12 + $0x146c] ss:$100 sps:$4 sm:$0xff]   ;;  %v12334_v63 = vld [vmem:[%s13820_s12 + $0x13a0] ss:$100 sps:$4 sm:$0xff]  }
 0x185   : > { %8341 = vmatpush2.bf16.msra.mxu1 %v12259_v22  ;;  %8363 = vmatprep.subr.bf16.mxu0 %v12270_v27  ;;  %v12327_v22 = vld [vmem:[%s13820_s12 + $0x191c] ss:$100 sps:$4 sm:$0xff]   ;;  %v12328_v25 = vld [vmem:[%s13820_s12 + $0x1468] ss:$100 sps:$4 sm:$0xff]   ;;  %v12331_v60 = vld [vmem:[%s13820_s12 + $0x24d0] ss:$100 sps:$4 sm:$0xff]  }
 0x186   : > { %8342 = vmatprep.subr.bf16.mxu1 %v12267_v26  ;;  %v14273_v35 = vpop.f32.mrf.mxu1  ;;  %10214 = vst [vmem:[%s14264_s20 + $0x8] sm:$0xff] %v10189_v31  ;;  %v12333_v26 = vld [vmem:[%s13820_s12 + $0x24d4] ss:$100 sps:$4 sm:$0xff]   ;;  %v12336_v27 = vld [vmem:[%s13820_s12 + $0x13a4] ss:$100 sps:$4 sm:$0xff]  }
 0x187   : > { %v12339_v28 = vld [vmem:[%s13820_s12 + $0x240c] ss:$100 sps:$4 sm:$0xff]  }
 0x188   : > { %v8026_v38 = vpop.f32.mrf.mxu1  ;;  %8364 = vmatpush1.bf16.msra.mxu0 %v12268_v32  ;;  %v12337_v31 = vld [vmem:[%s13820_s12 + $0x2408] ss:$100 sps:$4 sm:$0xff]   ;;  %v12340_v32 = vld [vmem:[%s13820_s12 + $0x12d8] ss:$100 sps:$4 sm:$0xff]  }
 0x189   : > { %8343 = vmatpush2.bf16.msra.mxu1 %v12265_v29  ;;  %8365 = vmatprep.subr.bf16.mxu0 %v12276_v34  ;;  %v12342_v29 = vld [vmem:[%s13820_s12 + $0x12dc] ss:$100 sps:$4 sm:$0xff]  }
 0x18a   : > { %8344 = vmatprep.subr.bf16.mxu1 %v12273_v33  ;;  %v8027_v44 = vpop.f32.mrf.mxu1  ;;  %v12345_v33 = vld [vmem:[%s13820_s12 + $0x2344] ss:$100 sps:$4 sm:$0xff]   ;;  %v12348_v34 = vld [vmem:[%s13820_s12 + $0x259c] ss:$100 sps:$4 sm:$0xff]  }
 0x18b   : > { %v12346_v38 = vld [vmem:[%s13820_s12 + $0x2598] ss:$100 sps:$4 sm:$0xff]  }
 0x18c   : > { %8366 = vmatpush1.bf16.msra.mxu0 %v12274_v39  ;;  %v12351_v39 = vld [vmem:[%s13820_s12 + $0x227c] ss:$100 sps:$4 sm:$0xff]  }
 0x18d   : > { %8345 = vmatpush2.bf16.msra.mxu1 %v12271_v37  ;;  %8367 = vmatprep.subr.bf16.mxu0 %v12282_v43  ;;  %v12343_v37 = vld [vmem:[%s13820_s12 + $0x2340] ss:$100 sps:$4 sm:$0xff]   ;;  %v12349_v44 = vld [vmem:[%s13820_s12 + $0x2278] ss:$100 sps:$4 sm:$0xff]  }
 0x18e   : > { %8346 = vmatprep.subr.bf16.mxu1 %v12279_v42  ;;  %v12357_v42 = vld [vmem:[%s13820_s12 + $0x59c] ss:$100 sps:$4 sm:$0xff]  }
 0x190   : > { %8368 = vmatpush1.bf16.msra.mxu0 %v12280_v48  ;;  %v12354_v48 = vld [vmem:[%s13820_s12 + $0x21b4] ss:$100 sps:$4 sm:$0xff]  }
 0x191   : > { %8347 = vmatpush2.bf16.msra.mxu1 %v12277_v47  ;;  %8369 = vmatprep.subr.bf16.mxu0 %v12288_v51 }
 0x192   : > { %8398 = vmatprep.subr.bf16.mxu1 %v12285_v50  ;;  %v12352_v50 = vld [vmem:[%s13820_s12 + $0x21b0] ss:$100 sps:$4 sm:$0xff]  }
 0x194   : > { %8349 = vmatmul.mubr.bf16.vlgmr.msra.gmra.mxu1 %v13916_v8  ;;  %8370 = vmatpush1.bf16.msra.mxu0 %v12286_v54 }
 0x195   : > { %8399 = vmatpush1.bf16.msra.mxu1 %v12283_v53  ;;  %8371 = vmatprep.subr.bf16.mxu0 %v12294_v56  ;;  %v12355_v53 = vld [vmem:[%s13820_s12 + $0x598] ss:$100 sps:$4 sm:$0xff]  }
 0x196   : > { %8400 = vmatprep.subr.bf16.mxu1 %v12291_v55  ;;  %8430 = vmatprep.mubr.bf16.mxu1 %v13956_v36  ;;  %v12360_v55 = vld [vmem:[%s13820_s12 + $0x20ec] ss:$100 sps:$4 sm:$0xff]   ;;  %v12363_v56 = vld [vmem:[%s13820_s12 + $0x4d4] ss:$100 sps:$4 sm:$0xff]  }
 0x198   : > { %8372 = vmatpush1.bf16.msra.mxu0 %v12292_v59 }
 0x199   : > { %8401 = vmatpush1.bf16.msra.mxu1 %v12289_v57  ;;  %8373 = vmatprep.subr.bf16.mxu0 %v12300_v62  ;;  %v12358_v57 = vld [vmem:[%s13820_s12 + $0x20e8] ss:$100 sps:$4 sm:$0xff]  }
 0x19a   : > { %8402 = vmatprep.subr.bf16.mxu1 %v12297_v61  ;;  %v12361_v61 = vld [vmem:[%s13820_s12 + $0x4d0] ss:$100 sps:$4 sm:$0xff]  }
 0x19c   : > { %8374 = vmatpush2.bf16.msra.mxu0 %v12298_v3  ;;  %v12369_v3 = vld [vmem:[%s13820_s12 + $0x40c] ss:$100 sps:$4 sm:$0xff]  }
 0x19d   : > { %8403 = vmatpush1.bf16.msra.mxu1 %v12295_v0  ;;  %8375 = vmatprep.subr.bf16.mxu0 %v12306_v5  ;;  %v12366_v0 = vld [vmem:[%s13820_s12 + $0x2024] ss:$100 sps:$4 sm:$0xff]   ;;  %v14346_v5 = vsub.s32 2, %v14220_v58 }
 0x19e   : > { %8404 = vmatprep.subr.bf16.mxu1 %v12303_v4  ;;  %v12364_v4 = vld [vmem:[%s13820_s12 + $0x2020] ss:$100 sps:$4 sm:$0xff]  }
 0x1a0   : > { %8376 = vmatpush2.bf16.msra.mxu0 %v12304_v10 }
 0x1a1   : > { %8405 = vmatpush1.bf16.msra.mxu1 %v12301_v6  ;;  %8377 = vmatprep.subr.bf16.mxu0 %v12312_v12  ;;  %v14352_v12 = vsub.s32 3, %v14220_v58 }
 0x1a2   : > { %8406 = vmatprep.subr.bf16.mxu1 %v12309_v11  ;;  %v12367_v11 = vld [vmem:[%s13820_s12 + $0x408] ss:$100 sps:$4 sm:$0xff]  }
 0x1a4   : > { %8378 = vmatpush2.bf16.msra.mxu0 %v12310_v14 }
 0x1a5   : > { %8407 = vmatpush1.bf16.msra.mxu1 %v12307_v13  ;;  %8379 = vmatprep.subr.bf16.mxu0 %v12318_v41  ;;  %v12372_v13 = vld [vmem:[%s13820_s12 + $0x1f5c] ss:$100 sps:$4 sm:$0xff]  }
 0x1a6   : > { %8408 = vmatprep.subr.bf16.mxu1 %v12315_v40  ;;  %v12375_v40 = vld [vmem:[%s13820_s12 + $0x344] ss:$100 sps:$4 sm:$0xff]  }
 0x1a8   : > { %8380 = vmatpush2.bf16.msra.mxu0 %v12316_v17 }
 0x1a9   : > { %8409 = vmatpush1.bf16.msra.mxu1 %v12313_v15  ;;  %8381 = vmatprep.subr.bf16.mxu0 %v12324_v45 }
 0x1aa   : > { %8410 = vmatprep.subr.bf16.mxu1 %v12321_v18 }
 0x1ac   : > { %8382 = vmatpush2.bf16.msra.mxu0 %v12322_v20  ;;  %v12370_v20 = vld [vmem:[%s13820_s12 + $0x1f58] ss:$100 sps:$4 sm:$0xff]  }
 0x1ad   : > { %8411 = vmatpush1.bf16.msra.mxu1 %v12319_v46  ;;  %8383 = vmatprep.subr.bf16.mxu0 %v12330_v23  ;;  %v10053_v46 = vrot.slane %v14227_v1, %v14352_v12  ;;  %v12378_v23 = vld [vmem:[%s13820_s12 + $0x121c] ss:$100 sps:$4 sm:$0xff]  }
 0x1ae   : > { %8412 = vmatprep.subr.bf16.mxu1 %v12327_v22  ;;  %v12373_v22 = vld [vmem:[%s13820_s12 + $0x340] ss:$100 sps:$4 sm:$0xff]  }
 0x1b0   : > { %8384 = vmatpush2.bf16.msra.mxu0 %v12328_v25 }
 0x1b1   : > { %8413 = vmatpush1.bf16.msra.mxu1 %v12325_v24  ;;  %8385 = vmatprep.subr.bf16.mxu0 %v12336_v27 }
 0x1b2   : > { %8414 = vmatprep.subr.bf16.mxu1 %v12333_v26 }
 0x1b4   : > { %8386 = vmatpush2.bf16.msra.mxu0 %v12334_v63 }
 0x1b5   : > { %8415 = vmatpush2.bf16.msra.mxu1 %v12331_v60  ;;  %8387 = vmatprep.subr.bf16.mxu0 %v12342_v29  ;;  %v12384_v29 = vld [vmem:[%s13820_s12 + $0x1154] ss:$100 sps:$4 sm:$0xff]  }
 0x1b6   : > { %8416 = vmatprep.subr.bf16.mxu1 %v12339_v28  ;;  %v12379_v28 = vld [vmem:[%s13820_s12 + $0x278] ss:$100 sps:$4 sm:$0xff]  }
 0x1b8   : > { %8388 = vmatpush2.bf16.msra.mxu0 %v12340_v32 }
 0x1b9   : > { %8417 = vmatpush2.bf16.msra.mxu1 %v12337_v31  ;;  %8453 = vmatprep.subr.bf16.mxu0 %v12348_v34  ;;  %v12387_v31 = vld [vmem:[%s13820_s12 + $0x1b4] ss:$100 sps:$4 sm:$0xff]  }
 0x1ba   : > { %8418 = vmatprep.subr.bf16.mxu1 %v12345_v33  ;;  %v12382_v34 = vld [vmem:[%s13820_s12 + $0x1150] ss:$100 sps:$4 sm:$0xff]  }
 0x1bb   : > { %v8063_v43 = vpop.f32.mrf.mxu0  ;;  %8390 = vmatmul.mubr.bf16.vlgmr.msra.gmra.mxu0 %v13918_v9 }
 0x1bc   : > { %8454 = vmatpush1.bf16.msra.mxu0 %v12346_v38  ;;  %8471 = vmatprep.mubr.bf16.mxu0 %v13708_v16  ;;  %v8064_v10 = vadd.f32 %v8063_v43, %v14267_v30  ;;  %v10049_v30 = vrot.slane %v14227_v1, %v14346_v5  ;;  %v12376_v1 = vld [vmem:[%s13820_s12 + $0x1218] ss:$100 sps:$4 sm:$0xff]   ;;  %v12390_v38 = vld [vmem:[%s13820_s12 + $0x108c] ss:$100 sps:$4 sm:$0xff]  }
 0x1bd   : > { %8419 = vmatpush2.bf16.msra.mxu1 %v12343_v37  ;;  %v8065_v47 = vpop.f32.mrf.mxu0  ;;  %8480 = vmatprep.subr.bf16.mxu0 %v12357_v42  ;;  %v12385_v37 = vld [vmem:[%s13820_s12 + $0x1b0] ss:$100 sps:$4 sm:$0xff]   ;;  %v12388_v42 = vld [vmem:[%s13820_s12 + $0x1088] ss:$100 sps:$4 sm:$0xff]  }
 0x1be   : > { %8420 = vmatprep.subr.bf16.mxu1 %v12351_v39  ;;  %v8066_v41 = vadd.f32 %v8065_v47, %v14273_v35  ;;  %v12381_v35 = vld [vmem:[%s13820_s12 + $0x27c] ss:$100 sps:$4 sm:$0xff]   ;;  %v12393_v39 = vld [vmem:[%s13820_s12 + $0xec] ss:$100 sps:$4 sm:$0xff]   ;;  %v12399_v47 = vld [vmem:[%s13820_s12 + $0x24] ss:$100 sps:$4 sm:$0xff]  }
 0x1bf   : > { %v8067_v51 = vpop.f32.mrf.mxu0  ;;  %v12391_v43 = vld [vmem:[%s13820_s12 + $0xe8] ss:$100 sps:$4 sm:$0xff]  }
 0x1c0   : > { %v12402_v51 = vld [vmem:[%s13820_s12 + $0xefc] ss:$100 sps:$4 sm:$0xff]  }
 0x1c1   : > { %8421 = vmatpush2.bf16.msra.mxu1 %v12349_v44  ;;  %v8068_v54 = vpop.f32.mrf.mxu0  ;;  %v12396_v44 = vld [vmem:[%s13820_s12 + $0xfc4] ss:$100 sps:$4 sm:$0xff]  }
 0x1c2   : > { %8422 = vmatprep.subr.bf16.mxu1 %v12354_v48  ;;  %v12394_v48 = vld [vmem:[%s13820_s12 + $0xfc0] ss:$100 sps:$4 sm:$0xff]   ;;  %v12400_v54 = vld [vmem:[%s13820_s12 + $0xef8] ss:$100 sps:$4 sm:$0xff]  }
 0x1c3   : > { %11617 = vmatmul.mubr.msk.bf16.vlgmr.msra.gmra.mxu0 %vm7820_vm0, %v13933_v19 }
 0x1c4   : > { %v8104_v59 = vpop.f32.mrf.mxu1  ;;  %8481 = vmatpush1.bf16.msra.mxu0 %v12355_v53  ;;  %8512 = vmatprep.mubr.bf16.mxu0 %v13883_v49  ;;  %v12405_v53 = vld [vmem:[%s13820_s12 + $0xbdc] ss:$100 sps:$4 sm:$0xff]  }
 0x1c5   : > { %8423 = vmatpush2.bf16.msra.mxu1 %v12352_v50  ;;  %8482 = vmatprep.subr.bf16.mxu0 %v12363_v56  ;;  %v8105_v15 = vadd.f32 %v8104_v59, %v8064_v10  ;;  %v12397_v50 = vld [vmem:[%s13820_s12 + $0x20] ss:$100 sps:$4 sm:$0xff]   ;;  %v12408_v56 = vld [vmem:[%s13820_s12 + $0xe34] ss:$100 sps:$4 sm:$0xff]  }
 0x1c6   : > { %v8106_v62 = vpop.f32.mrf.mxu1  ;;  %8424 = vmatprep.subr.bf16.mxu1 %v12360_v55  ;;  %v12403_v55 = vld [vmem:[%s13820_s12 + $0xbd8] ss:$100 sps:$4 sm:$0xff]   ;;  %v12406_v59 = vld [vmem:[%s13820_s12 + $0xe30] ss:$100 sps:$4 sm:$0xff]   ;;  %v12423_v10 = vld [vmem:[%s13820_s12 + $0x984] ss:$100 sps:$4 sm:$0xff]  }
 0x1c7   : > { %v8107_v18 = vadd.f32 %v8106_v62, %v8066_v41  ;;  %v12414_v62 = vld [vmem:[%s13820_s12 + $0xd6c] ss:$100 sps:$4 sm:$0xff]   ;;  %v12424_v41 = vld [vmem:[%s13820_s12 + $0x1858] ss:$100 sps:$4 sm:$0xff]  }
 0x1c8   : > { %v8108_v6 = vpop.f32.mrf.mxu1  ;;  %8483 = vmatpush1.bf16.msra.mxu0 %v12361_v61  ;;  %v12409_v61 = vld [vmem:[%s13820_s12 + $0xb10] ss:$100 sps:$4 sm:$0xff]  }
 0x1c9   : > { %8425 = vmatpush2.bf16.msra.mxu1 %v12358_v57  ;;  %8484 = vmatprep.subr.bf16.mxu0 %v12369_v3  ;;  %v12411_v57 = vld [vmem:[%s13820_s12 + $0xb14] ss:$100 sps:$4 sm:$0xff]   ;;  %v12412_v3 = vld [vmem:[%s13820_s12 + $0xd68] ss:$100 sps:$4 sm:$0xff]  }
 0x1ca   : > { %v8109_v14 = vpop.f32.mrf.mxu1  ;;  %8426 = vmatprep.subr.bf16.mxu1 %v12366_v0  ;;  %v12417_v0 = vld [vmem:[%s13820_s12 + $0xa4c] ss:$100 sps:$4 sm:$0xff]   ;;  %v12420_v6 = vld [vmem:[%s13820_s12 + $0xca4] ss:$100 sps:$4 sm:$0xff]  }
 0x1cb   : > { %v12426_v14 = vld [vmem:[%s13820_s12 + $0x185c] ss:$100 sps:$4 sm:$0xff]  }
 0x1cc   : > { %v8145_v17 = vpop.f32.mrf.mxu1  ;;  %8485 = vmatpush1.bf16.msra.mxu0 %v12367_v11  ;;  %v12418_v11 = vld [vmem:[%s13820_s12 + $0xca0] ss:$100 sps:$4 sm:$0xff]  }
 0x1cd   : > { %8427 = vmatpush2.bf16.msra.mxu1 %v12364_v4  ;;  %v8146_v45 = vadd.f32 %v8145_v17, %v8105_v15  ;;  %8486 = vmatprep.subr.bf16.mxu0 %v12375_v40  ;;  %v12415_v4 = vld [vmem:[%s13820_s12 + $0xa48] ss:$100 sps:$4 sm:$0xff]   ;;  %v12429_v40 = vld [vmem:[%s13820_s12 + $0x8bc] ss:$100 sps:$4 sm:$0xff]   ;;  %v12435_v17 = vld [vmem:[%s13820_s12 + $0x7f4] ss:$100 sps:$4 sm:$0xff]  }
 0x1ce   : > { %v8147_v24 = vpop.f32.mrf.mxu1  ;;  %8428 = vmatprep.subr.bf16.mxu1 %v12372_v13  ;;  %v12421_v13 = vld [vmem:[%s13820_s12 + $0x980] ss:$100 sps:$4 sm:$0xff]   ;;  %v12427_v15 = vld [vmem:[%s13820_s12 + $0x8b8] ss:$100 sps:$4 sm:$0xff]  }
 0x1cf   : > { %v10165_v25 = vadd.f32 %v10049_v30, %v8146_v45  ;;  %v8148_v26 = vadd.f32 %v8147_v24, %v8107_v18  ;;  %v12432_v30 = vld [vmem:[%s13820_s12 + $0x1794] ss:$100 sps:$4 sm:$0xff]   ;;  %v12444_v24 = vld [vmem:[%s13820_s12 + $0x1604] ss:$100 sps:$4 sm:$0xff]  }
 0x1d0   : > { %v8149_v27 = vpop.f32.mrf.mxu1  ;;  %8487 = vmatpush1.bf16.msra.mxu0 %v12373_v22  ;;  %v12430_v18 = vld [vmem:[%s13820_s12 + $0x1790] ss:$100 sps:$4 sm:$0xff]   ;;  %v12436_v22 = vld [vmem:[%s13820_s12 + $0x16c8] ss:$100 sps:$4 sm:$0xff]  }
 0x1d1   : > { %v10190_v60 = vmax.f32 %v10165_v25, 0.0  ;;  %v10166_v63 = vadd.f32 %v10053_v46, %v8148_v26  ;;  %8429 = vmatpush2.bf16.msra.mxu1 %v12370_v20  ;;  %8488 = vmatprep.subr.bf16.mxu0 %v12381_v35  ;;  %v12433_v45 = vld [vmem:[%s13820_s12 + $0x7f0] ss:$100 sps:$4 sm:$0xff]   ;;  %v12447_v35 = vld [vmem:[%s13820_s12 + $0x664] ss:$100 sps:$4 sm:$0xff]  }
 0x1d2   : > { %8521 = vmatprep.subr.bf16.mxu1 %v12378_v23  ;;  %v8150_v32 = vpop.f32.mrf.mxu1  ;;  %v12438_v46 = vld [vmem:[%s13820_s12 + $0x16cc] ss:$100 sps:$4 sm:$0xff]   ;;  %v12442_v26 = vld [vmem:[%s13820_s12 + $0x1600] ss:$100 sps:$4 sm:$0xff]  }
 0x1d3   : > { %10215 = vst [vmem:[%s14264_s20 + $0x10] sm:$0xff] %v10190_v60  ;;  %v10191_v33 = vmax.f32 %v10166_v63, 0.0  ;;  %v12441_v20 = vld [vmem:[%s13820_s12 + $0x72c] ss:$100 sps:$4 sm:$0xff]   ;;  %v12445_v27 = vld [vmem:[%s13820_s12 + $0x660] ss:$100 sps:$4 sm:$0xff]  }
 0x1d4   : > { %8431 = vmatmul.mubr.bf16.vlgmr.msra.gmra.mxu1 %v14003_v21  ;;  %8489 = vmatpush1.bf16.msra.mxu0 %v12379_v28  ;;  %v12439_v23 = vld [vmem:[%s13820_s12 + $0x728] ss:$100 sps:$4 sm:$0xff]   ;;  %v12450_v60 = vld [vmem:[%s13820_s12 + $0x153c] ss:$100 sps:$4 sm:$0xff]   ;;  %v12456_v32 = vld [vmem:[%s13820_s12 + $0x1474] ss:$100 sps:$4 sm:$0xff]  }
 0x1d5   : > { %10216 = vst [vmem:[%s14264_s20 + $0x18] sm:$0xff] %v10191_v33  ;;  %8522 = vmatpush1.bf16.msra.mxu1 %v12376_v1  ;;  %8490 = vmatprep.subr.bf16.mxu0 %v12387_v31  ;;  %v12453_v1 = vld [vmem:[%s13820_s12 + $0x1e9c] ss:$100 sps:$4 sm:$0xff]  }
 0x1d6   : > { %8523 = vmatprep.subr.bf16.mxu1 %v12384_v29  ;;  %8553 = vmatprep.mubr.bf16.mxu1 %v13889_v52  ;;  %v12448_v29 = vld [vmem:[%s13820_s12 + $0x1538] ss:$100 sps:$4 sm:$0xff]  }
 0x1d7   : > { %v12451_v31 = vld [vmem:[%s13820_s12 + $0x1e98] ss:$100 sps:$4 sm:$0xff]  }
 0x1d8   : > { %8491 = vmatpush1.bf16.msra.mxu0 %v12385_v37  ;;  %v12454_v37 = vld [vmem:[%s13820_s12 + $0x1470] ss:$100 sps:$4 sm:$0xff]  }
 0x1d9   : > { %8524 = vmatpush1.bf16.msra.mxu1 %v12382_v34  ;;  %8492 = vmatprep.subr.bf16.mxu0 %v12393_v39  ;;  %v12459_v34 = vld [vmem:[%s13820_s12 + $0x1dd4] ss:$100 sps:$4 sm:$0xff]   ;;  %v12462_v39 = vld [vmem:[%s13820_s12 + $0x13ac] ss:$100 sps:$4 sm:$0xff]  }
 0x1da   : > { %8525 = vmatprep.subr.bf16.mxu1 %v12390_v38  ;;  %v12457_v38 = vld [vmem:[%s13820_s12 + $0x1dd0] ss:$100 sps:$4 sm:$0xff]  }
 0x1dc   : > { %8493 = vmatpush1.bf16.msra.mxu0 %v12391_v43  ;;  %v12460_v43 = vld [vmem:[%s13820_s12 + $0x13a8] ss:$100 sps:$4 sm:$0xff]  }
 0x1dd   : > { %8526 = vmatpush1.bf16.msra.mxu1 %v12388_v42  ;;  %8494 = vmatprep.subr.bf16.mxu0 %v12399_v47  ;;  %v12465_v42 = vld [vmem:[%s13820_s12 + $0x1d0c] ss:$100 sps:$4 sm:$0xff]   ;;  %v12468_v47 = vld [vmem:[%s13820_s12 + $0x12e4] ss:$100 sps:$4 sm:$0xff]  }
 0x1de   : > { %8527 = vmatprep.subr.bf16.mxu1 %v12396_v44  ;;  %v12463_v44 = vld [vmem:[%s13820_s12 + $0x1d08] ss:$100 sps:$4 sm:$0xff]  }
 0x1e0   : > { %8495 = vmatpush1.bf16.msra.mxu0 %v12397_v50 }
 0x1e1   : > { %8528 = vmatpush1.bf16.msra.mxu1 %v12394_v48  ;;  %8496 = vmatprep.subr.bf16.mxu0 %v12405_v53  ;;  %v12471_v48 = vld [vmem:[%s13820_s12 + $0x1c44] ss:$100 sps:$4 sm:$0xff]  }
 0x1e2   : > { %8529 = vmatprep.subr.bf16.mxu1 %v12402_v51  ;;  %v12466_v51 = vld [vmem:[%s13820_s12 + $0x12e0] ss:$100 sps:$4 sm:$0xff]  }
 0x1e3   : > { %v12469_v53 = vld [vmem:[%s13820_s12 + $0x1c40] ss:$100 sps:$4 sm:$0xff]  }
 0x1e4   : > { %8497 = vmatpush2.bf16.msra.mxu0 %v12403_v55  ;;  %v12477_v55 = vld [vmem:[%s13820_s12 + $0x25a4] ss:$100 sps:$4 sm:$0xff]  }
 0x1e5   : > { %8530 = vmatpush1.bf16.msra.mxu1 %v12400_v54  ;;  %8498 = vmatprep.subr.bf16.mxu0 %v12411_v57  ;;  %v12474_v54 = vld [vmem:[%s13820_s12 + $0x1b7c] ss:$100 sps:$4 sm:$0xff]  }
 0x1e6   : > { %8531 = vmatprep.subr.bf16.mxu1 %v12408_v56  ;;  %v12472_v57 = vld [vmem:[%s13820_s12 + $0x1b78] ss:$100 sps:$4 sm:$0xff]  }
 0x1e8   : > { %8499 = vmatpush2.bf16.msra.mxu0 %v12409_v61  ;;  %v12475_v61 = vld [vmem:[%s13820_s12 + $0x25a0] ss:$100 sps:$4 sm:$0xff]  }
 0x1e9   : > { %8532 = vmatpush1.bf16.msra.mxu1 %v12406_v59  ;;  %8500 = vmatprep.subr.bf16.mxu0 %v12417_v0  ;;  %v12483_v0 = vld [vmem:[%s13820_s12 + $0x5a4] ss:$100 sps:$4 sm:$0xff]  }
 0x1ea   : > { %8533 = vmatprep.subr.bf16.mxu1 %v12414_v62  ;;  %v12480_v62 = vld [vmem:[%s13820_s12 + $0x1ab4] ss:$100 sps:$4 sm:$0xff]  }
 0x1ec   : > { %8501 = vmatpush2.bf16.msra.mxu0 %v12415_v4 }
 0x1ed   : > { %8534 = vmatpush1.bf16.msra.mxu1 %v12412_v3  ;;  %8502 = vmatprep.subr.bf16.mxu0 %v12423_v10  ;;  %v12486_v10 = vld [vmem:[%s13820_s12 + $0x19ec] ss:$100 sps:$4 sm:$0xff]  }
 0x1ee   : > { %8535 = vmatprep.subr.bf16.mxu1 %v12420_v6  ;;  %v12478_v6 = vld [vmem:[%s13820_s12 + $0x1ab0] ss:$100 sps:$4 sm:$0xff]  }
 0x1f0   : > { %8503 = vmatpush2.bf16.msra.mxu0 %v12421_v13  ;;  %v12481_v13 = vld [vmem:[%s13820_s12 + $0x5a0] ss:$100 sps:$4 sm:$0xff]  }
 0x1f1   : > { %8536 = vmatpush1.bf16.msra.mxu1 %v12418_v11  ;;  %8504 = vmatprep.subr.bf16.mxu0 %v12429_v40 }
 0x1f2   : > { %8537 = vmatprep.subr.bf16.mxu1 %v12426_v14  ;;  %v12484_v14 = vld [vmem:[%s13820_s12 + $0x19e8] ss:$100 sps:$4 sm:$0xff]  }
 0x1f4   : > { %8505 = vmatpush2.bf16.msra.mxu0 %v12427_v15  ;;  %v12492_v15 = vld [vmem:[%s13820_s12 + $0x1924] ss:$100 sps:$4 sm:$0xff]  }
 0x1f5   : > { %8538 = vmatpush2.bf16.msra.mxu1 %v12424_v41  ;;  %8506 = vmatprep.subr.bf16.mxu0 %v12435_v17  ;;  %v12489_v41 = vld [vmem:[%s13820_s12 + $0x4dc] ss:$100 sps:$4 sm:$0xff]  }
 0x1f6   : > { %8539 = vmatprep.subr.bf16.mxu1 %v12432_v30  ;;  %v12487_v17 = vld [vmem:[%s13820_s12 + $0x4d8] ss:$100 sps:$4 sm:$0xff]  }
 0x1f8   : > { %8507 = vmatpush2.bf16.msra.mxu0 %v12433_v45  ;;  %v12495_v45 = vld [vmem:[%s13820_s12 + $0x414] ss:$100 sps:$4 sm:$0xff]  }
 0x1f9   : > { %8540 = vmatpush2.bf16.msra.mxu1 %v12430_v18  ;;  %8508 = vmatprep.subr.bf16.mxu0 %v12441_v20  ;;  %v12490_v18 = vld [vmem:[%s13820_s12 + $0x1920] ss:$100 sps:$4 sm:$0xff]   ;;  %v12493_v20 = vld [vmem:[%s13820_s12 + $0x410] ss:$100 sps:$4 sm:$0xff]  }
 0x1fa   : > { %8541 = vmatprep.subr.bf16.mxu1 %v12438_v46  ;;  %v12498_v46 = vld [vmem:[%s13820_s12 + $0x24dc] ss:$100 sps:$4 sm:$0xff]  }
 0x1fb   : > { %v14413_v25 = vpop.f32.mrf.mxu0 }
 0x1fc   : > { %8509 = vmatpush2.bf16.msra.mxu0 %v12439_v23  ;;  %v12501_v23 = vld [vmem:[%s13820_s12 + $0x34c] ss:$100 sps:$4 sm:$0xff]  }
 0x1fd   : > { %8542 = vmatpush2.bf16.msra.mxu1 %v12436_v22  ;;  %v14418_v63 = vpop.f32.mrf.mxu0  ;;  %8510 = vmatprep.subr.bf16.mxu0 %v12447_v35  ;;  %v12496_v22 = vld [vmem:[%s13820_s12 + $0x24d8] ss:$100 sps:$4 sm:$0xff]   ;;  %v12499_v35 = vld [vmem:[%s13820_s12 + $0x348] ss:$100 sps:$4 sm:$0xff]  }
 0x1fe   : > { %8543 = vmatprep.subr.bf16.mxu1 %v12444_v24  ;;  %v12504_v24 = vld [vmem:[%s13820_s12 + $0x2414] ss:$100 sps:$4 sm:$0xff]  }
 0x1ff   : > { %v8190_v28 = vpop.f32.mrf.mxu0 }
 0x200   : > { %8511 = vmatpush2.bf16.msra.mxu0 %v12445_v27  ;;  %v12507_v27 = vld [vmem:[%s13820_s12 + $0x284] ss:$100 sps:$4 sm:$0xff]  }
 0x201   : > { %8544 = vmatpush2.bf16.msra.mxu1 %v12442_v26  ;;  %v8191_v33 = vpop.f32.mrf.mxu0  ;;  %8562 = vmatprep.subr.bf16.mxu0 %v12453_v1  ;;  %v12502_v26 = vld [vmem:[%s13820_s12 + $0x2410] ss:$100 sps:$4 sm:$0xff]   ;;  %v12505_v1 = vld [vmem:[%s13820_s12 + $0x280] ss:$100 sps:$4 sm:$0xff]   ;;  %v12508_v28 = vld [vmem:[%s13820_s12 + $0x2348] ss:$100 sps:$4 sm:$0xff]  }
 0x202   : > { %8545 = vmatprep.subr.bf16.mxu1 %v12450_v60  ;;  %v12510_v60 = vld [vmem:[%s13820_s12 + $0x234c] ss:$100 sps:$4 sm:$0xff]   ;;  %v12514_v33 = vld [vmem:[%s13820_s12 + $0x2280] ss:$100 sps:$4 sm:$0xff]  }
 0x203   : > { %8513 = vmatmul.mubr.bf16.vlgmr.msra.gmra.mxu0 %v13916_v8 }
 0x204   : > { %8563 = vmatpush1.bf16.msra.mxu0 %v12451_v31  ;;  %8594 = vmatprep.mubr.bf16.mxu0 %v13956_v36  ;;  %v12516_v31 = vld [vmem:[%s13820_s12 + $0x2284] ss:$100 sps:$4 sm:$0xff]  }
 0x205   : > { %8546 = vmatpush2.bf16.msra.mxu1 %v12448_v29  ;;  %8564 = vmatprep.subr.bf16.mxu0 %v12459_v34  ;;  %v12513_v29 = vld [vmem:[%s13820_s12 + $0x1bc] ss:$100 sps:$4 sm:$0xff]   ;;  %v12519_v34 = vld [vmem:[%s13820_s12 + $0xf4] ss:$100 sps:$4 sm:$0xff]  }
 0x206   : > { %8547 = vmatprep.subr.bf16.mxu1 %v12456_v32  ;;  %v12511_v32 = vld [vmem:[%s13820_s12 + $0x1b8] ss:$100 sps:$4 sm:$0xff]  }
 0x208   : > { %8565 = vmatpush1.bf16.msra.mxu0 %v12457_v38  ;;  %v12517_v38 = vld [vmem:[%s13820_s12 + $0xf0] ss:$100 sps:$4 sm:$0xff]  }
 0x209   : > { %8548 = vmatpush2.bf16.msra.mxu1 %v12454_v37  ;;  %8566 = vmatprep.subr.bf16.mxu0 %v12465_v42  ;;  %v12522_v37 = vld [vmem:[%s13820_s12 + $0x21bc] ss:$100 sps:$4 sm:$0xff]   ;;  %v12525_v42 = vld [vmem:[%s13820_s12 + $0x2c] ss:$100 sps:$4 sm:$0xff]  }
 0x20a   : > { %8549 = vmatprep.subr.bf16.mxu1 %v12462_v39  ;;  %v12520_v39 = vld [vmem:[%s13820_s12 + $0x21b8] ss:$100 sps:$4 sm:$0xff]  }
 0x20c   : > { %v14435_v50 = vpop.f32.mrf.mxu1  ;;  %8567 = vmatpush1.bf16.msra.mxu0 %v12463_v44  ;;  %v12523_v44 = vld [vmem:[%s13820_s12 + $0x28] ss:$100 sps:$4 sm:$0xff]  }
 0x20d   : > { %8550 = vmatpush2.bf16.msra.mxu1 %v12460_v43  ;;  %8568 = vmatprep.subr.bf16.mxu0 %v12471_v48  ;;  %v12528_v43 = vld [vmem:[%s13820_s12 + $0x20f4] ss:$100 sps:$4 sm:$0xff]   ;;  %v12531_v48 = vld [vmem:[%s13820_s12 + $0xbe4] ss:$100 sps:$4 sm:$0xff]  }
 0x20e   : > { %v14441_v56 = vpop.f32.mrf.mxu1  ;;  %8551 = vmatprep.subr.bf16.mxu1 %v12468_v47  ;;  %v12526_v47 = vld [vmem:[%s13820_s12 + $0x20f0] ss:$100 sps:$4 sm:$0xff]  }
 0x210   : > { %v8231_v59 = vpop.f32.mrf.mxu1  ;;  %8569 = vmatpush1.bf16.msra.mxu0 %v12469_v53  ;;  %v12529_v53 = vld [vmem:[%s13820_s12 + $0xbe0] ss:$100 sps:$4 sm:$0xff]  }
 0x211   : > { %8552 = vmatpush2.bf16.msra.mxu1 %v12466_v51  ;;  %8570 = vmatprep.subr.bf16.mxu0 %v12474_v54  ;;  %v12534_v51 = vld [vmem:[%s13820_s12 + $0x202c] ss:$100 sps:$4 sm:$0xff]   ;;  %v12540_v59 = vld [vmem:[%s13820_s12 + $0x1f64] ss:$100 sps:$4 sm:$0xff]  }
 0x212   : > { %8617 = vmatprep.subr.bf16.mxu1 %v12477_v55  ;;  %v8232_v3 = vpop.f32.mrf.mxu1  ;;  %v12532_v54 = vld [vmem:[%s13820_s12 + $0x2028] ss:$100 sps:$4 sm:$0xff]   ;;  %v14493_v55 = vsub.s32 4, %v14220_v58 }
 0x213   : > { %v12535_v3 = vld [vmem:[%s13820_s12 + $0xb18] ss:$100 sps:$4 sm:$0xff]  }
 0x214   : > { %8554 = vmatmul.mubr.bf16.vlgmr.msra.gmra.mxu1 %v13918_v9  ;;  %v14448_v4 = vpop.f32.mrf.mxu1  ;;  %8571 = vmatpush1.bf16.msra.mxu0 %v12472_v57  ;;  %v12537_v57 = vld [vmem:[%s13820_s12 + $0xb1c] ss:$100 sps:$4 sm:$0xff]  }
 0x215   : > { %8618 = vmatpush1.bf16.msra.mxu1 %v12475_v61  ;;  %8572 = vmatprep.subr.bf16.mxu0 %v12480_v62  ;;  %v8228_v61 = vadd.f32 %v14435_v50, %v14413_v25  ;;  %v14500_v62 = vsub.s32 5, %v14220_v58  ;;  %v12543_v25 = vld [vmem:[%s13820_s12 + $0xa54] ss:$100 sps:$4 sm:$0xff]   ;;  %v12546_v50 = vld [vmem:[%s13820_s12 + $0x1224] ss:$100 sps:$4 sm:$0xff]  }
 0x216   : > { %8635 = vmatprep.mubr.bf16.mxu1 %v13708_v16  ;;  %v14453_v11 = vpop.f32.mrf.mxu1  ;;  %8644 = vmatprep.subr.bf16.mxu1 %v12483_v0 }
 0x218   : > { %v8313_v40 = vpop.f32.mrf.mxu1  ;;  %8573 = vmatpush1.bf16.msra.mxu0 %v12478_v6  ;;  %v8230_v6 = vadd.f32 %v14441_v56, %v14418_v63 }
 0x219   : > { %8574 = vmatprep.subr.bf16.mxu0 %v12486_v10  ;;  %v12538_v40 = vld [vmem:[%s13820_s12 + $0x1f60] ss:$100 sps:$4 sm:$0xff]  }
 0x21a   : > { %v8314_v30 = vpop.f32.mrf.mxu1 }
 0x21c   : > { %11618 = vmatmul.mubr.msk.bf16.vlgmr.msra.gmra.mxu1 %vm7820_vm0, %v13933_v19  ;;  %8575 = vmatpush1.bf16.msra.mxu0 %v12484_v14 }
 0x21d   : > { %8645 = vmatpush1.bf16.msra.mxu1 %v12481_v13  ;;  %8576 = vmatprep.subr.bf16.mxu0 %v12492_v15  ;;  %v14506_v13 = vld [vmem:[%s13826_s30] sm:$0xff] }
 0x21e   : > { %8646 = vmatprep.subr.bf16.mxu1 %v12489_v41  ;;  %8676 = vmatprep.mubr.bf16.mxu1 %v13883_v49  ;;  %v10057_v14 = vrot.slane %v14506_v13, %v14493_v55  ;;  %v10061_v15 = vrot.slane %v14506_v13, %v14500_v62 }
 0x220   : > { %8577 = vmatpush1.bf16.msra.mxu0 %v12490_v18 }
 0x221   : > { %8647 = vmatpush1.bf16.msra.mxu1 %v12487_v17  ;;  %8578 = vmatprep.subr.bf16.mxu0 %v12498_v46  ;;  %v12541_v17 = vld [vmem:[%s13820_s12 + $0xa50] ss:$100 sps:$4 sm:$0xff]   ;;  %v12544_v46 = vld [vmem:[%s13820_s12 + $0x1220] ss:$100 sps:$4 sm:$0xff]  }
 0x222   : > { %8648 = vmatprep.subr.bf16.mxu1 %v12495_v45 }
 0x224   : > { %8579 = vmatpush2.bf16.msra.mxu0 %v12496_v22  ;;  %v12552_v22 = vld [vmem:[%s13820_s12 + $0x115c] ss:$100 sps:$4 sm:$0xff]  }
 0x225   : > { %8649 = vmatpush1.bf16.msra.mxu1 %v12493_v20  ;;  %8580 = vmatprep.subr.bf16.mxu0 %v12504_v24  ;;  %v12549_v20 = vld [vmem:[%s13820_s12 + $0x98c] ss:$100 sps:$4 sm:$0xff]  }
 0x226   : > { %8650 = vmatprep.subr.bf16.mxu1 %v12501_v23 }
 0x228   : > { %8581 = vmatpush2.bf16.msra.mxu0 %v12502_v26  ;;  %v12550_v26 = vld [vmem:[%s13820_s12 + $0x1158] ss:$100 sps:$4 sm:$0xff]  }
 0x229   : > { %8651 = vmatpush1.bf16.msra.mxu1 %v12499_v35  ;;  %8582 = vmatprep.subr.bf16.mxu0 %v12510_v60  ;;  %v12547_v35 = vld [vmem:[%s13820_s12 + $0x988] ss:$100 sps:$4 sm:$0xff]   ;;  %v12558_v60 = vld [vmem:[%s13820_s12 + $0x1094] ss:$100 sps:$4 sm:$0xff]  }
 0x22a   : > { %8652 = vmatprep.subr.bf16.mxu1 %v12507_v27  ;;  %v12555_v27 = vld [vmem:[%s13820_s12 + $0x8c4] ss:$100 sps:$4 sm:$0xff]  }
 0x22c   : > { %8583 = vmatpush2.bf16.msra.mxu0 %v12508_v28  ;;  %v12556_v28 = vld [vmem:[%s13820_s12 + $0x1090] ss:$100 sps:$4 sm:$0xff]  }
 0x22d   : > { %8653 = vmatpush1.bf16.msra.mxu1 %v12505_v1  ;;  %8584 = vmatprep.subr.bf16.mxu0 %v12516_v31  ;;  %v12553_v1 = vld [vmem:[%s13820_s12 + $0x8c0] ss:$100 sps:$4 sm:$0xff]   ;;  %v12564_v31 = vld [vmem:[%s13820_s12 + $0xfcc] ss:$100 sps:$4 sm:$0xff]  }
 0x22e   : > { %8654 = vmatprep.subr.bf16.mxu1 %v12513_v29  ;;  %v12561_v29 = vld [vmem:[%s13820_s12 + $0x7fc] ss:$100 sps:$4 sm:$0xff]  }
 0x230   : > { %8585 = vmatpush2.bf16.msra.mxu0 %v12514_v33  ;;  %v12562_v33 = vld [vmem:[%s13820_s12 + $0xfc8] ss:$100 sps:$4 sm:$0xff]  }
 0x231   : > { %8655 = vmatpush1.bf16.msra.mxu1 %v12511_v32  ;;  %8586 = vmatprep.subr.bf16.mxu0 %v12522_v37  ;;  %v12559_v32 = vld [vmem:[%s13820_s12 + $0x7f8] ss:$100 sps:$4 sm:$0xff]   ;;  %v12570_v37 = vld [vmem:[%s13820_s12 + $0xf04] ss:$100 sps:$4 sm:$0xff]  }
 0x232   : > { %8656 = vmatprep.subr.bf16.mxu1 %v12519_v34  ;;  %v12567_v34 = vld [vmem:[%s13820_s12 + $0x734] ss:$100 sps:$4 sm:$0xff]  }
 0x234   : > { %8587 = vmatpush2.bf16.msra.mxu0 %v12520_v39  ;;  %v12568_v39 = vld [vmem:[%s13820_s12 + $0xf00] ss:$100 sps:$4 sm:$0xff]  }
 0x235   : > { %8657 = vmatpush1.bf16.msra.mxu1 %v12517_v38  ;;  %8588 = vmatprep.subr.bf16.mxu0 %v12528_v43  ;;  %v12565_v38 = vld [vmem:[%s13820_s12 + $0x730] ss:$100 sps:$4 sm:$0xff]   ;;  %v12576_v43 = vld [vmem:[%s13820_s12 + $0xe3c] ss:$100 sps:$4 sm:$0xff]  }
 0x236   : > { %8658 = vmatprep.subr.bf16.mxu1 %v12525_v42  ;;  %v12573_v42 = vld [vmem:[%s13820_s12 + $0x66c] ss:$100 sps:$4 sm:$0xff]  }
 0x238   : > { %8589 = vmatpush2.bf16.msra.mxu0 %v12526_v47  ;;  %v12574_v47 = vld [vmem:[%s13820_s12 + $0xe38] ss:$100 sps:$4 sm:$0xff]  }
 0x239   : > { %8659 = vmatpush1.bf16.msra.mxu1 %v12523_v44  ;;  %8590 = vmatprep.subr.bf16.mxu0 %v12534_v51  ;;  %v12571_v44 = vld [vmem:[%s13820_s12 + $0x668] ss:$100 sps:$4 sm:$0xff]  }
 0x23a   : > { %8660 = vmatprep.subr.bf16.mxu1 %v12531_v48  ;;  %v12579_v51 = vld [vmem:[%s13820_s12 + $0x1ea4] ss:$100 sps:$4 sm:$0xff]  }
 0x23b   : > { %v8268_v0 = vpop.f32.mrf.mxu0 }
 0x23c   : > { %v8269_v10 = vadd.f32 %v8268_v0, %v8228_v61  ;;  %8591 = vmatpush2.bf16.msra.mxu0 %v12532_v54  ;;  %v12585_v61 = vld [vmem:[%s13820_s12 + $0x1ddc] ss:$100 sps:$4 sm:$0xff]  }
 0x23d   : > { %8661 = vmatpush2.bf16.msra.mxu1 %v12529_v53  ;;  %v8270_v41 = vpop.f32.mrf.mxu0  ;;  %8592 = vmatprep.subr.bf16.mxu0 %v12540_v59  ;;  %v12582_v53 = vld [vmem:[%s13820_s12 + $0xd74] ss:$100 sps:$4 sm:$0xff]  }
 0x23e   : > { %8662 = vmatprep.subr.bf16.mxu1 %v12537_v57  ;;  %v8310_v63 = vadd.f32 %v14448_v4, %v8269_v10  ;;  %v8271_v56 = vadd.f32 %v8270_v41, %v8230_v6  ;;  %v12577_v57 = vld [vmem:[%s13820_s12 + $0x1ea0] ss:$100 sps:$4 sm:$0xff]   ;;  %v12580_v59 = vld [vmem:[%s13820_s12 + $0xd70] ss:$100 sps:$4 sm:$0xff]   ;;  %v12583_v10 = vld [vmem:[%s13820_s12 + $0x1dd8] ss:$100 sps:$4 sm:$0xff]  }
 0x23f   : > { %v8272_v30 = vpop.f32.mrf.mxu0  ;;  %v12592_v41 = vld [vmem:[%s13820_s12 + $0x1860] ss:$100 sps:$4 sm:$0xff]  }
 0x240   : > { %v10167_v18 = vadd.f32 %v10057_v14, %v8310_v63  ;;  %v8312_v45 = vadd.f32 %v14453_v11, %v8271_v56  ;;  %8593 = vmatpush2.bf16.msra.mxu0 %v12538_v40  ;;  %v12586_v14 = vld [vmem:[%s13820_s12 + $0xca8] ss:$100 sps:$4 sm:$0xff]   ;;  %v12591_v40 = vld [vmem:[%s13820_s12 + $0x1d14] ss:$100 sps:$4 sm:$0xff]   ;;  %v12600_v56 = vld [vmem:[%s13820_s12 + $0x179c] ss:$100 sps:$4 sm:$0xff]  }
 0x241   : > { %8663 = vmatpush2.bf16.msra.mxu1 %v12535_v3  ;;  %v8273_v4 = vpop.f32.mrf.mxu0  ;;  %8685 = vmatprep.subr.bf16.mxu0 %v12546_v50  ;;  %v12588_v3 = vld [vmem:[%s13820_s12 + $0xcac] ss:$100 sps:$4 sm:$0xff]   ;;  %v12598_v30 = vld [vmem:[%s13820_s12 + $0x1798] ss:$100 sps:$4 sm:$0xff]  }
 0x242   : > { %8664 = vmatprep.subr.bf16.mxu1 %v12543_v25  ;;  %v10192_v23 = vmax.f32 %v10167_v18, 0.0  ;;  %v10168_v24 = vadd.f32 %v10061_v15, %v8312_v45  ;;  %v12594_v25 = vld [vmem:[%s13820_s12 + $0x1864] ss:$100 sps:$4 sm:$0xff]   ;;  %v12589_v50 = vld [vmem:[%s13820_s12 + $0x1d10] ss:$100 sps:$4 sm:$0xff]  }
 0x243   : > { %8595 = vmatmul.mubr.bf16.vlgmr.msra.gmra.mxu0 %v14003_v21  ;;  %v12597_v63 = vld [vmem:[%s13820_s12 + $0x1c4c] ss:$100 sps:$4 sm:$0xff]   ;;  %v12606_v18 = vld [vmem:[%s13820_s12 + $0x16d4] ss:$100 sps:$4 sm:$0xff]   ;;  %v12601_v45 = vld [vmem:[%s13820_s12 + $0x1b80] ss:$100 sps:$4 sm:$0xff]  }
 0x244   : > { %10217 = vst [vmem:[%s14264_s20 + $0x20] sm:$0xff] %v10192_v23  ;;  %v10193_v11 = vmax.f32 %v10168_v24, 0.0  ;;  %8686 = vmatpush1.bf16.msra.mxu0 %v12544_v46  ;;  %8717 = vmatprep.mubr.bf16.mxu0 %v13889_v52  ;;  %v12595_v15 = vld [vmem:[%s13820_s12 + $0x1c48] ss:$100 sps:$4 sm:$0xff]   ;;  %v12604_v46 = vld [vmem:[%s13820_s12 + $0x16d0] ss:$100 sps:$4 sm:$0xff]  }
 0x245   : > { %8665 = vmatpush2.bf16.msra.mxu1 %v12541_v17  ;;  %8687 = vmatprep.subr.bf16.mxu0 %v12552_v22  ;;  %v12603_v17 = vld [vmem:[%s13820_s12 + $0x1b84] ss:$100 sps:$4 sm:$0xff]   ;;  %v12612_v22 = vld [vmem:[%s13820_s12 + $0x160c] ss:$100 sps:$4 sm:$0xff]   ;;  %v12607_v4 = vld [vmem:[%s13820_s12 + $0x1ab8] ss:$100 sps:$4 sm:$0xff]  }
 0x246   : > { %8666 = vmatprep.subr.bf16.mxu1 %v12549_v20  ;;  %10218 = vst [vmem:[%s14264_s20 + $0x28] sm:$0xff] %v10193_v11  ;;  %v12609_v20 = vld [vmem:[%s13820_s12 + $0x1abc] ss:$100 sps:$4 sm:$0xff]   ;;  %v12610_v23 = vld [vmem:[%s13820_s12 + $0x1608] ss:$100 sps:$4 sm:$0xff]  }
 0x247   : > { %v12615_v24 = vld [vmem:[%s13820_s12 + $0x19f4] ss:$100 sps:$4 sm:$0xff]  }
 0x248   : > { %8688 = vmatpush1.bf16.msra.mxu0 %v12550_v26  ;;  %v12613_v11 = vld [vmem:[%s13820_s12 + $0x19f0] ss:$100 sps:$4 sm:$0xff]   ;;  %v12616_v26 = vld [vmem:[%s13820_s12 + $0x1540] ss:$100 sps:$4 sm:$0xff]  }
 0x249   : > { %8667 = vmatpush2.bf16.msra.mxu1 %v12547_v35  ;;  %8689 = vmatprep.subr.bf16.mxu0 %v12558_v60  ;;  %v12618_v35 = vld [vmem:[%s13820_s12 + $0x1544] ss:$100 sps:$4 sm:$0xff]   ;;  %v12624_v60 = vld [vmem:[%s13820_s12 + $0x147c] ss:$100 sps:$4 sm:$0xff]  }
 0x24a   : > { %8668 = vmatprep.subr.bf16.mxu1 %v12555_v27  ;;  %v12621_v27 = vld [vmem:[%s13820_s12 + $0x192c] ss:$100 sps:$4 sm:$0xff]  }
 0x24c   : > { %8690 = vmatpush1.bf16.msra.mxu0 %v12556_v28  ;;  %v12622_v28 = vld [vmem:[%s13820_s12 + $0x1478] ss:$100 sps:$4 sm:$0xff]  }
 0x24d   : > { %8669 = vmatpush2.bf16.msra.mxu1 %v12553_v1  ;;  %8691 = vmatprep.subr.bf16.mxu0 %v12564_v31  ;;  %v12619_v1 = vld [vmem:[%s13820_s12 + $0x1928] ss:$100 sps:$4 sm:$0xff]   ;;  %v12630_v31 = vld [vmem:[%s13820_s12 + $0x13b4] ss:$100 sps:$4 sm:$0xff]  }
 0x24e   : > { %8670 = vmatprep.subr.bf16.mxu1 %v12561_v29  ;;  %v12627_v29 = vld [vmem:[%s13820_s12 + $0x24e4] ss:$100 sps:$4 sm:$0xff]  }
 0x250   : > { %8692 = vmatpush1.bf16.msra.mxu0 %v12562_v33  ;;  %v12628_v33 = vld [vmem:[%s13820_s12 + $0x13b0] ss:$100 sps:$4 sm:$0xff]  }
 0x251   : > { %8671 = vmatpush2.bf16.msra.mxu1 %v12559_v32  ;;  %8693 = vmatprep.subr.bf16.mxu0 %v12570_v37  ;;  %v12625_v32 = vld [vmem:[%s13820_s12 + $0x24e0] ss:$100 sps:$4 sm:$0xff]   ;;  %v12636_v37 = vld [vmem:[%s13820_s12 + $0x12ec] ss:$100 sps:$4 sm:$0xff]  }
 0x252   : > { %8672 = vmatprep.subr.bf16.mxu1 %v12567_v34  ;;  %v12633_v34 = vld [vmem:[%s13820_s12 + $0x241c] ss:$100 sps:$4 sm:$0xff]  }
 0x254   : > { %v14543_v48 = vpop.f32.mrf.mxu1  ;;  %8694 = vmatpush1.bf16.msra.mxu0 %v12568_v39  ;;  %v12631_v39 = vld [vmem:[%s13820_s12 + $0x2418] ss:$100 sps:$4 sm:$0xff]  }
 0x255   : > { %8673 = vmatpush2.bf16.msra.mxu1 %v12565_v38  ;;  %8695 = vmatprep.subr.bf16.mxu0 %v12576_v43  ;;  %v12639_v43 = vld [vmem:[%s13820_s12 + $0x2354] ss:$100 sps:$4 sm:$0xff]  }
 0x256   : > { %8674 = vmatprep.subr.bf16.mxu1 %v12573_v42  ;;  %v14547_v54 = vpop.f32.mrf.mxu1  ;;  %v12634_v42 = vld [vmem:[%s13820_s12 + $0x12e8] ss:$100 sps:$4 sm:$0xff]  }
 0x258   : > { %v8354_v0 = vpop.f32.mrf.mxu1  ;;  %8696 = vmatpush1.bf16.msra.mxu0 %v12574_v47  ;;  %v12642_v47 = vld [vmem:[%s13820_s12 + $0x25ac] ss:$100 sps:$4 sm:$0xff]  }
 0x259   : > { %8675 = vmatpush2.bf16.msra.mxu1 %v12571_v44  ;;  %8697 = vmatprep.subr.bf16.mxu0 %v12582_v53  ;;  %v12637_v53 = vld [vmem:[%s13820_s12 + $0x2350] ss:$100 sps:$4 sm:$0xff]  }
 0x25a   : > { %8726 = vmatprep.subr.bf16.mxu1 %v12579_v51  ;;  %v8355_v6 = vpop.f32.mrf.mxu1  ;;  %v12651_v0 = vld [vmem:[%s13820_s12 + $0x5ac] ss:$100 sps:$4 sm:$0xff]  }
 0x25b   : > { %v12643_v6 = vld [vmem:[%s13820_s12 + $0x2288] ss:$100 sps:$4 sm:$0xff]  }
 0x25c   : > { %8677 = vmatmul.mubr.bf16.vlgmr.msra.gmra.mxu1 %v13916_v8  ;;  %8698 = vmatpush1.bf16.msra.mxu0 %v12580_v59  ;;  %v12645_v59 = vld [vmem:[%s13820_s12 + $0x228c] ss:$100 sps:$4 sm:$0xff]  }
 0x25d   : > { %8727 = vmatpush1.bf16.msra.mxu1 %v12577_v57  ;;  %8699 = vmatprep.subr.bf16.mxu0 %v12588_v3  ;;  %v12640_v57 = vld [vmem:[%s13820_s12 + $0x25a8] ss:$100 sps:$4 sm:$0xff]  }
 0x25e   : > { %8728 = vmatprep.subr.bf16.mxu1 %v12585_v61  ;;  %8758 = vmatprep.mubr.bf16.mxu1 %v13956_v36 }
 0x260   : > { %8700 = vmatpush1.bf16.msra.mxu0 %v12586_v14  ;;  %v12648_v14 = vld [vmem:[%s13820_s12 + $0x21c4] ss:$100 sps:$4 sm:$0xff]  }
 0x261   : > { %8729 = vmatpush1.bf16.msra.mxu1 %v12583_v10  ;;  %8701 = vmatprep.subr.bf16.mxu0 %v12594_v25 }
 0x262   : > { %8730 = vmatprep.subr.bf16.mxu1 %v12591_v40  ;;  %v12646_v40 = vld [vmem:[%s13820_s12 + $0x21c0] ss:$100 sps:$4 sm:$0xff]  }
 0x264   : > { %8702 = vmatpush2.bf16.msra.mxu0 %v12592_v41 }
 0x265   : > { %8731 = vmatpush1.bf16.msra.mxu1 %v12589_v50  ;;  %8703 = vmatprep.subr.bf16.mxu0 %v12600_v56  ;;  %v12649_v50 = vld [vmem:[%s13820_s12 + $0x5a8] ss:$100 sps:$4 sm:$0xff]  }
 0x266   : > { %8732 = vmatprep.subr.bf16.mxu1 %v12597_v63  ;;  %v12654_v63 = vld [vmem:[%s13820_s12 + $0x20fc] ss:$100 sps:$4 sm:$0xff]   ;;  %v12657_v56 = vld [vmem:[%s13820_s12 + $0x4e4] ss:$100 sps:$4 sm:$0xff]  }
 0x268   : > { %8704 = vmatpush2.bf16.msra.mxu0 %v12598_v30  ;;  %v12655_v30 = vld [vmem:[%s13820_s12 + $0x4e0] ss:$100 sps:$4 sm:$0xff]  }
 0x269   : > { %8733 = vmatpush1.bf16.msra.mxu1 %v12595_v15  ;;  %8705 = vmatprep.subr.bf16.mxu0 %v12606_v18  ;;  %v12652_v15 = vld [vmem:[%s13820_s12 + $0x20f8] ss:$100 sps:$4 sm:$0xff]  }
 0x26a   : > { %8734 = vmatprep.subr.bf16.mxu1 %v12603_v17  ;;  %v12660_v17 = vld [vmem:[%s13820_s12 + $0x2034] ss:$100 sps:$4 sm:$0xff]   ;;  %v12663_v18 = vld [vmem:[%s13820_s12 + $0x41c] ss:$100 sps:$4 sm:$0xff]  }
 0x26c   : > { %8706 = vmatpush2.bf16.msra.mxu0 %v12604_v46  ;;  %v14612_v46 = vsub.s32 6, %v14220_v58 }
 0x26d   : > { %8735 = vmatpush1.bf16.msra.mxu1 %v12601_v45  ;;  %8707 = vmatprep.subr.bf16.mxu0 %v12612_v22  ;;  %v12658_v45 = vld [vmem:[%s13820_s12 + $0x2030] ss:$100 sps:$4 sm:$0xff]  }
 0x26e   : > { %8736 = vmatprep.subr.bf16.mxu1 %v12609_v20  ;;  %v12661_v20 = vld [vmem:[%s13820_s12 + $0x418] ss:$100 sps:$4 sm:$0xff]   ;;  %v12666_v22 = vld [vmem:[%s13820_s12 + $0x1f6c] ss:$100 sps:$4 sm:$0xff]  }
 0x270   : > { %8708 = vmatpush2.bf16.msra.mxu0 %v12610_v23 }
 0x271   : > { %8737 = vmatpush1.bf16.msra.mxu1 %v12607_v4  ;;  %8709 = vmatprep.subr.bf16.mxu0 %v12618_v35  ;;  %v12669_v4 = vld [vmem:[%s13820_s12 + $0x354] ss:$100 sps:$4 sm:$0xff]  }
 0x272   : > { %8738 = vmatprep.subr.bf16.mxu1 %v12615_v24  ;;  %v14619_v24 = vsub.s32 7, %v14220_v58  ;;  %v12675_v58 = vld [vmem:[%s13820_s12 + $0x28c] ss:$100 sps:$4 sm:$0xff]  }
 0x274   : > { %8710 = vmatpush2.bf16.msra.mxu0 %v12616_v26 }
 0x275   : > { %8739 = vmatpush1.bf16.msra.mxu1 %v12613_v11  ;;  %8711 = vmatprep.subr.bf16.mxu0 %v12624_v60  ;;  %v12664_v60 = vld [vmem:[%s13820_s12 + $0x1f68] ss:$100 sps:$4 sm:$0xff]  }
 0x276   : > { %8740 = vmatprep.subr.bf16.mxu1 %v12621_v27  ;;  %v10065_v27 = vrot.slane %v14506_v13, %v14612_v46 }
 0x278   : > { %8712 = vmatpush2.bf16.msra.mxu0 %v12622_v28  ;;  %v12672_v28 = vld [vmem:[%s13820_s12 + $0x122c] ss:$100 sps:$4 sm:$0xff]  }
 0x279   : > { %8741 = vmatpush1.bf16.msra.mxu1 %v12619_v1  ;;  %8713 = vmatprep.subr.bf16.mxu0 %v12630_v31  ;;  %v12667_v1 = vld [vmem:[%s13820_s12 + $0x350] ss:$100 sps:$4 sm:$0xff]  }
 0x27a   : > { %8742 = vmatprep.subr.bf16.mxu1 %v12627_v29 }
 0x27b   : > { %v8391_v38 = vpop.f32.mrf.mxu0 }
 0x27c   : > { %8714 = vmatpush2.bf16.msra.mxu0 %v12628_v33  ;;  %v8392_v23 = vadd.f32 %v8391_v38, %v14543_v48  ;;  %v12673_v38 = vld [vmem:[%s13820_s12 + $0x288] ss:$100 sps:$4 sm:$0xff]  }
 0x27d   : > { %8743 = vmatpush2.bf16.msra.mxu1 %v12625_v32  ;;  %v8393_v44 = vpop.f32.mrf.mxu0  ;;  %8715 = vmatprep.subr.bf16.mxu0 %v12636_v37  ;;  %v12670_v37 = vld [vmem:[%s13820_s12 + $0x1228] ss:$100 sps:$4 sm:$0xff]  }
 0x27e   : > { %8744 = vmatprep.subr.bf16.mxu1 %v12633_v34  ;;  %v8394_v11 = vadd.f32 %v8393_v44, %v14547_v54  ;;  %v10069_v54 = vrot.slane %v14506_v13, %v14619_v24 }
 0x27f   : > { %v8395_v51 = vpop.f32.mrf.mxu0 }
 0x280   : > { %8716 = vmatpush2.bf16.msra.mxu0 %v12634_v42  ;;  %v12681_v42 = vld [vmem:[%s13820_s12 + $0x1c4] ss:$100 sps:$4 sm:$0xff]  }
 0x281   : > { %8745 = vmatpush2.bf16.msra.mxu1 %v12631_v39  ;;  %v8396_v61 = vpop.f32.mrf.mxu0  ;;  %8781 = vmatprep.subr.bf16.mxu0 %v12642_v47  ;;  %v12678_v39 = vld [vmem:[%s13820_s12 + $0x1164] ss:$100 sps:$4 sm:$0xff]  }
 0x282   : > { %8746 = vmatprep.subr.bf16.mxu1 %v12639_v43  ;;  %v12676_v51 = vld [vmem:[%s13820_s12 + $0x1160] ss:$100 sps:$4 sm:$0xff]   ;;  %v12682_v61 = vld [vmem:[%s13820_s12 + $0x1098] ss:$100 sps:$4 sm:$0xff]  }
 0x283   : > { %8718 = vmatmul.mubr.bf16.vlgmr.msra.gmra.mxu0 %v13918_v9  ;;  %v8473_v3 = vpop.f32.mrf.mxu0 }
 0x284   : > { %8782 = vmatpush1.bf16.msra.mxu0 %v12640_v57  ;;  %8799 = vmatprep.mubr.bf16.mxu0 %v13708_v16  ;;  %v12684_v57 = vld [vmem:[%s13820_s12 + $0x109c] ss:$100 sps:$4 sm:$0xff]  }
 0x285   : > { %8747 = vmatpush2.bf16.msra.mxu1 %v12637_v53  ;;  %v8475_v10 = vpop.f32.mrf.mxu0  ;;  %8808 = vmatprep.subr.bf16.mxu0 %v12651_v0  ;;  %v12679_v53 = vld [vmem:[%s13820_s12 + $0x1c0] ss:$100 sps:$4 sm:$0xff]   ;;  %v12685_v0 = vld [vmem:[%s13820_s12 + $0xf8] ss:$100 sps:$4 sm:$0xff]  }
 0x286   : > { %8748 = vmatprep.subr.bf16.mxu1 %v12645_v59  ;;  %v12687_v59 = vld [vmem:[%s13820_s12 + $0xfc] ss:$100 sps:$4 sm:$0xff]  }
 0x287   : > { %v8477_v25 = vpop.f32.mrf.mxu0 }
 0x288   : > { %v12699_v25 = vld [vmem:[%s13820_s12 + $0xbec] ss:$100 sps:$4 sm:$0xff]  }
 0x289   : > { %8749 = vmatpush2.bf16.msra.mxu1 %v12643_v6  ;;  %v8478_v41 = vpop.f32.mrf.mxu0  ;;  %v12693_v6 = vld [vmem:[%s13820_s12 + $0x34] ss:$100 sps:$4 sm:$0xff]  }
 0x28a   : > { %8750 = vmatprep.subr.bf16.mxu1 %v12648_v14  ;;  %v12691_v14 = vld [vmem:[%s13820_s12 + $0x30] ss:$100 sps:$4 sm:$0xff]   ;;  %v12697_v41 = vld [vmem:[%s13820_s12 + $0xbe8] ss:$100 sps:$4 sm:$0xff]  }
 0x28b   : > { %11619 = vmatmul.mubr.msk.bf16.vlgmr.msra.gmra.mxu0 %vm7820_vm0, %v13933_v19 }
 0x28c   : > { %8809 = vmatpush1.bf16.msra.mxu0 %v12649_v50  ;;  %8840 = vmatprep.mubr.bf16.mxu0 %v13883_v49  ;;  %v12694_v50 = vld [vmem:[%s13820_s12 + $0xf08] ss:$100 sps:$4 sm:$0xff]  }
 0x28d   : > { %8751 = vmatpush2.bf16.msra.mxu1 %v12646_v40  ;;  %8810 = vmatprep.subr.bf16.mxu0 %v12657_v56  ;;  %v12696_v40 = vld [vmem:[%s13820_s12 + $0xf0c] ss:$100 sps:$4 sm:$0xff]   ;;  %v12705_v56 = vld [vmem:[%s13820_s12 + $0xb24] ss:$100 sps:$4 sm:$0xff]  }
 0x28e   : > { %8752 = vmatprep.subr.bf16.mxu1 %v12654_v63  ;;  %v12702_v63 = vld [vmem:[%s13820_s12 + $0xe44] ss:$100 sps:$4 sm:$0xff]  }
 0x290   : > { %8811 = vmatpush1.bf16.msra.mxu0 %v12655_v30  ;;  %v12703_v30 = vld [vmem:[%s13820_s12 + $0xb20] ss:$100 sps:$4 sm:$0xff]  }
 0x291   : > { %8753 = vmatpush2.bf16.msra.mxu1 %v12652_v15  ;;  %8812 = vmatprep.subr.bf16.mxu0 %v12663_v18  ;;  %v12700_v15 = vld [vmem:[%s13820_s12 + $0xe40] ss:$100 sps:$4 sm:$0xff]  }
 0x292   : > { %8754 = vmatprep.subr.bf16.mxu1 %v12660_v17  ;;  %v12708_v17 = vld [vmem:[%s13820_s12 + $0xd7c] ss:$100 sps:$4 sm:$0xff]  }
 0x293   : > { %v12711_v18 = vld [vmem:[%s13820_s12 + $0xa5c] ss:$100 sps:$4 sm:$0xff]  }
 0x294   : > { %v8432_v35 = vpop.f32.mrf.mxu1  ;;  %8813 = vmatpush1.bf16.msra.mxu0 %v12661_v20  ;;  %v12709_v20 = vld [vmem:[%s13820_s12 + $0xa58] ss:$100 sps:$4 sm:$0xff]  }
 0x295   : > { %v8433_v26 = vadd.f32 %v8432_v35, %v8392_v23  ;;  %8755 = vmatpush2.bf16.msra.mxu1 %v12658_v45  ;;  %8814 = vmatprep.subr.bf16.mxu0 %v12669_v4  ;;  %v12706_v45 = vld [vmem:[%s13820_s12 + $0xd78] ss:$100 sps:$4 sm:$0xff]   ;;  %v12712_v23 = vld [vmem:[%s13820_s12 + $0xcb0] ss:$100 sps:$4 sm:$0xff]  }
 0x296   : > { %v8434_v29 = vpop.f32.mrf.mxu1  ;;  %8756 = vmatprep.subr.bf16.mxu1 %v12666_v22  ;;  %v12714_v22 = vld [vmem:[%s13820_s12 + $0xcb4] ss:$100 sps:$4 sm:$0xff]  }
 0x297   : > { %v8474_v48 = vadd.f32 %v8473_v3, %v8433_v26  ;;  %v8435_v31 = vadd.f32 %v8434_v29, %v8394_v11  ;;  %v12690_v3 = vld [vmem:[%s13820_s12 + $0xfd4] ss:$100 sps:$4 sm:$0xff]   ;;  %v12720_v11 = vld [vmem:[%s13820_s12 + $0x186c] ss:$100 sps:$4 sm:$0xff]   ;;  %v12724_v29 = vld [vmem:[%s13820_s12 + $0x17a0] ss:$100 sps:$4 sm:$0xff]  }
 0x298   : > { %v8436_v32 = vpop.f32.mrf.mxu1  ;;  %8815 = vmatpush1.bf16.msra.mxu0 %v12667_v1  ;;  %v12717_v4 = vld [vmem:[%s13820_s12 + $0x994] ss:$100 sps:$4 sm:$0xff]   ;;  %v12723_v26 = vld [vmem:[%s13820_s12 + $0x8cc] ss:$100 sps:$4 sm:$0xff]   ;;  %v12726_v1 = vld [vmem:[%s13820_s12 + $0x17a4] ss:$100 sps:$4 sm:$0xff]  }
 0x299   : > { %v10169_v33 = vadd.f32 %v10065_v27, %v8474_v48  ;;  %v8476_v34 = vadd.f32 %v8475_v10, %v8435_v31  ;;  %8757 = vmatpush2.bf16.msra.mxu1 %v12664_v60  ;;  %8816 = vmatprep.subr.bf16.mxu0 %v12675_v58  ;;  %v12688_v10 = vld [vmem:[%s13820_s12 + $0xfd0] ss:$100 sps:$4 sm:$0xff]   ;;  %v12718_v27 = vld [vmem:[%s13820_s12 + $0x1868] ss:$100 sps:$4 sm:$0xff]   ;;  %v12727_v58 = vld [vmem:[%s13820_s12 + $0x800] ss:$100 sps:$4 sm:$0xff]  }
 0x29a   : > { %8849 = vmatprep.subr.bf16.mxu1 %v12672_v28  ;;  %v8437_v43 = vpop.f32.mrf.mxu1  ;;  %v12715_v35 = vld [vmem:[%s13820_s12 + $0x990] ss:$100 sps:$4 sm:$0xff]   ;;  %v12721_v60 = vld [vmem:[%s13820_s12 + $0x8c8] ss:$100 sps:$4 sm:$0xff]   ;;  %v12732_v48 = vld [vmem:[%s13820_s12 + $0x16dc] ss:$100 sps:$4 sm:$0xff]  }
 0x29b   : > { %v10194_v44 = vmax.f32 %v10169_v33, 0.0  ;;  %v10170_v13 = vadd.f32 %v10069_v54, %v8476_v34  ;;  %v12729_v28 = vld [vmem:[%s13820_s12 + $0x804] ss:$100 sps:$4 sm:$0xff]   ;;  %v12735_v31 = vld [vmem:[%s13820_s12 + $0x73c] ss:$100 sps:$4 sm:$0xff]  }
 0x29c   : > { %8759 = vmatmul.mubr.bf16.vlgmr.msra.gmra.mxu1 %v14003_v21  ;;  %8817 = vmatpush1.bf16.msra.mxu0 %v12673_v38  ;;  %v12730_v54 = vld [vmem:[%s13820_s12 + $0x16d8] ss:$100 sps:$4 sm:$0xff]   ;;  %v12736_v38 = vld [vmem:[%s13820_s12 + $0x1610] ss:$100 sps:$4 sm:$0xff]  }
 0x29d   : > { %10219 = vst [vmem:[%s14264_s20 + $0x30] sm:$0xff] %v10194_v44  ;;  %v10195_v47 = vmax.f32 %v10170_v13, 0.0  ;;  %8850 = vmatpush1.bf16.msra.mxu1 %v12670_v37  ;;  %8818 = vmatprep.subr.bf16.mxu0 %v12681_v42  ;;  %v12733_v32 = vld [vmem:[%s13820_s12 + $0x738] ss:$100 sps:$4 sm:$0xff]   ;;  %v12744_v42 = vld [vmem:[%s13820_s12 + $0x154c] ss:$100 sps:$4 sm:$0xff]  }
 0x29e   : > { %8851 = vmatprep.subr.bf16.mxu1 %v12678_v39  ;;  %8881 = vmatprep.mubr.bf16.mxu1 %v13889_v52  ;;  %v12738_v33 = vld [vmem:[%s13820_s12 + $0x1614] ss:$100 sps:$4 sm:$0xff]   ;;  %v12747_v44 = vld [vmem:[%s13820_s12 + $0x1eac] ss:$100 sps:$4 sm:$0xff]  }
 0x29f   : > { %10220 = vst [vmem:[%s14264_s20 + $0x38] sm:$0xff] %v10195_v47  ;;  %v12741_v34 = vld [vmem:[%s13820_s12 + $0x674] ss:$100 sps:$4 sm:$0xff]   ;;  %v12742_v47 = vld [vmem:[%s13820_s12 + $0x1548] ss:$100 sps:$4 sm:$0xff]  }
 0x2a0   : > { %8819 = vmatpush1.bf16.msra.mxu0 %v12679_v53  ;;  %v12739_v39 = vld [vmem:[%s13820_s12 + $0x670] ss:$100 sps:$4 sm:$0xff]   ;;  %v12750_v53 = vld [vmem:[%s13820_s12 + $0x1484] ss:$100 sps:$4 sm:$0xff]  }
 0x2a1   : > { %8852 = vmatpush1.bf16.msra.mxu1 %v12676_v51  ;;  %8820 = vmatprep.subr.bf16.mxu0 %v12687_v59  ;;  %v12745_v51 = vld [vmem:[%s13820_s12 + $0x1ea8] ss:$100 sps:$4 sm:$0xff]  }
 0x2a2   : > { %8853 = vmatprep.subr.bf16.mxu1 %v12684_v57  ;;  %v12753_v59 = vld [vmem:[%s13820_s12 + $0x1de4] ss:$100 sps:$4 sm:$0xff]  }
 0x2a4   : > { %8821 = vmatpush1.bf16.msra.mxu0 %v12685_v0  ;;  %v12751_v0 = vld [vmem:[%s13820_s12 + $0x1de0] ss:$100 sps:$4 sm:$0xff]  }
 0x2a5   : > { %8854 = vmatpush1.bf16.msra.mxu1 %v12682_v61  ;;  %8822 = vmatprep.subr.bf16.mxu0 %v12693_v6  ;;  %v12748_v61 = vld [vmem:[%s13820_s12 + $0x1480] ss:$100 sps:$4 sm:$0xff]  }
 0x2a6   : > { %8855 = vmatprep.subr.bf16.mxu1 %v12690_v3  ;;  %v12756_v3 = vld [vmem:[%s13820_s12 + $0x13bc] ss:$100 sps:$4 sm:$0xff]  }
 0x2a7   : > { %v12759_v6 = vld [vmem:[%s13820_s12 + $0x1d1c] ss:$100 sps:$4 sm:$0xff]  }
 0x2a8   : > { %8823 = vmatpush1.bf16.msra.mxu0 %v12691_v14  ;;  %v12757_v14 = vld [vmem:[%s13820_s12 + $0x1d18] ss:$100 sps:$4 sm:$0xff]  }
 0x2a9   : > { %8856 = vmatpush1.bf16.msra.mxu1 %v12688_v10  ;;  %8824 = vmatprep.subr.bf16.mxu0 %v12699_v25  ;;  %v12754_v10 = vld [vmem:[%s13820_s12 + $0x13b8] ss:$100 sps:$4 sm:$0xff]  }
 0x2aa   : > { %8857 = vmatprep.subr.bf16.mxu1 %v12696_v40  ;;  %v12762_v40 = vld [vmem:[%s13820_s12 + $0x12f4] ss:$100 sps:$4 sm:$0xff]  }
 0x2ab   : > { %v12765_v25 = vld [vmem:[%s13820_s12 + $0x1c54] ss:$100 sps:$4 sm:$0xff]  }
 0x2ac   : > { %8825 = vmatpush2.bf16.msra.mxu0 %v12697_v41  ;;  %v12760_v41 = vld [vmem:[%s13820_s12 + $0x12f0] ss:$100 sps:$4 sm:$0xff]  }
 0x2ad   : > { %8858 = vmatpush1.bf16.msra.mxu1 %v12694_v50  ;;  %8826 = vmatprep.subr.bf16.mxu0 %v12705_v56  ;;  %v12768_v56 = vld [vmem:[%s13820_s12 + $0x1b8c] ss:$100 sps:$4 sm:$0xff]  }
 0x2ae   : > { %8859 = vmatprep.subr.bf16.mxu1 %v12702_v63  ;;  %v12763_v63 = vld [vmem:[%s13820_s12 + $0x1c50] ss:$100 sps:$4 sm:$0xff]  }
 0x2b0   : > { %8827 = vmatpush2.bf16.msra.mxu0 %v12703_v30 }
 0x2b1   : > { %8860 = vmatpush1.bf16.msra.mxu1 %v12700_v15  ;;  %8828 = vmatprep.subr.bf16.mxu0 %v12711_v18  ;;  %v12771_v15 = vld [vmem:[%s13820_s12 + $0x25b4] ss:$100 sps:$4 sm:$0xff]  }
 0x2b2   : > { %8861 = vmatprep.subr.bf16.mxu1 %v12708_v17  ;;  %v12766_v17 = vld [vmem:[%s13820_s12 + $0x1b88] ss:$100 sps:$4 sm:$0xff]  }
 0x2b4   : > { %8829 = vmatpush2.bf16.msra.mxu0 %v12709_v20  ;;  %v12774_v20 = vld [vmem:[%s13820_s12 + $0x1ac4] ss:$100 sps:$4 sm:$0xff]  }
 0x2b5   : > { %8862 = vmatpush1.bf16.msra.mxu1 %v12706_v45  ;;  %8830 = vmatprep.subr.bf16.mxu0 %v12717_v4  ;;  %v12769_v45 = vld [vmem:[%s13820_s12 + $0x25b0] ss:$100 sps:$4 sm:$0xff]  }
 0x2b6   : > { %8863 = vmatprep.subr.bf16.mxu1 %v12714_v22  ;;  %v12777_v22 = vld [vmem:[%s13820_s12 + $0x5b4] ss:$100 sps:$4 sm:$0xff]  }
 0x2b8   : > { %8831 = vmatpush2.bf16.msra.mxu0 %v12715_v35  ;;  %v12772_v35 = vld [vmem:[%s13820_s12 + $0x1ac0] ss:$100 sps:$4 sm:$0xff]  }
 0x2b9   : > { %8864 = vmatpush1.bf16.msra.mxu1 %v12712_v23  ;;  %8832 = vmatprep.subr.bf16.mxu0 %v12723_v26 }
 0x2ba   : > { %8865 = vmatprep.subr.bf16.mxu1 %v12720_v11  ;;  %v12780_v11 = vld [vmem:[%s13820_s12 + $0x19fc] ss:$100 sps:$4 sm:$0xff]  }
 0x2bc   : > { %8833 = vmatpush2.bf16.msra.mxu0 %v12721_v60  ;;  %v12778_v60 = vld [vmem:[%s13820_s12 + $0x19f8] ss:$100 sps:$4 sm:$0xff]  }
 0x2bd   : > { %8866 = vmatpush2.bf16.msra.mxu1 %v12718_v27  ;;  %8834 = vmatprep.subr.bf16.mxu0 %v12729_v28  ;;  %v12775_v27 = vld [vmem:[%s13820_s12 + $0x5b0] ss:$100 sps:$4 sm:$0xff]  }
 0x2be   : > { %8867 = vmatprep.subr.bf16.mxu1 %v12726_v1  ;;  %v12783_v28 = vld [vmem:[%s13820_s12 + $0x4ec] ss:$100 sps:$4 sm:$0xff]  }
 0x2c0   : > { %8835 = vmatpush2.bf16.msra.mxu0 %v12727_v58 }
 0x2c1   : > { %8868 = vmatpush2.bf16.msra.mxu1 %v12724_v29  ;;  %8836 = vmatprep.subr.bf16.mxu0 %v12735_v31  ;;  %v12786_v29 = vld [vmem:[%s13820_s12 + $0x1934] ss:$100 sps:$4 sm:$0xff]  }
 0x2c2   : > { %8869 = vmatprep.subr.bf16.mxu1 %v12732_v48  ;;  %v12781_v48 = vld [vmem:[%s13820_s12 + $0x4e8] ss:$100 sps:$4 sm:$0xff]   ;;  %v12784_v31 = vld [vmem:[%s13820_s12 + $0x1930] ss:$100 sps:$4 sm:$0xff]  }
 0x2c3   : > { %v14678_v37 = vpop.f32.mrf.mxu0 }
 0x2c4   : > { %8837 = vmatpush2.bf16.msra.mxu0 %v12733_v32  ;;  %v12792_v32 = vld [vmem:[%s13820_s12 + $0x24ec] ss:$100 sps:$4 sm:$0xff]  }
 0x2c5   : > { %8870 = vmatpush2.bf16.msra.mxu1 %v12730_v54  ;;  %v14683_v43 = vpop.f32.mrf.mxu0  ;;  %8838 = vmatprep.subr.bf16.mxu0 %v12741_v34  ;;  %v12789_v54 = vld [vmem:[%s13820_s12 + $0x424] ss:$100 sps:$4 sm:$0xff]  }
 0x2c6   : > { %8871 = vmatprep.subr.bf16.mxu1 %v12738_v33  ;;  %v12787_v33 = vld [vmem:[%s13820_s12 + $0x420] ss:$100 sps:$4 sm:$0xff]   ;;  %v12790_v34 = vld [vmem:[%s13820_s12 + $0x24e8] ss:$100 sps:$4 sm:$0xff]  }
 0x2c7   : > { %v8518_v13 = vpop.f32.mrf.mxu0 }
 0x2c8   : > { %8839 = vmatpush2.bf16.msra.mxu0 %v12739_v39  ;;  %v12798_v39 = vld [vmem:[%s13820_s12 + $0x2424] ss:$100 sps:$4 sm:$0xff]   ;;  %v12801_v13 = vld [vmem:[%s13820_s12 + $0x294] ss:$100 sps:$4 sm:$0xff]  }
 0x2c9   : > { %8872 = vmatpush2.bf16.msra.mxu1 %v12736_v38  ;;  %v8519_v57 = vpop.f32.mrf.mxu0  ;;  %8890 = vmatprep.subr.bf16.mxu0 %v12747_v44  ;;  %v12795_v38 = vld [vmem:[%s13820_s12 + $0x35c] ss:$100 sps:$4 sm:$0xff]  }
 0x2ca   : > { %8873 = vmatprep.subr.bf16.mxu1 %v12744_v42  ;;  %v12793_v42 = vld [vmem:[%s13820_s12 + $0x358] ss:$100 sps:$4 sm:$0xff]   ;;  %v12796_v44 = vld [vmem:[%s13820_s12 + $0x2420] ss:$100 sps:$4 sm:$0xff]   ;;  %v12807_v57 = vld [vmem:[%s13820_s12 + $0x1cc] ss:$100 sps:$4 sm:$0xff]  }
 0x2cb   : > { %8841 = vmatmul.mubr.bf16.vlgmr.msra.gmra.mxu0 %v13916_v8 }
 0x2cc   : > { %8891 = vmatpush1.bf16.msra.mxu0 %v12745_v51  ;;  %8922 = vmatprep.mubr.bf16.mxu0 %v13956_v36  ;;  %v12799_v51 = vld [vmem:[%s13820_s12 + $0x290] ss:$100 sps:$4 sm:$0xff]  }
 0x2cd   : > { %8874 = vmatpush2.bf16.msra.mxu1 %v12742_v47  ;;  %8892 = vmatprep.subr.bf16.mxu0 %v12753_v59  ;;  %v12804_v47 = vld [vmem:[%s13820_s12 + $0x235c] ss:$100 sps:$4 sm:$0xff]   ;;  %v12810_v59 = vld [vmem:[%s13820_s12 + $0x2294] ss:$100 sps:$4 sm:$0xff]  }
 0x2ce   : > { %8875 = vmatprep.subr.bf16.mxu1 %v12750_v53  ;;  %v12802_v53 = vld [vmem:[%s13820_s12 + $0x2358] ss:$100 sps:$4 sm:$0xff]  }
 0x2d0   : > { %8893 = vmatpush1.bf16.msra.mxu0 %v12751_v0  ;;  %v12808_v0 = vld [vmem:[%s13820_s12 + $0x2290] ss:$100 sps:$4 sm:$0xff]  }
 0x2d1   : > { %8876 = vmatpush2.bf16.msra.mxu1 %v12748_v61  ;;  %8894 = vmatprep.subr.bf16.mxu0 %v12759_v6  ;;  %v12805_v61 = vld [vmem:[%s13820_s12 + $0x1c8] ss:$100 sps:$4 sm:$0xff]  }
 0x2d2   : > { %8877 = vmatprep.subr.bf16.mxu1 %v12756_v3  ;;  %v12813_v3 = vld [vmem:[%s13820_s12 + $0x104] ss:$100 sps:$4 sm:$0xff]   ;;  %v12816_v6 = vld [vmem:[%s13820_s12 + $0x21cc] ss:$100 sps:$4 sm:$0xff]  }
 0x2d4   : > { %v14700_v50 = vpop.f32.mrf.mxu1  ;;  %8895 = vmatpush1.bf16.msra.mxu0 %v12757_v14  ;;  %v12814_v14 = vld [vmem:[%s13820_s12 + $0x21c8] ss:$100 sps:$4 sm:$0xff]  }
 0x2d5   : > { %8878 = vmatpush2.bf16.msra.mxu1 %v12754_v10  ;;  %8896 = vmatprep.subr.bf16.mxu0 %v12765_v25  ;;  %v12811_v10 = vld [vmem:[%s13820_s12 + $0x100] ss:$100 sps:$4 sm:$0xff]  }
 0x2d6   : > { %v14706_v30 = vpop.f32.mrf.mxu1  ;;  %8879 = vmatprep.subr.bf16.mxu1 %v12762_v40  ;;  %v12819_v40 = vld [vmem:[%s13820_s12 + $0x3c] ss:$100 sps:$4 sm:$0xff]   ;;  %v12822_v25 = vld [vmem:[%s13820_s12 + $0x2104] ss:$100 sps:$4 sm:$0xff]  }
 0x2d8   : > { %v8559_v18 = vpop.f32.mrf.mxu1  ;;  %8897 = vmatpush1.bf16.msra.mxu0 %v12763_v63  ;;  %v12820_v63 = vld [vmem:[%s13820_s12 + $0x2100] ss:$100 sps:$4 sm:$0xff]  }
 0x2d9   : > { %8880 = vmatpush2.bf16.msra.mxu1 %v12760_v41  ;;  %8898 = vmatprep.subr.bf16.mxu0 %v12768_v56  ;;  %v12817_v41 = vld [vmem:[%s13820_s12 + $0x38] ss:$100 sps:$4 sm:$0xff]  }
 0x2da   : > { %8945 = vmatprep.subr.bf16.mxu1 %v12771_v15  ;;  %v8560_v4 = vpop.f32.mrf.mxu1  ;;  %v12825_v56 = vld [vmem:[%s13820_s12 + $0xbf4] ss:$100 sps:$4 sm:$0xff]   ;;  %v12828_v15 = vld [vmem:[%s13820_s12 + $0x203c] ss:$100 sps:$4 sm:$0xff]  }
 0x2db   : > { %v12826_v18 = vld [vmem:[%s13820_s12 + $0x2038] ss:$100 sps:$4 sm:$0xff]   ;;  %v8556_v4 = vadd.f32 %v14700_v50, %v14678_v37 }
 0x2dc   : > { %8882 = vmatmul.mubr.bf16.vlgmr.msra.gmra.mxu1 %v13918_v9  ;;  %v14713_v23 = vpop.f32.mrf.mxu1  ;;  %8899 = vmatpush1.bf16.msra.mxu0 %v12766_v17  ;;  %v12823_v17 = vld [vmem:[%s13820_s12 + $0xbf0] ss:$100 sps:$4 sm:$0xff]  }
 0x2dd   : > { %8946 = vmatpush1.bf16.msra.mxu1 %v12769_v45  ;;  %8900 = vmatprep.subr.bf16.mxu0 %v12774_v20  ;;  %v14758_v45 = vld [vmem:[%s13826_s30 + $0x8] sm:$0xff] }
 0x2de   : > { %8963 = vmatprep.mubr.bf16.mxu1 %v13708_v16  ;;  %v14718_v26 = vpop.f32.mrf.mxu1  ;;  %8972 = vmatprep.subr.bf16.mxu1 %v12777_v22  ;;  %v12831_v20 = vld [vmem:[%s13820_s12 + $0xb2c] ss:$100 sps:$4 sm:$0xff]   ;;  %v12834_v22 = vld [vmem:[%s13820_s12 + $0x1f74] ss:$100 sps:$4 sm:$0xff]  }
 0x2df   : > { %v12840_v37 = vld [vmem:[%s13820_s12 + $0x1234] ss:$100 sps:$4 sm:$0xff]  }
 0x2e0   : > { %v8641_v1 = vpop.f32.mrf.mxu1  ;;  %8901 = vmatpush1.bf16.msra.mxu0 %v12772_v35 }
 0x2e1   : > { %8902 = vmatprep.subr.bf16.mxu0 %v12780_v11  ;;  %v8558_v11 = vadd.f32 %v14706_v30, %v14683_v43  ;;  %v12829_v1 = vld [vmem:[%s13820_s12 + $0xb28] ss:$100 sps:$4 sm:$0xff]   ;;  %v10077_v30 = vrot.slane %v14758_v45, %v14240_v7 }
 0x2e2   : > { %v8642_v58 = vpop.f32.mrf.mxu1 }
 0x2e3   : > { %v12837_v58 = vld [vmem:[%s13820_s12 + $0xa64] ss:$100 sps:$4 sm:$0xff]  }
 0x2e4   : > { %11620 = vmatmul.mubr.msk.bf16.vlgmr.msra.gmra.mxu1 %vm7820_vm0, %v13933_v19  ;;  %8903 = vmatpush1.bf16.msra.mxu0 %v12778_v60  ;;  %v10073_v60 = vrot.slane %v14758_v45, %v14230_v2 }
 0x2e5   : > { %8973 = vmatpush1.bf16.msra.mxu1 %v12775_v27  ;;  %8904 = vmatprep.subr.bf16.mxu0 %v12786_v29 }
 0x2e6   : > { %8974 = vmatprep.subr.bf16.mxu1 %v12783_v28  ;;  %9004 = vmatprep.mubr.bf16.mxu1 %v13883_v49  ;;  %v12832_v28 = vld [vmem:[%s13820_s12 + $0x1f70] ss:$100 sps:$4 sm:$0xff]  }
 0x2e8   : > { %8905 = vmatpush1.bf16.msra.mxu0 %v12784_v31 }
 0x2e9   : > { %8975 = vmatpush1.bf16.msra.mxu1 %v12781_v48  ;;  %8906 = vmatprep.subr.bf16.mxu0 %v12792_v32  ;;  %v12835_v32 = vld [vmem:[%s13820_s12 + $0xa60] ss:$100 sps:$4 sm:$0xff]  }
 0x2ea   : > { %8976 = vmatprep.subr.bf16.mxu1 %v12789_v54 }
 0x2ec   : > { %8907 = vmatpush2.bf16.msra.mxu0 %v12790_v34 }
 0x2ed   : > { %8977 = vmatpush1.bf16.msra.mxu1 %v12787_v33  ;;  %8908 = vmatprep.subr.bf16.mxu0 %v12798_v39  ;;  %v12838_v33 = vld [vmem:[%s13820_s12 + $0x1230] ss:$100 sps:$4 sm:$0xff]  }
 0x2ee   : > { %8978 = vmatprep.subr.bf16.mxu1 %v12795_v38  ;;  %v12846_v38 = vld [vmem:[%s13820_s12 + $0x116c] ss:$100 sps:$4 sm:$0xff]  }
 0x2f0   : > { %8909 = vmatpush2.bf16.msra.mxu0 %v12796_v44  ;;  %v12841_v44 = vld [vmem:[%s13820_s12 + $0x998] ss:$100 sps:$4 sm:$0xff]  }
 0x2f1   : > { %8979 = vmatpush1.bf16.msra.mxu1 %v12793_v42  ;;  %8910 = vmatprep.subr.bf16.mxu0 %v12804_v47  ;;  %v12849_v47 = vld [vmem:[%s13820_s12 + $0x8d4] ss:$100 sps:$4 sm:$0xff]  }
 0x2f2   : > { %8980 = vmatprep.subr.bf16.mxu1 %v12801_v13  ;;  %v12844_v13 = vld [vmem:[%s13820_s12 + $0x1168] ss:$100 sps:$4 sm:$0xff]  }
 0x2f4   : > { %8911 = vmatpush2.bf16.msra.mxu0 %v12802_v53  ;;  %v12847_v53 = vld [vmem:[%s13820_s12 + $0x8d0] ss:$100 sps:$4 sm:$0xff]  }
 0x2f5   : > { %8981 = vmatpush1.bf16.msra.mxu1 %v12799_v51  ;;  %8912 = vmatprep.subr.bf16.mxu0 %v12810_v59  ;;  %v12852_v51 = vld [vmem:[%s13820_s12 + $0x10a4] ss:$100 sps:$4 sm:$0xff]   ;;  %v12855_v59 = vld [vmem:[%s13820_s12 + $0x80c] ss:$100 sps:$4 sm:$0xff]  }
 0x2f6   : > { %8982 = vmatprep.subr.bf16.mxu1 %v12807_v57  ;;  %v12850_v57 = vld [vmem:[%s13820_s12 + $0x10a0] ss:$100 sps:$4 sm:$0xff]  }
 0x2f8   : > { %8913 = vmatpush2.bf16.msra.mxu0 %v12808_v0  ;;  %v12853_v0 = vld [vmem:[%s13820_s12 + $0x808] ss:$100 sps:$4 sm:$0xff]  }
 0x2f9   : > { %8983 = vmatpush1.bf16.msra.mxu1 %v12805_v61  ;;  %8914 = vmatprep.subr.bf16.mxu0 %v12816_v6  ;;  %v12858_v61 = vld [vmem:[%s13820_s12 + $0xfdc] ss:$100 sps:$4 sm:$0xff]   ;;  %v12861_v6 = vld [vmem:[%s13820_s12 + $0x744] ss:$100 sps:$4 sm:$0xff]  }
 0x2fa   : > { %8984 = vmatprep.subr.bf16.mxu1 %v12813_v3  ;;  %v12856_v3 = vld [vmem:[%s13820_s12 + $0xfd8] ss:$100 sps:$4 sm:$0xff]  }
 0x2fc   : > { %8915 = vmatpush2.bf16.msra.mxu0 %v12814_v14  ;;  %v12859_v14 = vld [vmem:[%s13820_s12 + $0x740] ss:$100 sps:$4 sm:$0xff]  }
 0x2fd   : > { %8985 = vmatpush1.bf16.msra.mxu1 %v12811_v10  ;;  %8916 = vmatprep.subr.bf16.mxu0 %v12822_v25  ;;  %v12864_v10 = vld [vmem:[%s13820_s12 + $0xf14] ss:$100 sps:$4 sm:$0xff]   ;;  %v12867_v25 = vld [vmem:[%s13820_s12 + $0x67c] ss:$100 sps:$4 sm:$0xff]  }
 0x2fe   : > { %8986 = vmatprep.subr.bf16.mxu1 %v12819_v40  ;;  %v12862_v40 = vld [vmem:[%s13820_s12 + $0xf10] ss:$100 sps:$4 sm:$0xff]  }
 0x300   : > { %8917 = vmatpush2.bf16.msra.mxu0 %v12820_v63 }
 0x301   : > { %8987 = vmatpush1.bf16.msra.mxu1 %v12817_v41  ;;  %8918 = vmatprep.subr.bf16.mxu0 %v12828_v15  ;;  %v12870_v41 = vld [vmem:[%s13820_s12 + $0xe4c] ss:$100 sps:$4 sm:$0xff]  }
 0x302   : > { %8988 = vmatprep.subr.bf16.mxu1 %v12825_v56  ;;  %v12865_v56 = vld [vmem:[%s13820_s12 + $0x678] ss:$100 sps:$4 sm:$0xff]   ;;  %v12868_v15 = vld [vmem:[%s13820_s12 + $0xe48] ss:$100 sps:$4 sm:$0xff]  }
 0x303   : > { %v8596_v35 = vpop.f32.mrf.mxu0 }
 0x304   : > { %v8597_v27 = vadd.f32 %v8596_v35, %v8556_v4  ;;  %8919 = vmatpush2.bf16.msra.mxu0 %v12826_v18  ;;  %v12876_v18 = vld [vmem:[%s13820_s12 + $0xd84] ss:$100 sps:$4 sm:$0xff]   ;;  %v12871_v4 = vld [vmem:[%s13820_s12 + $0x1eb0] ss:$100 sps:$4 sm:$0xff]  }
 0x305   : > { %8989 = vmatpush2.bf16.msra.mxu1 %v12823_v17  ;;  %v8598_v29 = vpop.f32.mrf.mxu0  ;;  %8920 = vmatprep.subr.bf16.mxu0 %v12834_v22  ;;  %v12873_v17 = vld [vmem:[%s13820_s12 + $0x1eb4] ss:$100 sps:$4 sm:$0xff]   ;;  %v12874_v35 = vld [vmem:[%s13820_s12 + $0xd80] ss:$100 sps:$4 sm:$0xff]  }
 0x306   : > { %8990 = vmatprep.subr.bf16.mxu1 %v12831_v20  ;;  %v8638_v50 = vadd.f32 %v14713_v23, %v8597_v27  ;;  %v8599_v43 = vadd.f32 %v8598_v29, %v8558_v11  ;;  %v12843_v23 = vld [vmem:[%s13820_s12 + $0x99c] ss:$100 sps:$4 sm:$0xff]   ;;  %v12879_v11 = vld [vmem:[%s13820_s12 + $0x1dec] ss:$100 sps:$4 sm:$0xff]   ;;  %v12885_v29 = vld [vmem:[%s13820_s12 + $0x1d24] ss:$100 sps:$4 sm:$0xff]  }
 0x307   : > { %v8600_v48 = vpop.f32.mrf.mxu0  ;;  %v12882_v27 = vld [vmem:[%s13820_s12 + $0xcbc] ss:$100 sps:$4 sm:$0xff]  }
 0x308   : > { %v10171_v31 = vadd.f32 %v10073_v60, %v8638_v50  ;;  %v8640_v54 = vadd.f32 %v14718_v26, %v8599_v43  ;;  %8921 = vmatpush2.bf16.msra.mxu0 %v12832_v28  ;;  %v12880_v28 = vld [vmem:[%s13820_s12 + $0xcb8] ss:$100 sps:$4 sm:$0xff]   ;;  %v12886_v50 = vld [vmem:[%s13820_s12 + $0x1870] ss:$100 sps:$4 sm:$0xff]  }
 0x309   : > { %8991 = vmatpush2.bf16.msra.mxu1 %v12829_v1  ;;  %v8601_v34 = vpop.f32.mrf.mxu0  ;;  %9013 = vmatprep.subr.bf16.mxu0 %v12840_v37  ;;  %v12877_v1 = vld [vmem:[%s13820_s12 + $0x1de8] ss:$100 sps:$4 sm:$0xff]   ;;  %v12883_v37 = vld [vmem:[%s13820_s12 + $0x1d20] ss:$100 sps:$4 sm:$0xff]   ;;  %v12889_v48 = vld [vmem:[%s13820_s12 + $0x1c58] ss:$100 sps:$4 sm:$0xff]  }
 0x30a   : > { %8992 = vmatprep.subr.bf16.mxu1 %v12837_v58  ;;  %v10196_v39 = vmax.f32 %v10171_v31, 0.0  ;;  %v10172_v42 = vadd.f32 %v10077_v30, %v8640_v54  ;;  %v12888_v58 = vld [vmem:[%s13820_s12 + $0x1874] ss:$100 sps:$4 sm:$0xff]   ;;  %v12891_v43 = vld [vmem:[%s13820_s12 + $0x1c5c] ss:$100 sps:$4 sm:$0xff]  }
 0x30b   : > { %8923 = vmatmul.mubr.bf16.vlgmr.msra.gmra.mxu0 %v14003_v21  ;;  %v12894_v30 = vld [vmem:[%s13820_s12 + $0x17ac] ss:$100 sps:$4 sm:$0xff]   ;;  %v12897_v54 = vld [vmem:[%s13820_s12 + $0x1b94] ss:$100 sps:$4 sm:$0xff]   ;;  %v12898_v34 = vld [vmem:[%s13820_s12 + $0x16e0] ss:$100 sps:$4 sm:$0xff]  }
 0x30c   : > { %10221 = vst [vmem:[%s14264_s20 + $0x40] sm:$0xff] %v10196_v39  ;;  %v10197_v26 = vmax.f32 %v10172_v42, 0.0  ;;  %9014 = vmatpush1.bf16.msra.mxu0 %v12838_v33  ;;  %9045 = vmatprep.mubr.bf16.mxu0 %v13889_v52  ;;  %v12892_v31 = vld [vmem:[%s13820_s12 + $0x17a8] ss:$100 sps:$4 sm:$0xff]   ;;  %v12895_v33 = vld [vmem:[%s13820_s12 + $0x1b90] ss:$100 sps:$4 sm:$0xff]  }
 0x30d   : > { %8993 = vmatpush2.bf16.msra.mxu1 %v12835_v32  ;;  %9015 = vmatprep.subr.bf16.mxu0 %v12846_v38  ;;  %v12900_v32 = vld [vmem:[%s13820_s12 + $0x16e4] ss:$100 sps:$4 sm:$0xff]   ;;  %v12906_v38 = vld [vmem:[%s13820_s12 + $0x161c] ss:$100 sps:$4 sm:$0xff]  }
 0x30e   : > { %8994 = vmatprep.subr.bf16.mxu1 %v12843_v23  ;;  %10222 = vst [vmem:[%s14264_s20 + $0x48] sm:$0xff] %v10197_v26  ;;  %v12903_v23 = vld [vmem:[%s13820_s12 + $0x1acc] ss:$100 sps:$4 sm:$0xff]   ;;  %v12904_v42 = vld [vmem:[%s13820_s12 + $0x1618] ss:$100 sps:$4 sm:$0xff]  }
 0x30f   : > { %v12901_v39 = vld [vmem:[%s13820_s12 + $0x1ac8] ss:$100 sps:$4 sm:$0xff]  }
 0x310   : > { %9016 = vmatpush1.bf16.msra.mxu0 %v12844_v13  ;;  %v12909_v26 = vld [vmem:[%s13820_s12 + $0x1a04] ss:$100 sps:$4 sm:$0xff]  }
 0x311   : > { %8995 = vmatpush2.bf16.msra.mxu1 %v12841_v44  ;;  %9017 = vmatprep.subr.bf16.mxu0 %v12852_v51  ;;  %v12912_v44 = vld [vmem:[%s13820_s12 + $0x1554] ss:$100 sps:$4 sm:$0xff]   ;;  %v12907_v13 = vld [vmem:[%s13820_s12 + $0x1a00] ss:$100 sps:$4 sm:$0xff]  }
 0x312   : > { %8996 = vmatprep.subr.bf16.mxu1 %v12849_v47  ;;  %v12910_v47 = vld [vmem:[%s13820_s12 + $0x1550] ss:$100 sps:$4 sm:$0xff]   ;;  %v12915_v51 = vld [vmem:[%s13820_s12 + $0x193c] ss:$100 sps:$4 sm:$0xff]  }
 0x314   : > { %9018 = vmatpush1.bf16.msra.mxu0 %v12850_v57  ;;  %v12913_v57 = vld [vmem:[%s13820_s12 + $0x1938] ss:$100 sps:$4 sm:$0xff]  }
 0x315   : > { %8997 = vmatpush2.bf16.msra.mxu1 %v12847_v53  ;;  %9019 = vmatprep.subr.bf16.mxu0 %v12858_v61  ;;  %v12918_v53 = vld [vmem:[%s13820_s12 + $0x148c] ss:$100 sps:$4 sm:$0xff]   ;;  %v12921_v61 = vld [vmem:[%s13820_s12 + $0x24f4] ss:$100 sps:$4 sm:$0xff]  }
 0x316   : > { %8998 = vmatprep.subr.bf16.mxu1 %v12855_v59  ;;  %v12916_v59 = vld [vmem:[%s13820_s12 + $0x1488] ss:$100 sps:$4 sm:$0xff]  }
 0x318   : > { %9020 = vmatpush1.bf16.msra.mxu0 %v12856_v3  ;;  %v12919_v3 = vld [vmem:[%s13820_s12 + $0x24f0] ss:$100 sps:$4 sm:$0xff]  }
 0x319   : > { %8999 = vmatpush2.bf16.msra.mxu1 %v12853_v0  ;;  %9021 = vmatprep.subr.bf16.mxu0 %v12864_v10  ;;  %v12924_v0 = vld [vmem:[%s13820_s12 + $0x13c4] ss:$100 sps:$4 sm:$0xff]   ;;  %v12927_v10 = vld [vmem:[%s13820_s12 + $0x242c] ss:$100 sps:$4 sm:$0xff]  }
 0x31a   : > { %9000 = vmatprep.subr.bf16.mxu1 %v12861_v6  ;;  %v12922_v6 = vld [vmem:[%s13820_s12 + $0x13c0] ss:$100 sps:$4 sm:$0xff]  }
 0x31c   : > { %v14800_v63 = vpop.f32.mrf.mxu1  ;;  %9022 = vmatpush1.bf16.msra.mxu0 %v12862_v40 }
 0x31d   : > { %9001 = vmatpush2.bf16.msra.mxu1 %v12859_v14  ;;  %9023 = vmatprep.subr.bf16.mxu0 %v12870_v41  ;;  %v12930_v14 = vld [vmem:[%s13820_s12 + $0x12fc] ss:$100 sps:$4 sm:$0xff]  }
 0x31e   : > { %9002 = vmatprep.subr.bf16.mxu1 %v12867_v25  ;;  %v14806_v20 = vpop.f32.mrf.mxu1  ;;  %v12925_v25 = vld [vmem:[%s13820_s12 + $0x2428] ss:$100 sps:$4 sm:$0xff]   ;;  %v12928_v41 = vld [vmem:[%s13820_s12 + $0x12f8] ss:$100 sps:$4 sm:$0xff]  }
 0x320   : > { %v8682_v22 = vpop.f32.mrf.mxu1  ;;  %9024 = vmatpush1.bf16.msra.mxu0 %v12868_v15  ;;  %v12933_v15 = vld [vmem:[%s13820_s12 + $0x2364] ss:$100 sps:$4 sm:$0xff]  }
 0x321   : > { %9003 = vmatpush2.bf16.msra.mxu1 %v12865_v56  ;;  %9025 = vmatprep.subr.bf16.mxu0 %v12876_v18  ;;  %v12931_v22 = vld [vmem:[%s13820_s12 + $0x2360] ss:$100 sps:$4 sm:$0xff]  }
 0x322   : > { %9054 = vmatprep.subr.bf16.mxu1 %v12873_v17  ;;  %v8683_v60 = vpop.f32.mrf.mxu1  ;;  %v12936_v17 = vld [vmem:[%s13820_s12 + $0x25bc] ss:$100 sps:$4 sm:$0xff]  }
 0x324   : > { %9005 = vmatmul.mubr.bf16.vlgmr.msra.gmra.mxu1 %v13916_v8  ;;  %9026 = vmatpush1.bf16.msra.mxu0 %v12874_v35 }
 0x325   : > { %9055 = vmatpush1.bf16.msra.mxu1 %v12871_v4  ;;  %9027 = vmatprep.subr.bf16.mxu0 %v12882_v27  ;;  %v12934_v4 = vld [vmem:[%s13820_s12 + $0x25b8] ss:$100 sps:$4 sm:$0xff]  }
 0x326   : > { %9056 = vmatprep.subr.bf16.mxu1 %v12879_v11  ;;  %9086 = vmatprep.mubr.bf16.mxu1 %v13956_v36  ;;  %v12939_v11 = vld [vmem:[%s13820_s12 + $0x229c] ss:$100 sps:$4 sm:$0xff]  }
 0x327   : > { %v12945_v27 = vld [vmem:[%s13820_s12 + $0x5bc] ss:$100 sps:$4 sm:$0xff]  }
 0x328   : > { %9028 = vmatpush1.bf16.msra.mxu0 %v12880_v28 }
 0x329   : > { %9057 = vmatpush1.bf16.msra.mxu1 %v12877_v1  ;;  %9029 = vmatprep.subr.bf16.mxu0 %v12888_v58  ;;  %v12937_v1 = vld [vmem:[%s13820_s12 + $0x2298] ss:$100 sps:$4 sm:$0xff]  }
 0x32a   : > { %9058 = vmatprep.subr.bf16.mxu1 %v12885_v29  ;;  %v12942_v29 = vld [vmem:[%s13820_s12 + $0x21d4] ss:$100 sps:$4 sm:$0xff]  }
 0x32c   : > { %9030 = vmatpush2.bf16.msra.mxu0 %v12886_v50  ;;  %v12943_v50 = vld [vmem:[%s13820_s12 + $0x5b8] ss:$100 sps:$4 sm:$0xff]  }
 0x32d   : > { %9059 = vmatpush1.bf16.msra.mxu1 %v12883_v37  ;;  %9031 = vmatprep.subr.bf16.mxu0 %v12894_v30  ;;  %v12940_v37 = vld [vmem:[%s13820_s12 + $0x21d0] ss:$100 sps:$4 sm:$0xff]  }
 0x32e   : > { %9060 = vmatprep.subr.bf16.mxu1 %v12891_v43  ;;  %v12948_v30 = vld [vmem:[%s13820_s12 + $0x210c] ss:$100 sps:$4 sm:$0xff]  }
 0x330   : > { %9032 = vmatpush2.bf16.msra.mxu0 %v12892_v31  ;;  %v12946_v31 = vld [vmem:[%s13820_s12 + $0x2108] ss:$100 sps:$4 sm:$0xff]  }
 0x331   : > { %9061 = vmatpush1.bf16.msra.mxu1 %v12889_v48  ;;  %9033 = vmatprep.subr.bf16.mxu0 %v12900_v32  ;;  %v12951_v48 = vld [vmem:[%s13820_s12 + $0x4f4] ss:$100 sps:$4 sm:$0xff]   ;;  %v12954_v32 = vld [vmem:[%s13820_s12 + $0x2044] ss:$100 sps:$4 sm:$0xff]  }
 0x332   : > { %9062 = vmatprep.subr.bf16.mxu1 %v12897_v54  ;;  %v12949_v54 = vld [vmem:[%s13820_s12 + $0x4f0] ss:$100 sps:$4 sm:$0xff]  }
 0x334   : > { %9034 = vmatpush2.bf16.msra.mxu0 %v12898_v34  ;;  %v12952_v34 = vld [vmem:[%s13820_s12 + $0x2040] ss:$100 sps:$4 sm:$0xff]  }
 0x335   : > { %9063 = vmatpush1.bf16.msra.mxu1 %v12895_v33  ;;  %9035 = vmatprep.subr.bf16.mxu0 %v12906_v38  ;;  %v12957_v33 = vld [vmem:[%s13820_s12 + $0x42c] ss:$100 sps:$4 sm:$0xff]   ;;  %v12960_v38 = vld [vmem:[%s13820_s12 + $0x1f7c] ss:$100 sps:$4 sm:$0xff]  }
 0x336   : > { %9064 = vmatprep.subr.bf16.mxu1 %v12903_v23  ;;  %v12955_v23 = vld [vmem:[%s13820_s12 + $0x428] ss:$100 sps:$4 sm:$0xff]  }
 0x338   : > { %9036 = vmatpush2.bf16.msra.mxu0 %v12904_v42 }
 0x339   : > { %9065 = vmatpush1.bf16.msra.mxu1 %v12901_v39  ;;  %9037 = vmatprep.subr.bf16.mxu0 %v12912_v44  ;;  %v12963_v39 = vld [vmem:[%s13820_s12 + $0x364] ss:$100 sps:$4 sm:$0xff]  }
 0x33a   : > { %9066 = vmatprep.subr.bf16.mxu1 %v12909_v26 }
 0x33c   : > { %9038 = vmatpush2.bf16.msra.mxu0 %v12910_v47  ;;  %v10081_v47 = vrot.slane %v14758_v45, %v14346_v5 }
 0x33d   : > { %9067 = vmatpush1.bf16.msra.mxu1 %v12907_v13  ;;  %9039 = vmatprep.subr.bf16.mxu0 %v12918_v53  ;;  %v12961_v53 = vld [vmem:[%s13820_s12 + $0x360] ss:$100 sps:$4 sm:$0xff]  }
 0x33e   : > { %9068 = vmatprep.subr.bf16.mxu1 %v12915_v51  ;;  %v12958_v51 = vld [vmem:[%s13820_s12 + $0x1f78] ss:$100 sps:$4 sm:$0xff]  }
 0x340   : > { %9040 = vmatpush2.bf16.msra.mxu0 %v12916_v59  ;;  %v12966_v59 = vld [vmem:[%s13820_s12 + $0x123c] ss:$100 sps:$4 sm:$0xff]  }
 0x341   : > { %9069 = vmatpush1.bf16.msra.mxu1 %v12913_v57  ;;  %9041 = vmatprep.subr.bf16.mxu0 %v12924_v0 }
 0x342   : > { %9070 = vmatprep.subr.bf16.mxu1 %v12921_v61 }
 0x343   : > { %v8719_v40 = vpop.f32.mrf.mxu0 }
 0x344   : > { %9042 = vmatpush2.bf16.msra.mxu0 %v12922_v6  ;;  %v8720_v42 = vadd.f32 %v8719_v40, %v14800_v63  ;;  %v12969_v63 = vld [vmem:[%s13820_s12 + $0x29c] ss:$100 sps:$4 sm:$0xff]  }
 0x345   : > { %9071 = vmatpush2.bf16.msra.mxu1 %v12919_v3  ;;  %v8721_v56 = vpop.f32.mrf.mxu0  ;;  %9043 = vmatprep.subr.bf16.mxu0 %v12930_v14  ;;  %v12964_v14 = vld [vmem:[%s13820_s12 + $0x1238] ss:$100 sps:$4 sm:$0xff]  }
 0x346   : > { %9072 = vmatprep.subr.bf16.mxu1 %v12927_v10  ;;  %v8722_v44 = vadd.f32 %v8721_v56, %v14806_v20  ;;  %v10085_v20 = vrot.slane %v14758_v45, %v14352_v12  ;;  %v12967_v40 = vld [vmem:[%s13820_s12 + $0x298] ss:$100 sps:$4 sm:$0xff]  }
 0x347   : > { %v8723_v18 = vpop.f32.mrf.mxu0 }
 0x348   : > { %9044 = vmatpush2.bf16.msra.mxu0 %v12928_v41  ;;  %v12975_v41 = vld [vmem:[%s13820_s12 + $0x1d4] ss:$100 sps:$4 sm:$0xff]  }
 0x349   : > { %9073 = vmatpush2.bf16.msra.mxu1 %v12925_v25  ;;  %v8724_v35 = vpop.f32.mrf.mxu0  ;;  %9109 = vmatprep.subr.bf16.mxu0 %v12936_v17  ;;  %v12972_v25 = vld [vmem:[%s13820_s12 + $0x1174] ss:$100 sps:$4 sm:$0xff]  }
 0x34a   : > { %9074 = vmatprep.subr.bf16.mxu1 %v12933_v15  ;;  %v12978_v35 = vld [vmem:[%s13820_s12 + $0x10ac] ss:$100 sps:$4 sm:$0xff]  }
 0x34b   : > { %9046 = vmatmul.mubr.bf16.vlgmr.msra.gmra.mxu0 %v13918_v9  ;;  %v8801_v60 = vpop.f32.mrf.mxu0 }
 0x34c   : > { %9110 = vmatpush1.bf16.msra.mxu0 %v12934_v4  ;;  %9127 = vmatprep.mubr.bf16.mxu0 %v13708_v16  ;;  %v12973_v4 = vld [vmem:[%s13820_s12 + $0x1d0] ss:$100 sps:$4 sm:$0xff]  }
 0x34d   : > { %9075 = vmatpush2.bf16.msra.mxu1 %v12931_v22  ;;  %v8803_v28 = vpop.f32.mrf.mxu0  ;;  %9136 = vmatprep.subr.bf16.mxu0 %v12945_v27  ;;  %v12970_v22 = vld [vmem:[%s13820_s12 + $0x1170] ss:$100 sps:$4 sm:$0xff]   ;;  %v12976_v27 = vld [vmem:[%s13820_s12 + $0x10a8] ss:$100 sps:$4 sm:$0xff]  }
 0x34e   : > { %9076 = vmatprep.subr.bf16.mxu1 %v12939_v11  ;;  %v12981_v11 = vld [vmem:[%s13820_s12 + $0x10c] ss:$100 sps:$4 sm:$0xff]  }
 0x34f   : > { %v8805_v58 = vpop.f32.mrf.mxu0 }
 0x350   : > { %v12985_v58 = vld [vmem:[%s13820_s12 + $0x40] ss:$100 sps:$4 sm:$0xff]  }
 0x351   : > { %9077 = vmatpush2.bf16.msra.mxu1 %v12937_v1  ;;  %v8806_v43 = vpop.f32.mrf.mxu0  ;;  %v12984_v1 = vld [vmem:[%s13820_s12 + $0xfe4] ss:$100 sps:$4 sm:$0xff]  }
 0x352   : > { %9078 = vmatprep.subr.bf16.mxu1 %v12942_v29  ;;  %v12982_v29 = vld [vmem:[%s13820_s12 + $0xfe0] ss:$100 sps:$4 sm:$0xff]   ;;  %v12988_v43 = vld [vmem:[%s13820_s12 + $0xf18] ss:$100 sps:$4 sm:$0xff]  }
 0x353   : > { %11621 = vmatmul.mubr.msk.bf16.vlgmr.msra.gmra.mxu0 %vm7820_vm0, %v13933_v19 }
 0x354   : > { %9137 = vmatpush1.bf16.msra.mxu0 %v12943_v50  ;;  %9168 = vmatprep.mubr.bf16.mxu0 %v13883_v49  ;;  %v12993_v50 = vld [vmem:[%s13820_s12 + $0xbfc] ss:$100 sps:$4 sm:$0xff]  }
 0x355   : > { %9079 = vmatpush2.bf16.msra.mxu1 %v12940_v37  ;;  %9138 = vmatprep.subr.bf16.mxu0 %v12951_v48  ;;  %v12990_v37 = vld [vmem:[%s13820_s12 + $0xf1c] ss:$100 sps:$4 sm:$0xff]   ;;  %v12996_v48 = vld [vmem:[%s13820_s12 + $0xe54] ss:$100 sps:$4 sm:$0xff]  }
 0x356   : > { %9080 = vmatprep.subr.bf16.mxu1 %v12948_v30  ;;  %v12991_v30 = vld [vmem:[%s13820_s12 + $0xbf8] ss:$100 sps:$4 sm:$0xff]  }
 0x358   : > { %9139 = vmatpush1.bf16.msra.mxu0 %v12949_v54  ;;  %v12994_v54 = vld [vmem:[%s13820_s12 + $0xe50] ss:$100 sps:$4 sm:$0xff]  }
 0x359   : > { %9081 = vmatpush2.bf16.msra.mxu1 %v12946_v31  ;;  %9140 = vmatprep.subr.bf16.mxu0 %v12957_v33  ;;  %v12999_v31 = vld [vmem:[%s13820_s12 + $0xb34] ss:$100 sps:$4 sm:$0xff]   ;;  %v13002_v33 = vld [vmem:[%s13820_s12 + $0xd8c] ss:$100 sps:$4 sm:$0xff]  }
 0x35a   : > { %9082 = vmatprep.subr.bf16.mxu1 %v12954_v32  ;;  %v12997_v32 = vld [vmem:[%s13820_s12 + $0xb30] ss:$100 sps:$4 sm:$0xff]  }
 0x35c   : > { %v8760_v26 = vpop.f32.mrf.mxu1  ;;  %9141 = vmatpush1.bf16.msra.mxu0 %v12955_v23  ;;  %v13000_v23 = vld [vmem:[%s13820_s12 + $0xd88] ss:$100 sps:$4 sm:$0xff]  }
 0x35d   : > { %v8761_v13 = vadd.f32 %v8760_v26, %v8720_v42  ;;  %9083 = vmatpush2.bf16.msra.mxu1 %v12952_v34  ;;  %9142 = vmatprep.subr.bf16.mxu0 %v12963_v39  ;;  %v13005_v34 = vld [vmem:[%s13820_s12 + $0xa6c] ss:$100 sps:$4 sm:$0xff]   ;;  %v13008_v39 = vld [vmem:[%s13820_s12 + $0xcc4] ss:$100 sps:$4 sm:$0xff]  }
 0x35e   : > { %v8762_v57 = vpop.f32.mrf.mxu1  ;;  %9084 = vmatprep.subr.bf16.mxu1 %v12960_v38  ;;  %v13003_v38 = vld [vmem:[%s13820_s12 + $0xa68] ss:$100 sps:$4 sm:$0xff]   ;;  %v13006_v26 = vld [vmem:[%s13820_s12 + $0xcc0] ss:$100 sps:$4 sm:$0xff]  }
 0x35f   : > { %v8802_v61 = vadd.f32 %v8801_v60, %v8761_v13  ;;  %v8763_v0 = vadd.f32 %v8762_v57, %v8722_v44  ;;  %v12979_v60 = vld [vmem:[%s13820_s12 + $0x108] ss:$100 sps:$4 sm:$0xff]   ;;  %v13009_v44 = vld [vmem:[%s13820_s12 + $0x9a0] ss:$100 sps:$4 sm:$0xff]   ;;  %v13020_v57 = vld [vmem:[%s13820_s12 + $0x17b4] ss:$100 sps:$4 sm:$0xff]  }
 0x360   : > { %v8764_v3 = vpop.f32.mrf.mxu1  ;;  %9143 = vmatpush1.bf16.msra.mxu0 %v12961_v53  ;;  %v13011_v42 = vld [vmem:[%s13820_s12 + $0x9a4] ss:$100 sps:$4 sm:$0xff]   ;;  %v13014_v13 = vld [vmem:[%s13820_s12 + $0x187c] ss:$100 sps:$4 sm:$0xff]  }
 0x361   : > { %v10173_v6 = vadd.f32 %v10081_v47, %v8802_v61  ;;  %v8804_v10 = vadd.f32 %v8803_v28, %v8763_v0  ;;  %9085 = vmatpush2.bf16.msra.mxu1 %v12958_v51  ;;  %9144 = vmatprep.subr.bf16.mxu0 %v12969_v63  ;;  %v12987_v28 = vld [vmem:[%s13820_s12 + $0x44] ss:$100 sps:$4 sm:$0xff]   ;;  %v13017_v47 = vld [vmem:[%s13820_s12 + $0x8dc] ss:$100 sps:$4 sm:$0xff]   ;;  %v13018_v63 = vld [vmem:[%s13820_s12 + $0x17b0] ss:$100 sps:$4 sm:$0xff]  }
 0x362   : > { %9177 = vmatprep.subr.bf16.mxu1 %v12966_v59  ;;  %v8765_v56 = vpop.f32.mrf.mxu1  ;;  %v13012_v51 = vld [vmem:[%s13820_s12 + $0x1878] ss:$100 sps:$4 sm:$0xff]   ;;  %v13021_v61 = vld [vmem:[%s13820_s12 + $0x810] ss:$100 sps:$4 sm:$0xff]   ;;  %v13024_v3 = vld [vmem:[%s13820_s12 + $0x16e8] ss:$100 sps:$4 sm:$0xff]  }
 0x363   : > { %v10198_v15 = vmax.f32 %v10173_v6, 0.0  ;;  %v10174_v17 = vadd.f32 %v10085_v20, %v8804_v10  ;;  %v13015_v53 = vld [vmem:[%s13820_s12 + $0x8d8] ss:$100 sps:$4 sm:$0xff]   ;;  %v13026_v0 = vld [vmem:[%s13820_s12 + $0x16ec] ss:$100 sps:$4 sm:$0xff]  }
 0x364   : > { %9087 = vmatmul.mubr.bf16.vlgmr.msra.gmra.mxu1 %v14003_v21  ;;  %9145 = vmatpush1.bf16.msra.mxu0 %v12967_v40  ;;  %v13023_v59 = vld [vmem:[%s13820_s12 + $0x814] ss:$100 sps:$4 sm:$0xff]   ;;  %v13029_v20 = vld [vmem:[%s13820_s12 + $0x74c] ss:$100 sps:$4 sm:$0xff]   ;;  %v13032_v10 = vld [vmem:[%s13820_s12 + $0x1624] ss:$100 sps:$4 sm:$0xff]  }
 0x365   : > { %10223 = vst [vmem:[%s14264_s20 + $0x50] sm:$0xff] %v10198_v15  ;;  %v10199_v18 = vmax.f32 %v10174_v17, 0.0  ;;  %9178 = vmatpush1.bf16.msra.mxu1 %v12964_v14  ;;  %9146 = vmatprep.subr.bf16.mxu0 %v12975_v41  ;;  %v13027_v6 = vld [vmem:[%s13820_s12 + $0x748] ss:$100 sps:$4 sm:$0xff]   ;;  %v13033_v41 = vld [vmem:[%s13820_s12 + $0x680] ss:$100 sps:$4 sm:$0xff]  }
 0x366   : > { %9179 = vmatprep.subr.bf16.mxu1 %v12972_v25  ;;  %9209 = vmatprep.mubr.bf16.mxu1 %v13889_v52  ;;  %v13035_v14 = vld [vmem:[%s13820_s12 + $0x684] ss:$100 sps:$4 sm:$0xff]   ;;  %v13038_v15 = vld [vmem:[%s13820_s12 + $0x155c] ss:$100 sps:$4 sm:$0xff]  }
 0x367   : > { %10224 = vst [vmem:[%s14264_s20 + $0x58] sm:$0xff] %v10199_v18  ;;  %v13030_v25 = vld [vmem:[%s13820_s12 + $0x1620] ss:$100 sps:$4 sm:$0xff]  }
 0x368   : > { %9147 = vmatpush1.bf16.msra.mxu0 %v12973_v4  ;;  %v13041_v17 = vld [vmem:[%s13820_s12 + $0x1ebc] ss:$100 sps:$4 sm:$0xff]  }
 0x369   : > { %9180 = vmatpush1.bf16.msra.mxu1 %v12970_v22  ;;  %9148 = vmatprep.subr.bf16.mxu0 %v12981_v11  ;;  %v13036_v22 = vld [vmem:[%s13820_s12 + $0x1558] ss:$100 sps:$4 sm:$0xff]  }
 0x36a   : > { %9181 = vmatprep.subr.bf16.mxu1 %v12978_v35  ;;  %v13039_v4 = vld [vmem:[%s13820_s12 + $0x1eb8] ss:$100 sps:$4 sm:$0xff]  }
 0x36b   : > { %v13044_v11 = vld [vmem:[%s13820_s12 + $0x1494] ss:$100 sps:$4 sm:$0xff]  }
 0x36c   : > { %9149 = vmatpush1.bf16.msra.mxu0 %v12979_v60  ;;  %v13042_v60 = vld [vmem:[%s13820_s12 + $0x1490] ss:$100 sps:$4 sm:$0xff]  }
 0x36d   : > { %9182 = vmatpush1.bf16.msra.mxu1 %v12976_v27  ;;  %9150 = vmatprep.subr.bf16.mxu0 %v12987_v28  ;;  %v13047_v27 = vld [vmem:[%s13820_s12 + $0x1df4] ss:$100 sps:$4 sm:$0xff]   ;;  %v13050_v28 = vld [vmem:[%s13820_s12 + $0x13cc] ss:$100 sps:$4 sm:$0xff]  }
 0x36e   : > { %9183 = vmatprep.subr.bf16.mxu1 %v12984_v1  ;;  %v13045_v1 = vld [vmem:[%s13820_s12 + $0x1df0] ss:$100 sps:$4 sm:$0xff]  }
 0x370   : > { %9151 = vmatpush1.bf16.msra.mxu0 %v12985_v58  ;;  %v13048_v58 = vld [vmem:[%s13820_s12 + $0x13c8] ss:$100 sps:$4 sm:$0xff]  }
 0x371   : > { %9184 = vmatpush1.bf16.msra.mxu1 %v12982_v29  ;;  %9152 = vmatprep.subr.bf16.mxu0 %v12993_v50  ;;  %v13053_v29 = vld [vmem:[%s13820_s12 + $0x1d2c] ss:$100 sps:$4 sm:$0xff]   ;;  %v13056_v50 = vld [vmem:[%s13820_s12 + $0x1304] ss:$100 sps:$4 sm:$0xff]  }
 0x372   : > { %9185 = vmatprep.subr.bf16.mxu1 %v12990_v37  ;;  %v13051_v37 = vld [vmem:[%s13820_s12 + $0x1d28] ss:$100 sps:$4 sm:$0xff]  }
 0x374   : > { %9153 = vmatpush2.bf16.msra.mxu0 %v12991_v30 }
 0x375   : > { %9186 = vmatpush1.bf16.msra.mxu1 %v12988_v43  ;;  %9154 = vmatprep.subr.bf16.mxu0 %v12999_v31  ;;  %v13059_v43 = vld [vmem:[%s13820_s12 + $0x1c64] ss:$100 sps:$4 sm:$0xff]  }
 0x376   : > { %9187 = vmatprep.subr.bf16.mxu1 %v12996_v48  ;;  %v13054_v48 = vld [vmem:[%s13820_s12 + $0x1300] ss:$100 sps:$4 sm:$0xff]  }
 0x377   : > { %v13057_v31 = vld [vmem:[%s13820_s12 + $0x1c60] ss:$100 sps:$4 sm:$0xff]  }
 0x378   : > { %9155 = vmatpush2.bf16.msra.mxu0 %v12997_v32  ;;  %v13062_v32 = vld [vmem:[%s13820_s12 + $0x1b9c] ss:$100 sps:$4 sm:$0xff]  }
 0x379   : > { %9188 = vmatpush1.bf16.msra.mxu1 %v12994_v54  ;;  %9156 = vmatprep.subr.bf16.mxu0 %v13005_v34 }
 0x37a   : > { %9189 = vmatprep.subr.bf16.mxu1 %v13002_v33  ;;  %v13065_v33 = vld [vmem:[%s13820_s12 + $0x25c4] ss:$100 sps:$4 sm:$0xff]  }
 0x37c   : > { %9157 = vmatpush2.bf16.msra.mxu0 %v13003_v38  ;;  %v13063_v38 = vld [vmem:[%s13820_s12 + $0x25c0] ss:$100 sps:$4 sm:$0xff]  }
 0x37d   : > { %9190 = vmatpush1.bf16.msra.mxu1 %v13000_v23  ;;  %9158 = vmatprep.subr.bf16.mxu0 %v13011_v42  ;;  %v13060_v23 = vld [vmem:[%s13820_s12 + $0x1b98] ss:$100 sps:$4 sm:$0xff]  }
 0x37e   : > { %9191 = vmatprep.subr.bf16.mxu1 %v13008_v39  ;;  %v13068_v39 = vld [vmem:[%s13820_s12 + $0x1ad4] ss:$100 sps:$4 sm:$0xff]  }
 0x380   : > { %9159 = vmatpush2.bf16.msra.mxu0 %v13009_v44 }
 0x381   : > { %9192 = vmatpush1.bf16.msra.mxu1 %v13006_v26  ;;  %9160 = vmatprep.subr.bf16.mxu0 %v13017_v47  ;;  %v13071_v26 = vld [vmem:[%s13820_s12 + $0x5c4] ss:$100 sps:$4 sm:$0xff]   ;;  %v13074_v47 = vld [vmem:[%s13820_s12 + $0x1a0c] ss:$100 sps:$4 sm:$0xff]  }
 0x382   : > { %9193 = vmatprep.subr.bf16.mxu1 %v13014_v13  ;;  %v13066_v13 = vld [vmem:[%s13820_s12 + $0x1ad0] ss:$100 sps:$4 sm:$0xff]  }
 0x384   : > { %9161 = vmatpush2.bf16.msra.mxu0 %v13015_v53 }
 0x385   : > { %9194 = vmatpush2.bf16.msra.mxu1 %v13012_v51  ;;  %9162 = vmatprep.subr.bf16.mxu0 %v13023_v59  ;;  %v13072_v59 = vld [vmem:[%s13820_s12 + $0x1a08] ss:$100 sps:$4 sm:$0xff]  }
 0x386   : > { %9195 = vmatprep.subr.bf16.mxu1 %v13020_v57  ;;  %v13069_v57 = vld [vmem:[%s13820_s12 + $0x5c0] ss:$100 sps:$4 sm:$0xff]  }
 0x388   : > { %9163 = vmatpush2.bf16.msra.mxu0 %v13021_v61  ;;  %v13080_v61 = vld [vmem:[%s13820_s12 + $0x1944] ss:$100 sps:$4 sm:$0xff]  }
 0x389   : > { %9196 = vmatpush2.bf16.msra.mxu1 %v13018_v63  ;;  %9164 = vmatprep.subr.bf16.mxu0 %v13029_v20  ;;  %v13077_v63 = vld [vmem:[%s13820_s12 + $0x4fc] ss:$100 sps:$4 sm:$0xff]  }
 0x38a   : > { %9197 = vmatprep.subr.bf16.mxu1 %v13026_v0  ;;  %v13075_v20 = vld [vmem:[%s13820_s12 + $0x4f8] ss:$100 sps:$4 sm:$0xff]  }
 0x38b   : > { %v14931_v40 = vpop.f32.mrf.mxu0 }
 0x38c   : > { %9165 = vmatpush2.bf16.msra.mxu0 %v13027_v6  ;;  %v13083_v6 = vld [vmem:[%s13820_s12 + $0x434] ss:$100 sps:$4 sm:$0xff]  }
 0x38d   : > { %9198 = vmatpush2.bf16.msra.mxu1 %v13024_v3  ;;  %v14935_v56 = vpop.f32.mrf.mxu0  ;;  %9166 = vmatprep.subr.bf16.mxu0 %v13035_v14  ;;  %v13078_v3 = vld [vmem:[%s13820_s12 + $0x1940] ss:$100 sps:$4 sm:$0xff]   ;;  %v13081_v14 = vld [vmem:[%s13820_s12 + $0x430] ss:$100 sps:$4 sm:$0xff]  }
 0x38e   : > { %9199 = vmatprep.subr.bf16.mxu1 %v13032_v10  ;;  %v13086_v10 = vld [vmem:[%s13820_s12 + $0x24fc] ss:$100 sps:$4 sm:$0xff]  }
 0x38f   : > { %v8846_v18 = vpop.f32.mrf.mxu0 }
 0x390   : > { %9167 = vmatpush2.bf16.msra.mxu0 %v13033_v41  ;;  %v13089_v41 = vld [vmem:[%s13820_s12 + $0x36c] ss:$100 sps:$4 sm:$0xff]  }
 0x391   : > { %9200 = vmatpush2.bf16.msra.mxu1 %v13030_v25  ;;  %v8847_v35 = vpop.f32.mrf.mxu0  ;;  %9218 = vmatprep.subr.bf16.mxu0 %v13041_v17  ;;  %v13084_v25 = vld [vmem:[%s13820_s12 + $0x24f8] ss:$100 sps:$4 sm:$0xff]   ;;  %v13087_v17 = vld [vmem:[%s13820_s12 + $0x368] ss:$100 sps:$4 sm:$0xff]   ;;  %v13090_v18 = vld [vmem:[%s13820_s12 + $0x2430] ss:$100 sps:$4 sm:$0xff]  }
 0x392   : > { %9201 = vmatprep.subr.bf16.mxu1 %v13038_v15  ;;  %v13092_v15 = vld [vmem:[%s13820_s12 + $0x2434] ss:$100 sps:$4 sm:$0xff]   ;;  %v13093_v35 = vld [vmem:[%s13820_s12 + $0x2a0] ss:$100 sps:$4 sm:$0xff]  }
 0x393   : > { %9169 = vmatmul.mubr.bf16.vlgmr.msra.gmra.mxu0 %v13916_v8 }
 0x394   : > { %9219 = vmatpush1.bf16.msra.mxu0 %v13039_v4  ;;  %9250 = vmatprep.mubr.bf16.mxu0 %v13956_v36  ;;  %v13098_v4 = vld [vmem:[%s13820_s12 + $0x236c] ss:$100 sps:$4 sm:$0xff]  }
 0x395   : > { %9202 = vmatpush2.bf16.msra.mxu1 %v13036_v22  ;;  %9220 = vmatprep.subr.bf16.mxu0 %v13047_v27  ;;  %v13095_v22 = vld [vmem:[%s13820_s12 + $0x2a4] ss:$100 sps:$4 sm:$0xff]   ;;  %v13101_v27 = vld [vmem:[%s13820_s12 + $0x1dc] ss:$100 sps:$4 sm:$0xff]  }
 0x396   : > { %9203 = vmatprep.subr.bf16.mxu1 %v13044_v11  ;;  %v13096_v11 = vld [vmem:[%s13820_s12 + $0x2368] ss:$100 sps:$4 sm:$0xff]  }
 0x398   : > { %9221 = vmatpush1.bf16.msra.mxu0 %v13045_v1  ;;  %v13099_v1 = vld [vmem:[%s13820_s12 + $0x1d8] ss:$100 sps:$4 sm:$0xff]  }
 0x399   : > { %9204 = vmatpush2.bf16.msra.mxu1 %v13042_v60  ;;  %9222 = vmatprep.subr.bf16.mxu0 %v13053_v29  ;;  %v13104_v60 = vld [vmem:[%s13820_s12 + $0x22a4] ss:$100 sps:$4 sm:$0xff]   ;;  %v13107_v29 = vld [vmem:[%s13820_s12 + $0x114] ss:$100 sps:$4 sm:$0xff]  }
 0x39a   : > { %9205 = vmatprep.subr.bf16.mxu1 %v13050_v28  ;;  %v13102_v28 = vld [vmem:[%s13820_s12 + $0x22a0] ss:$100 sps:$4 sm:$0xff]  }
 0x39c   : > { %v14953_v30 = vpop.f32.mrf.mxu1  ;;  %9223 = vmatpush1.bf16.msra.mxu0 %v13051_v37  ;;  %v13105_v37 = vld [vmem:[%s13820_s12 + $0x110] ss:$100 sps:$4 sm:$0xff]  }
 0x39d   : > { %9206 = vmatpush2.bf16.msra.mxu1 %v13048_v58  ;;  %9224 = vmatprep.subr.bf16.mxu0 %v13059_v43  ;;  %v13110_v58 = vld [vmem:[%s13820_s12 + $0x21dc] ss:$100 sps:$4 sm:$0xff]   ;;  %v13113_v43 = vld [vmem:[%s13820_s12 + $0x4c] ss:$100 sps:$4 sm:$0xff]  }
 0x39e   : > { %v14957_v54 = vpop.f32.mrf.mxu1  ;;  %9207 = vmatprep.subr.bf16.mxu1 %v13056_v50  ;;  %v13108_v50 = vld [vmem:[%s13820_s12 + $0x21d8] ss:$100 sps:$4 sm:$0xff]  }
 0x3a0   : > { %v8887_v34 = vpop.f32.mrf.mxu1  ;;  %9225 = vmatpush1.bf16.msra.mxu0 %v13057_v31  ;;  %v13111_v31 = vld [vmem:[%s13820_s12 + $0x48] ss:$100 sps:$4 sm:$0xff]  }
 0x3a1   : > { %9208 = vmatpush2.bf16.msra.mxu1 %v13054_v48  ;;  %9226 = vmatprep.subr.bf16.mxu0 %v13062_v32  ;;  %v13116_v48 = vld [vmem:[%s13820_s12 + $0x2114] ss:$100 sps:$4 sm:$0xff]   ;;  %v13122_v34 = vld [vmem:[%s13820_s12 + $0x204c] ss:$100 sps:$4 sm:$0xff]  }
 0x3a2   : > { %9273 = vmatprep.subr.bf16.mxu1 %v13065_v33  ;;  %v8888_v42 = vpop.f32.mrf.mxu1  ;;  %v13114_v32 = vld [vmem:[%s13820_s12 + $0x2110] ss:$100 sps:$4 sm:$0xff]   ;;  %v13119_v33 = vld [vmem:[%s13820_s12 + $0xc04] ss:$100 sps:$4 sm:$0xff]  }
 0x3a3   : > { %v13128_v42 = vld [vmem:[%s13820_s12 + $0x1f84] ss:$100 sps:$4 sm:$0xff]  }
 0x3a4   : > { %9210 = vmatmul.mubr.bf16.vlgmr.msra.gmra.mxu1 %v13918_v9  ;;  %v14966_v44 = vpop.f32.mrf.mxu1  ;;  %9227 = vmatpush1.bf16.msra.mxu0 %v13060_v23  ;;  %v13117_v23 = vld [vmem:[%s13820_s12 + $0xc00] ss:$100 sps:$4 sm:$0xff]  }
 0x3a5   : > { %9274 = vmatpush1.bf16.msra.mxu1 %v13063_v38  ;;  %9228 = vmatprep.subr.bf16.mxu0 %v13068_v39  ;;  %v13120_v38 = vld [vmem:[%s13820_s12 + $0x2048] ss:$100 sps:$4 sm:$0xff]   ;;  %v13125_v39 = vld [vmem:[%s13820_s12 + $0xb3c] ss:$100 sps:$4 sm:$0xff]  }
 0x3a6   : > { %9291 = vmatprep.mubr.bf16.mxu1 %v13708_v16  ;;  %v14971_v51 = vpop.f32.mrf.mxu1  ;;  %9300 = vmatprep.subr.bf16.mxu1 %v13071_v26  ;;  %v8884_v26 = vadd.f32 %v14953_v30, %v14931_v40  ;;  %v13134_v40 = vld [vmem:[%s13820_s12 + $0x1244] ss:$100 sps:$4 sm:$0xff]  }
 0x3a8   : > { %v8969_v53 = vpop.f32.mrf.mxu1  ;;  %9229 = vmatpush1.bf16.msra.mxu0 %v13066_v13 }
 0x3a9   : > { %9230 = vmatprep.subr.bf16.mxu0 %v13074_v47  ;;  %v8886_v47 = vadd.f32 %v14957_v54, %v14935_v56  ;;  %v10093_v54 = vrot.slane %v14758_v45, %v14500_v62 }
 0x3aa   : > { %v8970_v0 = vpop.f32.mrf.mxu1 }
 0x3ab   : > { %v13131_v0 = vld [vmem:[%s13820_s12 + $0xa74] ss:$100 sps:$4 sm:$0xff]  }
 0x3ac   : > { %11622 = vmatmul.mubr.msk.bf16.vlgmr.msra.gmra.mxu1 %vm7820_vm0, %v13933_v19  ;;  %9231 = vmatpush1.bf16.msra.mxu0 %v13072_v59  ;;  %v13123_v59 = vld [vmem:[%s13820_s12 + $0xb38] ss:$100 sps:$4 sm:$0xff]  }
 0x3ad   : > { %9301 = vmatpush1.bf16.msra.mxu1 %v13069_v57  ;;  %9232 = vmatprep.subr.bf16.mxu0 %v13080_v61  ;;  %v10089_v57 = vrot.slane %v14758_v45, %v14493_v55 }
 0x3ae   : > { %9302 = vmatprep.subr.bf16.mxu1 %v13077_v63  ;;  %9332 = vmatprep.mubr.bf16.mxu1 %v13883_v49  ;;  %v13126_v63 = vld [vmem:[%s13820_s12 + $0x1f80] ss:$100 sps:$4 sm:$0xff]  }
 0x3b0   : > { %9233 = vmatpush1.bf16.msra.mxu0 %v13078_v3 }
 0x3b1   : > { %9303 = vmatpush1.bf16.msra.mxu1 %v13075_v20  ;;  %9234 = vmatprep.subr.bf16.mxu0 %v13086_v10  ;;  %v13129_v10 = vld [vmem:[%s13820_s12 + $0xa70] ss:$100 sps:$4 sm:$0xff]  }
 0x3b2   : > { %9304 = vmatprep.subr.bf16.mxu1 %v13083_v6 }
 0x3b4   : > { %9235 = vmatpush2.bf16.msra.mxu0 %v13084_v25 }
 0x3b5   : > { %9305 = vmatpush1.bf16.msra.mxu1 %v13081_v14  ;;  %9236 = vmatprep.subr.bf16.mxu0 %v13092_v15  ;;  %v13132_v14 = vld [vmem:[%s13820_s12 + $0x1240] ss:$100 sps:$4 sm:$0xff]  }
 0x3b6   : > { %9306 = vmatprep.subr.bf16.mxu1 %v13089_v41  ;;  %v13140_v41 = vld [vmem:[%s13820_s12 + $0x117c] ss:$100 sps:$4 sm:$0xff]  }
 0x3b8   : > { %9237 = vmatpush2.bf16.msra.mxu0 %v13090_v18  ;;  %v13138_v18 = vld [vmem:[%s13820_s12 + $0x1178] ss:$100 sps:$4 sm:$0xff]  }
 0x3b9   : > { %9307 = vmatpush1.bf16.msra.mxu1 %v13087_v17  ;;  %9238 = vmatprep.subr.bf16.mxu0 %v13098_v4  ;;  %v13135_v17 = vld [vmem:[%s13820_s12 + $0x9a8] ss:$100 sps:$4 sm:$0xff]   ;;  %v13146_v4 = vld [vmem:[%s13820_s12 + $0x10b4] ss:$100 sps:$4 sm:$0xff]  }
 0x3ba   : > { %9308 = vmatprep.subr.bf16.mxu1 %v13095_v22  ;;  %v13143_v22 = vld [vmem:[%s13820_s12 + $0x8e4] ss:$100 sps:$4 sm:$0xff]  }
 0x3bc   : > { %9239 = vmatpush2.bf16.msra.mxu0 %v13096_v11  ;;  %v13144_v11 = vld [vmem:[%s13820_s12 + $0x10b0] ss:$100 sps:$4 sm:$0xff]  }
 0x3bd   : > { %9309 = vmatpush1.bf16.msra.mxu1 %v13093_v35  ;;  %9240 = vmatprep.subr.bf16.mxu0 %v13104_v60  ;;  %v13141_v35 = vld [vmem:[%s13820_s12 + $0x8e0] ss:$100 sps:$4 sm:$0xff]   ;;  %v13152_v60 = vld [vmem:[%s13820_s12 + $0xfec] ss:$100 sps:$4 sm:$0xff]  }
 0x3be   : > { %9310 = vmatprep.subr.bf16.mxu1 %v13101_v27  ;;  %v13149_v27 = vld [vmem:[%s13820_s12 + $0x81c] ss:$100 sps:$4 sm:$0xff]  }
 0x3c0   : > { %9241 = vmatpush2.bf16.msra.mxu0 %v13102_v28  ;;  %v13150_v28 = vld [vmem:[%s13820_s12 + $0xfe8] ss:$100 sps:$4 sm:$0xff]  }
 0x3c1   : > { %9311 = vmatpush1.bf16.msra.mxu1 %v13099_v1  ;;  %9242 = vmatprep.subr.bf16.mxu0 %v13110_v58  ;;  %v13147_v1 = vld [vmem:[%s13820_s12 + $0x818] ss:$100 sps:$4 sm:$0xff]   ;;  %v13158_v58 = vld [vmem:[%s13820_s12 + $0xf24] ss:$100 sps:$4 sm:$0xff]  }
 0x3c2   : > { %9312 = vmatprep.subr.bf16.mxu1 %v13107_v29  ;;  %v13155_v29 = vld [vmem:[%s13820_s12 + $0x754] ss:$100 sps:$4 sm:$0xff]  }
 0x3c4   : > { %9243 = vmatpush2.bf16.msra.mxu0 %v13108_v50  ;;  %v13156_v50 = vld [vmem:[%s13820_s12 + $0xf20] ss:$100 sps:$4 sm:$0xff]  }
 0x3c5   : > { %9313 = vmatpush1.bf16.msra.mxu1 %v13105_v37  ;;  %9244 = vmatprep.subr.bf16.mxu0 %v13116_v48  ;;  %v13153_v37 = vld [vmem:[%s13820_s12 + $0x750] ss:$100 sps:$4 sm:$0xff]   ;;  %v13164_v48 = vld [vmem:[%s13820_s12 + $0xe5c] ss:$100 sps:$4 sm:$0xff]  }
 0x3c6   : > { %9314 = vmatprep.subr.bf16.mxu1 %v13113_v43  ;;  %v13161_v43 = vld [vmem:[%s13820_s12 + $0x68c] ss:$100 sps:$4 sm:$0xff]  }
 0x3c8   : > { %9245 = vmatpush2.bf16.msra.mxu0 %v13114_v32  ;;  %v13159_v32 = vld [vmem:[%s13820_s12 + $0x688] ss:$100 sps:$4 sm:$0xff]  }
 0x3c9   : > { %9315 = vmatpush1.bf16.msra.mxu1 %v13111_v31  ;;  %9246 = vmatprep.subr.bf16.mxu0 %v13122_v34  ;;  %v13167_v34 = vld [vmem:[%s13820_s12 + $0x1ec4] ss:$100 sps:$4 sm:$0xff]  }
 0x3ca   : > { %9316 = vmatprep.subr.bf16.mxu1 %v13119_v33  ;;  %v13162_v33 = vld [vmem:[%s13820_s12 + $0xe58] ss:$100 sps:$4 sm:$0xff]  }
 0x3cb   : > { %v8924_v13 = vpop.f32.mrf.mxu0 }
 0x3cc   : > { %v8925_v53 = vadd.f32 %v8924_v13, %v8884_v26  ;;  %9247 = vmatpush2.bf16.msra.mxu0 %v13120_v38  ;;  %v13168_v26 = vld [vmem:[%s13820_s12 + $0xd90] ss:$100 sps:$4 sm:$0xff]   ;;  %v13173_v13 = vld [vmem:[%s13820_s12 + $0x1dfc] ss:$100 sps:$4 sm:$0xff]  }
 0x3cd   : > { %9317 = vmatpush2.bf16.msra.mxu1 %v13117_v23  ;;  %v8926_v61 = vpop.f32.mrf.mxu0  ;;  %9248 = vmatprep.subr.bf16.mxu0 %v13128_v42  ;;  %v13170_v23 = vld [vmem:[%s13820_s12 + $0xd94] ss:$100 sps:$4 sm:$0xff]   ;;  %v13165_v42 = vld [vmem:[%s13820_s12 + $0x1ec0] ss:$100 sps:$4 sm:$0xff]  }
 0x3ce   : > { %9318 = vmatprep.subr.bf16.mxu1 %v13125_v39  ;;  %v8966_v30 = vadd.f32 %v14966_v44, %v8925_v53  ;;  %v8927_v56 = vadd.f32 %v8926_v61, %v8886_v47  ;;  %v13137_v44 = vld [vmem:[%s13820_s12 + $0x9ac] ss:$100 sps:$4 sm:$0xff]   ;;  %v13182_v61 = vld [vmem:[%s13820_s12 + $0x1884] ss:$100 sps:$4 sm:$0xff]  }
 0x3cf   : > { %v8928_v20 = vpop.f32.mrf.mxu0  ;;  %v13176_v47 = vld [vmem:[%s13820_s12 + $0xccc] ss:$100 sps:$4 sm:$0xff]  }
 0x3d0   : > { %v10175_v3 = vadd.f32 %v10089_v57, %v8966_v30  ;;  %v8968_v6 = vadd.f32 %v14971_v51, %v8927_v56  ;;  %9249 = vmatpush2.bf16.msra.mxu0 %v13126_v63  ;;  %v13171_v57 = vld [vmem:[%s13820_s12 + $0x1df8] ss:$100 sps:$4 sm:$0xff]   ;;  %v13185_v30 = vld [vmem:[%s13820_s12 + $0x1c6c] ss:$100 sps:$4 sm:$0xff]  }
 0x3d1   : > { %9319 = vmatpush2.bf16.msra.mxu1 %v13123_v59  ;;  %v8929_v25 = vpop.f32.mrf.mxu0  ;;  %9341 = vmatprep.subr.bf16.mxu0 %v13134_v40  ;;  %v13174_v59 = vld [vmem:[%s13820_s12 + $0xcc8] ss:$100 sps:$4 sm:$0xff]   ;;  %v13179_v63 = vld [vmem:[%s13820_s12 + $0x1d34] ss:$100 sps:$4 sm:$0xff]   ;;  %v13180_v40 = vld [vmem:[%s13820_s12 + $0x1880] ss:$100 sps:$4 sm:$0xff]  }
 0x3d2   : > { %9320 = vmatprep.subr.bf16.mxu1 %v13131_v0  ;;  %v10200_v45 = vmax.f32 %v10175_v3, 0.0  ;;  %v10176_v15 = vadd.f32 %v10093_v54, %v8968_v6  ;;  %v13177_v0 = vld [vmem:[%s13820_s12 + $0x1d30] ss:$100 sps:$4 sm:$0xff]   ;;  %v13188_v56 = vld [vmem:[%s13820_s12 + $0x17bc] ss:$100 sps:$4 sm:$0xff]  }
 0x3d3   : > { %9251 = vmatmul.mubr.bf16.vlgmr.msra.gmra.mxu0 %v14003_v21  ;;  %v13183_v54 = vld [vmem:[%s13820_s12 + $0x1c68] ss:$100 sps:$4 sm:$0xff]   ;;  %v13186_v20 = vld [vmem:[%s13820_s12 + $0x17b8] ss:$100 sps:$4 sm:$0xff]  }
 0x3d4   : > { %10225 = vst [vmem:[%s14264_s20 + $0x60] sm:$0xff] %v10200_v45  ;;  %v10201_v51 = vmax.f32 %v10176_v15, 0.0  ;;  %9342 = vmatpush1.bf16.msra.mxu0 %v13132_v14  ;;  %9373 = vmatprep.mubr.bf16.mxu0 %v13889_v52  ;;  %v13191_v3 = vld [vmem:[%s13820_s12 + $0x1ba4] ss:$100 sps:$4 sm:$0xff]   ;;  %v13194_v6 = vld [vmem:[%s13820_s12 + $0x16f4] ss:$100 sps:$4 sm:$0xff]  }
 0x3d5   : > { %9321 = vmatpush2.bf16.msra.mxu1 %v13129_v10  ;;  %9343 = vmatprep.subr.bf16.mxu0 %v13140_v41  ;;  %v13189_v10 = vld [vmem:[%s13820_s12 + $0x1ba0] ss:$100 sps:$4 sm:$0xff]   ;;  %v13192_v14 = vld [vmem:[%s13820_s12 + $0x16f0] ss:$100 sps:$4 sm:$0xff]   ;;  %v13195_v41 = vld [vmem:[%s13820_s12 + $0x1ad8] ss:$100 sps:$4 sm:$0xff]  }
 0x3d6   : > { %9322 = vmatprep.subr.bf16.mxu1 %v13137_v44  ;;  %10226 = vst [vmem:[%s14264_s20 + $0x68] sm:$0xff] %v10201_v51  ;;  %v13197_v25 = vld [vmem:[%s13820_s12 + $0x1adc] ss:$100 sps:$4 sm:$0xff]   ;;  %v13200_v44 = vld [vmem:[%s13820_s12 + $0x162c] ss:$100 sps:$4 sm:$0xff]  }
 0x3d7   : > { %v13198_v45 = vld [vmem:[%s13820_s12 + $0x1628] ss:$100 sps:$4 sm:$0xff]   ;;  %v13203_v15 = vld [vmem:[%s13820_s12 + $0x1a14] ss:$100 sps:$4 sm:$0xff]  }
 0x3d8   : > { %9344 = vmatpush1.bf16.msra.mxu0 %v13138_v18  ;;  %v13206_v51 = vld [vmem:[%s13820_s12 + $0x1564] ss:$100 sps:$4 sm:$0xff]  }
 0x3d9   : > { %9323 = vmatpush2.bf16.msra.mxu1 %v13135_v17  ;;  %9345 = vmatprep.subr.bf16.mxu0 %v13146_v4  ;;  %v13201_v17 = vld [vmem:[%s13820_s12 + $0x1a10] ss:$100 sps:$4 sm:$0xff]   ;;  %v13204_v18 = vld [vmem:[%s13820_s12 + $0x1560] ss:$100 sps:$4 sm:$0xff]  }
 0x3da   : > { %9324 = vmatprep.subr.bf16.mxu1 %v13143_v22  ;;  %v13209_v22 = vld [vmem:[%s13820_s12 + $0x194c] ss:$100 sps:$4 sm:$0xff]   ;;  %v13212_v4 = vld [vmem:[%s13820_s12 + $0x149c] ss:$100 sps:$4 sm:$0xff]  }
 0x3dc   : > { %9346 = vmatpush1.bf16.msra.mxu0 %v13144_v11  ;;  %v13210_v11 = vld [vmem:[%s13820_s12 + $0x1498] ss:$100 sps:$4 sm:$0xff]  }
 0x3dd   : > { %9325 = vmatpush2.bf16.msra.mxu1 %v13141_v35  ;;  %9347 = vmatprep.subr.bf16.mxu0 %v13152_v60  ;;  %v13207_v35 = vld [vmem:[%s13820_s12 + $0x1948] ss:$100 sps:$4 sm:$0xff]   ;;  %v13218_v60 = vld [vmem:[%s13820_s12 + $0x13d4] ss:$100 sps:$4 sm:$0xff]  }
 0x3de   : > { %9326 = vmatprep.subr.bf16.mxu1 %v13149_v27  ;;  %v13215_v27 = vld [vmem:[%s13820_s12 + $0x2504] ss:$100 sps:$4 sm:$0xff]  }
 0x3e0   : > { %9348 = vmatpush1.bf16.msra.mxu0 %v13150_v28  ;;  %v13216_v28 = vld [vmem:[%s13820_s12 + $0x13d0] ss:$100 sps:$4 sm:$0xff]  }
 0x3e1   : > { %9327 = vmatpush2.bf16.msra.mxu1 %v13147_v1  ;;  %9349 = vmatprep.subr.bf16.mxu0 %v13158_v58  ;;  %v13213_v1 = vld [vmem:[%s13820_s12 + $0x2500] ss:$100 sps:$4 sm:$0xff]   ;;  %v13224_v58 = vld [vmem:[%s13820_s12 + $0x130c] ss:$100 sps:$4 sm:$0xff]  }
 0x3e2   : > { %9328 = vmatprep.subr.bf16.mxu1 %v13155_v29  ;;  %v13221_v29 = vld [vmem:[%s13820_s12 + $0x243c] ss:$100 sps:$4 sm:$0xff]  }
 0x3e4   : > { %v15050_v31 = vpop.f32.mrf.mxu1  ;;  %9350 = vmatpush1.bf16.msra.mxu0 %v13156_v50  ;;  %v13219_v50 = vld [vmem:[%s13820_s12 + $0x2438] ss:$100 sps:$4 sm:$0xff]  }
 0x3e5   : > { %9329 = vmatpush2.bf16.msra.mxu1 %v13153_v37  ;;  %9351 = vmatprep.subr.bf16.mxu0 %v13164_v48 }
 0x3e6   : > { %9330 = vmatprep.subr.bf16.mxu1 %v13161_v43  ;;  %v15056_v38 = vpop.f32.mrf.mxu1  ;;  %v13222_v43 = vld [vmem:[%s13820_s12 + $0x1308] ss:$100 sps:$4 sm:$0xff]  }
 0x3e8   : > { %v9010_v39 = vpop.f32.mrf.mxu1  ;;  %9352 = vmatpush1.bf16.msra.mxu0 %v13162_v33  ;;  %v13230_v33 = vld [vmem:[%s13820_s12 + $0x25cc] ss:$100 sps:$4 sm:$0xff]  }
 0x3e9   : > { %9331 = vmatpush2.bf16.msra.mxu1 %v13159_v32  ;;  %9353 = vmatprep.subr.bf16.mxu0 %v13170_v23  ;;  %v13227_v32 = vld [vmem:[%s13820_s12 + $0x2374] ss:$100 sps:$4 sm:$0xff]   ;;  %v13228_v39 = vld [vmem:[%s13820_s12 + $0x25c8] ss:$100 sps:$4 sm:$0xff]  }
 0x3ea   : > { %9382 = vmatprep.subr.bf16.mxu1 %v13167_v34  ;;  %v9011_v53 = vpop.f32.mrf.mxu1  ;;  %v13225_v23 = vld [vmem:[%s13820_s12 + $0x2370] ss:$100 sps:$4 sm:$0xff]  }
 0x3eb   : > { %v13231_v53 = vld [vmem:[%s13820_s12 + $0x22a8] ss:$100 sps:$4 sm:$0xff]  }
 0x3ec   : > { %9333 = vmatmul.mubr.bf16.vlgmr.msra.gmra.mxu1 %v13916_v8  ;;  %9354 = vmatpush1.bf16.msra.mxu0 %v13168_v26  ;;  %v13233_v26 = vld [vmem:[%s13820_s12 + $0x22ac] ss:$100 sps:$4 sm:$0xff]  }
 0x3ed   : > { %9383 = vmatpush1.bf16.msra.mxu1 %v13165_v42  ;;  %9355 = vmatprep.subr.bf16.mxu0 %v13176_v47 }
 0x3ee   : > { %9384 = vmatprep.subr.bf16.mxu1 %v13173_v13  ;;  %9414 = vmatprep.mubr.bf16.mxu1 %v13956_v36  ;;  %v13239_v13 = vld [vmem:[%s13820_s12 + $0x5cc] ss:$100 sps:$4 sm:$0xff]  }
 0x3f0   : > { %9356 = vmatpush1.bf16.msra.mxu0 %v13174_v59  ;;  %v13236_v59 = vld [vmem:[%s13820_s12 + $0x21e4] ss:$100 sps:$4 sm:$0xff]  }
 0x3f1   : > { %9385 = vmatpush1.bf16.msra.mxu1 %v13171_v57  ;;  %9357 = vmatprep.subr.bf16.mxu0 %v13182_v61  ;;  %v13234_v61 = vld [vmem:[%s13820_s12 + $0x21e0] ss:$100 sps:$4 sm:$0xff]  }
 0x3f2   : > { %9386 = vmatprep.subr.bf16.mxu1 %v13179_v63 }
 0x3f4   : > { %9358 = vmatpush2.bf16.msra.mxu0 %v13180_v40 }
 0x3f5   : > { %9387 = vmatpush1.bf16.msra.mxu1 %v13177_v0  ;;  %9359 = vmatprep.subr.bf16.mxu0 %v13188_v56  ;;  %v13237_v0 = vld [vmem:[%s13820_s12 + $0x5c8] ss:$100 sps:$4 sm:$0xff]  }
 0x3f6   : > { %9388 = vmatprep.subr.bf16.mxu1 %v13185_v30  ;;  %v13242_v30 = vld [vmem:[%s13820_s12 + $0x211c] ss:$100 sps:$4 sm:$0xff]   ;;  %v13245_v56 = vld [vmem:[%s13820_s12 + $0x504] ss:$100 sps:$4 sm:$0xff]  }
 0x3f8   : > { %9360 = vmatpush2.bf16.msra.mxu0 %v13186_v20  ;;  %v13243_v20 = vld [vmem:[%s13820_s12 + $0x500] ss:$100 sps:$4 sm:$0xff]  }
 0x3f9   : > { %9389 = vmatpush1.bf16.msra.mxu1 %v13183_v54  ;;  %9361 = vmatprep.subr.bf16.mxu0 %v13194_v6  ;;  %v13240_v54 = vld [vmem:[%s13820_s12 + $0x2118] ss:$100 sps:$4 sm:$0xff]  }
 0x3fa   : > { %9390 = vmatprep.subr.bf16.mxu1 %v13191_v3  ;;  %v13248_v3 = vld [vmem:[%s13820_s12 + $0x2054] ss:$100 sps:$4 sm:$0xff]   ;;  %v13251_v6 = vld [vmem:[%s13820_s12 + $0x43c] ss:$100 sps:$4 sm:$0xff]  }
 0x3fc   : > { %9362 = vmatpush2.bf16.msra.mxu0 %v13192_v14  ;;  %v13249_v14 = vld [vmem:[%s13820_s12 + $0x438] ss:$100 sps:$4 sm:$0xff]  }
 0x3fd   : > { %9391 = vmatpush1.bf16.msra.mxu1 %v13189_v10  ;;  %9363 = vmatprep.subr.bf16.mxu0 %v13200_v44  ;;  %v13246_v10 = vld [vmem:[%s13820_s12 + $0x2050] ss:$100 sps:$4 sm:$0xff]  }
 0x3fe   : > { %9392 = vmatprep.subr.bf16.mxu1 %v13197_v25  ;;  %v13254_v25 = vld [vmem:[%s13820_s12 + $0x1f8c] ss:$100 sps:$4 sm:$0xff]   ;;  %v13257_v44 = vld [vmem:[%s13820_s12 + $0x374] ss:$100 sps:$4 sm:$0xff]  }
 0x400   : > { %9364 = vmatpush2.bf16.msra.mxu0 %v13198_v45 }
 0x401   : > { %9393 = vmatpush1.bf16.msra.mxu1 %v13195_v41  ;;  %9365 = vmatprep.subr.bf16.mxu0 %v13206_v51 }
 0x402   : > { %9394 = vmatprep.subr.bf16.mxu1 %v13203_v15 }
 0x404   : > { %9366 = vmatpush2.bf16.msra.mxu0 %v13204_v18 }
 0x405   : > { %9395 = vmatpush1.bf16.msra.mxu1 %v13201_v17  ;;  %9367 = vmatprep.subr.bf16.mxu0 %v13212_v4  ;;  %v13590_v17 = vld [vmem:[%s13826_s30 + $0x8] sm:$0xff] }
 0x406   : > { %9396 = vmatprep.subr.bf16.mxu1 %v13209_v22  ;;  %v10097_v18 = vrot.slane %v13590_v17, %v14612_v46  ;;  %v13252_v22 = vld [vmem:[%s13820_s12 + $0x1f88] ss:$100 sps:$4 sm:$0xff]   ;;  %v13255_v4 = vld [vmem:[%s13820_s12 + $0x370] ss:$100 sps:$4 sm:$0xff]  }
 0x408   : > { %9368 = vmatpush2.bf16.msra.mxu0 %v13210_v11  ;;  %v13260_v11 = vld [vmem:[%s13820_s12 + $0x124c] ss:$100 sps:$4 sm:$0xff]  }
 0x409   : > { %9397 = vmatpush1.bf16.msra.mxu1 %v13207_v35  ;;  %9369 = vmatprep.subr.bf16.mxu0 %v13218_v60 }
 0x40a   : > { %9398 = vmatprep.subr.bf16.mxu1 %v13215_v27 }
 0x40b   : > { %v9047_v37 = vpop.f32.mrf.mxu0 }
 0x40c   : > { %9370 = vmatpush2.bf16.msra.mxu0 %v13216_v28  ;;  %v9048_v41 = vadd.f32 %v9047_v37, %v15050_v31  ;;  %v13263_v31 = vld [vmem:[%s13820_s12 + $0x2ac] ss:$100 sps:$4 sm:$0xff]  }
 0x40d   : > { %9399 = vmatpush2.bf16.msra.mxu1 %v13213_v1  ;;  %v9049_v48 = vpop.f32.mrf.mxu0  ;;  %9371 = vmatprep.subr.bf16.mxu0 %v13224_v58  ;;  %v13258_v58 = vld [vmem:[%s13820_s12 + $0x1248] ss:$100 sps:$4 sm:$0xff]  }
 0x40e   : > { %9400 = vmatprep.subr.bf16.mxu1 %v13221_v29  ;;  %v9050_v15 = vadd.f32 %v9049_v48, %v15056_v38  ;;  %v10101_v38 = vrot.slane %v13590_v17, %v14619_v24  ;;  %v13261_v37 = vld [vmem:[%s13820_s12 + $0x2a8] ss:$100 sps:$4 sm:$0xff]  }
 0x40f   : > { %v9051_v34 = vpop.f32.mrf.mxu0  ;;  %v13311_v17 = vld [vmem:[%s13820_s12 + $0x8ec] ss:$100 sps:$4 sm:$0xff]  }
 0x410   : > { %9372 = vmatpush2.bf16.msra.mxu0 %v13222_v43  ;;  %v13269_v43 = vld [vmem:[%s13820_s12 + $0x1e4] ss:$100 sps:$4 sm:$0xff]  }
 0x411   : > { %9401 = vmatpush2.bf16.msra.mxu1 %v13219_v50  ;;  %v9052_v42 = vpop.f32.mrf.mxu0  ;;  %9437 = vmatprep.subr.bf16.mxu0 %v13230_v33  ;;  %v13266_v50 = vld [vmem:[%s13820_s12 + $0x1184] ss:$100 sps:$4 sm:$0xff]  }
 0x412   : > { %9402 = vmatprep.subr.bf16.mxu1 %v13227_v32  ;;  %v13272_v42 = vld [vmem:[%s13820_s12 + $0x10bc] ss:$100 sps:$4 sm:$0xff]  }
 0x413   : > { %9374 = vmatmul.mubr.bf16.vlgmr.msra.gmra.mxu0 %v13918_v9  ;;  %v9129_v47 = vpop.f32.mrf.mxu0 }
 0x414   : > { %9438 = vmatpush1.bf16.msra.mxu0 %v13228_v39  ;;  %9455 = vmatprep.mubr.bf16.mxu0 %v13708_v16  ;;  %v13267_v39 = vld [vmem:[%s13820_s12 + $0x1e0] ss:$100 sps:$4 sm:$0xff]  }
 0x415   : > { %9403 = vmatpush2.bf16.msra.mxu1 %v13225_v23  ;;  %v9131_v57 = vpop.f32.mrf.mxu0  ;;  %9464 = vmatprep.subr.bf16.mxu0 %v13239_v13  ;;  %v13264_v23 = vld [vmem:[%s13820_s12 + $0x1180] ss:$100 sps:$4 sm:$0xff]   ;;  %v13270_v13 = vld [vmem:[%s13820_s12 + $0x10b8] ss:$100 sps:$4 sm:$0xff]  }
 0x416   : > { %9404 = vmatprep.subr.bf16.mxu1 %v13233_v26  ;;  %v13275_v26 = vld [vmem:[%s13820_s12 + $0x11c] ss:$100 sps:$4 sm:$0xff]  }
 0x417   : > { %v9133_v63 = vpop.f32.mrf.mxu0 }
 0x418   : > { %v13279_v63 = vld [vmem:[%s13820_s12 + $0x50] ss:$100 sps:$4 sm:$0xff]  }
 0x419   : > { %9405 = vmatpush2.bf16.msra.mxu1 %v13231_v53  ;;  %v9134_v40 = vpop.f32.mrf.mxu0  ;;  %v13278_v53 = vld [vmem:[%s13820_s12 + $0xff4] ss:$100 sps:$4 sm:$0xff]  }
 0x41a   : > { %9406 = vmatprep.subr.bf16.mxu1 %v13236_v59  ;;  %v13276_v59 = vld [vmem:[%s13820_s12 + $0xff0] ss:$100 sps:$4 sm:$0xff]   ;;  %v13282_v40 = vld [vmem:[%s13820_s12 + $0xf28] ss:$100 sps:$4 sm:$0xff]  }
 0x41b   : > { %11623 = vmatmul.mubr.msk.bf16.vlgmr.msra.gmra.mxu0 %vm7820_vm0, %v13933_v19 }
 0x41c   : > { %9465 = vmatpush1.bf16.msra.mxu0 %v13237_v0  ;;  %9496 = vmatprep.mubr.bf16.mxu0 %v13883_v49  ;;  %v13287_v0 = vld [vmem:[%s13820_s12 + $0xc0c] ss:$100 sps:$4 sm:$0xff]  }
 0x41d   : > { %9407 = vmatpush2.bf16.msra.mxu1 %v13234_v61  ;;  %9466 = vmatprep.subr.bf16.mxu0 %v13245_v56  ;;  %v13284_v61 = vld [vmem:[%s13820_s12 + $0xf2c] ss:$100 sps:$4 sm:$0xff]   ;;  %v13290_v56 = vld [vmem:[%s13820_s12 + $0xe64] ss:$100 sps:$4 sm:$0xff]  }
 0x41e   : > { %9408 = vmatprep.subr.bf16.mxu1 %v13242_v30  ;;  %v13285_v30 = vld [vmem:[%s13820_s12 + $0xc08] ss:$100 sps:$4 sm:$0xff]  }
 0x420   : > { %9467 = vmatpush1.bf16.msra.mxu0 %v13243_v20  ;;  %v13288_v20 = vld [vmem:[%s13820_s12 + $0xe60] ss:$100 sps:$4 sm:$0xff]  }
 0x421   : > { %9409 = vmatpush2.bf16.msra.mxu1 %v13240_v54  ;;  %9468 = vmatprep.subr.bf16.mxu0 %v13251_v6  ;;  %v13293_v54 = vld [vmem:[%s13820_s12 + $0xb44] ss:$100 sps:$4 sm:$0xff]   ;;  %v13296_v6 = vld [vmem:[%s13820_s12 + $0xd9c] ss:$100 sps:$4 sm:$0xff]  }
 0x422   : > { %9410 = vmatprep.subr.bf16.mxu1 %v13248_v3  ;;  %v13291_v3 = vld [vmem:[%s13820_s12 + $0xb40] ss:$100 sps:$4 sm:$0xff]  }
 0x424   : > { %v9088_v45 = vpop.f32.mrf.mxu1  ;;  %9469 = vmatpush1.bf16.msra.mxu0 %v13249_v14  ;;  %v13294_v14 = vld [vmem:[%s13820_s12 + $0xd98] ss:$100 sps:$4 sm:$0xff]  }
 0x425   : > { %v9089_v51 = vadd.f32 %v9088_v45, %v9048_v41  ;;  %9411 = vmatpush2.bf16.msra.mxu1 %v13246_v10  ;;  %9470 = vmatprep.subr.bf16.mxu0 %v13257_v44  ;;  %v13299_v10 = vld [vmem:[%s13820_s12 + $0xa7c] ss:$100 sps:$4 sm:$0xff]   ;;  %v13302_v44 = vld [vmem:[%s13820_s12 + $0xcd4] ss:$100 sps:$4 sm:$0xff]  }
 0x426   : > { %v9090_v35 = vpop.f32.mrf.mxu1  ;;  %9412 = vmatprep.subr.bf16.mxu1 %v13254_v25  ;;  %v13297_v25 = vld [vmem:[%s13820_s12 + $0xa78] ss:$100 sps:$4 sm:$0xff]   ;;  %v13300_v45 = vld [vmem:[%s13820_s12 + $0xcd0] ss:$100 sps:$4 sm:$0xff]  }
 0x427   : > { %v9130_v27 = vadd.f32 %v9129_v47, %v9089_v51  ;;  %v9091_v60 = vadd.f32 %v9090_v35, %v9050_v15  ;;  %v13273_v47 = vld [vmem:[%s13820_s12 + $0x118] ss:$100 sps:$4 sm:$0xff]   ;;  %v13303_v15 = vld [vmem:[%s13820_s12 + $0x9b0] ss:$100 sps:$4 sm:$0xff]   ;;  %v13317_v35 = vld [vmem:[%s13820_s12 + $0x824] ss:$100 sps:$4 sm:$0xff]  }
 0x428   : > { %v9092_v1 = vpop.f32.mrf.mxu1  ;;  %9471 = vmatpush1.bf16.msra.mxu0 %v13255_v4  ;;  %v13305_v41 = vld [vmem:[%s13820_s12 + $0x9b4] ss:$100 sps:$4 sm:$0xff]   ;;  %v13308_v51 = vld [vmem:[%s13820_s12 + $0x188c] ss:$100 sps:$4 sm:$0xff]   ;;  %v13314_v4 = vld [vmem:[%s13820_s12 + $0x17c4] ss:$100 sps:$4 sm:$0xff]  }
 0x429   : > { %v10177_v28 = vadd.f32 %v10097_v18, %v9130_v27  ;;  %v9132_v29 = vadd.f32 %v9131_v57, %v9091_v60  ;;  %9413 = vmatpush2.bf16.msra.mxu1 %v13252_v22  ;;  %9472 = vmatprep.subr.bf16.mxu0 %v13263_v31  ;;  %v13281_v57 = vld [vmem:[%s13820_s12 + $0x54] ss:$100 sps:$4 sm:$0xff]   ;;  %v13306_v18 = vld [vmem:[%s13820_s12 + $0x1888] ss:$100 sps:$4 sm:$0xff]   ;;  %v13315_v31 = vld [vmem:[%s13820_s12 + $0x820] ss:$100 sps:$4 sm:$0xff]  }
 0x42a   : > { %9505 = vmatprep.subr.bf16.mxu1 %v13260_v11  ;;  %v9093_v48 = vpop.f32.mrf.mxu1  ;;  %v13309_v22 = vld [vmem:[%s13820_s12 + $0x8e8] ss:$100 sps:$4 sm:$0xff]   ;;  %v13312_v11 = vld [vmem:[%s13820_s12 + $0x17c0] ss:$100 sps:$4 sm:$0xff]   ;;  %v13321_v1 = vld [vmem:[%s13820_s12 + $0x758] ss:$100 sps:$4 sm:$0xff]  }
 0x42b   : > { %v10202_v32 = vmax.f32 %v10177_v28, 0.0  ;;  %v10178_v33 = vadd.f32 %v10101_v38, %v9132_v29  ;;  %v13320_v27 = vld [vmem:[%s13820_s12 + $0x16fc] ss:$100 sps:$4 sm:$0xff]   ;;  %v13326_v28 = vld [vmem:[%s13820_s12 + $0x1634] ss:$100 sps:$4 sm:$0xff]  }
 0x42c   : > { %9415 = vmatmul.mubr.bf16.vlgmr.msra.gmra.mxu1 %v14003_v21  ;;  %9473 = vmatpush1.bf16.msra.mxu0 %v13261_v37  ;;  %v13323_v60 = vld [vmem:[%s13820_s12 + $0x75c] ss:$100 sps:$4 sm:$0xff]   ;;  %v13329_v29 = vld [vmem:[%s13820_s12 + $0x694] ss:$100 sps:$4 sm:$0xff]   ;;  %v13332_v48 = vld [vmem:[%s13820_s12 + $0x156c] ss:$100 sps:$4 sm:$0xff]  }
 0x42d   : > { %10227 = vst [vmem:[%s14264_s20 + $0x70] sm:$0xff] %v10202_v32  ;;  %v10203_v34 = vmax.f32 %v10178_v33, 0.0  ;;  %9506 = vmatpush1.bf16.msra.mxu1 %v13258_v58  ;;  %9474 = vmatprep.subr.bf16.mxu0 %v13269_v43  ;;  %v13318_v38 = vld [vmem:[%s13820_s12 + $0x16f8] ss:$100 sps:$4 sm:$0xff]   ;;  %v13324_v37 = vld [vmem:[%s13820_s12 + $0x1630] ss:$100 sps:$4 sm:$0xff]  }
 0x42e   : > { %9507 = vmatprep.subr.bf16.mxu1 %v13266_v50  ;;  %9537 = vmatprep.mubr.bf16.mxu1 %v13889_v52  ;;  %v13327_v50 = vld [vmem:[%s13820_s12 + $0x690] ss:$100 sps:$4 sm:$0xff]  }
 0x42f   : > { %10228 = vst [vmem:[%s14264_s20 + $0x78] sm:$0xff] %v10203_v34  ;;  %v13335_v32 = vld [vmem:[%s13820_s12 + $0x1ecc] ss:$100 sps:$4 sm:$0xff]  }
 0x430   : > { %9475 = vmatpush1.bf16.msra.mxu0 %v13267_v39  ;;  %v13330_v34 = vld [vmem:[%s13820_s12 + $0x1568] ss:$100 sps:$4 sm:$0xff]  }
 0x431   : > { %9508 = vmatpush1.bf16.msra.mxu1 %v13264_v23  ;;  %9476 = vmatprep.subr.bf16.mxu0 %v13275_v26  ;;  %v13333_v23 = vld [vmem:[%s13820_s12 + $0x1ec8] ss:$100 sps:$4 sm:$0xff]  }
 0x432   : > { %9509 = vmatprep.subr.bf16.mxu1 %v13272_v42  ;;  %v13338_v42 = vld [vmem:[%s13820_s12 + $0x14a4] ss:$100 sps:$4 sm:$0xff]  }
 0x433   : > { %v13341_v26 = vld [vmem:[%s13820_s12 + $0x1e04] ss:$100 sps:$4 sm:$0xff]  }
 0x434   : > { %9477 = vmatpush1.bf16.msra.mxu0 %v13273_v47  ;;  %v13339_v47 = vld [vmem:[%s13820_s12 + $0x1e00] ss:$100 sps:$4 sm:$0xff]  }
 0x435   : > { %9510 = vmatpush1.bf16.msra.mxu1 %v13270_v13  ;;  %9478 = vmatprep.subr.bf16.mxu0 %v13281_v57  ;;  %v13336_v13 = vld [vmem:[%s13820_s12 + $0x14a0] ss:$100 sps:$4 sm:$0xff]  }
 0x436   : > { %9511 = vmatprep.subr.bf16.mxu1 %v13278_v53  ;;  %v13344_v53 = vld [vmem:[%s13820_s12 + $0x13dc] ss:$100 sps:$4 sm:$0xff]  }
 0x437   : > { %v13347_v57 = vld [vmem:[%s13820_s12 + $0x1d3c] ss:$100 sps:$4 sm:$0xff]  }
 0x438   : > { %9479 = vmatpush1.bf16.msra.mxu0 %v13279_v63  ;;  %v13345_v63 = vld [vmem:[%s13820_s12 + $0x1d38] ss:$100 sps:$4 sm:$0xff]  }
 0x439   : > { %9512 = vmatpush1.bf16.msra.mxu1 %v13276_v59  ;;  %9480 = vmatprep.subr.bf16.mxu0 %v13287_v0  ;;  %v13342_v59 = vld [vmem:[%s13820_s12 + $0x13d8] ss:$100 sps:$4 sm:$0xff]  }
 0x43a   : > { %9513 = vmatprep.subr.bf16.mxu1 %v13284_v61  ;;  %v13350_v61 = vld [vmem:[%s13820_s12 + $0x1314] ss:$100 sps:$4 sm:$0xff]  }
 0x43b   : > { %v13353_v0 = vld [vmem:[%s13820_s12 + $0x1c74] ss:$100 sps:$4 sm:$0xff]  }
 0x43c   : > { %9481 = vmatpush2.bf16.msra.mxu0 %v13285_v30  ;;  %v13348_v30 = vld [vmem:[%s13820_s12 + $0x1310] ss:$100 sps:$4 sm:$0xff]  }
 0x43d   : > { %9514 = vmatpush1.bf16.msra.mxu1 %v13282_v40  ;;  %9482 = vmatprep.subr.bf16.mxu0 %v13293_v54 }
 0x43e   : > { %9515 = vmatprep.subr.bf16.mxu1 %v13290_v56  ;;  %v13351_v56 = vld [vmem:[%s13820_s12 + $0x1c70] ss:$100 sps:$4 sm:$0xff]  }
 0x440   : > { %9483 = vmatpush2.bf16.msra.mxu0 %v13291_v3  ;;  %v13359_v3 = vld [vmem:[%s13820_s12 + $0x25d4] ss:$100 sps:$4 sm:$0xff]  }
 0x441   : > { %9516 = vmatpush1.bf16.msra.mxu1 %v13288_v20  ;;  %9484 = vmatprep.subr.bf16.mxu0 %v13299_v10  ;;  %v13356_v20 = vld [vmem:[%s13820_s12 + $0x1bac] ss:$100 sps:$4 sm:$0xff]  }
 0x442   : > { %9517 = vmatprep.subr.bf16.mxu1 %v13296_v6  ;;  %v13354_v10 = vld [vmem:[%s13820_s12 + $0x1ba8] ss:$100 sps:$4 sm:$0xff]  }
 0x444   : > { %9485 = vmatpush2.bf16.msra.mxu0 %v13297_v25  ;;  %v13362_v25 = vld [vmem:[%s13820_s12 + $0x1ae4] ss:$100 sps:$4 sm:$0xff]  }
 0x445   : > { %9518 = vmatpush1.bf16.msra.mxu1 %v13294_v14  ;;  %9486 = vmatprep.subr.bf16.mxu0 %v13305_v41  ;;  %v13357_v14 = vld [vmem:[%s13820_s12 + $0x25d0] ss:$100 sps:$4 sm:$0xff]  }
 0x446   : > { %9519 = vmatprep.subr.bf16.mxu1 %v13302_v44  ;;  %v13365_v41 = vld [vmem:[%s13820_s12 + $0x5d4] ss:$100 sps:$4 sm:$0xff]  }
 0x448   : > { %9487 = vmatpush2.bf16.msra.mxu0 %v13303_v15  ;;  %v13360_v15 = vld [vmem:[%s13820_s12 + $0x1ae0] ss:$100 sps:$4 sm:$0xff]  }
 0x449   : > { %9520 = vmatpush1.bf16.msra.mxu1 %v13300_v45  ;;  %9488 = vmatprep.subr.bf16.mxu0 %v13311_v17 }
 0x44a   : > { %9521 = vmatprep.subr.bf16.mxu1 %v13308_v51  ;;  %v13368_v51 = vld [vmem:[%s13820_s12 + $0x1a1c] ss:$100 sps:$4 sm:$0xff]  }
 0x44c   : > { %9489 = vmatpush2.bf16.msra.mxu0 %v13309_v22  ;;  %v13363_v22 = vld [vmem:[%s13820_s12 + $0x5d0] ss:$100 sps:$4 sm:$0xff]  }
 0x44d   : > { %9522 = vmatpush2.bf16.msra.mxu1 %v13306_v18  ;;  %9490 = vmatprep.subr.bf16.mxu0 %v13317_v35  ;;  %v13371_v35 = vld [vmem:[%s13820_s12 + $0x50c] ss:$100 sps:$4 sm:$0xff]  }
 0x44e   : > { %9523 = vmatprep.subr.bf16.mxu1 %v13314_v4  ;;  %v13366_v4 = vld [vmem:[%s13820_s12 + $0x1a18] ss:$100 sps:$4 sm:$0xff]  }
 0x450   : > { %9491 = vmatpush2.bf16.msra.mxu0 %v13315_v31 }
 0x451   : > { %9524 = vmatpush2.bf16.msra.mxu1 %v13312_v11  ;;  %9492 = vmatprep.subr.bf16.mxu0 %v13323_v60  ;;  %v13374_v11 = vld [vmem:[%s13820_s12 + $0x1954] ss:$100 sps:$4 sm:$0xff]  }
 0x452   : > { %9525 = vmatprep.subr.bf16.mxu1 %v13320_v27  ;;  %v13369_v27 = vld [vmem:[%s13820_s12 + $0x508] ss:$100 sps:$4 sm:$0xff]   ;;  %v13372_v60 = vld [vmem:[%s13820_s12 + $0x1950] ss:$100 sps:$4 sm:$0xff]  }
 0x453   : > { %v15180_v58 = vpop.f32.mrf.mxu0 }
 0x454   : > { %9493 = vmatpush2.bf16.msra.mxu0 %v13321_v1  ;;  %v13380_v1 = vld [vmem:[%s13820_s12 + $0x250c] ss:$100 sps:$4 sm:$0xff]  }
 0x455   : > { %9526 = vmatpush2.bf16.msra.mxu1 %v13318_v38  ;;  %v15184_v43 = vpop.f32.mrf.mxu0  ;;  %9494 = vmatprep.subr.bf16.mxu0 %v13329_v29  ;;  %v13377_v38 = vld [vmem:[%s13820_s12 + $0x444] ss:$100 sps:$4 sm:$0xff]  }
 0x456   : > { %9527 = vmatprep.subr.bf16.mxu1 %v13326_v28  ;;  %v13375_v28 = vld [vmem:[%s13820_s12 + $0x440] ss:$100 sps:$4 sm:$0xff]   ;;  %v13378_v29 = vld [vmem:[%s13820_s12 + $0x2508] ss:$100 sps:$4 sm:$0xff]  }
 0x457   : > { %v9174_v33 = vpop.f32.mrf.mxu0 }
 0x458   : > { %9495 = vmatpush2.bf16.msra.mxu0 %v13327_v50  ;;  %v13386_v50 = vld [vmem:[%s13820_s12 + $0x2444] ss:$100 sps:$4 sm:$0xff]   ;;  %v13389_v33 = vld [vmem:[%s13820_s12 + $0x2b4] ss:$100 sps:$4 sm:$0xff]  }
 0x459   : > { %9528 = vmatpush2.bf16.msra.mxu1 %v13324_v37  ;;  %v9175_v39 = vpop.f32.mrf.mxu0  ;;  %9546 = vmatprep.subr.bf16.mxu0 %v13335_v32  ;;  %v13383_v37 = vld [vmem:[%s13820_s12 + $0x37c] ss:$100 sps:$4 sm:$0xff]  }
 0x45a   : > { %9529 = vmatprep.subr.bf16.mxu1 %v13332_v48  ;;  %v13381_v48 = vld [vmem:[%s13820_s12 + $0x378] ss:$100 sps:$4 sm:$0xff]   ;;  %v13384_v32 = vld [vmem:[%s13820_s12 + $0x2440] ss:$100 sps:$4 sm:$0xff]  }
 0x45b   : > { %9497 = vmatmul.mubr.bf16.vlgmr.msra.gmra.mxu0 %v13916_v8  ;;  %v13390_v39 = vld [vmem:[%s13820_s12 + $0x2378] ss:$100 sps:$4 sm:$0xff]  }
 0x45c   : > { %9547 = vmatpush1.bf16.msra.mxu0 %v13333_v23  ;;  %9578 = vmatprep.mubr.bf16.mxu0 %v13956_v36  ;;  %v13387_v23 = vld [vmem:[%s13820_s12 + $0x2b0] ss:$100 sps:$4 sm:$0xff]  }
 0x45d   : > { %9530 = vmatpush2.bf16.msra.mxu1 %v13330_v34  ;;  %9548 = vmatprep.subr.bf16.mxu0 %v13341_v26  ;;  %v13392_v34 = vld [vmem:[%s13820_s12 + $0x237c] ss:$100 sps:$4 sm:$0xff]   ;;  %v13398_v26 = vld [vmem:[%s13820_s12 + $0x22b4] ss:$100 sps:$4 sm:$0xff]  }
 0x45e   : > { %9531 = vmatprep.subr.bf16.mxu1 %v13338_v42  ;;  %v13395_v42 = vld [vmem:[%s13820_s12 + $0x1ec] ss:$100 sps:$4 sm:$0xff]  }
 0x460   : > { %9549 = vmatpush1.bf16.msra.mxu0 %v13339_v47  ;;  %v13396_v47 = vld [vmem:[%s13820_s12 + $0x22b0] ss:$100 sps:$4 sm:$0xff]  }
 0x461   : > { %9532 = vmatpush2.bf16.msra.mxu1 %v13336_v13  ;;  %9550 = vmatprep.subr.bf16.mxu0 %v13347_v57  ;;  %v13393_v13 = vld [vmem:[%s13820_s12 + $0x1e8] ss:$100 sps:$4 sm:$0xff]  }
 0x462   : > { %9533 = vmatprep.subr.bf16.mxu1 %v13344_v53  ;;  %v13401_v53 = vld [vmem:[%s13820_s12 + $0x124] ss:$100 sps:$4 sm:$0xff]   ;;  %v13404_v57 = vld [vmem:[%s13820_s12 + $0x21ec] ss:$100 sps:$4 sm:$0xff]  }
 0x464   : > { %v15202_v40 = vpop.f32.mrf.mxu1  ;;  %9551 = vmatpush1.bf16.msra.mxu0 %v13345_v63  ;;  %v13402_v63 = vld [vmem:[%s13820_s12 + $0x21e8] ss:$100 sps:$4 sm:$0xff]  }
 0x465   : > { %9534 = vmatpush2.bf16.msra.mxu1 %v13342_v59  ;;  %9552 = vmatprep.subr.bf16.mxu0 %v13353_v0  ;;  %v13399_v59 = vld [vmem:[%s13820_s12 + $0x120] ss:$100 sps:$4 sm:$0xff]  }
 0x466   : > { %v15206_v54 = vpop.f32.mrf.mxu1  ;;  %9535 = vmatprep.subr.bf16.mxu1 %v13350_v61  ;;  %v13407_v61 = vld [vmem:[%s13820_s12 + $0x5c] ss:$100 sps:$4 sm:$0xff]   ;;  %v13410_v0 = vld [vmem:[%s13820_s12 + $0x2124] ss:$100 sps:$4 sm:$0xff]  }
 0x468   : > { %v9215_v6 = vpop.f32.mrf.mxu1  ;;  %9553 = vmatpush1.bf16.msra.mxu0 %v13351_v56  ;;  %v13408_v56 = vld [vmem:[%s13820_s12 + $0x2120] ss:$100 sps:$4 sm:$0xff]  }
 0x469   : > { %9536 = vmatpush2.bf16.msra.mxu1 %v13348_v30  ;;  %9554 = vmatprep.subr.bf16.mxu0 %v13356_v20  ;;  %v13405_v30 = vld [vmem:[%s13820_s12 + $0x58] ss:$100 sps:$4 sm:$0xff]   ;;  %v13411_v6 = vld [vmem:[%s13820_s12 + $0xc10] ss:$100 sps:$4 sm:$0xff]  }
 0x46a   : > { %9601 = vmatprep.subr.bf16.mxu1 %v13359_v3  ;;  %v9216_v44 = vpop.f32.mrf.mxu1  ;;  %v13413_v20 = vld [vmem:[%s13820_s12 + $0xc14] ss:$100 sps:$4 sm:$0xff]   ;;  %v13416_v3 = vld [vmem:[%s13820_s12 + $0x205c] ss:$100 sps:$4 sm:$0xff]  }
 0x46b   : > { %v13422_v44 = vld [vmem:[%s13820_s12 + $0x1f94] ss:$100 sps:$4 sm:$0xff]  }
 0x46c   : > { %9538 = vmatmul.mubr.bf16.vlgmr.msra.gmra.mxu1 %v13918_v9  ;;  %v15215_v45 = vpop.f32.mrf.mxu1  ;;  %9555 = vmatpush1.bf16.msra.mxu0 %v13354_v10  ;;  %v13414_v10 = vld [vmem:[%s13820_s12 + $0x2058] ss:$100 sps:$4 sm:$0xff]  }
 0x46d   : > { %9602 = vmatpush1.bf16.msra.mxu1 %v13357_v14  ;;  %9556 = vmatprep.subr.bf16.mxu0 %v13362_v25  ;;  %v15260_v14 = vld [vmem:[%s13826_s30 + $0x10] sm:$0xff] }
 0x46e   : > { %9619 = vmatprep.mubr.bf16.mxu1 %v13708_v16  ;;  %v15220_v17 = vpop.f32.mrf.mxu1  ;;  %9628 = vmatprep.subr.bf16.mxu1 %v13365_v41  ;;  %v13419_v25 = vld [vmem:[%s13820_s12 + $0xb4c] ss:$100 sps:$4 sm:$0xff]   ;;  %v9212_v41 = vadd.f32 %v15202_v40, %v15180_v58  ;;  %v13428_v58 = vld [vmem:[%s13820_s12 + $0x1254] ss:$100 sps:$4 sm:$0xff]  }
 0x470   : > { %v9297_v18 = vpop.f32.mrf.mxu1  ;;  %9557 = vmatpush1.bf16.msra.mxu0 %v13360_v15 }
 0x471   : > { %9558 = vmatprep.subr.bf16.mxu0 %v13368_v51  ;;  %v9214_v51 = vadd.f32 %v15206_v54, %v15184_v43  ;;  %v10109_v54 = vrot.slane %v15260_v14, %v14240_v7 }
 0x472   : > { %v9298_v31 = vpop.f32.mrf.mxu1 }
 0x473   : > { %v13425_v31 = vld [vmem:[%s13820_s12 + $0xa84] ss:$100 sps:$4 sm:$0xff]  }
 0x474   : > { %11624 = vmatmul.mubr.msk.bf16.vlgmr.msra.gmra.mxu1 %vm7820_vm0, %v13933_v19  ;;  %9559 = vmatpush1.bf16.msra.mxu0 %v13366_v4  ;;  %v13417_v4 = vld [vmem:[%s13820_s12 + $0xb48] ss:$100 sps:$4 sm:$0xff]  }
 0x475   : > { %9629 = vmatpush1.bf16.msra.mxu1 %v13363_v22  ;;  %9560 = vmatprep.subr.bf16.mxu0 %v13374_v11  ;;  %v10105_v22 = vrot.slane %v15260_v14, %v14230_v2 }
 0x476   : > { %9630 = vmatprep.subr.bf16.mxu1 %v13371_v35  ;;  %9660 = vmatprep.mubr.bf16.mxu1 %v13883_v49  ;;  %v13420_v35 = vld [vmem:[%s13820_s12 + $0x1f90] ss:$100 sps:$4 sm:$0xff]  }
 0x478   : > { %9561 = vmatpush1.bf16.msra.mxu0 %v13372_v60 }
 0x479   : > { %9631 = vmatpush1.bf16.msra.mxu1 %v13369_v27  ;;  %9562 = vmatprep.subr.bf16.mxu0 %v13380_v1  ;;  %v13426_v1 = vld [vmem:[%s13820_s12 + $0x1250] ss:$100 sps:$4 sm:$0xff]  }
 0x47a   : > { %9632 = vmatprep.subr.bf16.mxu1 %v13377_v38  ;;  %v13423_v38 = vld [vmem:[%s13820_s12 + $0xa80] ss:$100 sps:$4 sm:$0xff]  }
 0x47c   : > { %9563 = vmatpush2.bf16.msra.mxu0 %v13378_v29  ;;  %v13434_v29 = vld [vmem:[%s13820_s12 + $0x118c] ss:$100 sps:$4 sm:$0xff]  }
 0x47d   : > { %9633 = vmatpush1.bf16.msra.mxu1 %v13375_v28  ;;  %9564 = vmatprep.subr.bf16.mxu0 %v13386_v50  ;;  %v13429_v50 = vld [vmem:[%s13820_s12 + $0x9b8] ss:$100 sps:$4 sm:$0xff]  }
 0x47e   : > { %9634 = vmatprep.subr.bf16.mxu1 %v13383_v37 }
 0x480   : > { %9565 = vmatpush2.bf16.msra.mxu0 %v13384_v32  ;;  %v13437_v32 = vld [vmem:[%s13820_s12 + $0x8f4] ss:$100 sps:$4 sm:$0xff]  }
 0x481   : > { %9635 = vmatpush1.bf16.msra.mxu1 %v13381_v48  ;;  %9566 = vmatprep.subr.bf16.mxu0 %v13392_v34  ;;  %v13432_v48 = vld [vmem:[%s13820_s12 + $0x1188] ss:$100 sps:$4 sm:$0xff]   ;;  %v13435_v34 = vld [vmem:[%s13820_s12 + $0x8f0] ss:$100 sps:$4 sm:$0xff]  }
 0x482   : > { %9636 = vmatprep.subr.bf16.mxu1 %v13389_v33  ;;  %v13440_v33 = vld [vmem:[%s13820_s12 + $0x10c4] ss:$100 sps:$4 sm:$0xff]  }
 0x484   : > { %9567 = vmatpush2.bf16.msra.mxu0 %v13390_v39  ;;  %v13443_v39 = vld [vmem:[%s13820_s12 + $0x82c] ss:$100 sps:$4 sm:$0xff]  }
 0x485   : > { %9637 = vmatpush1.bf16.msra.mxu1 %v13387_v23  ;;  %9568 = vmatprep.subr.bf16.mxu0 %v13398_v26  ;;  %v13438_v23 = vld [vmem:[%s13820_s12 + $0x10c0] ss:$100 sps:$4 sm:$0xff]   ;;  %v13441_v26 = vld [vmem:[%s13820_s12 + $0x828] ss:$100 sps:$4 sm:$0xff]  }
 0x486   : > { %9638 = vmatprep.subr.bf16.mxu1 %v13395_v42  ;;  %v13446_v42 = vld [vmem:[%s13820_s12 + $0xffc] ss:$100 sps:$4 sm:$0xff]  }
 0x488   : > { %9569 = vmatpush2.bf16.msra.mxu0 %v13396_v47  ;;  %v13449_v47 = vld [vmem:[%s13820_s12 + $0x764] ss:$100 sps:$4 sm:$0xff]  }
 0x489   : > { %9639 = vmatpush1.bf16.msra.mxu1 %v13393_v13  ;;  %9570 = vmatprep.subr.bf16.mxu0 %v13404_v57  ;;  %v13444_v13 = vld [vmem:[%s13820_s12 + $0xff8] ss:$100 sps:$4 sm:$0xff]   ;;  %v13447_v57 = vld [vmem:[%s13820_s12 + $0x760] ss:$100 sps:$4 sm:$0xff]  }
 0x48a   : > { %9640 = vmatprep.subr.bf16.mxu1 %v13401_v53  ;;  %v13452_v53 = vld [vmem:[%s13820_s12 + $0xf34] ss:$100 sps:$4 sm:$0xff]  }
 0x48c   : > { %9571 = vmatpush2.bf16.msra.mxu0 %v13402_v63  ;;  %v13455_v63 = vld [vmem:[%s13820_s12 + $0x69c] ss:$100 sps:$4 sm:$0xff]  }
 0x48d   : > { %9641 = vmatpush1.bf16.msra.mxu1 %v13399_v59  ;;  %9572 = vmatprep.subr.bf16.mxu0 %v13410_v0  ;;  %v13450_v59 = vld [vmem:[%s13820_s12 + $0xf30] ss:$100 sps:$4 sm:$0xff]  }
 0x48e   : > { %9642 = vmatprep.subr.bf16.mxu1 %v13407_v61  ;;  %v13458_v61 = vld [vmem:[%s13820_s12 + $0xe6c] ss:$100 sps:$4 sm:$0xff]  }
 0x490   : > { %9573 = vmatpush2.bf16.msra.mxu0 %v13408_v56  ;;  %v13456_v56 = vld [vmem:[%s13820_s12 + $0xe68] ss:$100 sps:$4 sm:$0xff]  }
 0x491   : > { %9643 = vmatpush1.bf16.msra.mxu1 %v13405_v30  ;;  %9574 = vmatprep.subr.bf16.mxu0 %v13416_v3  ;;  %v13453_v30 = vld [vmem:[%s13820_s12 + $0x698] ss:$100 sps:$4 sm:$0xff]   ;;  %v13464_v3 = vld [vmem:[%s13820_s12 + $0xda4] ss:$100 sps:$4 sm:$0xff]  }
 0x492   : > { %9644 = vmatprep.subr.bf16.mxu1 %v13413_v20  ;;  %v13461_v20 = vld [vmem:[%s13820_s12 + $0x1ed4] ss:$100 sps:$4 sm:$0xff]  }
 0x493   : > { %v9252_v15 = vpop.f32.mrf.mxu0 }
 0x494   : > { %v9253_v18 = vadd.f32 %v9252_v15, %v9212_v41  ;;  %9575 = vmatpush2.bf16.msra.mxu0 %v13414_v10  ;;  %v13467_v41 = vld [vmem:[%s13820_s12 + $0x1e0c] ss:$100 sps:$4 sm:$0xff]   ;;  %v13470_v15 = vld [vmem:[%s13820_s12 + $0xcdc] ss:$100 sps:$4 sm:$0xff]  }
 0x495   : > { %9645 = vmatpush2.bf16.msra.mxu1 %v13411_v6  ;;  %v9254_v11 = vpop.f32.mrf.mxu0  ;;  %9576 = vmatprep.subr.bf16.mxu0 %v13422_v44  ;;  %v13462_v44 = vld [vmem:[%s13820_s12 + $0xda0] ss:$100 sps:$4 sm:$0xff]  }
 0x496   : > { %9646 = vmatprep.subr.bf16.mxu1 %v13419_v25  ;;  %v9294_v40 = vadd.f32 %v15215_v45, %v9253_v18  ;;  %v9255_v43 = vadd.f32 %v9254_v11, %v9214_v51  ;;  %v13431_v45 = vld [vmem:[%s13820_s12 + $0x9bc] ss:$100 sps:$4 sm:$0xff]   ;;  %v13459_v25 = vld [vmem:[%s13820_s12 + $0x1ed0] ss:$100 sps:$4 sm:$0xff]   ;;  %v13465_v18 = vld [vmem:[%s13820_s12 + $0x1e08] ss:$100 sps:$4 sm:$0xff]  }
 0x497   : > { %v9256_v2 = vpop.f32.mrf.mxu0  ;;  %v13471_v11 = vld [vmem:[%s13820_s12 + $0x1d40] ss:$100 sps:$4 sm:$0xff]  }
 0x498   : > { %v10179_v27 = vadd.f32 %v10105_v22, %v9294_v40  ;;  %v9296_v60 = vadd.f32 %v15220_v17, %v9255_v43  ;;  %9577 = vmatpush2.bf16.msra.mxu0 %v13420_v35  ;;  %v13468_v22 = vld [vmem:[%s13820_s12 + $0xcd8] ss:$100 sps:$4 sm:$0xff]   ;;  %v13482_v40 = vld [vmem:[%s13820_s12 + $0x17cc] ss:$100 sps:$4 sm:$0xff]  }
 0x499   : > { %9647 = vmatpush2.bf16.msra.mxu1 %v13417_v4  ;;  %v9257_v28 = vpop.f32.mrf.mxu0  ;;  %9669 = vmatprep.subr.bf16.mxu0 %v13428_v58  ;;  %v13473_v4 = vld [vmem:[%s13820_s12 + $0x1d44] ss:$100 sps:$4 sm:$0xff]   ;;  %v13476_v35 = vld [vmem:[%s13820_s12 + $0x1894] ss:$100 sps:$4 sm:$0xff]   ;;  %v13479_v58 = vld [vmem:[%s13820_s12 + $0x1c7c] ss:$100 sps:$4 sm:$0xff]  }
 0x49a   : > { %9648 = vmatprep.subr.bf16.mxu1 %v13425_v31  ;;  %v10204_v7 = vmax.f32 %v10179_v27, 0.0  ;;  %v10180_v37 = vadd.f32 %v10109_v54, %v9296_v60  ;;  %v13474_v31 = vld [vmem:[%s13820_s12 + $0x1890] ss:$100 sps:$4 sm:$0xff]   ;;  %v13477_v43 = vld [vmem:[%s13820_s12 + $0x1c78] ss:$100 sps:$4 sm:$0xff]  }
 0x49b   : > { %9579 = vmatmul.mubr.bf16.vlgmr.msra.gmra.mxu0 %v14003_v21  ;;  %v13480_v54 = vld [vmem:[%s13820_s12 + $0x17c8] ss:$100 sps:$4 sm:$0xff]   ;;  %v13485_v2 = vld [vmem:[%s13820_s12 + $0x1bb4] ss:$100 sps:$4 sm:$0xff]   ;;  %v13494_v28 = vld [vmem:[%s13820_s12 + $0x163c] ss:$100 sps:$4 sm:$0xff]  }
 0x49c   : > { %10229 = vst [vmem:[%s14264_s20 + $0x80] sm:$0xff] %v10204_v7  ;;  %v10205_v17 = vmax.f32 %v10180_v37, 0.0  ;;  %9670 = vmatpush1.bf16.msra.mxu0 %v13426_v1  ;;  %9701 = vmatprep.mubr.bf16.mxu0 %v13889_v52  ;;  %v13488_v27 = vld [vmem:[%s13820_s12 + $0x1704] ss:$100 sps:$4 sm:$0xff]   ;;  %v13483_v60 = vld [vmem:[%s13820_s12 + $0x1bb0] ss:$100 sps:$4 sm:$0xff]  }
 0x49d   : > { %9649 = vmatpush2.bf16.msra.mxu1 %v13423_v38  ;;  %9671 = vmatprep.subr.bf16.mxu0 %v13434_v29  ;;  %v13486_v38 = vld [vmem:[%s13820_s12 + $0x1700] ss:$100 sps:$4 sm:$0xff]   ;;  %v13491_v1 = vld [vmem:[%s13820_s12 + $0x1aec] ss:$100 sps:$4 sm:$0xff]   ;;  %v13492_v29 = vld [vmem:[%s13820_s12 + $0x1638] ss:$100 sps:$4 sm:$0xff]  }
 0x49e   : > { %9650 = vmatprep.subr.bf16.mxu1 %v13431_v45  ;;  %10230 = vst [vmem:[%s14264_s20 + $0x88] sm:$0xff] %v10205_v17  ;;  %v13489_v45 = vld [vmem:[%s13820_s12 + $0x1ae8] ss:$100 sps:$4 sm:$0xff]   ;;  %v13500_v37 = vld [vmem:[%s13820_s12 + $0x1574] ss:$100 sps:$4 sm:$0xff]  }
 0x49f   : > { %v13497_v7 = vld [vmem:[%s13820_s12 + $0x1a24] ss:$100 sps:$4 sm:$0xff]  }
 0x4a0   : > { %9672 = vmatpush1.bf16.msra.mxu0 %v13432_v48  ;;  %v13495_v17 = vld [vmem:[%s13820_s12 + $0x1a20] ss:$100 sps:$4 sm:$0xff]  }
 0x4a1   : > { %9651 = vmatpush2.bf16.msra.mxu1 %v13429_v50  ;;  %9673 = vmatprep.subr.bf16.mxu0 %v13440_v33  ;;  %v13498_v50 = vld [vmem:[%s13820_s12 + $0x1570] ss:$100 sps:$4 sm:$0xff]   ;;  %v13503_v48 = vld [vmem:[%s13820_s12 + $0x195c] ss:$100 sps:$4 sm:$0xff]  }
 0x4a2   : > { %9652 = vmatprep.subr.bf16.mxu1 %v13437_v32  ;;  %v13506_v32 = vld [vmem:[%s13820_s12 + $0x14ac] ss:$100 sps:$4 sm:$0xff]   ;;  %v13501_v33 = vld [vmem:[%s13820_s12 + $0x1958] ss:$100 sps:$4 sm:$0xff]  }
 0x4a4   : > { %9674 = vmatpush1.bf16.msra.mxu0 %v13438_v23  ;;  %v13509_v23 = vld [vmem:[%s13820_s12 + $0x2514] ss:$100 sps:$4 sm:$0xff]  }
 0x4a5   : > { %9653 = vmatpush2.bf16.msra.mxu1 %v13435_v34  ;;  %9675 = vmatprep.subr.bf16.mxu0 %v13446_v42  ;;  %v13504_v34 = vld [vmem:[%s13820_s12 + $0x14a8] ss:$100 sps:$4 sm:$0xff]   ;;  %v13507_v42 = vld [vmem:[%s13820_s12 + $0x2510] ss:$100 sps:$4 sm:$0xff]  }
 0x4a6   : > { %9654 = vmatprep.subr.bf16.mxu1 %v13443_v39  ;;  %v13512_v39 = vld [vmem:[%s13820_s12 + $0x13e4] ss:$100 sps:$4 sm:$0xff]  }
 0x4a8   : > { %9676 = vmatpush1.bf16.msra.mxu0 %v13444_v13  ;;  %v13515_v13 = vld [vmem:[%s13820_s12 + $0x244c] ss:$100 sps:$4 sm:$0xff]  }
 0x4a9   : > { %9655 = vmatpush2.bf16.msra.mxu1 %v13441_v26  ;;  %9677 = vmatprep.subr.bf16.mxu0 %v13452_v53  ;;  %v13510_v26 = vld [vmem:[%s13820_s12 + $0x13e0] ss:$100 sps:$4 sm:$0xff]  }
 0x4aa   : > { %9656 = vmatprep.subr.bf16.mxu1 %v13449_v47  ;;  %v13518_v47 = vld [vmem:[%s13820_s12 + $0x131c] ss:$100 sps:$4 sm:$0xff]  }
 0x4ac   : > { %v15302_v0 = vpop.f32.mrf.mxu1  ;;  %9678 = vmatpush1.bf16.msra.mxu0 %v13450_v59  ;;  %v13516_v59 = vld [vmem:[%s13820_s12 + $0x1318] ss:$100 sps:$4 sm:$0xff]  }
 0x4ad   : > { %9657 = vmatpush2.bf16.msra.mxu1 %v13447_v57  ;;  %9679 = vmatprep.subr.bf16.mxu0 %v13458_v61  ;;  %v13513_v57 = vld [vmem:[%s13820_s12 + $0x2448] ss:$100 sps:$4 sm:$0xff]  }
 0x4ae   : > { %9658 = vmatprep.subr.bf16.mxu1 %v13455_v63  ;;  %v15308_v6 = vpop.f32.mrf.mxu1  ;;  %v13521_v61 = vld [vmem:[%s13820_s12 + $0x2384] ss:$100 sps:$4 sm:$0xff]  }
 0x4b0   : > { %v9338_v10 = vpop.f32.mrf.mxu1  ;;  %9680 = vmatpush1.bf16.msra.mxu0 %v13456_v56 }
 0x4b1   : > { %9659 = vmatpush2.bf16.msra.mxu1 %v13453_v30  ;;  %9681 = vmatprep.subr.bf16.mxu0 %v13464_v3  ;;  %v13524_v30 = vld [vmem:[%s13820_s12 + $0x25dc] ss:$100 sps:$4 sm:$0xff]  }
 0x4b2   : > { %9710 = vmatprep.subr.bf16.mxu1 %v13461_v20  ;;  %v9339_v51 = vpop.f32.mrf.mxu1  ;;  %v13519_v20 = vld [vmem:[%s13820_s12 + $0x2380] ss:$100 sps:$4 sm:$0xff]   ;;  %v13522_v3 = vld [vmem:[%s13820_s12 + $0x25d8] ss:$100 sps:$4 sm:$0xff]  }
 0x4b4   : > { %9661 = vmatmul.mubr.bf16.vlgmr.msra.gmra.mxu1 %v13916_v8  ;;  %9682 = vmatpush1.bf16.msra.mxu0 %v13462_v44  ;;  %v13531_v44 = vld [vmem:[%s13820_s12 + $0xc18] ss:$100 sps:$4 sm:$0xff]  }
 0x4b5   : > { %9711 = vmatpush1.bf16.msra.mxu1 %v13459_v25  ;;  %9683 = vmatprep.subr.bf16.mxu0 %v13470_v15  ;;  %v13527_v25 = vld [vmem:[%s13820_s12 + $0x22bc] ss:$100 sps:$4 sm:$0xff]  }
 0x4b6   : > { %9712 = vmatprep.subr.bf16.mxu1 %v13467_v41  ;;  %9742 = vmatprep.mubr.bf16.mxu1 %v13956_v36  ;;  %v13525_v15 = vld [vmem:[%s13820_s12 + $0x22b8] ss:$100 sps:$4 sm:$0xff]  }
 0x4b8   : > { %9684 = vmatpush1.bf16.msra.mxu0 %v13468_v22 }
 0x4b9   : > { %9713 = vmatpush1.bf16.msra.mxu1 %v13465_v18  ;;  %9685 = vmatprep.subr.bf16.mxu0 %v13476_v35  ;;  %v13530_v18 = vld [vmem:[%s13820_s12 + $0x21f4] ss:$100 sps:$4 sm:$0xff]  }
 0x4ba   : > { %9714 = vmatprep.subr.bf16.mxu1 %v13473_v4  ;;  %v13528_v4 = vld [vmem:[%s13820_s12 + $0x21f0] ss:$100 sps:$4 sm:$0xff]   ;;  %v13532_v35 = vld [vmem:[%s13820_s12 + $0x5d8] ss:$100 sps:$4 sm:$0xff]  }
 0x4bc   : > { %9686 = vmatpush2.bf16.msra.mxu0 %v13474_v31  ;;  %v13535_v31 = vld [vmem:[%s13820_s12 + $0x212c] ss:$100 sps:$4 sm:$0xff]  }
 0x4bd   : > { %9715 = vmatpush1.bf16.msra.mxu1 %v13471_v11  ;;  %9687 = vmatprep.subr.bf16.mxu0 %v13482_v40  ;;  %v13537_v40 = vld [vmem:[%s13820_s12 + $0x510] ss:$100 sps:$4 sm:$0xff]  }
 0x4be   : > { %9716 = vmatprep.subr.bf16.mxu1 %v13479_v58  ;;  %v13536_v58 = vld [vmem:[%s13820_s12 + $0xb50] ss:$100 sps:$4 sm:$0xff]  }
 0x4c0   : > { %9688 = vmatpush2.bf16.msra.mxu0 %v13480_v54  ;;  %v13541_v54 = vld [vmem:[%s13820_s12 + $0xa88] ss:$100 sps:$4 sm:$0xff]  }
 0x4c1   : > { %9717 = vmatpush1.bf16.msra.mxu1 %v13477_v43  ;;  %9689 = vmatprep.subr.bf16.mxu0 %v13488_v27  ;;  %v13540_v43 = vld [vmem:[%s13820_s12 + $0x2064] ss:$100 sps:$4 sm:$0xff]  }
 0x4c2   : > { %9718 = vmatprep.subr.bf16.mxu1 %v13485_v2  ;;  %v13538_v2 = vld [vmem:[%s13820_s12 + $0x2060] ss:$100 sps:$4 sm:$0xff]   ;;  %v13542_v27 = vld [vmem:[%s13820_s12 + $0x448] ss:$100 sps:$4 sm:$0xff]  }
 0x4c4   : > { %9690 = vmatpush2.bf16.msra.mxu0 %v13486_v38  ;;  %v13546_v38 = vld [vmem:[%s13820_s12 + $0x9c0] ss:$100 sps:$4 sm:$0xff]  }
 0x4c5   : > { %9719 = vmatpush1.bf16.msra.mxu1 %v13483_v60  ;;  %9691 = vmatprep.subr.bf16.mxu0 %v13494_v28  ;;  %v13545_v60 = vld [vmem:[%s13820_s12 + $0x1f9c] ss:$100 sps:$4 sm:$0xff]  }
 0x4c6   : > { %9720 = vmatprep.subr.bf16.mxu1 %v13491_v1 }
 0x4c8   : > { %9692 = vmatpush2.bf16.msra.mxu0 %v13492_v29 }
 0x4c9   : > { %9721 = vmatpush1.bf16.msra.mxu1 %v13489_v45  ;;  %9693 = vmatprep.subr.bf16.mxu0 %v13500_v37  ;;  %v13547_v37 = vld [vmem:[%s13820_s12 + $0x380] ss:$100 sps:$4 sm:$0xff]  }
 0x4ca   : > { %9722 = vmatprep.subr.bf16.mxu1 %v13497_v7  ;;  %v13543_v7 = vld [vmem:[%s13820_s12 + $0x1f98] ss:$100 sps:$4 sm:$0xff]  }
 0x4cc   : > { %9694 = vmatpush2.bf16.msra.mxu0 %v13498_v50  ;;  %v13548_v50 = vld [vmem:[%s13820_s12 + $0x1898] ss:$100 sps:$4 sm:$0xff]  }
 0x4cd   : > { %9723 = vmatpush1.bf16.msra.mxu1 %v13495_v17  ;;  %9695 = vmatprep.subr.bf16.mxu0 %v13506_v32 }
 0x4ce   : > { %9724 = vmatprep.subr.bf16.mxu1 %v13503_v48 }
 0x4d0   : > { %9696 = vmatpush2.bf16.msra.mxu0 %v13504_v34 }
 0x4d1   : > { %9725 = vmatpush1.bf16.msra.mxu1 %v13501_v33  ;;  %9697 = vmatprep.subr.bf16.mxu0 %v13512_v39  ;;  %v13551_v39 = vld [vmem:[%s13820_s12 + $0x2b8] ss:$100 sps:$4 sm:$0xff]  }
 0x4d2   : > { %9726 = vmatprep.subr.bf16.mxu1 %v13509_v23  ;;  %v13549_v23 = vld [vmem:[%s13820_s12 + $0x1258] ss:$100 sps:$4 sm:$0xff]  }
 0x4d3   : > { %v9375_v53 = vpop.f32.mrf.mxu0 }
 0x4d4   : > { %9698 = vmatpush2.bf16.msra.mxu0 %v13510_v26  ;;  %v9376_v1 = vadd.f32 %v9375_v53, %v15302_v0  ;;  %v13550_v0 = vld [vmem:[%s13820_s12 + $0x8f8] ss:$100 sps:$4 sm:$0xff]   ;;  %v13554_v26 = vld [vmem:[%s13820_s12 + $0x830] ss:$100 sps:$4 sm:$0xff]  }
 0x4d5   : > { %9727 = vmatpush2.bf16.msra.mxu1 %v13507_v42  ;;  %v9377_v63 = vpop.f32.mrf.mxu0  ;;  %9699 = vmatprep.subr.bf16.mxu0 %v13518_v47  ;;  %v13552_v42 = vld [vmem:[%s13820_s12 + $0x17d0] ss:$100 sps:$4 sm:$0xff]  }
 0x4d6   : > { %9728 = vmatprep.subr.bf16.mxu1 %v13515_v13  ;;  %v9378_v45 = vadd.f32 %v9377_v63, %v15308_v6  ;;  %v10117_v6 = vrot.slane %v15260_v14, %v14352_v12  ;;  %v13556_v63 = vld [vmem:[%s13820_s12 + $0x1708] ss:$100 sps:$4 sm:$0xff]  }
 0x4d7   : > { %v9379_v56 = vpop.f32.mrf.mxu0 }
 0x4d8   : > { %9700 = vmatpush2.bf16.msra.mxu0 %v13516_v59  ;;  %v13555_v59 = vld [vmem:[%s13820_s12 + $0x1f0] ss:$100 sps:$4 sm:$0xff]   ;;  %v13559_v56 = vld [vmem:[%s13820_s12 + $0x128] ss:$100 sps:$4 sm:$0xff]  }
 0x4d9   : > { %9729 = vmatpush2.bf16.msra.mxu1 %v13513_v57  ;;  %v9380_v10 = vpop.f32.mrf.mxu0  ;;  %9765 = vmatprep.subr.bf16.mxu0 %v13524_v30  ;;  %v13553_v57 = vld [vmem:[%s13820_s12 + $0x1190] ss:$100 sps:$4 sm:$0xff]   ;;  %v13557_v30 = vld [vmem:[%s13820_s12 + $0x10c8] ss:$100 sps:$4 sm:$0xff]  }
 0x4da   : > { %9730 = vmatprep.subr.bf16.mxu1 %v13521_v61  ;;  %v13558_v61 = vld [vmem:[%s13820_s12 + $0x768] ss:$100 sps:$4 sm:$0xff]   ;;  %v13561_v10 = vld [vmem:[%s13820_s12 + $0x1000] ss:$100 sps:$4 sm:$0xff]  }
 0x4db   : > { %9702 = vmatmul.mubr.bf16.vlgmr.msra.gmra.mxu0 %v13918_v9  ;;  %v9457_v41 = vpop.f32.mrf.mxu0 }
 0x4dc   : > { %9766 = vmatpush1.bf16.msra.mxu0 %v13522_v3  ;;  %9783 = vmatprep.mubr.bf16.mxu0 %v13708_v16  ;;  %v13533_v16 = vld [vmem:[%s13820_s12 + $0x2128] ss:$100 sps:$4 sm:$0xff]   ;;  %v13562_v3 = vld [vmem:[%s13820_s12 + $0x6a0] ss:$100 sps:$4 sm:$0xff]  }
 0x4dd   : > { %9731 = vmatpush2.bf16.msra.mxu1 %v13519_v20  ;;  %v9459_v51 = vpop.f32.mrf.mxu0  ;;  %11632 = vmatprep.subr.bf16.mxu0 %v13531_v44  ;;  %v13560_v20 = vld [vmem:[%s13820_s12 + $0x1640] ss:$100 sps:$4 sm:$0xff]   ;;  %v13566_v44 = vld [vmem:[%s13820_s12 + $0x2518] ss:$100 sps:$4 sm:$0xff]  }
 0x4de   : > { %9732 = vmatprep.subr.bf16.mxu1 %v13527_v25  ;;  %v13563_v25 = vld [vmem:[%s13820_s12 + $0x60] ss:$100 sps:$4 sm:$0xff]  }
 0x4df   : > { %v9461_v22 = vpop.f32.mrf.mxu0 }
 0x4e0   : > { %v13569_v22 = vld [vmem:[%s13820_s12 + $0xe70] ss:$100 sps:$4 sm:$0xff]  }
 0x4e1   : > { %9733 = vmatpush2.bf16.msra.mxu1 %v13525_v15  ;;  %v9462_v11 = vpop.f32.mrf.mxu0  ;;  %v13567_v15 = vld [vmem:[%s13820_s12 + $0x1ed8] ss:$100 sps:$4 sm:$0xff]  }
 0x4e2   : > { %9734 = vmatprep.subr.bf16.mxu1 %v13530_v18  ;;  %v13570_v18 = vld [vmem:[%s13820_s12 + $0x2450] ss:$100 sps:$4 sm:$0xff]   ;;  %v13574_v11 = vld [vmem:[%s13820_s12 + $0x2388] ss:$100 sps:$4 sm:$0xff]  }
 0x4e3   : > { %11625 = vmatmul.mubr.msk.bf16.vlgmr.msra.gmra.mxu0 %vm7820_vm0, %v13933_v19 }
 0x4e4   : > { %11633 = vmatpush3.bf16.msra.mxu0 %v13532_v35  ;;  %9824 = vmatprep.mubr.bf16.mxu0 %v13883_v49  ;;  %v10113_v49 = vrot.slane %v15260_v14, %v14346_v5  ;;  %v13572_v35 = vld [vmem:[%s13820_s12 + $0x13e8] ss:$100 sps:$4 sm:$0xff]  }
 0x4e5   : > { %9735 = vmatpush2.bf16.msra.mxu1 %v13528_v4  ;;  %11634 = vmatprep.subr.bf16.mxu0 %v13536_v58  ;;  %v13571_v4 = vld [vmem:[%s13820_s12 + $0x1e10] ss:$100 sps:$4 sm:$0xff]   ;;  %v13576_v58 = vld [vmem:[%s13820_s12 + $0x1320] ss:$100 sps:$4 sm:$0xff]  }
 0x4e6   : > { %9736 = vmatprep.subr.bf16.mxu1 %v13535_v31  ;;  %v13573_v31 = vld [vmem:[%s13820_s12 + $0xda8] ss:$100 sps:$4 sm:$0xff]  }
 0x4e8   : > { %11635 = vmatpush3.bf16.msra.mxu0 %v13537_v40  ;;  %v13577_v40 = vld [vmem:[%s13820_s12 + $0xce0] ss:$100 sps:$4 sm:$0xff]  }
 0x4e9   : > { %9737 = vmatpush2.bf16.msra.mxu1 %v13533_v16  ;;  %11636 = vmatprep.subr.bf16.mxu0 %v13541_v54  ;;  %v13578_v16 = vld [vmem:[%s13820_s12 + $0x22c0] ss:$100 sps:$4 sm:$0xff]   ;;  %v13581_v54 = vld [vmem:[%s13820_s12 + $0x1bb8] ss:$100 sps:$4 sm:$0xff]  }
 0x4ea   : > { %9738 = vmatprep.subr.bf16.mxu1 %v13540_v43  ;;  %v13579_v43 = vld [vmem:[%s13820_s12 + $0x1c80] ss:$100 sps:$4 sm:$0xff]  }
 0x4ec   : > { %v9416_v28 = vpop.f32.mrf.mxu1  ;;  %11637 = vmatpush3.bf16.msra.mxu0 %v13542_v27  ;;  %v13582_v27 = vld [vmem:[%s13820_s12 + $0x2130] ss:$100 sps:$4 sm:$0xff]  }
 0x4ed   : > { %v9417_v29 = vadd.f32 %v9416_v28, %v9376_v1  ;;  %9739 = vmatpush2.bf16.msra.mxu1 %v13538_v2  ;;  %11638 = vmatprep.subr.bf16.mxu0 %v13546_v38  ;;  %v13588_v2 = vld [vmem:[%s13820_s12 + $0x25e0] ss:$100 sps:$4 sm:$0xff]   ;;  %v13583_v38 = vld [vmem:[%s13820_s12 + $0x1af0] ss:$100 sps:$4 sm:$0xff]   ;;  %v13584_v1 = vld [vmem:[%s13820_s12 + $0x2068] ss:$100 sps:$4 sm:$0xff]  }
 0x4ee   : > { %v9418_v17 = vpop.f32.mrf.mxu1  ;;  %9740 = vmatprep.subr.bf16.mxu1 %v13545_v60  ;;  %v13709_v60 = vmov 0.0   ;;  %v13585_v28 = vld [vmem:[%s13820_s12 + $0x1a28] ss:$100 sps:$4 sm:$0xff]  }
 0x4ef   : > { %v9458_v48 = vadd.f32 %v9457_v41, %v9417_v29  ;;  %v9419_v32 = vadd.f32 %v9418_v17, %v9378_v45  ;;  %v13565_v41 = vld [vmem:[%s13820_s12 + $0xf38] ss:$100 sps:$4 sm:$0xff]   ;;  %v13586_v45 = vld [vmem:[%s13820_s12 + $0x1fa0] ss:$100 sps:$4 sm:$0xff]  }
 0x4f0   : > { %v9420_v5 = vpop.f32.mrf.mxu1  ;;  %11639 = vmatpush3.bf16.msra.mxu0 %v13547_v37 }
 0x4f1   : > { %v10181_v33 = vadd.f32 %v10113_v49, %v9458_v48  ;;  %v9460_v34 = vadd.f32 %v9459_v51, %v9419_v32  ;;  %9741 = vmatpush2.bf16.msra.mxu1 %v13543_v7  ;;  %11640 = vmatprep.subr.bf16.mxu0 %v13550_v0  ;;  %v13568_v51 = vld [vmem:[%s13820_s12 + $0x14b0] ss:$100 sps:$4 sm:$0xff]   ;;  %v13587_v49 = vld [vmem:[%s13820_s12 + $0x1960] ss:$100 sps:$4 sm:$0xff]  }
 0x4f2   : > { %11654 = vmatprep.subr.bf16.mxu1 %v13548_v50  ;;  %v9421_v13 = vpop.f32.mrf.mxu1 }
 0x4f3   : > { %v10206_v47 = vmax.f32 %v10181_v33, 0.0  ;;  %v10182_v12 = vadd.f32 %v10117_v6, %v9460_v34 }
 0x4f4   : > { %9743 = vmatmul.mubr.bf16.vlgmr.msra.gmra.mxu1 %v14003_v21  ;;  %11641 = vmatpush3.bf16.msra.mxu0 %v13551_v39 }
 0x4f5   : > { %10231 = vst [vmem:[%s14264_s20 + $0x90] sm:$0xff] %v10206_v47  ;;  %v10207_v53 = vmax.f32 %v10182_v12, 0.0  ;;  %11655 = vmatpush3.bf16.msra.mxu1 %v13549_v23  ;;  %11642 = vmatprep.subr.bf16.mxu0 %v13554_v26  ;;  %v10125_v47 = vrot.slane %v15260_v14, %v14500_v62 }
 0x4f6   : > { %11656 = vmatprep.subr.bf16.mxu1 %v13552_v42  ;;  %9864 = vmatprep.mubr.bf16.mxu1 %v13889_v52  ;;  %v13564_v52 = vld [vmem:[%s13820_s12 + $0x1578] ss:$100 sps:$4 sm:$0xff]   ;;  %v10121_v42 = vrot.slane %v15260_v14, %v14493_v55 }
 0x4f7   : > { %10232 = vst [vmem:[%s14264_s20 + $0x98] sm:$0xff] %v10207_v53 }
 0x4f8   : > { %11643 = vmatpush3.bf16.msra.mxu0 %v13555_v59 }
 0x4f9   : > { %11657 = vmatpush3.bf16.msra.mxu1 %v13553_v57  ;;  %11644 = vmatprep.subr.bf16.mxu0 %v13558_v61 }
 0x4fa   : > { %11658 = vmatprep.subr.bf16.mxu1 %v13556_v63 }
 0x4fc   : > { %11645 = vmatpush3.bf16.msra.mxu0 %v13559_v56 }
 0x4fd   : > { %11659 = vmatpush3.bf16.msra.mxu1 %v13557_v30  ;;  %11646 = vmatprep.subr.bf16.mxu0 %v13562_v3 }
 0x4fe   : > { %11660 = vmatprep.subr.bf16.mxu1 %v13560_v20 }
 0x500   : > { %11647 = vmatpush3.bf16.msra.mxu0 %v13563_v25 }
 0x501   : > { %11661 = vmatpush3.bf16.msra.mxu1 %v13561_v10  ;;  %11676 = vmatprep.subr.bf16.mxu0 %v13566_v44 }
 0x502   : > { %11662 = vmatprep.subr.bf16.mxu1 %v13564_v52 }
 0x503   : > { %9825 = vmatmul.mubr.bf16.vlgmr.msra.gmra.mxu0 %v13916_v8  ;;  %v13575_v8 = vld [vmem:[%s13820_s12 + $0x1d48] ss:$100 sps:$4 sm:$0xff]  }
 0x504   : > { %11677 = vmatpush3.bf16.msra.mxu0 %v13567_v15  ;;  %9904 = vmatprep.mubr.bf16.mxu0 %v13956_v36  ;;  %v13580_v36 = vld [vmem:[%s13820_s12 + $0x21f8] ss:$100 sps:$4 sm:$0xff]  }
 0x505   : > { %11663 = vmatpush3.bf16.msra.mxu1 %v13565_v41  ;;  %11678 = vmatprep.subr.bf16.mxu0 %v13570_v18 }
 0x506   : > { %11664 = vmatprep.subr.bf16.mxu1 %v13568_v51 }
 0x508   : > { %11679 = vmatpush3.bf16.msra.mxu0 %v13571_v4 }
 0x509   : > { %11665 = vmatpush3.bf16.msra.mxu1 %v13569_v22  ;;  %11680 = vmatprep.subr.bf16.mxu0 %v13574_v11  ;;  %v10129_v11 = vrot.slane %v15260_v14, %v14612_v46 }
 0x50a   : > { %11666 = vmatprep.subr.bf16.mxu1 %v13572_v35 }
 0x50c   : > { %11681 = vmatpush3.bf16.msra.mxu0 %v13575_v8 }
 0x50d   : > { %11667 = vmatpush3.bf16.msra.mxu1 %v13573_v31  ;;  %11682 = vmatprep.subr.bf16.mxu0 %v13578_v16  ;;  %v10133_v16 = vrot.slane %v15260_v14, %v14619_v24 }
 0x50e   : > { %11668 = vmatprep.subr.bf16.mxu1 %v13576_v58 }
 0x510   : > { %11683 = vmatpush3.bf16.msra.mxu0 %v13579_v43 }
 0x511   : > { %11669 = vmatpush3.bf16.msra.mxu1 %v13577_v40  ;;  %11684 = vmatprep.subr.bf16.mxu0 %v13580_v36 }
 0x512   : > { %11700 = vmatprep.subr.bf16.mxu1 %v13709_v60 }
 0x514   : > { %9865 = vmatmul.mubr.bf16.vlgmr.msra.gmra.mxu1 %v13918_v9  ;;  %11685 = vmatpush3.bf16.msra.mxu0 %v13581_v54 }
 0x515   : > { %11701 = vmatpush3.bf16.msra.mxu1 %v13588_v2  ;;  %11686 = vmatprep.subr.bf16.mxu0 %v13582_v27 }
 0x516   : > { %11702 = vmatprep.mubr.msk.bf16.mxu1 %vm13710_vm1, %v13709_v60 }
 0x518   : > { %11687 = vmatpush3.bf16.msra.mxu0 %v13583_v38 }
 0x519   : > { %11688 = vmatprep.subr.bf16.mxu0 %v13584_v1 }
 0x51b   : > { %v9498_v29 = vpop.f32.mrf.mxu0 }
 0x51c   : > { %11703 = vmatmul.mubr.msk.bf16.vlgmr.msra.gmra.mxu1 %vm7820_vm0, %v13933_v19  ;;  %11689 = vmatpush3.bf16.msra.mxu0 %v13585_v28 }
 0x51d   : > { %v9500_v7 = vpop.f32.mrf.mxu0  ;;  %11690 = vmatprep.subr.bf16.mxu0 %v13586_v45 }
 0x51f   : > { %v9502_v9 = vpop.f32.mrf.mxu0 }
 0x520   : > { %11691 = vmatpush3.bf16.msra.mxu0 %v13587_v49 }
 0x521   : > { %v9503_v37 = vpop.f32.mrf.mxu0 }
 0x523   : > { %9905 = vmatmul.mubr.bf16.vlgmr.msra.gmra.mxu0 %v14003_v21 }
 0x52c   : > { %v9539_v17 = vpop.f32.mrf.mxu1 }
 0x52d   : > { %v9540_v34 = vadd.f32 %v9539_v17, %v9498_v29 }
 0x52e   : > { %v9541_v50 = vpop.f32.mrf.mxu1 }
 0x52f   : > { %v9542_v23 = vadd.f32 %v9541_v50, %v9500_v7 }
 0x530   : > { %v9543_v0 = vpop.f32.mrf.mxu1 }
 0x532   : > { %v9544_v48 = vpop.f32.mrf.mxu1 }
 0x534   : > { %v9621_v32 = vpop.f32.mrf.mxu1 }
 0x536   : > { %v9623_v6 = vpop.f32.mrf.mxu1 }
 0x538   : > { %v9625_v5 = vpop.f32.mrf.mxu1 }
 0x53a   : > { %v9626_v33 = vpop.f32.mrf.mxu1 }
 0x55b   : > { %v9580_v19 = vpop.f32.mrf.mxu0 }
 0x55c   : > { %v9581_v39 = vadd.f32 %v9580_v19, %v9540_v34  ;;  %v11627_v34 = vld [vmem:[%s13826_s30 + $0x18] ss:$0 sm:$0xff] }
 0x55d   : > { %v9582_v26 = vpop.f32.mrf.mxu0 }
 0x55e   : > { %v9622_v13 = vadd.f32 %v9621_v32, %v9581_v39  ;;  %v9583_v21 = vadd.f32 %v9582_v26, %v9542_v23 }
 0x55f   : > { %v9584_v12 = vpop.f32.mrf.mxu0 }
 0x560   : > { %v10183_v53 = vadd.f32 %v10121_v42, %v9622_v13  ;;  %v9624_v57 = vadd.f32 %v9623_v6, %v9583_v21 }
 0x561   : > { %v9585_v59 = vpop.f32.mrf.mxu0 }
 0x562   : > { %v10208_v63 = vmax.f32 %v10183_v53, 0.0  ;;  %v10184_v61 = vadd.f32 %v10125_v47, %v9624_v57 }
 0x564   : > { %10233 = vst [vmem:[%s14264_s20 + $0xa0] sm:$0xff] %v10208_v63  ;;  %v10209_v30 = vmax.f32 %v10184_v61, 0.0 }
 0x566   : > { %10234 = vst [vmem:[%s14264_s20 + $0xa8] sm:$0xff] %v10209_v30 }
 0x574   : > { %v9662_v56 = vpop.f32.mrf.mxu1 }
 0x576   : > { %v9664_v20 = vpop.f32.mrf.mxu1 }
 0x578   : > { %v9666_v3 = vpop.f32.mrf.mxu1 }
 0x57a   : > { %v9667_v10 = vpop.f32.mrf.mxu1 }
 0x59b   : > { %v9703_v55 = vpop.f32.mrf.mxu0 }
 0x59c   : > { %v9704_v18 = vadd.f32 %v9703_v55, %v9662_v56 }
 0x59d   : > { %v9705_v25 = vpop.f32.mrf.mxu0 }
 0x59e   : > { %v9706_v4 = vadd.f32 %v9705_v25, %v9664_v20 }
 0x59f   : > { %v9707_v52 = vpop.f32.mrf.mxu0 }
 0x5a1   : > { %v9708_v44 = vpop.f32.mrf.mxu0 }
 0x5a3   : > { %v9785_v41 = vpop.f32.mrf.mxu0 }
 0x5a5   : > { %v9787_v15 = vpop.f32.mrf.mxu0 }
 0x5a7   : > { %v9789_v62 = vpop.f32.mrf.mxu0 }
 0x5a9   : > { %v9790_v51 = vpop.f32.mrf.mxu0 }
 0x5b4   : > { %v9744_v22 = vpop.f32.mrf.mxu1 }
 0x5b5   : > { %v9745_v35 = vadd.f32 %v9744_v22, %v9704_v18 }
 0x5b6   : > { %v9746_v31 = vpop.f32.mrf.mxu1 }
 0x5b7   : > { %v9786_v8 = vadd.f32 %v9785_v41, %v9745_v35  ;;  %v9747_v58 = vadd.f32 %v9746_v31, %v9706_v4 }
 0x5b8   : > { %v9748_v40 = vpop.f32.mrf.mxu1 }
 0x5b9   : > { %v10185_v43 = vadd.f32 %v10129_v11, %v9786_v8  ;;  %v9788_v36 = vadd.f32 %v9787_v15, %v9747_v58 }
 0x5ba   : > { %v9749_v54 = vpop.f32.mrf.mxu1 }
 0x5bb   : > { %v10210_v2 = vmax.f32 %v10185_v43, 0.0  ;;  %v10186_v27 = vadd.f32 %v10133_v16, %v9788_v36 }
 0x5bd   : > { %10235 = vst [vmem:[%s14264_s20 + $0xb0] sm:$0xff] %v10210_v2  ;;  %v10211_v60 = vmax.f32 %v10186_v27, 0.0 }
 0x5bf   : > { %10236 = vst [vmem:[%s14264_s20 + $0xb8] sm:$0xff] %v10211_v60 }
 0x5c3   : > { %v11648_v38 = vpop.f32.mrf.mxu0 }
 0x5c5   : > { %v11649_v1 = vpop.f32.mrf.mxu0 }
 0x5c6   : > { %v11650_v0 = vadd.f32 %v11649_v1, %v11648_v38 }
 0x5c7   : > { %v11651_v28 = vpop.f32.mrf.mxu0 }
 0x5c9   : > { %v11652_v45 = vpop.f32.mrf.mxu0 }
 0x5d4   : > { %v11670_v46 = vpop.f32.mrf.mxu1 }
 0x5d6   : > { %v11671_v29 = vpop.f32.mrf.mxu1 }
 0x5d7   : > { %v11672_v17 = vadd.f32 %v11671_v29, %v11670_v46 }
 0x5d8   : > { %v11673_v49 = vpop.f32.mrf.mxu1 }
 0x5d9   : > { %v9867_v32 = vadd.f32 %v11672_v17, %v11650_v0 }
 0x5da   : > { %v11674_v7 = vpop.f32.mrf.mxu1 }
 0x5dc   : > { %v9946_v9 = vpop.f32.mrf.mxu1 }
 0x5de   : > { %v11704_v24 = vpop.f32.mrf.mxu1 }
 0x5e0   : > { %v9949_v14 = vpop.f32.mrf.mxu1 }
 0x5e2   : > { %v11705_v37 = vpop.f32.mrf.mxu1 }
 0x5e3   : > { %v11692_v50 = vpop.f32.mrf.mxu0 }
 0x5e5   : > { %v11693_v48 = vpop.f32.mrf.mxu0 }
 0x5e6   : > { %v11694_v6 = vadd.f32 %v11693_v48, %v11692_v50 }
 0x5e7   : > { %v11695_v5 = vpop.f32.mrf.mxu0 }
 0x5e8   : > { %v9907_v33 = vadd.f32 %v11694_v6, %v9867_v32 }
 0x5e9   : > { %v11696_v19 = vpop.f32.mrf.mxu0 }
 0x5ea   : > { %v9947_v23 = vadd.f32 %v9946_v9, %v9907_v33 }
 0x5ec   : > { %v10187_v39 = vadd.f32 %v11627_v34, %v9947_v23 }
 0x5ee   : > { %v10212_v42 = vmax.f32 %v10187_v39, 0.0 }
 0x5f0   : > { %10237 = vst [vmem:[%s14264_s20 + $0xc0] sm:$0xff] %v10212_v42 }
 0x5f1 PF: > { %s19_s17 = sadd.s32 1, %s13701_s17   ;;  %s15473_s12 = smov %s13685_s13 }
 0x5f2   : > { %p16_p9 = scmp.ge.s32.totalorder %s19_s17, 6   ;;  %s15474_s13 = smov %s13689_s14 }
 0x5f3   : > { %s15475_s14 = smov %s13776_s23  ;;  %s15476_s15 = smov %s13697_s16 }
 0x5f4   : > { %s15477_s16 = smov %s15479_s19  ;;  %18 = sbr.rel (!%p16_p9) target bundleno = 6 (0x6), region = 96 }
 0x5f9   :  { %10268 = vsyncpa [#allocation4], 1 }
 0x5fa   :  { %10270 = vsyncpa [#allocation4 + $0x1], 1 }
 0x5fb   :  { %10271 = vsyncpa [#allocation6], 1 }
 0x5fc   :  { %10273 = vsyncpa [#allocation6 + $0x1], 1 }

</bundles_post_ra>
